<compile_context>
chip_gen: v7x
topology: tpu7x:2x2x1
jax: 0.10.0
libtpu: 0.0.40
codegen_flags: <defaults>
</compile_context>

<pallas_src>
import functools

import jax
import jax.numpy as jnp
from jax.experimental import pallas as pl
from jax.experimental.pallas import tpu as pltpu

_VMEM_LIMIT = 48 * 1024 * 1024          # <= v7x's 64 MiB physical VMEM per TC
_VMEM_SPEC = pl.BlockSpec(memory_space=pltpu.MemorySpace.VMEM)
_EXPANSION = 1                          # BasicBlock


def _round_up(x, m):
    return ((x + m - 1) // m) * m


def _pick_tile(dim, max_tile, align=128):
    """Return (tile, padded_dim) with padded_dim % tile == 0, tile % 128 == 0."""
    padded = _round_up(max(dim, 1), align)
    tile = align
    while tile * 2 <= max_tile and padded % (tile * 2) == 0:
        tile *= 2
    return tile, padded


# ----------------------------- Pallas kernels ------------------------------ #

def _mm_bias_kernel(x_ref, w_ref, b_ref, o_ref, acc_ref, *, relu):
    # Tile of relu?((x @ w) + bias), f32 accumulation over the trailing K axis.
    @pl.when(pl.program_id(2) == 0)
    def _():
        acc_ref[...] = jnp.zeros_like(acc_ref)

    acc_ref[...] += jnp.dot(x_ref[...], w_ref[...],
                            preferred_element_type=jnp.float32)

    @pl.when(pl.program_id(2) == pl.num_programs(2) - 1)
    def _():
        out = acc_ref[...] + b_ref[...]
        if relu:
            out = jnp.maximum(out, 0.0)
        o_ref[...] = out.astype(o_ref.dtype)


def _mm_bias_res_kernel(x_ref, w_ref, b_ref, r_ref, o_ref, acc_ref):
    # Tile of relu((x @ w) + bias + residual) — fused BasicBlock tail.
    @pl.when(pl.program_id(2) == 0)
    def _():
        acc_ref[...] = jnp.zeros_like(acc_ref)

    acc_ref[...] += jnp.dot(x_ref[...], w_ref[...],
                            preferred_element_type=jnp.float32)

    @pl.when(pl.program_id(2) == pl.num_programs(2) - 1)
    def _():
        out = acc_ref[...] + b_ref[...] + r_ref[...].astype(jnp.float32)
        o_ref[...] = jnp.maximum(out, 0.0).astype(o_ref.dtype)


def _maxpool3x3_kernel(xp_ref, o_ref):
    # xp: (1, H+2, W+2, C) padded with -inf; 3x3 stride-1 max pool -> (1,H,W,C).
    _, H, W, _ = o_ref.shape
    x = xp_ref[...].astype(jnp.float32)
    out = x[:, 0:H, 0:W, :]
    for i in range(3):
        for j in range(3):
            if i == 0 and j == 0:
                continue
            out = jnp.maximum(out, x[:, i:i + H, j:j + W, :])
    o_ref[...] = out.astype(o_ref.dtype)


def _avgpool_fc_kernel(x_ref, w_ref, b_ref, o_ref):
    # x: (N, H, W, C) -> global average pool -> (N, C) @ (C, classes) + bias.
    pooled = jnp.mean(x_ref[...].astype(jnp.float32), axis=(1, 2))
    out = jnp.dot(pooled, w_ref[...], preferred_element_type=jnp.float32)
    o_ref[...] = (out + b_ref[...]).astype(o_ref.dtype)


# ----------------------------- kernel wrappers ------------------------------ #

def _matmul_bias(patches, w, bias, *, relu, residual=None):
    """(M,K) bf16 @ (Kp,Np) bf16 -> (Mp,Np) bf16 with bias(+res)(+relu) epilogue."""
    M, K = patches.shape
    Kp, Np = w.shape
    tm, Mp = _pick_tile(M, 256)
    tk, _ = _pick_tile(Kp, 512)
    tn, _ = _pick_tile(Np, 256)

    x = patches
    if (Mp, Kp) != (M, K):
        x = jnp.pad(x, ((0, Mp - M), (0, Kp - K)))

    grid = (Mp // tm, Np // tn, Kp // tk)
    in_specs = [
        pl.BlockSpec((tm, tk), lambda i, j, k: (i, k)),
        pl.BlockSpec((tk, tn), lambda i, j, k: (k, j)),
        pl.BlockSpec((1, tn), lambda i, j, k: (0, j)),
    ]
    args = [x, w, bias]
    if residual is None:
        kernel = functools.partial(_mm_bias_kernel, relu=relu)
    else:
        r = residual.astype(jnp.bfloat16)
        rM, rN = r.shape
        if (Mp, Np) != (rM, rN):
            r = jnp.pad(r, ((0, Mp - rM), (0, Np - rN)))
        in_specs.append(pl.BlockSpec((tm, tn), lambda i, j, k: (i, j)))
        args.append(r)
        kernel = _mm_bias_res_kernel

    return pl.pallas_call(
        kernel,
        out_shape=jax.ShapeDtypeStruct((Mp, Np), jnp.bfloat16),
        grid_spec=pltpu.PrefetchScalarGridSpec(
            num_scalar_prefetch=0,
            grid=grid,
            in_specs=in_specs,
            out_specs=pl.BlockSpec((tm, tn), lambda i, j, k: (i, j)),
            scratch_shapes=[pltpu.VMEM((tm, tn), jnp.float32)],
        ),
        compiler_params=pltpu.CompilerParams(
            dimension_semantics=("parallel", "parallel", "arbitrary"),
            vmem_limit_bytes=_VMEM_LIMIT),
        cost_estimate=pl.CostEstimate(
            flops=2 * Mp * Np * Kp,
            transcendentals=0,
            bytes_accessed=2 * (Mp * Kp + Kp * Np + Mp * Np)),
    )(*args)


def _maxpool3x3_s1(x):
    N, H, W, C = x.shape
    xp = jnp.pad(x, ((0, 0), (1, 1), (1, 1), (0, 0)),
                 constant_values=-jnp.inf)
    return pl.pallas_call(
        _maxpool3x3_kernel,
        out_shape=jax.ShapeDtypeStruct((N, H, W, C), x.dtype),
        grid_spec=pltpu.PrefetchScalarGridSpec(
            num_scalar_prefetch=0,
            grid=(N,),
            in_specs=[pl.BlockSpec((1, H + 2, W + 2, C),
                                   lambda n: (n, 0, 0, 0))],
            out_specs=pl.BlockSpec((1, H, W, C), lambda n: (n, 0, 0, 0)),
        ),
        compiler_params=pltpu.CompilerParams(
            dimension_semantics=("parallel",),
            vmem_limit_bytes=_VMEM_LIMIT),
    )(xp)


def _avgpool_fc(x, fc_w_t, fc_b):
    N = x.shape[0]
    num_classes = fc_w_t.shape[1]
    return pl.pallas_call(
        _avgpool_fc_kernel,
        out_shape=jax.ShapeDtypeStruct((N, num_classes), jnp.float32),
        in_specs=[_VMEM_SPEC] * 3,
        out_specs=_VMEM_SPEC,
        compiler_params=pltpu.CompilerParams(vmem_limit_bytes=_VMEM_LIMIT),
    )(x, fc_w_t, fc_b)


# ------------------------------ conv plumbing ------------------------------- #

def _im2col(x, kh, kw, stride, pad):
    # NHWC (bf16) -> patch matrix (N*Ho*Wo, kh*kw*C), matching the
    # OIHW -> (kh, kw, Cin, Cout) weight flattening order.
    N, H, W, C = x.shape
    Ho = (H + 2 * pad - kh) // stride + 1
    Wo = (W + 2 * pad - kw) // stride + 1
    if kh == 1 and kw == 1 and pad == 0:
        patches = x[:, ::stride, ::stride, :]
        return patches.reshape(N * Ho * Wo, C), (N, Ho, Wo)
    xp = jnp.pad(x, ((0, 0), (pad, pad), (pad, pad), (0, 0)))
    cols = []
    for i in range(kh):
        for j in range(kw):
            cols.append(xp[:, i:i + stride * Ho:stride,
                           j:j + stride * Wo:stride, :])
    patches = jnp.concatenate(cols, axis=-1)         # (N, Ho, Wo, kh*kw*C)
    return patches.reshape(N * Ho * Wo, kh * kw * C), (N, Ho, Wo)


def _conv_bn(x, pc, *, kh, kw, cout, stride, pad, relu, residual=None):
    # pc["w"]: (Kp, Np) bf16 with BN scale folded in; pc["b"]: (1, Np) f32.
    # If `residual` is given, the kernel computes relu(conv + bias + residual).
    patches, (n, ho, wo) = _im2col(x, kh, kw, stride, pad)
    M = patches.shape[0]
    res2 = None if residual is None else residual.reshape(M, cout)
    out = _matmul_bias(patches, pc["w"], pc["b"], relu=relu, residual=res2)
    return out[:M, :cout].reshape(n, ho, wo, cout)


# ------------------------------ model / params ------------------------------ #

def init_params(num_blocks, num_classes, seed=0):
    """Raw PyTorch-style parameters (conv OIHW weights + eval-mode BN)."""
    key = jax.random.PRNGKey(seed)

    def nk():
        nonlocal key
        key, sub = jax.random.split(key)
        return sub

    def conv_w(cout, cin, k):
        fan_in = cin * k * k
        return jax.random.normal(nk(), (cout, cin, k, k), jnp.float32) * (
            (2.0 / fan_in) ** 0.5 * 0.5)

    def bn(c):
        eps = 1e-5
        gamma = 1.0 + 0.1 * jax.random.normal(nk(), (c,), jnp.float32)
        beta = 0.1 * jax.random.normal(nk(), (c,), jnp.float32)
        mean = 0.1 * jax.random.normal(nk(), (c,), jnp.float32)
        var = 0.5 + jax.random.uniform(nk(), (c,), jnp.float32)
        scale = gamma / jnp.sqrt(var + eps)
        bias = beta - mean * scale
        return scale, bias

    params = {"conv1": conv_w(64, 3, 3), "bn1": bn(64)}
    in_ch = 64
    layers = []
    for out_ch, nb, stride0 in zip([64, 128, 256, 512], num_blocks, [1, 2, 2, 2]):
        blocks = []
        for s in [stride0] + [1] * (nb - 1):
            blk = {
                "conv1_w": conv_w(out_ch, in_ch, 3), "bn1": bn(out_ch),
                "conv2_w": conv_w(out_ch, out_ch, 3), "bn2": bn(out_ch),
            }
            if s != 1 or in_ch != out_ch * _EXPANSION:
                blk["down_w"] = conv_w(out_ch * _EXPANSION, in_ch, 1)
                blk["down_bn"] = bn(out_ch * _EXPANSION)
            else:
                blk["down_w"] = None
                blk["down_bn"] = None
            blocks.append(blk)
            in_ch = out_ch * _EXPANSION
        layers.append(blocks)
    params["layers"] = layers
    params["fc_w"] = 0.05 * jax.random.normal(
        nk(), (num_classes, 512 * _EXPANSION), jnp.float32)
    params["fc_b"] = 0.05 * jax.random.normal(nk(), (num_classes,), jnp.float32)
    return params


def _prep_conv(w_oihw, bn_scale_bias):
    # One-time prep: fold BN scale into the weights, transpose OIHW -> (K, N),
    # zero-pad K/N to multiples of 128 (lane-dense tiles), cast to bf16.
    scale, bias = bn_scale_bias
    cout, cin, kh, kw = w_oihw.shape
    k = kh * kw * cin
    w2 = jnp.transpose(w_oihw, (2, 3, 1, 0)).reshape(k, cout) * scale[None, :]
    kp, np_ = _round_up(k, 128), _round_up(cout, 128)
    w2 = jnp.pad(w2, ((0, kp - k), (0, np_ - cout))).astype(jnp.bfloat16)
    b = jnp.pad(bias, (0, np_ - cout)).reshape(1, np_).astype(jnp.float32)
    return {"w": w2, "b": b}


def prepare_params(raw):
    """Inference-time parameter prep (done once, outside the forward pass)."""
    prep = {
        "conv1": _prep_conv(raw["conv1"], raw["bn1"]),
        "layers": [],
        "fc_w_t": raw["fc_w"].T.astype(jnp.float32),
        "fc_b": raw["fc_b"].reshape(1, -1).astype(jnp.float32),
    }
    for blocks in raw["layers"]:
        pblocks = []
        for blk in blocks:
            down = None
            if blk["down_w"] is not None:
                down = _prep_conv(blk["down_w"], blk["down_bn"])
            pblocks.append({
                "conv1": _prep_conv(blk["conv1_w"], blk["bn1"]),
                "conv2": _prep_conv(blk["conv2_w"], blk["bn2"]),
                "down": down,
            })
        prep["layers"].append(pblocks)
    return prep


def resnet_forward(x_nchw, params, num_blocks):
    x = jnp.transpose(x_nchw, (0, 2, 3, 1)).astype(jnp.bfloat16)  # NCHW -> NHWC
    x = _conv_bn(x, params["conv1"], kh=3, kw=3, cout=64,
                 stride=1, pad=1, relu=True)
    x = _maxpool3x3_s1(x)
    for li, (out_ch, nb, stride0) in enumerate(
            zip((64, 128, 256, 512), num_blocks, (1, 2, 2, 2))):
        for bi, s in enumerate([stride0] + [1] * (nb - 1)):
            blk = params["layers"][li][bi]
            if blk["down"] is not None:
                sc = _conv_bn(x, blk["down"], kh=1, kw=1, cout=out_ch,
                              stride=s, pad=0, relu=False)
            else:
                sc = x
            h = _conv_bn(x, blk["conv1"], kh=3, kw=3, cout=out_ch,
                         stride=s, pad=1, relu=True)
            # fused: relu(bn2(conv2(h)) + shortcut)
            x = _conv_bn(h, blk["conv2"], kh=3, kw=3, cout=out_ch,
                         stride=1, pad=1, relu=True, residual=sc)
    fc_out = _avgpool_fc(x, params["fc_w_t"], params["fc_b"])
    return fc_out


# ----------------------------------- main ----------------------------------- #

if __name__ == "__main__":
    num_blocks = [1, 1, 1, 1]   # small synthetic ResNet (BasicBlock, expansion=1)
    num_classes = 10

    raw = init_params(num_blocks, num_classes, seed=0)
    params = prepare_params(raw)

    x = jax.random.normal(jax.random.PRNGKey(0), (2, 3, 16, 16), jnp.float32)  # NCHW

    fwd = jax.jit(lambda inp, prm: resnet_forward(inp, prm, num_blocks))
    out = jax.block_until_ready(fwd(x, params))

    assert out.shape == (2, num_classes), out.shape
    assert bool(jnp.all(jnp.isfinite(out)))
    print("KERNEL_OK")
</pallas_src>

<mosaic_0001>
module attributes {stable_mosaic.version = 11 : i64} {
  func.func @_mm_bias_kernel(%arg0: i32, %arg1: i32, %arg2: i32, %arg3: memref<256x128xbf16, #tpu.memory_space<vmem>>, %arg4: memref<128x128xbf16, #tpu.memory_space<vmem>>, %arg5: memref<1x128xf32, #tpu.memory_space<vmem>>, %arg6: memref<256x128xbf16, #tpu.memory_space<vmem>>, %arg7: memref<256x128xf32, #tpu.memory_space<vmem>>) attributes {dimension_semantics = [#tpu.dimension_semantics<parallel>, #tpu.dimension_semantics<parallel>, #tpu.dimension_semantics<arbitrary>], iteration_bounds = array<i64: 2, 1, 1>, scalar_prefetch = 0 : i64, scratch_operands = 1 : i64, tpu.core_type = #tpu.core_type<tc>, window_params = [{transform_indices = @transform_0, window_bounds = array<i64: 256, 128>}, {transform_indices = @transform_1, window_bounds = array<i64: 128, 128>}, {transform_indices = @transform_2, window_bounds = array<i64: 1, 128>}, {transform_indices = @transform_3, window_bounds = array<i64: 256, 128>}]} {
    %c0_i32 = arith.constant 0 : i32
    %0 = arith.cmpi eq, %arg2, %c0_i32 : i32
    %1 = arith.extui %0 : i1 to i32
    %c0_i32_0 = arith.constant 0 : i32
    %2 = arith.cmpi ne, %1, %c0_i32_0 : i32
    scf.if %2 {
      %cst_10 = arith.constant 0.000000e+00 : f32
      %12 = vector.broadcast %cst_10 : f32 to vector<256x128xf32>
      %c0_11 = arith.constant 0 : index
      %c0_12 = arith.constant 0 : index
      %13 = vector.load %arg7[%c0_11, %c0_12] : memref<256x128xf32, #tpu.memory_space<vmem>>, vector<256x128xf32>
      tpu.vector_store %arg7[%c0_11, %c0_12], %12 {strides = array<i32>} : memref<256x128xf32, #tpu.memory_space<vmem>>, vector<256x128xf32>,
    } else {
    }
    %c0 = arith.constant 0 : index
    %c0_1 = arith.constant 0 : index
    %3 = vector.load %arg7[%c0, %c0_1] : memref<256x128xf32, #tpu.memory_space<vmem>>, vector<256x128xf32>
    %c0_2 = arith.constant 0 : index
    %c0_3 = arith.constant 0 : index
    %4 = vector.load %arg3[%c0_2, %c0_3] : memref<256x128xbf16, #tpu.memory_space<vmem>>, vector<256x128xbf16>
    %c0_4 = arith.constant 0 : index
    %c0_5 = arith.constant 0 : index
    %5 = vector.load %arg4[%c0_4, %c0_5] : memref<128x128xbf16, #tpu.memory_space<vmem>>, vector<128x128xbf16>
    %cst = arith.constant dense<0.000000e+00> : vector<256x128xf32>
    %6 = tpu.matmul %4, %5, %cst {dimension_numbers = #tpu.dot_dimension_numbers<[1], [0], [0], [1], [0, 0, 1, 1], [], []>} : vector<256x128xbf16>, vector<128x128xbf16>, vector<256x128xf32> -> vector<256x128xf32>
    %7 = arith.addf %3, %6 : vector<256x128xf32>
    %c0_6 = arith.constant 0 : index
    %c0_7 = arith.constant 0 : index
    %8 = vector.load %arg7[%c0_6, %c0_7] : memref<256x128xf32, #tpu.memory_space<vmem>>, vector<256x128xf32>
    tpu.vector_store %arg7[%c0_6, %c0_7], %7 {strides = array<i32>} : memref<256x128xf32, #tpu.memory_space<vmem>>, vector<256x128xf32>,
    %c0_i32_8 = arith.constant 0 : i32
    %9 = arith.cmpi eq, %arg2, %c0_i32_8 : i32
    %10 = arith.extui %9 : i1 to i32
    %c0_i32_9 = arith.constant 0 : i32
    %11 = arith.cmpi ne, %10, %c0_i32_9 : i32
    scf.if %11 {
      %c0_10 = arith.constant 0 : index
      %c0_11 = arith.constant 0 : index
      %12 = vector.load %arg7[%c0_10, %c0_11] : memref<256x128xf32, #tpu.memory_space<vmem>>, vector<256x128xf32>
      %c0_12 = arith.constant 0 : index
      %c0_13 = arith.constant 0 : index
      %13 = vector.load %arg5[%c0_12, %c0_13] : memref<1x128xf32, #tpu.memory_space<vmem>>, vector<1x128xf32>
      %14 = vector.broadcast %13 : vector<1x128xf32> to vector<256x128xf32>
      %15 = arith.addf %12, %14 : vector<256x128xf32>
      %cst_14 = arith.constant 0.000000e+00 : f32
      %16 = vector.broadcast %cst_14 : f32 to vector<256x128xf32>
      %17 = arith.maximumf %15, %16 : vector<256x128xf32>
      %18 = arith.truncf %17 : vector<256x128xf32> to vector<256x128xbf16>
      %c0_15 = arith.constant 0 : index
      %c0_16 = arith.constant 0 : index
      %19 = vector.load %arg6[%c0_15, %c0_16] : memref<256x128xbf16, #tpu.memory_space<vmem>>, vector<256x128xbf16>
      tpu.vector_store %arg6[%c0_15, %c0_16], %18 {strides = array<i32>} : memref<256x128xbf16, #tpu.memory_space<vmem>>, vector<256x128xbf16>,
    } else {
    }
    return
  }
  func.func @transform_0(%arg0: i32, %arg1: i32, %arg2: i32) -> (i32, i32) {
    %c0_i32 = arith.constant 0 : i32
    return %arg0, %arg2 : i32, i32
  }
  func.func @transform_1(%arg0: i32, %arg1: i32, %arg2: i32) -> (i32, i32) {
    %c0_i32 = arith.constant 0 : i32
    return %arg2, %arg1 : i32, i32
  }
  func.func @transform_2(%arg0: i32, %arg1: i32, %arg2: i32) -> (i32, i32) {
    %c0_i32 = arith.constant 0 : i32
    %c0_i32_0 = arith.constant 0 : i32
    return %c0_i32, %arg1 : i32, i32
  }
  func.func @transform_3(%arg0: i32, %arg1: i32, %arg2: i32) -> (i32, i32) {
    %c0_i32 = arith.constant 0 : i32
    return %arg0, %arg1 : i32, i32
  }
}

module attributes {stable_mosaic.version = 11 : i64} {
  func.func @_maxpool3x3_kernel(%arg0: i32, %arg1: memref<1x18x18x64xbf16, #tpu.memory_space<vmem>>, %arg2: memref<1x16x16x64xbf16, #tpu.memory_space<vmem>>) attributes {dimension_semantics = [#tpu.dimension_semantics<parallel>], iteration_bounds = array<i64: 2>, scalar_prefetch = 0 : i64, scratch_operands = 0 : i64, tpu.core_type = #tpu.core_type<tc>, window_params = [{transform_indices = @transform_0, window_bounds = array<i64: 1, 18, 18, 64>}, {transform_indices = @transform_1, window_bounds = array<i64: 1, 16, 16, 64>}]} {
    %c0 = arith.constant 0 : index
    %c0_0 = arith.constant 0 : index
    %c0_1 = arith.constant 0 : index
    %c0_2 = arith.constant 0 : index
    %0 = vector.load %arg1[%c0, %c0_0, %c0_1, %c0_2] : memref<1x18x18x64xbf16, #tpu.memory_space<vmem>>, vector<1x18x18x64xbf16>
    %1 = arith.extf %0 : vector<1x18x18x64xbf16> to vector<1x18x18x64xf32>
    %2 = vector.extract_strided_slice %1 {offsets = [0, 0, 0, 0], sizes = [1, 16, 16, 64], strides = [1, 1, 1, 1]} : vector<1x18x18x64xf32> to vector<1x16x16x64xf32>
    %3 = vector.extract_strided_slice %1 {offsets = [0, 0, 1, 0], sizes = [1, 16, 16, 64], strides = [1, 1, 1, 1]} : vector<1x18x18x64xf32> to vector<1x16x16x64xf32>
    %4 = arith.maximumf %2, %3 : vector<1x16x16x64xf32>
    %5 = vector.extract_strided_slice %1 {offsets = [0, 0, 2, 0], sizes = [1, 16, 16, 64], strides = [1, 1, 1, 1]} : vector<1x18x18x64xf32> to vector<1x16x16x64xf32>
    %6 = arith.maximumf %4, %5 : vector<1x16x16x64xf32>
    %7 = vector.extract_strided_slice %1 {offsets = [0, 1, 0, 0], sizes = [1, 16, 16, 64], strides = [1, 1, 1, 1]} : vector<1x18x18x64xf32> to vector<1x16x16x64xf32>
    %8 = arith.maximumf %6, %7 : vector<1x16x16x64xf32>
    %9 = vector.extract_strided_slice %1 {offsets = [0, 1, 1, 0], sizes = [1, 16, 16, 64], strides = [1, 1, 1, 1]} : vector<1x18x18x64xf32> to vector<1x16x16x64xf32>
    %10 = arith.maximumf %8, %9 : vector<1x16x16x64xf32>
    %11 = vector.extract_strided_slice %1 {offsets = [0, 1, 2, 0], sizes = [1, 16, 16, 64], strides = [1, 1, 1, 1]} : vector<1x18x18x64xf32> to vector<1x16x16x64xf32>
    %12 = arith.maximumf %10, %11 : vector<1x16x16x64xf32>
    %13 = vector.extract_strided_slice %1 {offsets = [0, 2, 0, 0], sizes = [1, 16, 16, 64], strides = [1, 1, 1, 1]} : vector<1x18x18x64xf32> to vector<1x16x16x64xf32>
    %14 = arith.maximumf %12, %13 : vector<1x16x16x64xf32>
    %15 = vector.extract_strided_slice %1 {offsets = [0, 2, 1, 0], sizes = [1, 16, 16, 64], strides = [1, 1, 1, 1]} : vector<1x18x18x64xf32> to vector<1x16x16x64xf32>
    %16 = arith.maximumf %14, %15 : vector<1x16x16x64xf32>
    %17 = vector.extract_strided_slice %1 {offsets = [0, 2, 2, 0], sizes = [1, 16, 16, 64], strides = [1, 1, 1, 1]} : vector<1x18x18x64xf32> to vector<1x16x16x64xf32>
    %18 = arith.maximumf %16, %17 : vector<1x16x16x64xf32>
    %19 = arith.truncf %18 : vector<1x16x16x64xf32> to vector<1x16x16x64xbf16>
    %c0_3 = arith.constant 0 : index
    %c0_4 = arith.constant 0 : index
    %c0_5 = arith.constant 0 : index
    %c0_6 = arith.constant 0 : index
    %20 = vector.load %arg2[%c0_3, %c0_4, %c0_5, %c0_6] : memref<1x16x16x64xbf16, #tpu.memory_space<vmem>>, vector<1x16x16x64xbf16>
    tpu.vector_store %arg2[%c0_3, %c0_4, %c0_5, %c0_6], %19 {strides = array<i32>} : memref<1x16x16x64xbf16, #tpu.memory_space<vmem>>, vector<1x16x16x64xbf16>,
    return
  }
  func.func @transform_0(%arg0: i32) -> (i32, i32, i32, i32) {
    %c0_i32 = arith.constant 0 : i32
    %c0_i32_0 = arith.constant 0 : i32
    %c0_i32_1 = arith.constant 0 : i32
    %c0_i32_2 = arith.constant 0 : i32
    return %arg0, %c0_i32, %c0_i32_0, %c0_i32_1 : i32, i32, i32, i32
  }
  func.func @transform_1(%arg0: i32) -> (i32, i32, i32, i32) {
    %c0_i32 = arith.constant 0 : i32
    %c0_i32_0 = arith.constant 0 : i32
    %c0_i32_1 = arith.constant 0 : i32
    %c0_i32_2 = arith.constant 0 : i32
    return %arg0, %c0_i32, %c0_i32_0, %c0_i32_1 : i32, i32, i32, i32
  }
}

module attributes {stable_mosaic.version = 11 : i64} {
  func.func @_mm_bias_kernel(%arg0: i32, %arg1: i32, %arg2: i32, %arg3: memref<256x128xbf16, #tpu.memory_space<vmem>>, %arg4: memref<128x128xbf16, #tpu.memory_space<vmem>>, %arg5: memref<1x128xf32, #tpu.memory_space<vmem>>, %arg6: memref<256x128xbf16, #tpu.memory_space<vmem>>, %arg7: memref<256x128xf32, #tpu.memory_space<vmem>>) attributes {dimension_semantics = [#tpu.dimension_semantics<parallel>, #tpu.dimension_semantics<parallel>, #tpu.dimension_semantics<arbitrary>], iteration_bounds = array<i64: 2, 1, 5>, scalar_prefetch = 0 : i64, scratch_operands = 1 : i64, tpu.core_type = #tpu.core_type<tc>, window_params = [{transform_indices = @transform_0, window_bounds = array<i64: 256, 128>}, {transform_indices = @transform_1, window_bounds = array<i64: 128, 128>}, {transform_indices = @transform_2, window_bounds = array<i64: 1, 128>}, {transform_indices = @transform_3, window_bounds = array<i64: 256, 128>}]} {
    %c0_i32 = arith.constant 0 : i32
    %0 = arith.cmpi eq, %arg2, %c0_i32 : i32
    %1 = arith.extui %0 : i1 to i32
    %c0_i32_0 = arith.constant 0 : i32
    %2 = arith.cmpi ne, %1, %c0_i32_0 : i32
    scf.if %2 {
      %cst_9 = arith.constant 0.000000e+00 : f32
      %12 = vector.broadcast %cst_9 : f32 to vector<256x128xf32>
      %c0_10 = arith.constant 0 : index
      %c0_11 = arith.constant 0 : index
      %13 = vector.load %arg7[%c0_10, %c0_11] : memref<256x128xf32, #tpu.memory_space<vmem>>, vector<256x128xf32>
      tpu.vector_store %arg7[%c0_10, %c0_11], %12 {strides = array<i32>} : memref<256x128xf32, #tpu.memory_space<vmem>>, vector<256x128xf32>,
    } else {
    }
    %c0 = arith.constant 0 : index
    %c0_1 = arith.constant 0 : index
    %3 = vector.load %arg7[%c0, %c0_1] : memref<256x128xf32, #tpu.memory_space<vmem>>, vector<256x128xf32>
    %c0_2 = arith.constant 0 : index
    %c0_3 = arith.constant 0 : index
    %4 = vector.load %arg3[%c0_2, %c0_3] : memref<256x128xbf16, #tpu.memory_space<vmem>>, vector<256x128xbf16>
    %c0_4 = arith.constant 0 : index
    %c0_5 = arith.constant 0 : index
    %5 = vector.load %arg4[%c0_4, %c0_5] : memref<128x128xbf16, #tpu.memory_space<vmem>>, vector<128x128xbf16>
    %cst = arith.constant dense<0.000000e+00> : vector<256x128xf32>
    %6 = tpu.matmul %4, %5, %cst {dimension_numbers = #tpu.dot_dimension_numbers<[1], [0], [0], [1], [0, 0, 1, 1], [], []>} : vector<256x128xbf16>, vector<128x128xbf16>, vector<256x128xf32> -> vector<256x128xf32>
    %7 = arith.addf %3, %6 : vector<256x128xf32>
    %c0_6 = arith.constant 0 : index
    %c0_7 = arith.constant 0 : index
    %8 = vector.load %arg7[%c0_6, %c0_7] : memref<256x128xf32, #tpu.memory_space<vmem>>, vector<256x128xf32>
    tpu.vector_store %arg7[%c0_6, %c0_7], %7 {strides = array<i32>} : memref<256x128xf32, #tpu.memory_space<vmem>>, vector<256x128xf32>,
    %c4_i32 = arith.constant 4 : i32
    %9 = arith.cmpi eq, %arg2, %c4_i32 : i32
    %10 = arith.extui %9 : i1 to i32
    %c0_i32_8 = arith.constant 0 : i32
    %11 = arith.cmpi ne, %10, %c0_i32_8 : i32
    scf.if %11 {
      %c0_9 = arith.constant 0 : index
      %c0_10 = arith.constant 0 : index
      %12 = vector.load %arg7[%c0_9, %c0_10] : memref<256x128xf32, #tpu.memory_space<vmem>>, vector<256x128xf32>
      %c0_11 = arith.constant 0 : index
      %c0_12 = arith.constant 0 : index
      %13 = vector.load %arg5[%c0_11, %c0_12] : memref<1x128xf32, #tpu.memory_space<vmem>>, vector<1x128xf32>
      %14 = vector.broadcast %13 : vector<1x128xf32> to vector<256x128xf32>
      %15 = arith.addf %12, %14 : vector<256x128xf32>
      %cst_13 = arith.constant 0.000000e+00 : f32
      %16 = vector.broadcast %cst_13 : f32 to vector<256x128xf32>
      %17 = arith.maximumf %15, %16 : vector<256x128xf32>
      %18 = arith.truncf %17 : vector<256x128xf32> to vector<256x128xbf16>
      %c0_14 = arith.constant 0 : index
      %c0_15 = arith.constant 0 : index
      %19 = vector.load %arg6[%c0_14, %c0_15] : memref<256x128xbf16, #tpu.memory_space<vmem>>, vector<256x128xbf16>
      tpu.vector_store %arg6[%c0_14, %c0_15], %18 {strides = array<i32>} : memref<256x128xbf16, #tpu.memory_space<vmem>>, vector<256x128xbf16>,
    } else {
    }
    return
  }
  func.func @transform_0(%arg0: i32, %arg1: i32, %arg2: i32) -> (i32, i32) {
    %c0_i32 = arith.constant 0 : i32
    return %arg0, %arg2 : i32, i32
  }
  func.func @transform_1(%arg0: i32, %arg1: i32, %arg2: i32) -> (i32, i32) {
    %c0_i32 = arith.constant 0 : i32
    return %arg2, %arg1 : i32, i32
  }
  func.func @transform_2(%arg0: i32, %arg1: i32, %arg2: i32) -> (i32, i32) {
    %c0_i32 = arith.constant 0 : i32
    %c0_i32_0 = arith.constant 0 : i32
    return %c0_i32, %arg1 : i32, i32
  }
  func.func @transform_3(%arg0: i32, %arg1: i32, %arg2: i32) -> (i32, i32) {
    %c0_i32 = arith.constant 0 : i32
    return %arg0, %arg1 : i32, i32
  }
}

module attributes {stable_mosaic.version = 11 : i64} {
  func.func @_mm_bias_res_kernel(%arg0: i32, %arg1: i32, %arg2: i32, %arg3: memref<256x128xbf16, #tpu.memory_space<vmem>>, %arg4: memref<128x128xbf16, #tpu.memory_space<vmem>>, %arg5: memref<1x128xf32, #tpu.memory_space<vmem>>, %arg6: memref<256x128xbf16, #tpu.memory_space<vmem>>, %arg7: memref<256x128xbf16, #tpu.memory_space<vmem>>, %arg8: memref<256x128xf32, #tpu.memory_space<vmem>>) attributes {dimension_semantics = [#tpu.dimension_semantics<parallel>, #tpu.dimension_semantics<parallel>, #tpu.dimension_semantics<arbitrary>], iteration_bounds = array<i64: 2, 1, 5>, scalar_prefetch = 0 : i64, scratch_operands = 1 : i64, tpu.core_type = #tpu.core_type<tc>, window_params = [{transform_indices = @transform_0, window_bounds = array<i64: 256, 128>}, {transform_indices = @transform_1, window_bounds = array<i64: 128, 128>}, {transform_indices = @transform_2, window_bounds = array<i64: 1, 128>}, {transform_indices = @transform_3, window_bounds = array<i64: 256, 128>}, {transform_indices = @transform_4, window_bounds = array<i64: 256, 128>}]} {
    %c0_i32 = arith.constant 0 : i32
    %0 = arith.cmpi eq, %arg2, %c0_i32 : i32
    %1 = arith.extui %0 : i1 to i32
    %c0_i32_0 = arith.constant 0 : i32
    %2 = arith.cmpi ne, %1, %c0_i32_0 : i32
    scf.if %2 {
      %cst_9 = arith.constant 0.000000e+00 : f32
      %12 = vector.broadcast %cst_9 : f32 to vector<256x128xf32>
      %c0_10 = arith.constant 0 : index
      %c0_11 = arith.constant 0 : index
      %13 = vector.load %arg8[%c0_10, %c0_11] : memref<256x128xf32, #tpu.memory_space<vmem>>, vector<256x128xf32>
      tpu.vector_store %arg8[%c0_10, %c0_11], %12 {strides = array<i32>} : memref<256x128xf32, #tpu.memory_space<vmem>>, vector<256x128xf32>,
    } else {
    }
    %c0 = arith.constant 0 : index
    %c0_1 = arith.constant 0 : index
    %3 = vector.load %arg8[%c0, %c0_1] : memref<256x128xf32, #tpu.memory_space<vmem>>, vector<256x128xf32>
    %c0_2 = arith.constant 0 : index
    %c0_3 = arith.constant 0 : index
    %4 = vector.load %arg3[%c0_2, %c0_3] : memref<256x128xbf16, #tpu.memory_space<vmem>>, vector<256x128xbf16>
    %c0_4 = arith.constant 0 : index
    %c0_5 = arith.constant 0 : index
    %5 = vector.load %arg4[%c0_4, %c0_5] : memref<128x128xbf16, #tpu.memory_space<vmem>>, vector<128x128xbf16>
    %cst = arith.constant dense<0.000000e+00> : vector<256x128xf32>
    %6 = tpu.matmul %4, %5, %cst {dimension_numbers = #tpu.dot_dimension_numbers<[1], [0], [0], [1], [0, 0, 1, 1], [], []>} : vector<256x128xbf16>, vector<128x128xbf16>, vector<256x128xf32> -> vector<256x128xf32>
    %7 = arith.addf %3, %6 : vector<256x128xf32>
    %c0_6 = arith.constant 0 : index
    %c0_7 = arith.constant 0 : index
    %8 = vector.load %arg8[%c0_6, %c0_7] : memref<256x128xf32, #tpu.memory_space<vmem>>, vector<256x128xf32>
    tpu.vector_store %arg8[%c0_6, %c0_7], %7 {strides = array<i32>} : memref<256x128xf32, #tpu.memory_space<vmem>>, vector<256x128xf32>,
    %c4_i32 = arith.constant 4 : i32
    %9 = arith.cmpi eq, %arg2, %c4_i32 : i32
    %10 = arith.extui %9 : i1 to i32
    %c0_i32_8 = arith.constant 0 : i32
    %11 = arith.cmpi ne, %10, %c0_i32_8 : i32
    scf.if %11 {
      %c0_9 = arith.constant 0 : index
      %c0_10 = arith.constant 0 : index
      %12 = vector.load %arg8[%c0_9, %c0_10] : memref<256x128xf32, #tpu.memory_space<vmem>>, vector<256x128xf32>
      %c0_11 = arith.constant 0 : index
      %c0_12 = arith.constant 0 : index
      %13 = vector.load %arg5[%c0_11, %c0_12] : memref<1x128xf32, #tpu.memory_space<vmem>>, vector<1x128xf32>
      %14 = vector.broadcast %13 : vector<1x128xf32> to vector<256x128xf32>
      %15 = arith.addf %12, %14 : vector<256x128xf32>
      %c0_13 = arith.constant 0 : index
      %c0_14 = arith.constant 0 : index
      %16 = vector.load %arg6[%c0_13, %c0_14] : memref<256x128xbf16, #tpu.memory_space<vmem>>, vector<256x128xbf16>
      %17 = arith.extf %16 : vector<256x128xbf16> to vector<256x128xf32>
      %18 = arith.addf %15, %17 : vector<256x128xf32>
      %cst_15 = arith.constant 0.000000e+00 : f32
      %19 = vector.broadcast %cst_15 : f32 to vector<256x128xf32>
      %20 = arith.maximumf %18, %19 : vector<256x128xf32>
      %21 = arith.truncf %20 : vector<256x128xf32> to vector<256x128xbf16>
      %c0_16 = arith.constant 0 : index
      %c0_17 = arith.constant 0 : index
      %22 = vector.load %arg7[%c0_16, %c0_17] : memref<256x128xbf16, #tpu.memory_space<vmem>>, vector<256x128xbf16>
      tpu.vector_store %arg7[%c0_16, %c0_17], %21 {strides = array<i32>} : memref<256x128xbf16, #tpu.memory_space<vmem>>, vector<256x128xbf16>,
    } else {
    }
    return
  }
  func.func @transform_0(%arg0: i32, %arg1: i32, %arg2: i32) -> (i32, i32) {
    %c0_i32 = arith.constant 0 : i32
    return %arg0, %arg2 : i32, i32
  }
  func.func @transform_1(%arg0: i32, %arg1: i32, %arg2: i32) -> (i32, i32) {
    %c0_i32 = arith.constant 0 : i32
    return %arg2, %arg1 : i32, i32
  }
  func.func @transform_2(%arg0: i32, %arg1: i32, %arg2: i32) -> (i32, i32) {
    %c0_i32 = arith.constant 0 : i32
    %c0_i32_0 = arith.constant 0 : i32
    return %c0_i32, %arg1 : i32, i32
  }
  func.func @transform_3(%arg0: i32, %arg1: i32, %arg2: i32) -> (i32, i32) {
    %c0_i32 = arith.constant 0 : i32
    return %arg0, %arg1 : i32, i32
  }
  func.func @transform_4(%arg0: i32, %arg1: i32, %arg2: i32) -> (i32, i32) {
    %c0_i32 = arith.constant 0 : i32
    return %arg0, %arg1 : i32, i32
  }
}

module attributes {stable_mosaic.version = 11 : i64} {
  func.func @_mm_bias_kernel(%arg0: i32, %arg1: i32, %arg2: i32, %arg3: memref<128x128xbf16, #tpu.memory_space<vmem>>, %arg4: memref<128x128xbf16, #tpu.memory_space<vmem>>, %arg5: memref<1x128xf32, #tpu.memory_space<vmem>>, %arg6: memref<128x128xbf16, #tpu.memory_space<vmem>>, %arg7: memref<128x128xf32, #tpu.memory_space<vmem>>) attributes {dimension_semantics = [#tpu.dimension_semantics<parallel>, #tpu.dimension_semantics<parallel>, #tpu.dimension_semantics<arbitrary>], iteration_bounds = array<i64: 1, 1, 5>, scalar_prefetch = 0 : i64, scratch_operands = 1 : i64, tpu.core_type = #tpu.core_type<tc>, window_params = [{transform_indices = @transform_0, window_bounds = array<i64: 128, 128>}, {transform_indices = @transform_1, window_bounds = array<i64: 128, 128>}, {transform_indices = @transform_2, window_bounds = array<i64: 1, 128>}, {transform_indices = @transform_3, window_bounds = array<i64: 128, 128>}]} {
    %c0_i32 = arith.constant 0 : i32
    %0 = arith.cmpi eq, %arg2, %c0_i32 : i32
    %1 = arith.extui %0 : i1 to i32
    %c0_i32_0 = arith.constant 0 : i32
    %2 = arith.cmpi ne, %1, %c0_i32_0 : i32
    scf.if %2 {
      %cst_9 = arith.constant 0.000000e+00 : f32
      %12 = vector.broadcast %cst_9 : f32 to vector<128x128xf32>
      %c0_10 = arith.constant 0 : index
      %c0_11 = arith.constant 0 : index
      %13 = vector.load %arg7[%c0_10, %c0_11] : memref<128x128xf32, #tpu.memory_space<vmem>>, vector<128x128xf32>
      tpu.vector_store %arg7[%c0_10, %c0_11], %12 {strides = array<i32>} : memref<128x128xf32, #tpu.memory_space<vmem>>, vector<128x128xf32>,
    } else {
    }
    %c0 = arith.constant 0 : index
    %c0_1 = arith.constant 0 : index
    %3 = vector.load %arg7[%c0, %c0_1] : memref<128x128xf32, #tpu.memory_space<vmem>>, vector<128x128xf32>
    %c0_2 = arith.constant 0 : index
    %c0_3 = arith.constant 0 : index
    %4 = vector.load %arg3[%c0_2, %c0_3] : memref<128x128xbf16, #tpu.memory_space<vmem>>, vector<128x128xbf16>
    %c0_4 = arith.constant 0 : index
    %c0_5 = arith.constant 0 : index
    %5 = vector.load %arg4[%c0_4, %c0_5] : memref<128x128xbf16, #tpu.memory_space<vmem>>, vector<128x128xbf16>
    %cst = arith.constant dense<0.000000e+00> : vector<128x128xf32>
    %6 = tpu.matmul %4, %5, %cst {dimension_numbers = #tpu.dot_dimension_numbers<[1], [0], [0], [1], [0, 0, 1, 1], [], []>} : vector<128x128xbf16>, vector<128x128xbf16>, vector<128x128xf32> -> vector<128x128xf32>
    %7 = arith.addf %3, %6 : vector<128x128xf32>
    %c0_6 = arith.constant 0 : index
    %c0_7 = arith.constant 0 : index
    %8 = vector.load %arg7[%c0_6, %c0_7] : memref<128x128xf32, #tpu.memory_space<vmem>>, vector<128x128xf32>
    tpu.vector_store %arg7[%c0_6, %c0_7], %7 {strides = array<i32>} : memref<128x128xf32, #tpu.memory_space<vmem>>, vector<128x128xf32>,
    %c4_i32 = arith.constant 4 : i32
    %9 = arith.cmpi eq, %arg2, %c4_i32 : i32
    %10 = arith.extui %9 : i1 to i32
    %c0_i32_8 = arith.constant 0 : i32
    %11 = arith.cmpi ne, %10, %c0_i32_8 : i32
    scf.if %11 {
      %c0_9 = arith.constant 0 : index
      %c0_10 = arith.constant 0 : index
      %12 = vector.load %arg7[%c0_9, %c0_10] : memref<128x128xf32, #tpu.memory_space<vmem>>, vector<128x128xf32>
      %c0_11 = arith.constant 0 : index
      %c0_12 = arith.constant 0 : index
      %13 = vector.load %arg5[%c0_11, %c0_12] : memref<1x128xf32, #tpu.memory_space<vmem>>, vector<1x128xf32>
      %14 = vector.broadcast %13 : vector<1x128xf32> to vector<128x128xf32>
      %15 = arith.addf %12, %14 : vector<128x128xf32>
      %cst_13 = arith.constant 0.000000e+00 : f32
      %16 = vector.broadcast %cst_13 : f32 to vector<128x128xf32>
      %17 = arith.maximumf %15, %16 : vector<128x128xf32>
      %18 = arith.truncf %17 : vector<128x128xf32> to vector<128x128xbf16>
      %c0_14 = arith.constant 0 : index
      %c0_15 = arith.constant 0 : index
      %19 = vector.load %arg6[%c0_14, %c0_15] : memref<128x128xbf16, #tpu.memory_space<vmem>>, vector<128x128xbf16>
      tpu.vector_store %arg6[%c0_14, %c0_15], %18 {strides = array<i32>} : memref<128x128xbf16, #tpu.memory_space<vmem>>, vector<128x128xbf16>,
    } else {
    }
    return
  }
  func.func @transform_0(%arg0: i32, %arg1: i32, %arg2: i32) -> (i32, i32) {
    %c0_i32 = arith.constant 0 : i32
    return %arg0, %arg2 : i32, i32
  }
  func.func @transform_1(%arg0: i32, %arg1: i32, %arg2: i32) -> (i32, i32) {
    %c0_i32 = arith.constant 0 : i32
    return %arg2, %arg1 : i32, i32
  }
  func.func @transform_2(%arg0: i32, %arg1: i32, %arg2: i32) -> (i32, i32) {
    %c0_i32 = arith.constant 0 : i32
    %c0_i32_0 = arith.constant 0 : i32
    return %c0_i32, %arg1 : i32, i32
  }
  func.func @transform_3(%arg0: i32, %arg1: i32, %arg2: i32) -> (i32, i32) {
    %c0_i32 = arith.constant 0 : i32
    return %arg0, %arg1 : i32, i32
  }
}

module attributes {stable_mosaic.version = 11 : i64} {
  func.func @_mm_bias_kernel(%arg0: i32, %arg1: i32, %arg2: i32, %arg3: memref<128x128xbf16, #tpu.memory_space<vmem>>, %arg4: memref<128x128xbf16, #tpu.memory_space<vmem>>, %arg5: memref<1x128xf32, #tpu.memory_space<vmem>>, %arg6: memref<128x128xbf16, #tpu.memory_space<vmem>>, %arg7: memref<128x128xf32, #tpu.memory_space<vmem>>) attributes {dimension_semantics = [#tpu.dimension_semantics<parallel>, #tpu.dimension_semantics<parallel>, #tpu.dimension_semantics<arbitrary>], iteration_bounds = array<i64: 1, 1, 1>, scalar_prefetch = 0 : i64, scratch_operands = 1 : i64, tpu.core_type = #tpu.core_type<tc>, window_params = [{transform_indices = @transform_0, window_bounds = array<i64: 128, 128>}, {transform_indices = @transform_1, window_bounds = array<i64: 128, 128>}, {transform_indices = @transform_2, window_bounds = array<i64: 1, 128>}, {transform_indices = @transform_3, window_bounds = array<i64: 128, 128>}]} {
    %c0_i32 = arith.constant 0 : i32
    %0 = arith.cmpi eq, %arg2, %c0_i32 : i32
    %1 = arith.extui %0 : i1 to i32
    %c0_i32_0 = arith.constant 0 : i32
    %2 = arith.cmpi ne, %1, %c0_i32_0 : i32
    scf.if %2 {
      %cst_10 = arith.constant 0.000000e+00 : f32
      %12 = vector.broadcast %cst_10 : f32 to vector<128x128xf32>
      %c0_11 = arith.constant 0 : index
      %c0_12 = arith.constant 0 : index
      %13 = vector.load %arg7[%c0_11, %c0_12] : memref<128x128xf32, #tpu.memory_space<vmem>>, vector<128x128xf32>
      tpu.vector_store %arg7[%c0_11, %c0_12], %12 {strides = array<i32>} : memref<128x128xf32, #tpu.memory_space<vmem>>, vector<128x128xf32>,
    } else {
    }
    %c0 = arith.constant 0 : index
    %c0_1 = arith.constant 0 : index
    %3 = vector.load %arg7[%c0, %c0_1] : memref<128x128xf32, #tpu.memory_space<vmem>>, vector<128x128xf32>
    %c0_2 = arith.constant 0 : index
    %c0_3 = arith.constant 0 : index
    %4 = vector.load %arg3[%c0_2, %c0_3] : memref<128x128xbf16, #tpu.memory_space<vmem>>, vector<128x128xbf16>
    %c0_4 = arith.constant 0 : index
    %c0_5 = arith.constant 0 : index
    %5 = vector.load %arg4[%c0_4, %c0_5] : memref<128x128xbf16, #tpu.memory_space<vmem>>, vector<128x128xbf16>
    %cst = arith.constant dense<0.000000e+00> : vector<128x128xf32>
    %6 = tpu.matmul %4, %5, %cst {dimension_numbers = #tpu.dot_dimension_numbers<[1], [0], [0], [1], [0, 0, 1, 1], [], []>} : vector<128x128xbf16>, vector<128x128xbf16>, vector<128x128xf32> -> vector<128x128xf32>
    %7 = arith.addf %3, %6 : vector<128x128xf32>
    %c0_6 = arith.constant 0 : index
    %c0_7 = arith.constant 0 : index
    %8 = vector.load %arg7[%c0_6, %c0_7] : memref<128x128xf32, #tpu.memory_space<vmem>>, vector<128x128xf32>
    tpu.vector_store %arg7[%c0_6, %c0_7], %7 {strides = array<i32>} : memref<128x128xf32, #tpu.memory_space<vmem>>, vector<128x128xf32>,
    %c0_i32_8 = arith.constant 0 : i32
    %9 = arith.cmpi eq, %arg2, %c0_i32_8 : i32
    %10 = arith.extui %9 : i1 to i32
    %c0_i32_9 = arith.constant 0 : i32
    %11 = arith.cmpi ne, %10, %c0_i32_9 : i32
    scf.if %11 {
      %c0_10 = arith.constant 0 : index
      %c0_11 = arith.constant 0 : index
      %12 = vector.load %arg7[%c0_10, %c0_11] : memref<128x128xf32, #tpu.memory_space<vmem>>, vector<128x128xf32>
      %c0_12 = arith.constant 0 : index
      %c0_13 = arith.constant 0 : index
      %13 = vector.load %arg5[%c0_12, %c0_13] : memref<1x128xf32, #tpu.memory_space<vmem>>, vector<1x128xf32>
      %14 = vector.broadcast %13 : vector<1x128xf32> to vector<128x128xf32>
      %15 = arith.addf %12, %14 : vector<128x128xf32>
      %16 = arith.truncf %15 : vector<128x128xf32> to vector<128x128xbf16>
      %c0_14 = arith.constant 0 : index
      %c0_15 = arith.constant 0 : index
      %17 = vector.load %arg6[%c0_14, %c0_15] : memref<128x128xbf16, #tpu.memory_space<vmem>>, vector<128x128xbf16>
      tpu.vector_store %arg6[%c0_14, %c0_15], %16 {strides = array<i32>} : memref<128x128xbf16, #tpu.memory_space<vmem>>, vector<128x128xbf16>,
    } else {
    }
    return
  }
  func.func @transform_0(%arg0: i32, %arg1: i32, %arg2: i32) -> (i32, i32) {
    %c0_i32 = arith.constant 0 : i32
    return %arg0, %arg2 : i32, i32
  }
  func.func @transform_1(%arg0: i32, %arg1: i32, %arg2: i32) -> (i32, i32) {
    %c0_i32 = arith.constant 0 : i32
    return %arg2, %arg1 : i32, i32
  }
  func.func @transform_2(%arg0: i32, %arg1: i32, %arg2: i32) -> (i32, i32) {
    %c0_i32 = arith.constant 0 : i32
    %c0_i32_0 = arith.constant 0 : i32
    return %c0_i32, %arg1 : i32, i32
  }
  func.func @transform_3(%arg0: i32, %arg1: i32, %arg2: i32) -> (i32, i32) {
    %c0_i32 = arith.constant 0 : i32
    return %arg0, %arg1 : i32, i32
  }
}

module attributes {stable_mosaic.version = 11 : i64} {
  func.func @_mm_bias_res_kernel(%arg0: i32, %arg1: i32, %arg2: i32, %arg3: memref<128x128xbf16, #tpu.memory_space<vmem>>, %arg4: memref<128x128xbf16, #tpu.memory_space<vmem>>, %arg5: memref<1x128xf32, #tpu.memory_space<vmem>>, %arg6: memref<128x128xbf16, #tpu.memory_space<vmem>>, %arg7: memref<128x128xbf16, #tpu.memory_space<vmem>>, %arg8: memref<128x128xf32, #tpu.memory_space<vmem>>) attributes {dimension_semantics = [#tpu.dimension_semantics<parallel>, #tpu.dimension_semantics<parallel>, #tpu.dimension_semantics<arbitrary>], iteration_bounds = array<i64: 1, 1, 9>, scalar_prefetch = 0 : i64, scratch_operands = 1 : i64, tpu.core_type = #tpu.core_type<tc>, window_params = [{transform_indices = @transform_0, window_bounds = array<i64: 128, 128>}, {transform_indices = @transform_1, window_bounds = array<i64: 128, 128>}, {transform_indices = @transform_2, window_bounds = array<i64: 1, 128>}, {transform_indices = @transform_3, window_bounds = array<i64: 128, 128>}, {transform_indices = @transform_4, window_bounds = array<i64: 128, 128>}]} {
    %c0_i32 = arith.constant 0 : i32
    %0 = arith.cmpi eq, %arg2, %c0_i32 : i32
    %1 = arith.extui %0 : i1 to i32
    %c0_i32_0 = arith.constant 0 : i32
    %2 = arith.cmpi ne, %1, %c0_i32_0 : i32
    scf.if %2 {
      %cst_9 = arith.constant 0.000000e+00 : f32
      %12 = vector.broadcast %cst_9 : f32 to vector<128x128xf32>
      %c0_10 = arith.constant 0 : index
      %c0_11 = arith.constant 0 : index
      %13 = vector.load %arg8[%c0_10, %c0_11] : memref<128x128xf32, #tpu.memory_space<vmem>>, vector<128x128xf32>
      tpu.vector_store %arg8[%c0_10, %c0_11], %12 {strides = array<i32>} : memref<128x128xf32, #tpu.memory_space<vmem>>, vector<128x128xf32>,
    } else {
    }
    %c0 = arith.constant 0 : index
    %c0_1 = arith.constant 0 : index
    %3 = vector.load %arg8[%c0, %c0_1] : memref<128x128xf32, #tpu.memory_space<vmem>>, vector<128x128xf32>
    %c0_2 = arith.constant 0 : index
    %c0_3 = arith.constant 0 : index
    %4 = vector.load %arg3[%c0_2, %c0_3] : memref<128x128xbf16, #tpu.memory_space<vmem>>, vector<128x128xbf16>
    %c0_4 = arith.constant 0 : index
    %c0_5 = arith.constant 0 : index
    %5 = vector.load %arg4[%c0_4, %c0_5] : memref<128x128xbf16, #tpu.memory_space<vmem>>, vector<128x128xbf16>
    %cst = arith.constant dense<0.000000e+00> : vector<128x128xf32>
    %6 = tpu.matmul %4, %5, %cst {dimension_numbers = #tpu.dot_dimension_numbers<[1], [0], [0], [1], [0, 0, 1, 1], [], []>} : vector<128x128xbf16>, vector<128x128xbf16>, vector<128x128xf32> -> vector<128x128xf32>
    %7 = arith.addf %3, %6 : vector<128x128xf32>
    %c0_6 = arith.constant 0 : index
    %c0_7 = arith.constant 0 : index
    %8 = vector.load %arg8[%c0_6, %c0_7] : memref<128x128xf32, #tpu.memory_space<vmem>>, vector<128x128xf32>
    tpu.vector_store %arg8[%c0_6, %c0_7], %7 {strides = array<i32>} : memref<128x128xf32, #tpu.memory_space<vmem>>, vector<128x128xf32>,
    %c8_i32 = arith.constant 8 : i32
    %9 = arith.cmpi eq, %arg2, %c8_i32 : i32
    %10 = arith.extui %9 : i1 to i32
    %c0_i32_8 = arith.constant 0 : i32
    %11 = arith.cmpi ne, %10, %c0_i32_8 : i32
    scf.if %11 {
      %c0_9 = arith.constant 0 : index
      %c0_10 = arith.constant 0 : index
      %12 = vector.load %arg8[%c0_9, %c0_10] : memref<128x128xf32, #tpu.memory_space<vmem>>, vector<128x128xf32>
      %c0_11 = arith.constant 0 : index
      %c0_12 = arith.constant 0 : index
      %13 = vector.load %arg5[%c0_11, %c0_12] : memref<1x128xf32, #tpu.memory_space<vmem>>, vector<1x128xf32>
      %14 = vector.broadcast %13 : vector<1x128xf32> to vector<128x128xf32>
      %15 = arith.addf %12, %14 : vector<128x128xf32>
      %c0_13 = arith.constant 0 : index
      %c0_14 = arith.constant 0 : index
      %16 = vector.load %arg6[%c0_13, %c0_14] : memref<128x128xbf16, #tpu.memory_space<vmem>>, vector<128x128xbf16>
      %17 = arith.extf %16 : vector<128x128xbf16> to vector<128x128xf32>
      %18 = arith.addf %15, %17 : vector<128x128xf32>
      %cst_15 = arith.constant 0.000000e+00 : f32
      %19 = vector.broadcast %cst_15 : f32 to vector<128x128xf32>
      %20 = arith.maximumf %18, %19 : vector<128x128xf32>
      %21 = arith.truncf %20 : vector<128x128xf32> to vector<128x128xbf16>
      %c0_16 = arith.constant 0 : index
      %c0_17 = arith.constant 0 : index
      %22 = vector.load %arg7[%c0_16, %c0_17] : memref<128x128xbf16, #tpu.memory_space<vmem>>, vector<128x128xbf16>
      tpu.vector_store %arg7[%c0_16, %c0_17], %21 {strides = array<i32>} : memref<128x128xbf16, #tpu.memory_space<vmem>>, vector<128x128xbf16>,
    } else {
    }
    return
  }
  func.func @transform_0(%arg0: i32, %arg1: i32, %arg2: i32) -> (i32, i32) {
    %c0_i32 = arith.constant 0 : i32
    return %arg0, %arg2 : i32, i32
  }
  func.func @transform_1(%arg0: i32, %arg1: i32, %arg2: i32) -> (i32, i32) {
    %c0_i32 = arith.constant 0 : i32
    return %arg2, %arg1 : i32, i32
  }
  func.func @transform_2(%arg0: i32, %arg1: i32, %arg2: i32) -> (i32, i32) {
    %c0_i32 = arith.constant 0 : i32
    %c0_i32_0 = arith.constant 0 : i32
    return %c0_i32, %arg1 : i32, i32
  }
  func.func @transform_3(%arg0: i32, %arg1: i32, %arg2: i32) -> (i32, i32) {
    %c0_i32 = arith.constant 0 : i32
    return %arg0, %arg1 : i32, i32
  }
  func.func @transform_4(%arg0: i32, %arg1: i32, %arg2: i32) -> (i32, i32) {
    %c0_i32 = arith.constant 0 : i32
    return %arg0, %arg1 : i32, i32
  }
}

module attributes {stable_mosaic.version = 11 : i64} {
  func.func @_mm_bias_kernel(%arg0: i32, %arg1: i32, %arg2: i32, %arg3: memref<128x128xbf16, #tpu.memory_space<vmem>>, %arg4: memref<128x256xbf16, #tpu.memory_space<vmem>>, %arg5: memref<1x256xf32, #tpu.memory_space<vmem>>, %arg6: memref<128x256xbf16, #tpu.memory_space<vmem>>, %arg7: memref<128x256xf32, #tpu.memory_space<vmem>>) attributes {dimension_semantics = [#tpu.dimension_semantics<parallel>, #tpu.dimension_semantics<parallel>, #tpu.dimension_semantics<arbitrary>], iteration_bounds = array<i64: 1, 1, 9>, scalar_prefetch = 0 : i64, scratch_operands = 1 : i64, tpu.core_type = #tpu.core_type<tc>, window_params = [{transform_indices = @transform_0, window_bounds = array<i64: 128, 128>}, {transform_indices = @transform_1, window_bounds = array<i64: 128, 256>}, {transform_indices = @transform_2, window_bounds = array<i64: 1, 256>}, {transform_indices = @transform_3, window_bounds = array<i64: 128, 256>}]} {
    %c0_i32 = arith.constant 0 : i32
    %0 = arith.cmpi eq, %arg2, %c0_i32 : i32
    %1 = arith.extui %0 : i1 to i32
    %c0_i32_0 = arith.constant 0 : i32
    %2 = arith.cmpi ne, %1, %c0_i32_0 : i32
    scf.if %2 {
      %cst_9 = arith.constant 0.000000e+00 : f32
      %12 = vector.broadcast %cst_9 : f32 to vector<128x256xf32>
      %c0_10 = arith.constant 0 : index
      %c0_11 = arith.constant 0 : index
      %13 = vector.load %arg7[%c0_10, %c0_11] : memref<128x256xf32, #tpu.memory_space<vmem>>, vector<128x256xf32>
      tpu.vector_store %arg7[%c0_10, %c0_11], %12 {strides = array<i32>} : memref<128x256xf32, #tpu.memory_space<vmem>>, vector<128x256xf32>,
    } else {
    }
    %c0 = arith.constant 0 : index
    %c0_1 = arith.constant 0 : index
    %3 = vector.load %arg7[%c0, %c0_1] : memref<128x256xf32, #tpu.memory_space<vmem>>, vector<128x256xf32>
    %c0_2 = arith.constant 0 : index
    %c0_3 = arith.constant 0 : index
    %4 = vector.load %arg3[%c0_2, %c0_3] : memref<128x128xbf16, #tpu.memory_space<vmem>>, vector<128x128xbf16>
    %c0_4 = arith.constant 0 : index
    %c0_5 = arith.constant 0 : index
    %5 = vector.load %arg4[%c0_4, %c0_5] : memref<128x256xbf16, #tpu.memory_space<vmem>>, vector<128x256xbf16>
    %cst = arith.constant dense<0.000000e+00> : vector<128x256xf32>
    %6 = tpu.matmul %4, %5, %cst {dimension_numbers = #tpu.dot_dimension_numbers<[1], [0], [0], [1], [0, 0, 1, 1], [], []>} : vector<128x128xbf16>, vector<128x256xbf16>, vector<128x256xf32> -> vector<128x256xf32>
    %7 = arith.addf %3, %6 : vector<128x256xf32>
    %c0_6 = arith.constant 0 : index
    %c0_7 = arith.constant 0 : index
    %8 = vector.load %arg7[%c0_6, %c0_7] : memref<128x256xf32, #tpu.memory_space<vmem>>, vector<128x256xf32>
    tpu.vector_store %arg7[%c0_6, %c0_7], %7 {strides = array<i32>} : memref<128x256xf32, #tpu.memory_space<vmem>>, vector<128x256xf32>,
    %c8_i32 = arith.constant 8 : i32
    %9 = arith.cmpi eq, %arg2, %c8_i32 : i32
    %10 = arith.extui %9 : i1 to i32
    %c0_i32_8 = arith.constant 0 : i32
    %11 = arith.cmpi ne, %10, %c0_i32_8 : i32
    scf.if %11 {
      %c0_9 = arith.constant 0 : index
      %c0_10 = arith.constant 0 : index
      %12 = vector.load %arg7[%c0_9, %c0_10] : memref<128x256xf32, #tpu.memory_space<vmem>>, vector<128x256xf32>
      %c0_11 = arith.constant 0 : index
      %c0_12 = arith.constant 0 : index
      %13 = vector.load %arg5[%c0_11, %c0_12] : memref<1x256xf32, #tpu.memory_space<vmem>>, vector<1x256xf32>
      %14 = vector.broadcast %13 : vector<1x256xf32> to vector<128x256xf32>
      %15 = arith.addf %12, %14 : vector<128x256xf32>
      %cst_13 = arith.constant 0.000000e+00 : f32
      %16 = vector.broadcast %cst_13 : f32 to vector<128x256xf32>
      %17 = arith.maximumf %15, %16 : vector<128x256xf32>
      %18 = arith.truncf %17 : vector<128x256xf32> to vector<128x256xbf16>
      %c0_14 = arith.constant 0 : index
      %c0_15 = arith.constant 0 : index
      %19 = vector.load %arg6[%c0_14, %c0_15] : memref<128x256xbf16, #tpu.memory_space<vmem>>, vector<128x256xbf16>
      tpu.vector_store %arg6[%c0_14, %c0_15], %18 {strides = array<i32>} : memref<128x256xbf16, #tpu.memory_space<vmem>>, vector<128x256xbf16>,
    } else {
    }
    return
  }
  func.func @transform_0(%arg0: i32, %arg1: i32, %arg2: i32) -> (i32, i32) {
    %c0_i32 = arith.constant 0 : i32
    return %arg0, %arg2 : i32, i32
  }
  func.func @transform_1(%arg0: i32, %arg1: i32, %arg2: i32) -> (i32, i32) {
    %c0_i32 = arith.constant 0 : i32
    return %arg2, %arg1 : i32, i32
  }
  func.func @transform_2(%arg0: i32, %arg1: i32, %arg2: i32) -> (i32, i32) {
    %c0_i32 = arith.constant 0 : i32
    %c0_i32_0 = arith.constant 0 : i32
    return %c0_i32, %arg1 : i32, i32
  }
  func.func @transform_3(%arg0: i32, %arg1: i32, %arg2: i32) -> (i32, i32) {
    %c0_i32 = arith.constant 0 : i32
    return %arg0, %arg1 : i32, i32
  }
}

module attributes {stable_mosaic.version = 11 : i64} {
  func.func @_mm_bias_kernel(%arg0: i32, %arg1: i32, %arg2: i32, %arg3: memref<128x128xbf16, #tpu.memory_space<vmem>>, %arg4: memref<128x256xbf16, #tpu.memory_space<vmem>>, %arg5: memref<1x256xf32, #tpu.memory_space<vmem>>, %arg6: memref<128x256xbf16, #tpu.memory_space<vmem>>, %arg7: memref<128x256xf32, #tpu.memory_space<vmem>>) attributes {dimension_semantics = [#tpu.dimension_semantics<parallel>, #tpu.dimension_semantics<parallel>, #tpu.dimension_semantics<arbitrary>], iteration_bounds = array<i64: 1, 1, 1>, scalar_prefetch = 0 : i64, scratch_operands = 1 : i64, tpu.core_type = #tpu.core_type<tc>, window_params = [{transform_indices = @transform_0, window_bounds = array<i64: 128, 128>}, {transform_indices = @transform_1, window_bounds = array<i64: 128, 256>}, {transform_indices = @transform_2, window_bounds = array<i64: 1, 256>}, {transform_indices = @transform_3, window_bounds = array<i64: 128, 256>}]} {
    %c0_i32 = arith.constant 0 : i32
    %0 = arith.cmpi eq, %arg2, %c0_i32 : i32
    %1 = arith.extui %0 : i1 to i32
    %c0_i32_0 = arith.constant 0 : i32
    %2 = arith.cmpi ne, %1, %c0_i32_0 : i32
    scf.if %2 {
      %cst_10 = arith.constant 0.000000e+00 : f32
      %12 = vector.broadcast %cst_10 : f32 to vector<128x256xf32>
      %c0_11 = arith.constant 0 : index
      %c0_12 = arith.constant 0 : index
      %13 = vector.load %arg7[%c0_11, %c0_12] : memref<128x256xf32, #tpu.memory_space<vmem>>, vector<128x256xf32>
      tpu.vector_store %arg7[%c0_11, %c0_12], %12 {strides = array<i32>} : memref<128x256xf32, #tpu.memory_space<vmem>>, vector<128x256xf32>,
    } else {
    }
    %c0 = arith.constant 0 : index
    %c0_1 = arith.constant 0 : index
    %3 = vector.load %arg7[%c0, %c0_1] : memref<128x256xf32, #tpu.memory_space<vmem>>, vector<128x256xf32>
    %c0_2 = arith.constant 0 : index
    %c0_3 = arith.constant 0 : index
    %4 = vector.load %arg3[%c0_2, %c0_3] : memref<128x128xbf16, #tpu.memory_space<vmem>>, vector<128x128xbf16>
    %c0_4 = arith.constant 0 : index
    %c0_5 = arith.constant 0 : index
    %5 = vector.load %arg4[%c0_4, %c0_5] : memref<128x256xbf16, #tpu.memory_space<vmem>>, vector<128x256xbf16>
    %cst = arith.constant dense<0.000000e+00> : vector<128x256xf32>
    %6 = tpu.matmul %4, %5, %cst {dimension_numbers = #tpu.dot_dimension_numbers<[1], [0], [0], [1], [0, 0, 1, 1], [], []>} : vector<128x128xbf16>, vector<128x256xbf16>, vector<128x256xf32> -> vector<128x256xf32>
    %7 = arith.addf %3, %6 : vector<128x256xf32>
    %c0_6 = arith.constant 0 : index
    %c0_7 = arith.constant 0 : index
    %8 = vector.load %arg7[%c0_6, %c0_7] : memref<128x256xf32, #tpu.memory_space<vmem>>, vector<128x256xf32>
    tpu.vector_store %arg7[%c0_6, %c0_7], %7 {strides = array<i32>} : memref<128x256xf32, #tpu.memory_space<vmem>>, vector<128x256xf32>,
    %c0_i32_8 = arith.constant 0 : i32
    %9 = arith.cmpi eq, %arg2, %c0_i32_8 : i32
    %10 = arith.extui %9 : i1 to i32
    %c0_i32_9 = arith.constant 0 : i32
    %11 = arith.cmpi ne, %10, %c0_i32_9 : i32
    scf.if %11 {
      %c0_10 = arith.constant 0 : index
      %c0_11 = arith.constant 0 : index
      %12 = vector.load %arg7[%c0_10, %c0_11] : memref<128x256xf32, #tpu.memory_space<vmem>>, vector<128x256xf32>
      %c0_12 = arith.constant 0 : index
      %c0_13 = arith.constant 0 : index
      %13 = vector.load %arg5[%c0_12, %c0_13] : memref<1x256xf32, #tpu.memory_space<vmem>>, vector<1x256xf32>
      %14 = vector.broadcast %13 : vector<1x256xf32> to vector<128x256xf32>
      %15 = arith.addf %12, %14 : vector<128x256xf32>
      %16 = arith.truncf %15 : vector<128x256xf32> to vector<128x256xbf16>
      %c0_14 = arith.constant 0 : index
      %c0_15 = arith.constant 0 : index
      %17 = vector.load %arg6[%c0_14, %c0_15] : memref<128x256xbf16, #tpu.memory_space<vmem>>, vector<128x256xbf16>
      tpu.vector_store %arg6[%c0_14, %c0_15], %16 {strides = array<i32>} : memref<128x256xbf16, #tpu.memory_space<vmem>>, vector<128x256xbf16>,
    } else {
    }
    return
  }
  func.func @transform_0(%arg0: i32, %arg1: i32, %arg2: i32) -> (i32, i32) {
    %c0_i32 = arith.constant 0 : i32
    return %arg0, %arg2 : i32, i32
  }
  func.func @transform_1(%arg0: i32, %arg1: i32, %arg2: i32) -> (i32, i32) {
    %c0_i32 = arith.constant 0 : i32
    return %arg2, %arg1 : i32, i32
  }
  func.func @transform_2(%arg0: i32, %arg1: i32, %arg2: i32) -> (i32, i32) {
    %c0_i32 = arith.constant 0 : i32
    %c0_i32_0 = arith.constant 0 : i32
    return %c0_i32, %arg1 : i32, i32
  }
  func.func @transform_3(%arg0: i32, %arg1: i32, %arg2: i32) -> (i32, i32) {
    %c0_i32 = arith.constant 0 : i32
    return %arg0, %arg1 : i32, i32
  }
}

module attributes {stable_mosaic.version = 11 : i64} {
  func.func @_mm_bias_res_kernel(%arg0: i32, %arg1: i32, %arg2: i32, %arg3: memref<128x256xbf16, #tpu.memory_space<vmem>>, %arg4: memref<256x256xbf16, #tpu.memory_space<vmem>>, %arg5: memref<1x256xf32, #tpu.memory_space<vmem>>, %arg6: memref<128x256xbf16, #tpu.memory_space<vmem>>, %arg7: memref<128x256xbf16, #tpu.memory_space<vmem>>, %arg8: memref<128x256xf32, #tpu.memory_space<vmem>>) attributes {dimension_semantics = [#tpu.dimension_semantics<parallel>, #tpu.dimension_semantics<parallel>, #tpu.dimension_semantics<arbitrary>], iteration_bounds = array<i64: 1, 1, 9>, scalar_prefetch = 0 : i64, scratch_operands = 1 : i64, tpu.core_type = #tpu.core_type<tc>, window_params = [{transform_indices = @transform_0, window_bounds = array<i64: 128, 256>}, {transform_indices = @transform_1, window_bounds = array<i64: 256, 256>}, {transform_indices = @transform_2, window_bounds = array<i64: 1, 256>}, {transform_indices = @transform_3, window_bounds = array<i64: 128, 256>}, {transform_indices = @transform_4, window_bounds = array<i64: 128, 256>}]} {
    %c0_i32 = arith.constant 0 : i32
    %0 = arith.cmpi eq, %arg2, %c0_i32 : i32
    %1 = arith.extui %0 : i1 to i32
    %c0_i32_0 = arith.constant 0 : i32
    %2 = arith.cmpi ne, %1, %c0_i32_0 : i32
    scf.if %2 {
      %cst_9 = arith.constant 0.000000e+00 : f32
      %12 = vector.broadcast %cst_9 : f32 to vector<128x256xf32>
      %c0_10 = arith.constant 0 : index
      %c0_11 = arith.constant 0 : index
      %13 = vector.load %arg8[%c0_10, %c0_11] : memref<128x256xf32, #tpu.memory_space<vmem>>, vector<128x256xf32>
      tpu.vector_store %arg8[%c0_10, %c0_11], %12 {strides = array<i32>} : memref<128x256xf32, #tpu.memory_space<vmem>>, vector<128x256xf32>,
    } else {
    }
    %c0 = arith.constant 0 : index
    %c0_1 = arith.constant 0 : index
    %3 = vector.load %arg8[%c0, %c0_1] : memref<128x256xf32, #tpu.memory_space<vmem>>, vector<128x256xf32>
    %c0_2 = arith.constant 0 : index
    %c0_3 = arith.constant 0 : index
    %4 = vector.load %arg3[%c0_2, %c0_3] : memref<128x256xbf16, #tpu.memory_space<vmem>>, vector<128x256xbf16>
    %c0_4 = arith.constant 0 : index
    %c0_5 = arith.constant 0 : index
    %5 = vector.load %arg4[%c0_4, %c0_5] : memref<256x256xbf16, #tpu.memory_space<vmem>>, vector<256x256xbf16>
    %cst = arith.constant dense<0.000000e+00> : vector<128x256xf32>
    %6 = tpu.matmul %4, %5, %cst {dimension_numbers = #tpu.dot_dimension_numbers<[1], [0], [0], [1], [0, 0, 1, 1], [], []>} : vector<128x256xbf16>, vector<256x256xbf16>, vector<128x256xf32> -> vector<128x256xf32>
    %7 = arith.addf %3, %6 : vector<128x256xf32>
    %c0_6 = arith.constant 0 : index
    %c0_7 = arith.constant 0 : index
    %8 = vector.load %arg8[%c0_6, %c0_7] : memref<128x256xf32, #tpu.memory_space<vmem>>, vector<128x256xf32>
    tpu.vector_store %arg8[%c0_6, %c0_7], %7 {strides = array<i32>} : memref<128x256xf32, #tpu.memory_space<vmem>>, vector<128x256xf32>,
    %c8_i32 = arith.constant 8 : i32
    %9 = arith.cmpi eq, %arg2, %c8_i32 : i32
    %10 = arith.extui %9 : i1 to i32
    %c0_i32_8 = arith.constant 0 : i32
    %11 = arith.cmpi ne, %10, %c0_i32_8 : i32
    scf.if %11 {
      %c0_9 = arith.constant 0 : index
      %c0_10 = arith.constant 0 : index
      %12 = vector.load %arg8[%c0_9, %c0_10] : memref<128x256xf32, #tpu.memory_space<vmem>>, vector<128x256xf32>
      %c0_11 = arith.constant 0 : index
      %c0_12 = arith.constant 0 : index
      %13 = vector.load %arg5[%c0_11, %c0_12] : memref<1x256xf32, #tpu.memory_space<vmem>>, vector<1x256xf32>
      %14 = vector.broadcast %13 : vector<1x256xf32> to vector<128x256xf32>
      %15 = arith.addf %12, %14 : vector<128x256xf32>
      %c0_13 = arith.constant 0 : index
      %c0_14 = arith.constant 0 : index
      %16 = vector.load %arg6[%c0_13, %c0_14] : memref<128x256xbf16, #tpu.memory_space<vmem>>, vector<128x256xbf16>
      %17 = arith.extf %16 : vector<128x256xbf16> to vector<128x256xf32>
      %18 = arith.addf %15, %17 : vector<128x256xf32>
      %cst_15 = arith.constant 0.000000e+00 : f32
      %19 = vector.broadcast %cst_15 : f32 to vector<128x256xf32>
      %20 = arith.maximumf %18, %19 : vector<128x256xf32>
      %21 = arith.truncf %20 : vector<128x256xf32> to vector<128x256xbf16>
      %c0_16 = arith.constant 0 : index
      %c0_17 = arith.constant 0 : index
      %22 = vector.load %arg7[%c0_16, %c0_17] : memref<128x256xbf16, #tpu.memory_space<vmem>>, vector<128x256xbf16>
      tpu.vector_store %arg7[%c0_16, %c0_17], %21 {strides = array<i32>} : memref<128x256xbf16, #tpu.memory_space<vmem>>, vector<128x256xbf16>,
    } else {
    }
    return
  }
  func.func @transform_0(%arg0: i32, %arg1: i32, %arg2: i32) -> (i32, i32) {
    %c0_i32 = arith.constant 0 : i32
    return %arg0, %arg2 : i32, i32
  }
  func.func @transform_1(%arg0: i32, %arg1: i32, %arg2: i32) -> (i32, i32) {
    %c0_i32 = arith.constant 0 : i32
    return %arg2, %arg1 : i32, i32
  }
  func.func @transform_2(%arg0: i32, %arg1: i32, %arg2: i32) -> (i32, i32) {
    %c0_i32 = arith.constant 0 : i32
    %c0_i32_0 = arith.constant 0 : i32
    return %c0_i32, %arg1 : i32, i32
  }
  func.func @transform_3(%arg0: i32, %arg1: i32, %arg2: i32) -> (i32, i32) {
    %c0_i32 = arith.constant 0 : i32
    return %arg0, %arg1 : i32, i32
  }
  func.func @transform_4(%arg0: i32, %arg1: i32, %arg2: i32) -> (i32, i32) {
    %c0_i32 = arith.constant 0 : i32
    return %arg0, %arg1 : i32, i32
  }
}

module attributes {stable_mosaic.version = 11 : i64} {
  func.func @_mm_bias_kernel(%arg0: i32, %arg1: i32, %arg2: i32, %arg3: memref<128x256xbf16, #tpu.memory_space<vmem>>, %arg4: memref<256x256xbf16, #tpu.memory_space<vmem>>, %arg5: memref<1x256xf32, #tpu.memory_space<vmem>>, %arg6: memref<128x256xbf16, #tpu.memory_space<vmem>>, %arg7: memref<128x256xf32, #tpu.memory_space<vmem>>) attributes {dimension_semantics = [#tpu.dimension_semantics<parallel>, #tpu.dimension_semantics<parallel>, #tpu.dimension_semantics<arbitrary>], iteration_bounds = array<i64: 1, 2, 9>, scalar_prefetch = 0 : i64, scratch_operands = 1 : i64, tpu.core_type = #tpu.core_type<tc>, window_params = [{transform_indices = @transform_0, window_bounds = array<i64: 128, 256>}, {transform_indices = @transform_1, window_bounds = array<i64: 256, 256>}, {transform_indices = @transform_2, window_bounds = array<i64: 1, 256>}, {transform_indices = @transform_3, window_bounds = array<i64: 128, 256>}]} {
    %c0_i32 = arith.constant 0 : i32
    %0 = arith.cmpi eq, %arg2, %c0_i32 : i32
    %1 = arith.extui %0 : i1 to i32
    %c0_i32_0 = arith.constant 0 : i32
    %2 = arith.cmpi ne, %1, %c0_i32_0 : i32
    scf.if %2 {
      %cst_9 = arith.constant 0.000000e+00 : f32
      %12 = vector.broadcast %cst_9 : f32 to vector<128x256xf32>
      %c0_10 = arith.constant 0 : index
      %c0_11 = arith.constant 0 : index
      %13 = vector.load %arg7[%c0_10, %c0_11] : memref<128x256xf32, #tpu.memory_space<vmem>>, vector<128x256xf32>
      tpu.vector_store %arg7[%c0_10, %c0_11], %12 {strides = array<i32>} : memref<128x256xf32, #tpu.memory_space<vmem>>, vector<128x256xf32>,
    } else {
    }
    %c0 = arith.constant 0 : index
    %c0_1 = arith.constant 0 : index
    %3 = vector.load %arg7[%c0, %c0_1] : memref<128x256xf32, #tpu.memory_space<vmem>>, vector<128x256xf32>
    %c0_2 = arith.constant 0 : index
    %c0_3 = arith.constant 0 : index
    %4 = vector.load %arg3[%c0_2, %c0_3] : memref<128x256xbf16, #tpu.memory_space<vmem>>, vector<128x256xbf16>
    %c0_4 = arith.constant 0 : index
    %c0_5 = arith.constant 0 : index
    %5 = vector.load %arg4[%c0_4, %c0_5] : memref<256x256xbf16, #tpu.memory_space<vmem>>, vector<256x256xbf16>
    %cst = arith.constant dense<0.000000e+00> : vector<128x256xf32>
    %6 = tpu.matmul %4, %5, %cst {dimension_numbers = #tpu.dot_dimension_numbers<[1], [0], [0], [1], [0, 0, 1, 1], [], []>} : vector<128x256xbf16>, vector<256x256xbf16>, vector<128x256xf32> -> vector<128x256xf32>
    %7 = arith.addf %3, %6 : vector<128x256xf32>
    %c0_6 = arith.constant 0 : index
    %c0_7 = arith.constant 0 : index
    %8 = vector.load %arg7[%c0_6, %c0_7] : memref<128x256xf32, #tpu.memory_space<vmem>>, vector<128x256xf32>
    tpu.vector_store %arg7[%c0_6, %c0_7], %7 {strides = array<i32>} : memref<128x256xf32, #tpu.memory_space<vmem>>, vector<128x256xf32>,
    %c8_i32 = arith.constant 8 : i32
    %9 = arith.cmpi eq, %arg2, %c8_i32 : i32
    %10 = arith.extui %9 : i1 to i32
    %c0_i32_8 = arith.constant 0 : i32
    %11 = arith.cmpi ne, %10, %c0_i32_8 : i32
    scf.if %11 {
      %c0_9 = arith.constant 0 : index
      %c0_10 = arith.constant 0 : index
      %12 = vector.load %arg7[%c0_9, %c0_10] : memref<128x256xf32, #tpu.memory_space<vmem>>, vector<128x256xf32>
      %c0_11 = arith.constant 0 : index
      %c0_12 = arith.constant 0 : index
      %13 = vector.load %arg5[%c0_11, %c0_12] : memref<1x256xf32, #tpu.memory_space<vmem>>, vector<1x256xf32>
      %14 = vector.broadcast %13 : vector<1x256xf32> to vector<128x256xf32>
      %15 = arith.addf %12, %14 : vector<128x256xf32>
      %cst_13 = arith.constant 0.000000e+00 : f32
      %16 = vector.broadcast %cst_13 : f32 to vector<128x256xf32>
      %17 = arith.maximumf %15, %16 : vector<128x256xf32>
      %18 = arith.truncf %17 : vector<128x256xf32> to vector<128x256xbf16>
      %c0_14 = arith.constant 0 : index
      %c0_15 = arith.constant 0 : index
      %19 = vector.load %arg6[%c0_14, %c0_15] : memref<128x256xbf16, #tpu.memory_space<vmem>>, vector<128x256xbf16>
      tpu.vector_store %arg6[%c0_14, %c0_15], %18 {strides = array<i32>} : memref<128x256xbf16, #tpu.memory_space<vmem>>, vector<128x256xbf16>,
    } else {
    }
    return
  }
  func.func @transform_0(%arg0: i32, %arg1: i32, %arg2: i32) -> (i32, i32) {
    %c0_i32 = arith.constant 0 : i32
    return %arg0, %arg2 : i32, i32
  }
  func.func @transform_1(%arg0: i32, %arg1: i32, %arg2: i32) -> (i32, i32) {
    %c0_i32 = arith.constant 0 : i32
    return %arg2, %arg1 : i32, i32
  }
  func.func @transform_2(%arg0: i32, %arg1: i32, %arg2: i32) -> (i32, i32) {
    %c0_i32 = arith.constant 0 : i32
    %c0_i32_0 = arith.constant 0 : i32
    return %c0_i32, %arg1 : i32, i32
  }
  func.func @transform_3(%arg0: i32, %arg1: i32, %arg2: i32) -> (i32, i32) {
    %c0_i32 = arith.constant 0 : i32
    return %arg0, %arg1 : i32, i32
  }
}

module attributes {stable_mosaic.version = 11 : i64} {
  func.func @_mm_bias_kernel(%arg0: i32, %arg1: i32, %arg2: i32, %arg3: memref<128x256xbf16, #tpu.memory_space<vmem>>, %arg4: memref<256x256xbf16, #tpu.memory_space<vmem>>, %arg5: memref<1x256xf32, #tpu.memory_space<vmem>>, %arg6: memref<128x256xbf16, #tpu.memory_space<vmem>>, %arg7: memref<128x256xf32, #tpu.memory_space<vmem>>) attributes {dimension_semantics = [#tpu.dimension_semantics<parallel>, #tpu.dimension_semantics<parallel>, #tpu.dimension_semantics<arbitrary>], iteration_bounds = array<i64: 1, 2, 1>, scalar_prefetch = 0 : i64, scratch_operands = 1 : i64, tpu.core_type = #tpu.core_type<tc>, window_params = [{transform_indices = @transform_0, window_bounds = array<i64: 128, 256>}, {transform_indices = @transform_1, window_bounds = array<i64: 256, 256>}, {transform_indices = @transform_2, window_bounds = array<i64: 1, 256>}, {transform_indices = @transform_3, window_bounds = array<i64: 128, 256>}]} {
    %c0_i32 = arith.constant 0 : i32
    %0 = arith.cmpi eq, %arg2, %c0_i32 : i32
    %1 = arith.extui %0 : i1 to i32
    %c0_i32_0 = arith.constant 0 : i32
    %2 = arith.cmpi ne, %1, %c0_i32_0 : i32
    scf.if %2 {
      %cst_10 = arith.constant 0.000000e+00 : f32
      %12 = vector.broadcast %cst_10 : f32 to vector<128x256xf32>
      %c0_11 = arith.constant 0 : index
      %c0_12 = arith.constant 0 : index
      %13 = vector.load %arg7[%c0_11, %c0_12] : memref<128x256xf32, #tpu.memory_space<vmem>>, vector<128x256xf32>
      tpu.vector_store %arg7[%c0_11, %c0_12], %12 {strides = array<i32>} : memref<128x256xf32, #tpu.memory_space<vmem>>, vector<128x256xf32>,
    } else {
    }
    %c0 = arith.constant 0 : index
    %c0_1 = arith.constant 0 : index
    %3 = vector.load %arg7[%c0, %c0_1] : memref<128x256xf32, #tpu.memory_space<vmem>>, vector<128x256xf32>
    %c0_2 = arith.constant 0 : index
    %c0_3 = arith.constant 0 : index
    %4 = vector.load %arg3[%c0_2, %c0_3] : memref<128x256xbf16, #tpu.memory_space<vmem>>, vector<128x256xbf16>
    %c0_4 = arith.constant 0 : index
    %c0_5 = arith.constant 0 : index
    %5 = vector.load %arg4[%c0_4, %c0_5] : memref<256x256xbf16, #tpu.memory_space<vmem>>, vector<256x256xbf16>
    %cst = arith.constant dense<0.000000e+00> : vector<128x256xf32>
    %6 = tpu.matmul %4, %5, %cst {dimension_numbers = #tpu.dot_dimension_numbers<[1], [0], [0], [1], [0, 0, 1, 1], [], []>} : vector<128x256xbf16>, vector<256x256xbf16>, vector<128x256xf32> -> vector<128x256xf32>
    %7 = arith.addf %3, %6 : vector<128x256xf32>
    %c0_6 = arith.constant 0 : index
    %c0_7 = arith.constant 0 : index
    %8 = vector.load %arg7[%c0_6, %c0_7] : memref<128x256xf32, #tpu.memory_space<vmem>>, vector<128x256xf32>
    tpu.vector_store %arg7[%c0_6, %c0_7], %7 {strides = array<i32>} : memref<128x256xf32, #tpu.memory_space<vmem>>, vector<128x256xf32>,
    %c0_i32_8 = arith.constant 0 : i32
    %9 = arith.cmpi eq, %arg2, %c0_i32_8 : i32
    %10 = arith.extui %9 : i1 to i32
    %c0_i32_9 = arith.constant 0 : i32
    %11 = arith.cmpi ne, %10, %c0_i32_9 : i32
    scf.if %11 {
      %c0_10 = arith.constant 0 : index
      %c0_11 = arith.constant 0 : index
      %12 = vector.load %arg7[%c0_10, %c0_11] : memref<128x256xf32, #tpu.memory_space<vmem>>, vector<128x256xf32>
      %c0_12 = arith.constant 0 : index
      %c0_13 = arith.constant 0 : index
      %13 = vector.load %arg5[%c0_12, %c0_13] : memref<1x256xf32, #tpu.memory_space<vmem>>, vector<1x256xf32>
      %14 = vector.broadcast %13 : vector<1x256xf32> to vector<128x256xf32>
      %15 = arith.addf %12, %14 : vector<128x256xf32>
      %16 = arith.truncf %15 : vector<128x256xf32> to vector<128x256xbf16>
      %c0_14 = arith.constant 0 : index
      %c0_15 = arith.constant 0 : index
      %17 = vector.load %arg6[%c0_14, %c0_15] : memref<128x256xbf16, #tpu.memory_space<vmem>>, vector<128x256xbf16>
      tpu.vector_store %arg6[%c0_14, %c0_15], %16 {strides = array<i32>} : memref<128x256xbf16, #tpu.memory_space<vmem>>, vector<128x256xbf16>,
    } else {
    }
    return
  }
  func.func @transform_0(%arg0: i32, %arg1: i32, %arg2: i32) -> (i32, i32) {
    %c0_i32 = arith.constant 0 : i32
    return %arg0, %arg2 : i32, i32
  }
  func.func @transform_1(%arg0: i32, %arg1: i32, %arg2: i32) -> (i32, i32) {
    %c0_i32 = arith.constant 0 : i32
    return %arg2, %arg1 : i32, i32
  }
  func.func @transform_2(%arg0: i32, %arg1: i32, %arg2: i32) -> (i32, i32) {
    %c0_i32 = arith.constant 0 : i32
    %c0_i32_0 = arith.constant 0 : i32
    return %c0_i32, %arg1 : i32, i32
  }
  func.func @transform_3(%arg0: i32, %arg1: i32, %arg2: i32) -> (i32, i32) {
    %c0_i32 = arith.constant 0 : i32
    return %arg0, %arg1 : i32, i32
  }
}

module attributes {stable_mosaic.version = 11 : i64} {
  func.func @_mm_bias_res_kernel(%arg0: i32, %arg1: i32, %arg2: i32, %arg3: memref<128x512xbf16, #tpu.memory_space<vmem>>, %arg4: memref<512x256xbf16, #tpu.memory_space<vmem>>, %arg5: memref<1x256xf32, #tpu.memory_space<vmem>>, %arg6: memref<128x256xbf16, #tpu.memory_space<vmem>>, %arg7: memref<128x256xbf16, #tpu.memory_space<vmem>>, %arg8: memref<128x256xf32, #tpu.memory_space<vmem>>) attributes {dimension_semantics = [#tpu.dimension_semantics<parallel>, #tpu.dimension_semantics<parallel>, #tpu.dimension_semantics<arbitrary>], iteration_bounds = array<i64: 1, 2, 9>, scalar_prefetch = 0 : i64, scratch_operands = 1 : i64, tpu.core_type = #tpu.core_type<tc>, window_params = [{transform_indices = @transform_0, window_bounds = array<i64: 128, 512>}, {transform_indices = @transform_1, window_bounds = array<i64: 512, 256>}, {transform_indices = @transform_2, window_bounds = array<i64: 1, 256>}, {transform_indices = @transform_3, window_bounds = array<i64: 128, 256>}, {transform_indices = @transform_4, window_bounds = array<i64: 128, 256>}]} {
    %c0_i32 = arith.constant 0 : i32
    %0 = arith.cmpi eq, %arg2, %c0_i32 : i32
    %1 = arith.extui %0 : i1 to i32
    %c0_i32_0 = arith.constant 0 : i32
    %2 = arith.cmpi ne, %1, %c0_i32_0 : i32
    scf.if %2 {
      %cst_9 = arith.constant 0.000000e+00 : f32
      %12 = vector.broadcast %cst_9 : f32 to vector<128x256xf32>
      %c0_10 = arith.constant 0 : index
      %c0_11 = arith.constant 0 : index
      %13 = vector.load %arg8[%c0_10, %c0_11] : memref<128x256xf32, #tpu.memory_space<vmem>>, vector<128x256xf32>
      tpu.vector_store %arg8[%c0_10, %c0_11], %12 {strides = array<i32>} : memref<128x256xf32, #tpu.memory_space<vmem>>, vector<128x256xf32>,
    } else {
    }
    %c0 = arith.constant 0 : index
    %c0_1 = arith.constant 0 : index
    %3 = vector.load %arg8[%c0, %c0_1] : memref<128x256xf32, #tpu.memory_space<vmem>>, vector<128x256xf32>
    %c0_2 = arith.constant 0 : index
    %c0_3 = arith.constant 0 : index
    %4 = vector.load %arg3[%c0_2, %c0_3] : memref<128x512xbf16, #tpu.memory_space<vmem>>, vector<128x512xbf16>
    %c0_4 = arith.constant 0 : index
    %c0_5 = arith.constant 0 : index
    %5 = vector.load %arg4[%c0_4, %c0_5] : memref<512x256xbf16, #tpu.memory_space<vmem>>, vector<512x256xbf16>
    %cst = arith.constant dense<0.000000e+00> : vector<128x256xf32>
    %6 = tpu.matmul %4, %5, %cst {dimension_numbers = #tpu.dot_dimension_numbers<[1], [0], [0], [1], [0, 0, 1, 1], [], []>} : vector<128x512xbf16>, vector<512x256xbf16>, vector<128x256xf32> -> vector<128x256xf32>
    %7 = arith.addf %3, %6 : vector<128x256xf32>
    %c0_6 = arith.constant 0 : index
    %c0_7 = arith.constant 0 : index
    %8 = vector.load %arg8[%c0_6, %c0_7] : memref<128x256xf32, #tpu.memory_space<vmem>>, vector<128x256xf32>
    tpu.vector_store %arg8[%c0_6, %c0_7], %7 {strides = array<i32>} : memref<128x256xf32, #tpu.memory_space<vmem>>, vector<128x256xf32>,
    %c8_i32 = arith.constant 8 : i32
    %9 = arith.cmpi eq, %arg2, %c8_i32 : i32
    %10 = arith.extui %9 : i1 to i32
    %c0_i32_8 = arith.constant 0 : i32
    %11 = arith.cmpi ne, %10, %c0_i32_8 : i32
    scf.if %11 {
      %c0_9 = arith.constant 0 : index
      %c0_10 = arith.constant 0 : index
      %12 = vector.load %arg8[%c0_9, %c0_10] : memref<128x256xf32, #tpu.memory_space<vmem>>, vector<128x256xf32>
      %c0_11 = arith.constant 0 : index
      %c0_12 = arith.constant 0 : index
      %13 = vector.load %arg5[%c0_11, %c0_12] : memref<1x256xf32, #tpu.memory_space<vmem>>, vector<1x256xf32>
      %14 = vector.broadcast %13 : vector<1x256xf32> to vector<128x256xf32>
      %15 = arith.addf %12, %14 : vector<128x256xf32>
      %c0_13 = arith.constant 0 : index
      %c0_14 = arith.constant 0 : index
      %16 = vector.load %arg6[%c0_13, %c0_14] : memref<128x256xbf16, #tpu.memory_space<vmem>>, vector<128x256xbf16>
      %17 = arith.extf %16 : vector<128x256xbf16> to vector<128x256xf32>
      %18 = arith.addf %15, %17 : vector<128x256xf32>
      %cst_15 = arith.constant 0.000000e+00 : f32
      %19 = vector.broadcast %cst_15 : f32 to vector<128x256xf32>
      %20 = arith.maximumf %18, %19 : vector<128x256xf32>
      %21 = arith.truncf %20 : vector<128x256xf32> to vector<128x256xbf16>
      %c0_16 = arith.constant 0 : index
      %c0_17 = arith.constant 0 : index
      %22 = vector.load %arg7[%c0_16, %c0_17] : memref<128x256xbf16, #tpu.memory_space<vmem>>, vector<128x256xbf16>
      tpu.vector_store %arg7[%c0_16, %c0_17], %21 {strides = array<i32>} : memref<128x256xbf16, #tpu.memory_space<vmem>>, vector<128x256xbf16>,
    } else {
    }
    return
  }
  func.func @transform_0(%arg0: i32, %arg1: i32, %arg2: i32) -> (i32, i32) {
    %c0_i32 = arith.constant 0 : i32
    return %arg0, %arg2 : i32, i32
  }
  func.func @transform_1(%arg0: i32, %arg1: i32, %arg2: i32) -> (i32, i32) {
    %c0_i32 = arith.constant 0 : i32
    return %arg2, %arg1 : i32, i32
  }
  func.func @transform_2(%arg0: i32, %arg1: i32, %arg2: i32) -> (i32, i32) {
    %c0_i32 = arith.constant 0 : i32
    %c0_i32_0 = arith.constant 0 : i32
    return %c0_i32, %arg1 : i32, i32
  }
  func.func @transform_3(%arg0: i32, %arg1: i32, %arg2: i32) -> (i32, i32) {
    %c0_i32 = arith.constant 0 : i32
    return %arg0, %arg1 : i32, i32
  }
  func.func @transform_4(%arg0: i32, %arg1: i32, %arg2: i32) -> (i32, i32) {
    %c0_i32 = arith.constant 0 : i32
    return %arg0, %arg1 : i32, i32
  }
}

module attributes {stable_mosaic.version = 11 : i64} {
  func.func @_avgpool_fc_kernel(%arg0: memref<2x2x2x512xbf16, #tpu.memory_space<vmem>>, %arg1: memref<512x10xf32, #tpu.memory_space<vmem>>, %arg2: memref<1x10xf32, #tpu.memory_space<vmem>>, %arg3: memref<2x10xf32, #tpu.memory_space<vmem>>) attributes {dimension_semantics = [], scalar_prefetch = 0 : i64, scratch_operands = 0 : i64, tpu.core_type = #tpu.core_type<tc>} {
    %c0 = arith.constant 0 : index
    %c0_0 = arith.constant 0 : index
    %c0_1 = arith.constant 0 : index
    %c0_2 = arith.constant 0 : index
    %0 = vector.load %arg0[%c0, %c0_0, %c0_1, %c0_2] : memref<2x2x2x512xbf16, #tpu.memory_space<vmem>>, vector<2x2x2x512xbf16>
    %1 = arith.extf %0 : vector<2x2x2x512xbf16> to vector<2x2x2x512xf32>
    %cst = arith.constant dense<0.000000e+00> : vector<2x512xf32>
    %2 = vector.multi_reduction <add>, %1, %cst [1, 2] : vector<2x2x2x512xf32> to vector<2x512xf32>
    %cst_3 = arith.constant 4.000000e+00 : f32
    %3 = vector.broadcast %cst_3 : f32 to vector<2x512xf32>
    %4 = arith.divf %2, %3 : vector<2x512xf32>
    %c0_4 = arith.constant 0 : index
    %c0_5 = arith.constant 0 : index
    %5 = vector.load %arg1[%c0_4, %c0_5] : memref<512x10xf32, #tpu.memory_space<vmem>>, vector<512x10xf32>
    %cst_6 = arith.constant dense<0.000000e+00> : vector<2x10xf32>
    %6 = tpu.matmul %4, %5, %cst_6 {dimension_numbers = #tpu.dot_dimension_numbers<[1], [0], [0], [1], [0, 0, 1, 1], [], []>} : vector<2x512xf32>, vector<512x10xf32>, vector<2x10xf32> -> vector<2x10xf32>
    %c0_7 = arith.constant 0 : index
    %c0_8 = arith.constant 0 : index
    %7 = vector.load %arg2[%c0_7, %c0_8] : memref<1x10xf32, #tpu.memory_space<vmem>>, vector<1x10xf32>
    %8 = vector.broadcast %7 : vector<1x10xf32> to vector<2x10xf32>
    %9 = arith.addf %6, %8 : vector<2x10xf32>
    %c0_9 = arith.constant 0 : index
    %c0_10 = arith.constant 0 : index
    %10 = vector.load %arg3[%c0_9, %c0_10] : memref<2x10xf32, #tpu.memory_space<vmem>>, vector<2x10xf32>
    tpu.vector_store %arg3[%c0_9, %c0_10], %9 {strides = array<i32>} : memref<2x10xf32, #tpu.memory_space<vmem>>, vector<2x10xf32>,
    return
  }
}

</mosaic_0001>

<bundles_post_ra>
// kernel: _lambda_.14
= control target key start
LH: loop header
LB: loop body
LE: loop exit
PB: predicated region body
PF: predicated region fallthrough
CT: control target
= control target key end

     0   :  { %8 = vsyncpa [#allocation4], 0  ;;  %s1780_s0 = inlined_call_operand.vmem [shape: bf16[512,128], index: 0, kind: input, shape index: {}]   ;;  %s1781_s1 = inlined_call_operand.hbm [shape: bf16[128,128], index: 1, kind: input, shape index: {}]   ;;  %s1782_s2 = inlined_call_operand.hbm [shape: f32[1,128], index: 2, kind: input, shape index: {}]   ;;  %s1783_s3 = inlined_call_operand.vmem [shape: bf16[512,128], index: 3, kind: output, shape index: {}]  }
   0x1   :  { %9 = vsyncpa [#allocation6], 0  ;;  %s1590_s12 = smov 0   ;;  %s1592_s13 = smov 0  }
   0x2   :  { %s1594_s14 = smov 0  }
   0x3 LB: > { %s1120_s15 = sadd.s32 4294967295, %s1564_s14   ;;  %s34_s16 = sadd.s32 1, %s1560_s13  ;;  %s1564_s14 = sphi %s1594_s14, %s15_s14   ;;  %s1560_s13 = sphi %s1592_s13, %s1793_s13   ;;  %s1556_s12 = sphi %s1590_s12, %s1792_s12  }
   0x4   : > { %p36_p0 = scmp.ge.s32.totalorder %s34_s16, 2  ;;  %p1122_p1 = scmp.ge.s32.totalorder %s1564_s14, 1 }
   0x5   : > { %p149_p2 = scmp.lt.s32.totalorder %s1564_s14, 3  ;;  %p1615_p4 = scmp.eq.s32.totalorder %s1120_s15, 0 }
   0x6   : > { %s1795_s16 = smov (%p36_p0, %s34_s16), 0  ;;  %s1566_s19 = smov [#allocation3]  }
   0x7   : > { %p1611_p3 = pnand %p1122_p1, %p149_p2  ;;  %s165_s20 = sshll.u32 %s1566_s19, 4  ;;  %s166_s20 = int_to_ptr.vmem [resolvable:$true] %s165_s20 }
   0x8   : > { %s1788_s18 = scalar_select %p1615_p4, 1, 0 }
   0x9   : > { %s1787_s17 = scalar_select %p1611_p3, 1, 0 }
   0xa   : > { %p1415_p5 = pneg %p1611_p3  ;;  %s1567_s22 = smov [#allocation5]  }
   0xb   : > { %s181_s23 = sshll.u32 %s1567_s22, 4  ;;  %s1478_s26 = scalar_lea.hbm %s1781_s1, 1024  ;;  %s1627_s23 = int_to_ptr.vmem [resolvable:$true] %s181_s23 }
   0xc   : > { %p1623_p6 = pnand %p1615_p4, %p1415_p5  ;;  %p1479_p7 = scmp.ne.s32.totalorder %s1781_s1, %s1478_s26 }
   0xd   : > { %p1485_p11 = scmp.lt.u32.totalorder %s1478_s26, %s1781_s1 }
   0xe   : > { %p1480_p8 = pneg %p1623_p6 }
  0x10   : > { %p1481_p9 = pnand %p1480_p8, %p1479_p7 }
  0x12   : > { %p1482_p10 = pneg %p1481_p9 }
  0x14   : > { %p1487_p12 = pnand %p1485_p11, %p1482_p10 }
  0x16   : > { %1490 = shalt.err (!%p1487_p12)
}
  0x17   : > { %s1491_s4 = scalar_lea.vmem %s166_s20, 1024  ;;  %p1499_p2 = scmp.lt.s32.totalorder %s166_s20, %s166_s20 }
  0x18   : > { %p1492_p13 = scmp.ne.s32.totalorder %s166_s20, %s1491_s4  ;;  %p1500_p5 = scmp.lt.s32.totalorder %s1491_s4, %s1491_s4 }
  0x1a   : > { %p1494_p0 = pnand %p1492_p13, %p1480_p8  ;;  %p1501_p4 = por %p1500_p5, %p1499_p2 }
  0x1c   : > { %p1495_p1 = pneg %p1494_p0 }
  0x1e   : > { %p1502_p3 = pnand %p1501_p4, %p1495_p1 }
  0x20   : > { %1505 = shalt.err (!%p1502_p3)
}
  0x21   : > { %s1568_s5 = smov 64   ;;  %s1569_s6 = smov 4  }
  0x22   : > { %1418 = dma.hbm_to_vmem [thread:$0]  (!%p1623_p6), %s1781_s1, 1024, %s166_s20, [#allocation4], %s1568_s5, %s1568_s5, %s1569_s6  }
  0x23   : > { %s1506_s11 = scalar_lea.hbm %s1782_s2, 16 }
  0x24   : > { %p1507_p7 = scmp.ne.s32.totalorder %s1782_s2, %s1506_s11  ;;  %p1513_p9 = scmp.lt.u32.totalorder %s1506_s11, %s1782_s2 }
  0x26   : > { %p1509_p3 = pnand %p1507_p7, %p1480_p8 }
  0x28   : > { %p1510_p4 = pneg %p1509_p3 }
  0x2a   : > { %p1515_p10 = pnand %p1513_p9, %p1510_p4 }
  0x2c   : > { %1518 = shalt.err (!%p1515_p10)
}
  0x2d   : > { %s1519_s20 = scalar_lea.vmem %s1627_s23, 16  ;;  %s1526_s25 = scalar_lea.vmem %s1627_s23, 32 }
  0x2e   : > { %p1520_p11 = scmp.ne.s32.totalorder %s1627_s23, %s1519_s20  ;;  %p1527_p0 = scmp.lt.s32.totalorder %s1627_s23, %s1627_s23 }
  0x2f   : > { %p1528_p1 = scmp.lt.s32.totalorder %s1526_s25, %s1519_s20 }
  0x30   : > { %p1522_p12 = pnand %p1520_p11, %p1480_p8 }
  0x31   : > { %p1529_p2 = por %p1528_p1, %p1527_p0 }
  0x32   : > { %p1523_p13 = pneg %p1522_p12 }
  0x34   : > { %p1530_p5 = pnand %p1529_p2, %p1523_p13 }
  0x36   : > { %1533 = shalt.err (!%p1530_p5)
}
  0x37   : > { %1421 = dma.hbm_to_vmem [thread:$0]  (!%p1623_p6), %s1782_s2, 16, %s1627_s23, [#allocation6]  }
  0x38   : > { %p1790_p7 = scmp.ne.s32.totalorder %s1787_s17, 0 }
  0x39   : > { %p1791_p8 = scmp.ne.s32.totalorder (!%p1790_p7), %s1788_s18, 0 }
  0x3a   : > { %206 = sbr.rel (%p1790_p7) target bundleno = 347 (0x15b), region = 32 }
  0x41   : > { %1547 = dma.done.wait (%p1791_p8), [#allocation4], 1024  }
  0x42   : > { %1549 = vsyncadd (%p1791_p8), [#allocation4], 4294966272 }
  0x43   : > { %1551 = dma.done.wait (%p1791_p8), [#allocation6], 16  }
  0x44   : > { %1553 = vsyncadd (%p1791_p8), [#allocation6], 4294967280  ;;  %s1129_s21 = sshll.u32 %s1556_s12, 5  ;;  %v1454_v0 = vld [vmem:[#allocation3] sm:$0xff]   ;;  %v1455_v1 = vld [vmem:[#allocation3 + $0x8] sm:$0xff]  }
  0x45   : > { %p241_p3 = scmp.lt.s32.totalorder %s1129_s21, 63  ;;  %1343 = vmatprep.subr.bf16.mxu0 %v1454_v0  ;;  %1391 = vmatprep.subr.bf16.mxu1 %v1454_v0  ;;  %v1456_v2 = vld [vmem:[#allocation3 + $0x10] sm:$0xff]   ;;  %v1457_v3 = vld [vmem:[#allocation3 + $0x18] sm:$0xff]   ;;  %v1458_v6 = vld [vmem:[#allocation3 + $0x20] sm:$0xff]  }
  0x46   : > { %1344 = vmatpush3.bf16.msra.mxu0 %v1454_v0  ;;  %1399 = vmatpush3.bf16.msra.mxu1 %v1454_v0  ;;  %v1459_v7 = vld [vmem:[#allocation3 + $0x28] sm:$0xff]   ;;  %v1460_v8 = vld [vmem:[#allocation3 + $0x30] sm:$0xff]   ;;  %v1461_v9 = vld [vmem:[#allocation3 + $0x38] sm:$0xff]  }
  0x47   : > { %s1797_s21 = smov (!%p241_p3, %s1129_s21), 63  ;;  %1345 = vmatprep.subr.bf16.mxu0 %v1455_v1  ;;  %1392 = vmatprep.subr.bf16.mxu1 %v1455_v1  ;;  %v1714_v24 = vld [vmem:[#allocation5] ss:$0 sm:$0xff] }
  0x48   : > { %s1130_s17 = sshll.u32 %s1797_s21, 2 }
  0x49   : > { %s1696_s12 = scalar_lea.vmem %s1780_s0, %s1130_s17  ;;  %s1729_s30 = scalar_lea.vmem %s1783_s3, %s1130_s17 }
  0x4a   : > { %1346 = vmatpush3.bf16.msra.mxu0 %v1455_v1  ;;  %1400 = vmatpush3.bf16.msra.mxu1 %v1455_v1  ;;  %v1462_v4 = vld [vmem:[%s1696_s12] sm:$0xff]   ;;  %v1464_v10 = vld [vmem:[%s1696_s12 + $0x8] sm:$0xff]   ;;  %v1466_v12 = vld [vmem:[%s1696_s12 + $0x10] sm:$0xff]  }
  0x4b   : > { %1347 = vmatprep.subr.bf16.mxu0 %v1456_v2  ;;  %1393 = vmatprep.subr.bf16.mxu1 %v1456_v2  ;;  %v1463_v5 = vld [vmem:[%s1696_s12 + $0x40] sm:$0xff]   ;;  %v1465_v11 = vld [vmem:[%s1696_s12 + $0x48] sm:$0xff]   ;;  %v1467_v13 = vld [vmem:[%s1696_s12 + $0x50] sm:$0xff]  }
  0x4c   : > { %1359 = vmatprep.mubr.bf16.mxu0 %v1462_v4  ;;  %1375 = vmatprep.mubr.bf16.mxu1 %v1463_v5  ;;  %v1468_v14 = vld [vmem:[%s1696_s12 + $0x18] sm:$0xff]   ;;  %v1470_v16 = vld [vmem:[%s1696_s12 + $0x20] sm:$0xff]   ;;  %v1472_v18 = vld [vmem:[%s1696_s12 + $0x28] sm:$0xff]  }
  0x4d   : > { %v1469_v15 = vld [vmem:[%s1696_s12 + $0x58] sm:$0xff]   ;;  %v1471_v17 = vld [vmem:[%s1696_s12 + $0x60] sm:$0xff]   ;;  %v1473_v19 = vld [vmem:[%s1696_s12 + $0x68] sm:$0xff]  }
  0x4e   : > { %1348 = vmatpush3.bf16.msra.mxu0 %v1456_v2  ;;  %1401 = vmatpush3.bf16.msra.mxu1 %v1456_v2  ;;  %v1474_v20 = vld [vmem:[%s1696_s12 + $0x30] sm:$0xff]   ;;  %v1476_v22 = vld [vmem:[%s1696_s12 + $0x38] sm:$0xff]  }
  0x4f   : > { %1349 = vmatprep.subr.bf16.mxu0 %v1457_v3  ;;  %1394 = vmatprep.subr.bf16.mxu1 %v1457_v3  ;;  %v1475_v21 = vld [vmem:[%s1696_s12 + $0x70] sm:$0xff]   ;;  %v1477_v23 = vld [vmem:[%s1696_s12 + $0x78] sm:$0xff]  }
  0x52   : > { %1350 = vmatpush3.bf16.msra.mxu0 %v1457_v3  ;;  %1402 = vmatpush3.bf16.msra.mxu1 %v1457_v3 }
  0x53   : > { %1351 = vmatprep.subr.bf16.mxu0 %v1458_v6  ;;  %1395 = vmatprep.subr.bf16.mxu1 %v1458_v6 }
  0x56   : > { %1352 = vmatpush3.bf16.msra.mxu0 %v1458_v6  ;;  %1403 = vmatpush3.bf16.msra.mxu1 %v1458_v6 }
  0x57   : > { %1353 = vmatprep.subr.bf16.mxu0 %v1459_v7  ;;  %1396 = vmatprep.subr.bf16.mxu1 %v1459_v7 }
  0x5a   : > { %1354 = vmatpush3.bf16.msra.mxu0 %v1459_v7  ;;  %1404 = vmatpush3.bf16.msra.mxu1 %v1459_v7 }
  0x5b   : > { %1355 = vmatprep.subr.bf16.mxu0 %v1460_v8  ;;  %1397 = vmatprep.subr.bf16.mxu1 %v1460_v8 }
  0x5e   : > { %1356 = vmatpush3.bf16.msra.mxu0 %v1460_v8  ;;  %1405 = vmatpush3.bf16.msra.mxu1 %v1460_v8 }
  0x5f   : > { %1357 = vmatprep.subr.bf16.mxu0 %v1461_v9  ;;  %1398 = vmatprep.subr.bf16.mxu1 %v1461_v9 }
  0x62   : > { %1358 = vmatpush3.bf16.msra.mxu0 %v1461_v9  ;;  %1406 = vmatpush3.bf16.msra.mxu1 %v1461_v9 }
  0x65   : > { %1360 = vmatmul.mubr.bf16.vlgmr.msra.gmra.mrb[0].mxu0 %v1464_v10  ;;  %1376 = vmatmul.mubr.bf16.vlgmr.msra.gmra.mrb[0].mxu1 %v1465_v11 }
  0x66   : > { %1363 = vmatprep.mubr.bf16.mxu0 %v1466_v12  ;;  %1379 = vmatprep.mubr.bf16.mxu1 %v1467_v13 }
  0x6d   : > { %1364 = vmatmul.mubr.bf16.gmra.mrb[4].mxu0 %v1468_v14  ;;  %1380 = vmatmul.mubr.bf16.gmra.mrb[4].mxu1 %v1469_v15 }
  0x6e   : > { %1367 = vmatprep.mubr.bf16.mxu0 %v1470_v16  ;;  %1383 = vmatprep.mubr.bf16.mxu1 %v1471_v17 }
  0x75   : > { %1368 = vmatmul.mubr.bf16.gmra.mrb[8].mxu0 %v1472_v18  ;;  %1384 = vmatmul.mubr.bf16.gmra.mrb[8].mxu1 %v1473_v19 }
  0x76   : > { %1371 = vmatprep.mubr.bf16.mxu0 %v1474_v20  ;;  %1387 = vmatprep.mubr.bf16.mxu1 %v1475_v21 }
  0x7d   : > { %1372 = vmatmul.mubr.bf16.gmra.mrb[12].mxu0 %v1476_v22  ;;  %1388 = vmatmul.mubr.bf16.gmra.mrb[12].mxu1 %v1477_v23 }
 0x138   : > { %v1361_v25 = vpop.f32.mrb[0].mxu0  ;;  %v1377_v26 = vpop.f32.mrb[0].mxu1 }
 0x139   : > { %v789_v27 = vadd.f32 %v1361_v25, %v1714_v24  ;;  %v805_v28 = vadd.f32 %v1377_v26, %v1714_v24  ;;  %v554_v29 = vpop.f32.mrb[1].mxu0  ;;  %v618_v30 = vpop.f32.mrb[1].mxu1 }
 0x13a   : > { %v787_v31 = vadd.f32 %v1714_v24, %v554_v29  ;;  %v803_v32 = vadd.f32 %v1714_v24, %v618_v30  ;;  %v1362_v33 = vpop.f32.mrb[2].mxu0  ;;  %v1378_v34 = vpop.f32.mrb[2].mxu1 }
 0x13b   : > { %v790_v35 = vadd.f32 %v1362_v33, %v1714_v24  ;;  %v806_v36 = vadd.f32 %v1378_v34, %v1714_v24  ;;  %v557_v37 = vpop.f32.mrb[3].mxu0  ;;  %v621_v38 = vpop.f32.mrb[3].mxu1  ;;  %v821_v41 = vmax.f32 %v789_v27, 0.0  ;;  %v837_v42 = vmax.f32 %v805_v28, 0.0 }
 0x13c   : > { %v788_v39 = vadd.f32 %v1714_v24, %v557_v37  ;;  %v804_v40 = vadd.f32 %v1714_v24, %v621_v38  ;;  %v819_v45 = vmax.f32 %v787_v31, 0.0  ;;  %v835_v46 = vmax.f32 %v803_v32, 0.0 }
 0x13d   : > { %v822_v43 = vmax.f32 %v790_v35, 0.0  ;;  %v838_v44 = vmax.f32 %v806_v36, 0.0 }
 0x13e   : > { %v820_v47 = vmax.f32 %v788_v39, 0.0  ;;  %v836_v48 = vmax.f32 %v804_v40, 0.0 }
 0x13f   : > { %v1232_v49 = vpack.c.bf16 %v822_v43, %v821_v41  ;;  %v1272_v50 = vpack.c.bf16 %v838_v44, %v837_v42 }
 0x140   : > { %v1227_v51 = vpack.c.bf16 %v820_v47, %v819_v45  ;;  %v1267_v52 = vpack.c.bf16 %v836_v48, %v835_v46  ;;  %v1365_v53 = vpop.f32.mrb[4].mxu0  ;;  %v1381_v54 = vpop.f32.mrb[4].mxu1 }
 0x141   : > { %1304 = vst [vmem:[%s1729_s30 + $0x8] sm:$0xff] %v1232_v49   ;;  %1312 = vst [vmem:[%s1729_s30 + $0x48] sm:$0xff] %v1272_v50   ;;  %v793_v55 = vadd.f32 %v1365_v53, %v1714_v24  ;;  %v809_v56 = vadd.f32 %v1381_v54, %v1714_v24  ;;  %v570_v57 = vpop.f32.mrb[5].mxu0  ;;  %v634_v58 = vpop.f32.mrb[5].mxu1 }
 0x142   : > { %1228 = vst [vmem:[%s1729_s30] sm:$0xff] %v1227_v51   ;;  %1311 = vst [vmem:[%s1729_s30 + $0x40] sm:$0xff] %v1267_v52   ;;  %v791_v59 = vadd.f32 %v1714_v24, %v570_v57  ;;  %v807_v60 = vadd.f32 %v1714_v24, %v634_v58  ;;  %v1366_v61 = vpop.f32.mrb[6].mxu0  ;;  %v1382_v62 = vpop.f32.mrb[6].mxu1 }
 0x143   : > { %v794_v63 = vadd.f32 %v1366_v61, %v1714_v24  ;;  %v810_v0 = vadd.f32 %v1382_v62, %v1714_v24  ;;  %v573_v1 = vpop.f32.mrb[7].mxu0  ;;  %v637_v2 = vpop.f32.mrb[7].mxu1  ;;  %v825_v5 = vmax.f32 %v793_v55, 0.0  ;;  %v841_v6 = vmax.f32 %v809_v56, 0.0 }
 0x144   : > { %v792_v3 = vadd.f32 %v1714_v24, %v573_v1  ;;  %v808_v4 = vadd.f32 %v1714_v24, %v637_v2  ;;  %v823_v9 = vmax.f32 %v791_v59, 0.0  ;;  %v839_v10 = vmax.f32 %v807_v60, 0.0 }
 0x145   : > { %v826_v7 = vmax.f32 %v794_v63, 0.0  ;;  %v842_v8 = vmax.f32 %v810_v0, 0.0 }
 0x146   : > { %v824_v11 = vmax.f32 %v792_v3, 0.0  ;;  %v840_v12 = vmax.f32 %v808_v4, 0.0 }
 0x147   : > { %v1242_v13 = vpack.c.bf16 %v826_v7, %v825_v5  ;;  %v1282_v14 = vpack.c.bf16 %v842_v8, %v841_v6 }
 0x148   : > { %v1237_v15 = vpack.c.bf16 %v824_v11, %v823_v9  ;;  %v1277_v16 = vpack.c.bf16 %v840_v12, %v839_v10  ;;  %v1369_v17 = vpop.f32.mrb[8].mxu0  ;;  %v1385_v18 = vpop.f32.mrb[8].mxu1 }
 0x149   : > { %1306 = vst [vmem:[%s1729_s30 + $0x18] sm:$0xff] %v1242_v13   ;;  %1314 = vst [vmem:[%s1729_s30 + $0x58] sm:$0xff] %v1282_v14   ;;  %v797_v19 = vadd.f32 %v1369_v17, %v1714_v24  ;;  %v813_v20 = vadd.f32 %v1385_v18, %v1714_v24  ;;  %v586_v21 = vpop.f32.mrb[9].mxu0  ;;  %v650_v22 = vpop.f32.mrb[9].mxu1 }
 0x14a   : > { %1305 = vst [vmem:[%s1729_s30 + $0x10] sm:$0xff] %v1237_v15   ;;  %1313 = vst [vmem:[%s1729_s30 + $0x50] sm:$0xff] %v1277_v16   ;;  %v795_v23 = vadd.f32 %v1714_v24, %v586_v21  ;;  %v811_v25 = vadd.f32 %v1714_v24, %v650_v22  ;;  %v1370_v26 = vpop.f32.mrb[10].mxu0  ;;  %v1386_v27 = vpop.f32.mrb[10].mxu1 }
 0x14b   : > { %v798_v28 = vadd.f32 %v1370_v26, %v1714_v24  ;;  %v814_v29 = vadd.f32 %v1386_v27, %v1714_v24  ;;  %v589_v30 = vpop.f32.mrb[11].mxu0  ;;  %v653_v31 = vpop.f32.mrb[11].mxu1  ;;  %v829_v34 = vmax.f32 %v797_v19, 0.0  ;;  %v845_v35 = vmax.f32 %v813_v20, 0.0 }
 0x14c   : > { %v796_v32 = vadd.f32 %v1714_v24, %v589_v30  ;;  %v812_v33 = vadd.f32 %v1714_v24, %v653_v31  ;;  %v827_v38 = vmax.f32 %v795_v23, 0.0  ;;  %v843_v39 = vmax.f32 %v811_v25, 0.0 }
 0x14d   : > { %v830_v36 = vmax.f32 %v798_v28, 0.0  ;;  %v846_v37 = vmax.f32 %v814_v29, 0.0 }
 0x14e   : > { %v828_v40 = vmax.f32 %v796_v32, 0.0  ;;  %v844_v41 = vmax.f32 %v812_v33, 0.0 }
 0x14f   : > { %v1252_v42 = vpack.c.bf16 %v830_v36, %v829_v34  ;;  %v1292_v43 = vpack.c.bf16 %v846_v37, %v845_v35 }
 0x150   : > { %v1247_v44 = vpack.c.bf16 %v828_v40, %v827_v38  ;;  %v1287_v45 = vpack.c.bf16 %v844_v41, %v843_v39  ;;  %v1373_v46 = vpop.f32.mrb[12].mxu0  ;;  %v1389_v47 = vpop.f32.mrb[12].mxu1 }
 0x151   : > { %1308 = vst [vmem:[%s1729_s30 + $0x28] sm:$0xff] %v1252_v42   ;;  %1316 = vst [vmem:[%s1729_s30 + $0x68] sm:$0xff] %v1292_v43   ;;  %v801_v48 = vadd.f32 %v1373_v46, %v1714_v24  ;;  %v817_v49 = vadd.f32 %v1389_v47, %v1714_v24  ;;  %v602_v50 = vpop.f32.mrb[13].mxu0  ;;  %v666_v51 = vpop.f32.mrb[13].mxu1 }
 0x152   : > { %1307 = vst [vmem:[%s1729_s30 + $0x20] sm:$0xff] %v1247_v44   ;;  %1315 = vst [vmem:[%s1729_s30 + $0x60] sm:$0xff] %v1287_v45   ;;  %v799_v52 = vadd.f32 %v1714_v24, %v602_v50  ;;  %v815_v53 = vadd.f32 %v1714_v24, %v666_v51  ;;  %v1374_v54 = vpop.f32.mrb[14].mxu0  ;;  %v1390_v55 = vpop.f32.mrb[14].mxu1 }
 0x153   : > { %v802_v56 = vadd.f32 %v1374_v54, %v1714_v24  ;;  %v818_v57 = vadd.f32 %v1390_v55, %v1714_v24  ;;  %v605_v58 = vpop.f32.mrb[15].mxu0  ;;  %v669_v59 = vpop.f32.mrb[15].mxu1  ;;  %v833_v62 = vmax.f32 %v801_v48, 0.0  ;;  %v849_v63 = vmax.f32 %v817_v49, 0.0 }
 0x154   : > { %v800_v60 = vadd.f32 %v1714_v24, %v605_v58  ;;  %v816_v61 = vadd.f32 %v1714_v24, %v669_v59  ;;  %v831_v2 = vmax.f32 %v799_v52, 0.0  ;;  %v847_v3 = vmax.f32 %v815_v53, 0.0 }
 0x155   : > { %v834_v0 = vmax.f32 %v802_v56, 0.0  ;;  %v850_v1 = vmax.f32 %v818_v57, 0.0 }
 0x156   : > { %v832_v4 = vmax.f32 %v800_v60, 0.0  ;;  %v848_v5 = vmax.f32 %v816_v61, 0.0 }
 0x157   : > { %v1262_v6 = vpack.c.bf16 %v834_v0, %v833_v62  ;;  %v1302_v7 = vpack.c.bf16 %v850_v1, %v849_v63 }
 0x158   : > { %v1257_v8 = vpack.c.bf16 %v832_v4, %v831_v2  ;;  %v1297_v9 = vpack.c.bf16 %v848_v5, %v847_v3 }
 0x159   : > { %1310 = vst [vmem:[%s1729_s30 + $0x38] sm:$0xff] %v1262_v6   ;;  %1318 = vst [vmem:[%s1729_s30 + $0x78] sm:$0xff] %v1302_v7  }
 0x15a   : > { %1309 = vst [vmem:[%s1729_s30 + $0x30] sm:$0xff] %v1257_v8   ;;  %1317 = vst [vmem:[%s1729_s30 + $0x70] sm:$0xff] %v1297_v9  }
 0x15b PF: > { %s15_s14 = sadd.s32 1, %s1564_s14   ;;  %s1792_s12 = smov %s1560_s13 }
 0x15c   : > { %p12_p6 = scmp.ge.s32.totalorder %s15_s14, 4   ;;  %s1793_s13 = smov %s1795_s16 }
 0x15e   :  { %14 = sbr.rel (!%p12_p6) target bundleno = 3 (0x3), region = 81 }
 0x165   :  { %1039 = vsyncpa [#allocation4], 1 }
 0x166   :  { %1041 = vsyncpa [#allocation4 + $0x1], 1 }
 0x167   :  { %1042 = vsyncpa [#allocation6], 1 }

// kernel: _lambda_.15
= control target key start
LH: loop header
LB: loop body
LE: loop exit
PB: predicated region body
PF: predicated region fallthrough
CT: control target
= control target key end

     0   :  { %s1151_s6 = smov 0   ;;  %s1509_s0 = inlined_call_operand.vmem [shape: bf16[2,18,18,64], index: 0, kind: input, shape index: {}]   ;;  %s1510_s1 = inlined_call_operand.vmem [shape: bf16[2,16,16,64], index: 1, kind: output, shape index: {}]  }
   0x1 LB: > { %s1005_s7 = sadd.s32 4294967295, %s1139_s6   ;;  %p1009_p0 = scmp.ge.s32.totalorder %s1139_s6, 1  ;;  %s1139_s6 = sphi %s1151_s6, %s11_s6  }
   0x2   : > { %p87_p1 = scmp.lt.s32.totalorder %s1139_s6, 3 }
   0x4   : > { %p88_p2 = pnand %p1009_p0, %p87_p1 }
   0x5   : > { %p107_p3 = scmp.lt.s32.totalorder (!%p88_p2), %s1005_s7, 1  ;;  %vm273_vm0 = vcmask (!%p88_p2), 1046528   ;;  %vm418_vm1 = vcmask (!%p88_p2), 1045504   ;;  %vm917_vm2 = vcmask (!%p88_p2), 519168  }
   0x6   : > { %91 = sbr.rel (%p88_p2) target bundleno = 156 (0x9c), region = 24 }
   0xd   : > { %s1512_s7 = smov (!%p107_p3, %s1005_s7), 1 }
   0xe   : > { %s1124_s8 = smul.u32 216, %s1512_s7  ;;  %s1047_s12 = sshll.u32 %s1512_s7, 7 }
   0xf   : > { %s1244_s15 = scalar_lea.vmem %s1510_s1, %s1047_s12 }
  0x10   : > { %s1165_s11 = scalar_lea.vmem %s1509_s0, %s1124_s8 }
  0x11   : > { %v1081_v0 = vld [vmem:[%s1165_s11] sm:$0xff]   ;;  %v120_v1 = vld [vmem:[%s1165_s11 + $0xc] sm:$0xff]   ;;  %v1116_v2 = vld [vmem:[%s1165_s11 + $0x18] sm:$0xff]  }
  0x12   : > { %v1082_v3 = vunpack.c.l.bf16 %v1081_v0  ;;  %v1170_v4 = vunpack.c.h.bf16 %v1081_v0  ;;  %v1172_v5 = vunpack.c.l.bf16 %v1116_v2  ;;  %v1174_v6 = vunpack.c.h.bf16 %v1116_v2  ;;  %v126_v7 = vld [vmem:[%s1165_s11 + $0x24] sm:$0xff]   ;;  %v122_v25 = vld [vmem:[%s1165_s11 + $0x14] sm:$0x1]  ;;  %v125_v26 = vld [vmem:[%s1165_s11 + $0x20] sm:$0x1] }
  0x13   : > { %v119_v8 = vld [vmem:[%s1165_s11 + $0x8] sm:$0x1]  ;;  %v174_v9 = vunpack.c.l.bf16 %v120_v1  ;;  %v1178_v10 = vunpack.c.h.bf16 %v120_v1  ;;  %v1180_v11 = vunpack.c.l.bf16 %v126_v7  ;;  %v176_v36 = vunpack.c.l.bf16 %v122_v25  ;;  %v1117_v51 = vld [vmem:[%s1165_s11 + $0x30] sm:$0xff]  }
  0x14   : > { %v173_v12 = vunpack.c.l.bf16 %v119_v8  ;;  %v274_v13 = vrot.slane %v1082_v3, 1  ;;  %v275_v14 = vrot.slane %v1170_v4, 1  ;;  %v284_v15 = vrot.slane %v1172_v5, 1 }
  0x15   : > { %v285_v16 = vrot.slane %v1174_v6, 1  ;;  %v279_v17 = vrot.slane %v174_v9, 1  ;;  %v280_v18 = vrot.slane %v1178_v10, 1  ;;  %v419_v19 = vrot.slane %v1082_v3, 2 }
  0x16   : > { %v420_v20 = vrot.slane %v1170_v4, 2  ;;  %v276_v21 = vsel %vm273_vm0, %v274_v13, %v275_v14  ;;  %v424_v23 = vrot.slane %v174_v9, 2  ;;  %v425_v24 = vrot.slane %v1178_v10, 2 }
  0x17   : > { %v1189_v22 = vsel %vm273_vm0, %v284_v15, %v285_v16  ;;  %v281_v27 = vsel %vm273_vm0, %v279_v17, %v280_v18  ;;  %v386_v28 = vmax.f32 %v1082_v3, %v276_v21  ;;  %v429_v33 = vrot.slane %v1172_v5, 2 }
  0x18   : > { %v390_v29 = vmax.f32 %v1172_v5, %v1189_v22  ;;  %v421_v30 = vsel %vm418_vm1, %v419_v19, %v420_v20  ;;  %v388_v31 = vmax.f32 %v174_v9, %v281_v27  ;;  %v426_v32 = vsel %vm418_vm1, %v424_v23, %v425_v24 }
  0x19   : > { %v430_v34 = vrot.slane %v1174_v6, 2  ;;  %v531_v35 = vmax.f32 %v386_v28, %v421_v30  ;;  %v179_v37 = vunpack.c.l.bf16 %v125_v26  ;;  %v1201_v38 = vunpack.c.h.bf16 %v126_v7 }
  0x1a   : > { %v533_v40 = vmax.f32 %v388_v31, %v426_v32  ;;  %v277_v41 = vrot.slane %v173_v12, 1  ;;  %v422_v42 = vrot.slane %v173_v12, 2  ;;  %v282_v45 = vrot.slane %v176_v36, 1 }
  0x1b   : > { %v431_v39 = vsel %vm418_vm1, %v429_v33, %v430_v34  ;;  %v563_v44 = vmax.f32 %v531_v35, %v174_v9  ;;  %v287_v46 = vrot.slane %v179_v37, 1  ;;  %v427_v50 = vrot.slane %v176_v36, 2 }
  0x1c   : > { %v535_v43 = vmax.f32 %v390_v29, %v431_v39  ;;  %v565_v47 = vmax.f32 %v533_v40, %v1172_v5  ;;  %v278_v48 = vsel %vm273_vm0, %v275_v14, %v277_v41  ;;  %v423_v49 = vsel %vm418_vm1, %v420_v20, %v422_v42 }
  0x1d   : > { %v605_v53 = vmax.f32 %v563_v44, %v281_v27  ;;  %v283_v54 = vsel %vm273_vm0, %v280_v18, %v282_v45  ;;  %v1211_v55 = vsel %vm273_vm0, %v285_v16, %v287_v46  ;;  %v387_v57 = vmax.f32 %v1170_v4, %v278_v48  ;;  %v128_v18 = vld [vmem:[%s1165_s11 + $0x2c] sm:$0x1] }
  0x1e   : > { %v567_v52 = vmax.f32 %v535_v43, %v1180_v11  ;;  %v607_v56 = vmax.f32 %v565_v47, %v1189_v22  ;;  %v389_v58 = vmax.f32 %v1178_v10, %v283_v54  ;;  %v391_v59 = vmax.f32 %v1174_v6, %v1211_v55 }
  0x1f   : > { %v644_v60 = vmax.f32 %v605_v53, %v426_v32  ;;  %v428_v61 = vsel %vm418_vm1, %v425_v24, %v427_v50  ;;  %v432_v62 = vrot.slane %v179_v37, 2  ;;  %v1219_v63 = vunpack.c.l.bf16 %v1117_v51  ;;  %v132_v24 = vld [vmem:[%s1165_s11 + $0x3c] sm:$0xff]  }
  0x20   : > { %v646_v0 = vmax.f32 %v607_v56, %v431_v39  ;;  %v532_v1 = vmax.f32 %v387_v57, %v423_v49  ;;  %v534_v2 = vmax.f32 %v389_v58, %v428_v61  ;;  %v289_v3 = vrot.slane %v1180_v11, 1 }
  0x21   : > { %v676_v4 = vmax.f32 %v644_v60, %v1172_v5  ;;  %v433_v7 = vsel %vm418_vm1, %v430_v34, %v432_v62  ;;  %v290_v8 = vrot.slane %v1201_v38, 1  ;;  %v434_v9 = vrot.slane %v1180_v11, 2 }
  0x22   : > { %v536_v12 = vmax.f32 %v391_v59, %v433_v7  ;;  %v564_v13 = vmax.f32 %v532_v1, %v1178_v10  ;;  %v566_v14 = vmax.f32 %v534_v2, %v1174_v6  ;;  %v435_v15 = vrot.slane %v1201_v38, 2 }
  0x23   : > { %v718_v16 = vmax.f32 %v676_v4, %v1189_v22  ;;  %v291_v17 = vsel %vm273_vm0, %v289_v3, %v290_v8  ;;  %v678_v5 = vmax.f32 %v646_v0, %v1180_v11  ;;  %v1234_v19 = vunpack.c.h.bf16 %v1117_v51  ;;  %v131_v51 = vld [vmem:[%s1165_s11 + $0x38] sm:$0x1]  ;;  %v1118_v0 = vld [vmem:[%s1165_s11 + $0x48] sm:$0xff]  }
  0x24   : > { %v568_v20 = vmax.f32 %v536_v12, %v1201_v38  ;;  %v606_v21 = vmax.f32 %v564_v13, %v283_v54  ;;  %v608_v23 = vmax.f32 %v566_v14, %v1211_v55  ;;  %v392_v10 = vmax.f32 %v1180_v11, %v291_v17 }
  0x25   : > { %v757_v25 = vmax.f32 %v718_v16, %v431_v39  ;;  %v436_v26 = vsel %vm418_vm1, %v434_v9, %v435_v15  ;;  %v609_v27 = vmax.f32 %v567_v52, %v291_v17  ;;  %v720_v22 = vmax.f32 %v678_v5, %v291_v17 }
  0x26   : > { %v645_v28 = vmax.f32 %v606_v21, %v428_v61  ;;  %v647_v29 = vmax.f32 %v608_v23, %v433_v7  ;;  %v537_v30 = vmax.f32 %v392_v10, %v436_v26  ;;  %v182_v31 = vunpack.c.l.bf16 %v128_v18 }
  0x27   : > { %v1048_v32 = vpack.c.bf16 %v757_v25, %v757_v25  ;;  %v648_v33 = vmax.f32 %v609_v27, %v436_v26  ;;  %v759_v11 = vmax.f32 %v720_v22, %v436_v26  ;;  %v1246_v34 = vunpack.c.l.bf16 %v132_v24  ;;  %v138_v25 = vld [vmem:[%s1165_s11 + $0x54] sm:$0xff]  }
  0x28   : > { %v677_v35 = vmax.f32 %v645_v28, %v1174_v6  ;;  %v569_v36 = vmax.f32 %v537_v30, %v1219_v63  ;;  %v292_v37 = vrot.slane %v182_v31, 1  ;;  %v437_v39 = vrot.slane %v182_v31, 2 }
  0x29   : > { %918 = vst.msk [vmem:[%s1244_s15] sm:$0xf] %vm917_vm2, %v1048_v32  ;;  %v1050_v40 = vpack.c.bf16 %v759_v11, %v759_v11  ;;  %v679_v41 = vmax.f32 %v647_v29, %v1201_v38  ;;  %v294_v42 = vrot.slane %v1219_v63, 1  ;;  %v295_v43 = vrot.slane %v1234_v19, 1 }
  0x2a   : > { %v719_v44 = vmax.f32 %v677_v35, %v1211_v55  ;;  %v293_v45 = vsel %vm273_vm0, %v290_v8, %v292_v37  ;;  %v438_v6 = vsel %vm418_vm1, %v435_v15, %v437_v39  ;;  %v439_v46 = vrot.slane %v1219_v63, 2 }
  0x2b   : > { %920 = vst.msk [vmem:[%s1244_s15 + $0x8] sm:$0xf] %vm917_vm2, %v1050_v40  ;;  %v393_v47 = vmax.f32 %v1201_v38, %v293_v45  ;;  %v610_v48 = vmax.f32 %v568_v20, %v293_v45  ;;  %v721_v49 = vmax.f32 %v679_v41, %v293_v45  ;;  %v296_v50 = vsel %vm273_vm0, %v294_v42, %v295_v43 }
  0x2c   : > { %v758_v52 = vmax.f32 %v719_v44, %v433_v7  ;;  %v394_v53 = vmax.f32 %v1219_v63, %v296_v50  ;;  %v440_v54 = vrot.slane %v1234_v19, 2  ;;  %v611_v55 = vmax.f32 %v569_v36, %v296_v50 }
  0x2d   : > { %v538_v56 = vmax.f32 %v393_v47, %v438_v6  ;;  %v649_v57 = vmax.f32 %v610_v48, %v438_v6  ;;  %v760_v58 = vmax.f32 %v721_v49, %v438_v6  ;;  %v680_v59 = vmax.f32 %v648_v33, %v1219_v63 }
  0x2e   : > { %v1049_v38 = vpack.c.bf16 %v758_v52, %v758_v52  ;;  %v441_v60 = vsel %vm418_vm1, %v439_v46, %v440_v54  ;;  %v185_v61 = vunpack.c.l.bf16 %v131_v51  ;;  %v1268_v62 = vunpack.c.h.bf16 %v132_v24  ;;  %v134_v24 = vld [vmem:[%s1165_s11 + $0x44] sm:$0x1] }
  0x2f   : > { %v570_v1 = vmax.f32 %v538_v56, %v1234_v19  ;;  %v1051_v2 = vpack.c.bf16 %v760_v58, %v760_v58  ;;  %v539_v3 = vmax.f32 %v394_v53, %v441_v60  ;;  %v650_v4 = vmax.f32 %v611_v55, %v441_v60  ;;  %v137_v55 = vld [vmem:[%s1165_s11 + $0x50] sm:$0x1] }
  0x30   : > { %919 = vst.msk [vmem:[%s1244_s15 + $0x4] sm:$0xf] %vm917_vm2, %v1049_v38  ;;  %v722_v7 = vmax.f32 %v680_v59, %v296_v50  ;;  %v297_v8 = vrot.slane %v185_v61, 1  ;;  %v442_v9 = vrot.slane %v185_v61, 2  ;;  %v681_v63 = vmax.f32 %v649_v57, %v1234_v19 }
  0x31   : > { %921 = vst.msk [vmem:[%s1244_s15 + $0xc] sm:$0xf] %vm917_vm2, %v1051_v2  ;;  %v571_v12 = vmax.f32 %v539_v3, %v1246_v34  ;;  %v1094_v13 = vunpack.c.l.bf16 %v1118_v0  ;;  %v299_v14 = vrot.slane %v1246_v34, 1  ;;  %v300_v15 = vrot.slane %v1268_v62, 1 }
  0x32   : > { %v761_v16 = vmax.f32 %v722_v7, %v441_v60  ;;  %v298_v17 = vsel %vm273_vm0, %v295_v43, %v297_v8  ;;  %v443_v5 = vsel %vm418_vm1, %v440_v54, %v442_v9  ;;  %v444_v18 = vrot.slane %v1246_v34, 2 }
  0x33   : > { %v395_v20 = vmax.f32 %v1234_v19, %v298_v17  ;;  %v612_v21 = vmax.f32 %v570_v1, %v298_v17  ;;  %v723_v23 = vmax.f32 %v681_v63, %v298_v17  ;;  %v301_v10 = vsel %vm273_vm0, %v299_v14, %v300_v15  ;;  %v1119_v1 = vld [vmem:[%s1165_s11 + $0x60] sm:$0xff]  }
  0x34   : > { %v1052_v26 = vpack.c.bf16 %v761_v16, %v761_v16  ;;  %v396_v27 = vmax.f32 %v1246_v34, %v301_v10  ;;  %v445_v22 = vrot.slane %v1268_v62, 2  ;;  %v613_v28 = vmax.f32 %v571_v12, %v301_v10 }
  0x35   : > { %v540_v29 = vmax.f32 %v395_v20, %v443_v5  ;;  %v651_v30 = vmax.f32 %v612_v21, %v443_v5  ;;  %v762_v31 = vmax.f32 %v723_v23, %v443_v5  ;;  %v682_v32 = vmax.f32 %v650_v4, %v1246_v34  ;;  %v140_v20 = vld [vmem:[%s1165_s11 + $0x5c] sm:$0x1] }
  0x36   : > { %922 = vst.msk [vmem:[%s1244_s15 + $0x10] sm:$0xf] %vm917_vm2, %v1052_v26  ;;  %v446_v19 = vsel %vm418_vm1, %v444_v18, %v445_v22  ;;  %v1293_v33 = vunpack.c.h.bf16 %v1118_v0  ;;  %v188_v11 = vunpack.c.l.bf16 %v134_v24  ;;  %v1295_v35 = vunpack.c.l.bf16 %v138_v25 }
  0x37   : > { %v572_v36 = vmax.f32 %v540_v29, %v1268_v62  ;;  %v1053_v37 = vpack.c.bf16 %v762_v31, %v762_v31  ;;  %v541_v39 = vmax.f32 %v396_v27, %v446_v19  ;;  %v652_v40 = vmax.f32 %v613_v28, %v446_v19 }
  0x38   : > { %v724_v41 = vmax.f32 %v682_v32, %v301_v10  ;;  %v302_v42 = vrot.slane %v188_v11, 1  ;;  %v447_v43 = vrot.slane %v188_v11, 2  ;;  %v683_v34 = vmax.f32 %v651_v30, %v1268_v62 }
  0x39   : > { %923 = vst.msk [vmem:[%s1244_s15 + $0x14] sm:$0xf] %vm917_vm2, %v1053_v37  ;;  %v573_v44 = vmax.f32 %v541_v39, %v1094_v13  ;;  %v304_v45 = vrot.slane %v1094_v13, 1  ;;  %v305_v6 = vrot.slane %v1293_v33, 1  ;;  %v449_v46 = vrot.slane %v1094_v13, 2 }
  0x3a   : > { %v763_v47 = vmax.f32 %v724_v41, %v446_v19  ;;  %v303_v48 = vsel %vm273_vm0, %v300_v15, %v302_v42  ;;  %v448_v49 = vsel %vm418_vm1, %v445_v22, %v447_v43  ;;  %v450_v50 = vrot.slane %v1293_v33, 2 }
  0x3b   : > { %v397_v51 = vmax.f32 %v1268_v62, %v303_v48  ;;  %v614_v52 = vmax.f32 %v572_v36, %v303_v48  ;;  %v725_v53 = vmax.f32 %v683_v34, %v303_v48  ;;  %v306_v54 = vsel %vm273_vm0, %v304_v45, %v305_v6 }
  0x3c   : > { %v1054_v56 = vpack.c.bf16 %v763_v47, %v763_v47  ;;  %v398_v57 = vmax.f32 %v1094_v13, %v306_v54  ;;  %v451_v58 = vsel %vm418_vm1, %v449_v46, %v450_v50  ;;  %v615_v59 = vmax.f32 %v573_v44, %v306_v54  ;;  %v144_v44 = vld [vmem:[%s1165_s11 + $0x6c] sm:$0xff]  }
  0x3d   : > { %v542_v38 = vmax.f32 %v397_v51, %v448_v49  ;;  %v653_v60 = vmax.f32 %v614_v52, %v448_v49  ;;  %v764_v61 = vmax.f32 %v725_v53, %v448_v49  ;;  %v684_v0 = vmax.f32 %v652_v40, %v1094_v13  ;;  %v143_v51 = vld [vmem:[%s1165_s11 + $0x68] sm:$0x1] }
  0x3e   : > { %924 = vst.msk [vmem:[%s1244_s15 + $0x18] sm:$0xf] %vm917_vm2, %v1054_v56  ;;  %v543_v2 = vmax.f32 %v398_v57, %v451_v58  ;;  %v654_v62 = vmax.f32 %v615_v59, %v451_v58  ;;  %v191_v3 = vunpack.c.l.bf16 %v137_v55  ;;  %v193_v4 = vunpack.c.h.bf16 %v138_v25 }
  0x3f   : > { %v574_v7 = vmax.f32 %v542_v38, %v1293_v33  ;;  %v1055_v8 = vpack.c.bf16 %v764_v61, %v764_v61  ;;  %v726_v9 = vmax.f32 %v684_v0, %v306_v54  ;;  %v685_v63 = vmax.f32 %v653_v60, %v1293_v33 }
  0x40   : > { %v575_v12 = vmax.f32 %v543_v2, %v1295_v35  ;;  %v307_v14 = vrot.slane %v191_v3, 1  ;;  %v452_v15 = vrot.slane %v191_v3, 2  ;;  %v1315_v16 = vunpack.c.l.bf16 %v1119_v1 }
  0x41   : > { %925 = vst.msk [vmem:[%s1244_s15 + $0x1c] sm:$0xf] %vm917_vm2, %v1055_v8  ;;  %v765_v13 = vmax.f32 %v726_v9, %v451_v58  ;;  %v309_v17 = vrot.slane %v1295_v35, 1  ;;  %v310_v5 = vrot.slane %v193_v4, 1  ;;  %v454_v18 = vrot.slane %v1295_v35, 2 }
  0x42   : > { %v308_v21 = vsel %vm273_vm0, %v305_v6, %v307_v14  ;;  %v453_v23 = vsel %vm418_vm1, %v450_v50, %v452_v15  ;;  %v455_v10 = vrot.slane %v193_v4, 2  ;;  %v686_v24 = vmax.f32 %v654_v62, %v1295_v35 }
  0x43   : > { %v1056_v25 = vpack.c.bf16 %v765_v13, %v765_v13  ;;  %v399_v26 = vmax.f32 %v1293_v33, %v308_v21  ;;  %v616_v27 = vmax.f32 %v574_v7, %v308_v21  ;;  %v727_v22 = vmax.f32 %v685_v63, %v308_v21 }
  0x44   : > { %v311_v28 = vsel %vm273_vm0, %v309_v17, %v310_v5  ;;  %v456_v29 = vsel %vm418_vm1, %v454_v18, %v455_v10  ;;  %v1328_v30 = vunpack.c.h.bf16 %v1119_v1  ;;  %v194_v31 = vunpack.c.l.bf16 %v140_v20 }
  0x45   : > { %926 = vst.msk [vmem:[%s1244_s15 + $0x20] sm:$0xf] %vm917_vm2, %v1056_v25  ;;  %v544_v32 = vmax.f32 %v399_v26, %v453_v23  ;;  %v655_v19 = vmax.f32 %v616_v27, %v453_v23  ;;  %v766_v11 = vmax.f32 %v727_v22, %v453_v23  ;;  %v400_v36 = vmax.f32 %v1295_v35, %v311_v28 }
  0x46   : > { %v617_v37 = vmax.f32 %v575_v12, %v311_v28  ;;  %v728_v33 = vmax.f32 %v686_v24, %v311_v28  ;;  %v312_v39 = vrot.slane %v194_v31, 1  ;;  %v457_v40 = vrot.slane %v194_v31, 2  ;;  %v146_v24 = vld [vmem:[%s1165_s11 + $0x74] sm:$0x1] }
  0x47   : > { %v576_v41 = vmax.f32 %v544_v32, %v193_v4  ;;  %v1057_v42 = vpack.c.bf16 %v766_v11, %v766_v11  ;;  %v545_v43 = vmax.f32 %v400_v36, %v456_v29  ;;  %v687_v34 = vmax.f32 %v655_v19, %v193_v4 }
  0x48   : > { %v656_v45 = vmax.f32 %v617_v37, %v456_v29  ;;  %v767_v6 = vmax.f32 %v728_v33, %v456_v29  ;;  %v313_v46 = vsel %vm273_vm0, %v310_v5, %v312_v39  ;;  %v458_v47 = vsel %vm418_vm1, %v455_v10, %v457_v40  ;;  %v150_v37 = vld [vmem:[%s1165_s11 + $0x84] sm:$0xff]  }
  0x49   : > { %927 = vst.msk [vmem:[%s1244_s15 + $0x24] sm:$0xf] %vm917_vm2, %v1057_v42  ;;  %v577_v35 = vmax.f32 %v545_v43, %v1315_v16  ;;  %v401_v48 = vmax.f32 %v193_v4, %v313_v46  ;;  %v618_v49 = vmax.f32 %v576_v41, %v313_v46  ;;  %v729_v50 = vmax.f32 %v687_v34, %v313_v46  ;;  %v1120_v4 = vld [vmem:[%s1165_s11 + $0x78] sm:$0xff]  }
  0x4a   : > { %v1058_v52 = vpack.c.bf16 %v767_v6, %v767_v6  ;;  %v198_v53 = vunpack.c.l.bf16 %v144_v44  ;;  %v314_v54 = vrot.slane %v1315_v16, 1  ;;  %v315_v55 = vrot.slane %v1328_v30, 1 }
  0x4b   : > { %v546_v56 = vmax.f32 %v401_v48, %v458_v47  ;;  %v657_v57 = vmax.f32 %v618_v49, %v458_v47  ;;  %v768_v58 = vmax.f32 %v729_v50, %v458_v47  ;;  %v459_v59 = vrot.slane %v1315_v16, 2 }
  0x4c   : > { %928 = vst.msk [vmem:[%s1244_s15 + $0x28] sm:$0xf] %vm917_vm2, %v1058_v52  ;;  %v316_v38 = vsel %vm273_vm0, %v314_v54, %v315_v55  ;;  %v460_v60 = vrot.slane %v1328_v30, 2  ;;  %v688_v61 = vmax.f32 %v656_v45, %v1315_v16  ;;  %v197_v0 = vunpack.c.l.bf16 %v143_v51 }
  0x4d   : > { %v578_v1 = vmax.f32 %v546_v56, %v1328_v30  ;;  %v1059_v2 = vpack.c.bf16 %v768_v58, %v768_v58  ;;  %v402_v62 = vmax.f32 %v1315_v16, %v316_v38  ;;  %v619_v3 = vmax.f32 %v577_v35, %v316_v38 }
  0x4e   : > { %v461_v7 = vsel %vm418_vm1, %v459_v59, %v460_v60  ;;  %v730_v8 = vmax.f32 %v688_v61, %v316_v38  ;;  %v199_v9 = vunpack.c.h.bf16 %v144_v44  ;;  %v317_v63 = vrot.slane %v197_v0, 1 }
  0x4f   : > { %929 = vst.msk [vmem:[%s1244_s15 + $0x2c] sm:$0xf] %vm917_vm2, %v1059_v2  ;;  %v547_v12 = vmax.f32 %v402_v62, %v461_v7  ;;  %v658_v14 = vmax.f32 %v619_v3, %v461_v7  ;;  %v462_v15 = vrot.slane %v197_v0, 2  ;;  %v689_v13 = vmax.f32 %v657_v57, %v1328_v30 }
  0x50   : > { %v769_v17 = vmax.f32 %v730_v8, %v461_v7  ;;  %v318_v5 = vsel %vm273_vm0, %v315_v55, %v317_v63  ;;  %v1356_v16 = vunpack.c.l.bf16 %v1120_v4  ;;  %v319_v18 = vrot.slane %v198_v53, 1  ;;  %v149_v55 = vld [vmem:[%s1165_s11 + $0x80] sm:$0x1] }
  0x51   : > { %v579_v20 = vmax.f32 %v547_v12, %v198_v53  ;;  %v403_v21 = vmax.f32 %v1328_v30, %v318_v5  ;;  %v463_v23 = vsel %vm418_vm1, %v460_v60, %v462_v15  ;;  %v620_v10 = vmax.f32 %v578_v1, %v318_v5 }
  0x52   : > { %v1060_v25 = vpack.c.bf16 %v769_v17, %v769_v17  ;;  %v731_v26 = vmax.f32 %v689_v13, %v318_v5  ;;  %v320_v27 = vrot.slane %v199_v9, 1  ;;  %v464_v22 = vrot.slane %v198_v53, 2 }
  0x53   : > { %v548_v28 = vmax.f32 %v403_v21, %v463_v23  ;;  %v659_v29 = vmax.f32 %v620_v10, %v463_v23  ;;  %v465_v31 = vrot.slane %v199_v9, 2  ;;  %v690_v32 = vmax.f32 %v658_v14, %v198_v53 }
  0x54   : > { %930 = vst.msk [vmem:[%s1244_s15 + $0x30] sm:$0xf] %vm917_vm2, %v1060_v25  ;;  %v770_v19 = vmax.f32 %v731_v26, %v463_v23  ;;  %v321_v11 = vsel %vm273_vm0, %v319_v18, %v320_v27  ;;  %v1364_v30 = vunpack.c.h.bf16 %v1120_v4  ;;  %v200_v36 = vunpack.c.l.bf16 %v146_v24  ;;  %v1121_v4 = vld [vmem:[%s1165_s11 + $0x90] sm:$0xff]  }
  0x55   : > { %v580_v33 = vmax.f32 %v548_v28, %v199_v9  ;;  %v404_v39 = vmax.f32 %v198_v53, %v321_v11  ;;  %v466_v40 = vsel %vm418_vm1, %v464_v22, %v465_v31  ;;  %v621_v41 = vmax.f32 %v579_v20, %v321_v11 }
  0x56   : > { %v1061_v42 = vpack.c.bf16 %v770_v19, %v770_v19  ;;  %v732_v43 = vmax.f32 %v690_v32, %v321_v11  ;;  %v322_v34 = vrot.slane %v200_v36, 1  ;;  %v467_v44 = vrot.slane %v200_v36, 2  ;;  %v152_v32 = vld [vmem:[%s1165_s11 + $0x8c] sm:$0x1] }
  0x57   : > { %v549_v45 = vmax.f32 %v404_v39, %v466_v40  ;;  %v660_v6 = vmax.f32 %v621_v41, %v466_v40  ;;  %v691_v46 = vmax.f32 %v659_v29, %v199_v9  ;;  %v1368_v47 = vunpack.c.l.bf16 %v150_v37 }
  0x58   : > { %931 = vst.msk [vmem:[%s1244_s15 + $0x34] sm:$0xf] %vm917_vm2, %v1061_v42  ;;  %v771_v35 = vmax.f32 %v732_v43, %v466_v40  ;;  %v323_v48 = vsel %vm273_vm0, %v320_v27, %v322_v34  ;;  %v468_v49 = vsel %vm418_vm1, %v465_v31, %v467_v44  ;;  %v324_v50 = vrot.slane %v1356_v16, 1 }
  0x59   : > { %v581_v51 = vmax.f32 %v549_v45, %v1356_v16  ;;  %v405_v52 = vmax.f32 %v199_v9, %v323_v48  ;;  %v622_v53 = vmax.f32 %v580_v33, %v323_v48  ;;  %v733_v54 = vmax.f32 %v691_v46, %v323_v48  ;;  %v156_v33 = vld [vmem:[%s1165_s11 + $0x9c] sm:$0xff]   ;;  %v155_v48 = vld [vmem:[%s1165_s11 + $0x98] sm:$0x1] }
  0x5a   : > { %v1062_v56 = vpack.c.bf16 %v771_v35, %v771_v35  ;;  %v325_v57 = vrot.slane %v1364_v30, 1  ;;  %v469_v58 = vrot.slane %v1356_v16, 2  ;;  %v470_v59 = vrot.slane %v1364_v30, 2 }
  0x5b   : > { %v550_v38 = vmax.f32 %v405_v52, %v468_v49  ;;  %v661_v60 = vmax.f32 %v622_v53, %v468_v49  ;;  %v772_v61 = vmax.f32 %v733_v54, %v468_v49  ;;  %v692_v0 = vmax.f32 %v660_v6, %v1356_v16 }
  0x5c   : > { %932 = vst.msk [vmem:[%s1244_s15 + $0x38] sm:$0xf] %vm917_vm2, %v1062_v56  ;;  %v326_v1 = vsel %vm273_vm0, %v324_v50, %v325_v57  ;;  %v471_v2 = vsel %vm418_vm1, %v469_v58, %v470_v59  ;;  %v203_v62 = vunpack.c.l.bf16 %v149_v55  ;;  %v1385_v3 = vunpack.c.h.bf16 %v150_v37 }
  0x5d   : > { %v582_v7 = vmax.f32 %v550_v38, %v1364_v30  ;;  %v1063_v8 = vpack.c.bf16 %v772_v61, %v772_v61  ;;  %v406_v9 = vmax.f32 %v1356_v16, %v326_v1  ;;  %v623_v63 = vmax.f32 %v581_v51, %v326_v1 }
  0x5e   : > { %v734_v12 = vmax.f32 %v692_v0, %v326_v1  ;;  %v327_v14 = vrot.slane %v203_v62, 1  ;;  %v472_v15 = vrot.slane %v203_v62, 2  ;;  %v693_v13 = vmax.f32 %v661_v60, %v1364_v30 }
  0x5f   : > { %933 = vst.msk [vmem:[%s1244_s15 + $0x3c] sm:$0xf] %vm917_vm2, %v1063_v8  ;;  %v551_v17 = vmax.f32 %v406_v9, %v471_v2  ;;  %v662_v5 = vmax.f32 %v623_v63, %v471_v2  ;;  %v1393_v18 = vunpack.c.l.bf16 %v1121_v4  ;;  %v329_v20 = vrot.slane %v1368_v47, 1 }
  0x60   : > { %v773_v21 = vmax.f32 %v734_v12, %v471_v2  ;;  %v328_v23 = vsel %vm273_vm0, %v325_v57, %v327_v14  ;;  %v473_v16 = vsel %vm418_vm1, %v470_v59, %v472_v15  ;;  %v330_v10 = vrot.slane %v1385_v3, 1 }
  0x61   : > { %v583_v24 = vmax.f32 %v551_v17, %v1368_v47  ;;  %v407_v25 = vmax.f32 %v1364_v30, %v328_v23  ;;  %v624_v26 = vmax.f32 %v582_v7, %v328_v23  ;;  %v735_v27 = vmax.f32 %v693_v13, %v328_v23  ;;  %v1122_v13 = vld [vmem:[%s1165_s11 + $0xa8] sm:$0xff]  }
  0x62   : > { %v1064_v22 = vpack.c.bf16 %v773_v21, %v773_v21  ;;  %v331_v28 = vsel %vm273_vm0, %v329_v20, %v330_v10  ;;  %v474_v29 = vrot.slane %v1368_v47, 2  ;;  %v475_v31 = vrot.slane %v1385_v3, 2 }
  0x63   : > { %v552_v19 = vmax.f32 %v407_v25, %v473_v16  ;;  %v663_v11 = vmax.f32 %v624_v26, %v473_v16  ;;  %v774_v36 = vmax.f32 %v735_v27, %v473_v16  ;;  %v408_v37 = vmax.f32 %v1368_v47, %v331_v28 }
  0x64   : > { %934 = vst.msk [vmem:[%s1244_s15 + $0x40] sm:$0xf] %vm917_vm2, %v1064_v22  ;;  %v476_v30 = vsel %vm418_vm1, %v474_v29, %v475_v31  ;;  %v625_v39 = vmax.f32 %v583_v24, %v331_v28  ;;  %v694_v40 = vmax.f32 %v662_v5, %v1368_v47  ;;  %v1107_v41 = vunpack.c.h.bf16 %v1121_v4 }
  0x65   : > { %v584_v42 = vmax.f32 %v552_v19, %v1385_v3  ;;  %v1065_v43 = vpack.c.bf16 %v774_v36, %v774_v36  ;;  %v553_v34 = vmax.f32 %v408_v37, %v476_v30  ;;  %v206_v44 = vunpack.c.l.bf16 %v152_v32  ;;  %v158_v32 = vld [vmem:[%s1165_s11 + $0xa4] sm:$0x1] }
  0x66   : > { %v664_v45 = vmax.f32 %v625_v39, %v476_v30  ;;  %v736_v6 = vmax.f32 %v694_v40, %v331_v28  ;;  %v695_v46 = vmax.f32 %v663_v11, %v1385_v3  ;;  %v1413_v35 = vunpack.c.l.bf16 %v156_v33 }
  0x67   : > { %935 = vst.msk [vmem:[%s1244_s15 + $0x44] sm:$0xf] %vm917_vm2, %v1065_v43  ;;  %v585_v49 = vmax.f32 %v553_v34, %v1393_v18  ;;  %v332_v50 = vrot.slane %v206_v44, 1  ;;  %v477_v51 = vrot.slane %v206_v44, 2  ;;  %v334_v47 = vrot.slane %v1393_v18, 1 }
  0x68   : > { %v775_v52 = vmax.f32 %v736_v6, %v476_v30  ;;  %v335_v53 = vrot.slane %v1107_v41, 1  ;;  %v479_v54 = vrot.slane %v1393_v18, 2  ;;  %v480_v55 = vrot.slane %v1107_v41, 2 }
  0x69   : > { %v333_v56 = vsel %vm273_vm0, %v330_v10, %v332_v50  ;;  %v478_v57 = vsel %vm418_vm1, %v475_v31, %v477_v51  ;;  %v696_v58 = vmax.f32 %v664_v45, %v1393_v18  ;;  %v209_v59 = vunpack.c.l.bf16 %v155_v48 }
  0x6a   : > { %v1066_v38 = vpack.c.bf16 %v775_v52, %v775_v52  ;;  %v409_v60 = vmax.f32 %v1385_v3, %v333_v56  ;;  %v626_v61 = vmax.f32 %v584_v42, %v333_v56  ;;  %v737_v0 = vmax.f32 %v695_v46, %v333_v56 }
  0x6b   : > { %v336_v1 = vsel %vm273_vm0, %v334_v47, %v335_v53  ;;  %v481_v2 = vsel %vm418_vm1, %v479_v54, %v480_v55  ;;  %v1427_v62 = vunpack.c.h.bf16 %v156_v33  ;;  %v337_v4 = vrot.slane %v209_v59, 1  ;;  %v162_v33 = vld [vmem:[%s1165_s11 + $0xb4] sm:$0xff]  }
  0x6c   : > { %936 = vst.msk [vmem:[%s1244_s15 + $0x48] sm:$0xf] %vm917_vm2, %v1066_v38  ;;  %v554_v7 = vmax.f32 %v409_v60, %v478_v57  ;;  %v665_v8 = vmax.f32 %v626_v61, %v478_v57  ;;  %v776_v9 = vmax.f32 %v737_v0, %v478_v57  ;;  %v410_v63 = vmax.f32 %v1393_v18, %v336_v1 }
  0x6d   : > { %v627_v12 = vmax.f32 %v585_v49, %v336_v1  ;;  %v738_v3 = vmax.f32 %v696_v58, %v336_v1  ;;  %v338_v14 = vsel %vm273_vm0, %v335_v53, %v337_v4  ;;  %v482_v15 = vrot.slane %v209_v59, 2 }
  0x6e   : > { %v586_v17 = vmax.f32 %v554_v7, %v1107_v41  ;;  %v1067_v5 = vpack.c.bf16 %v776_v9, %v776_v9  ;;  %v555_v20 = vmax.f32 %v410_v63, %v481_v2  ;;  %v411_v21 = vmax.f32 %v1107_v41, %v338_v14 }
  0x6f   : > { %v666_v23 = vmax.f32 %v627_v12, %v481_v2  ;;  %v777_v16 = vmax.f32 %v738_v3, %v481_v2  ;;  %v483_v10 = vsel %vm418_vm1, %v480_v55, %v482_v15  ;;  %v697_v24 = vmax.f32 %v665_v8, %v1107_v41  ;;  %v161_v55 = vld [vmem:[%s1165_s11 + $0xb0] sm:$0x1] }
  0x70   : > { %937 = vst.msk [vmem:[%s1244_s15 + $0x4c] sm:$0xf] %vm917_vm2, %v1067_v5  ;;  %v587_v18 = vmax.f32 %v555_v20, %v1413_v35  ;;  %v556_v25 = vmax.f32 %v411_v21, %v483_v10  ;;  %v628_v26 = vmax.f32 %v586_v17, %v338_v14  ;;  %v1110_v27 = vunpack.c.l.bf16 %v1122_v13 }
  0x71   : > { %v1068_v22 = vpack.c.bf16 %v777_v16, %v777_v16  ;;  %v739_v28 = vmax.f32 %v697_v24, %v338_v14  ;;  %v339_v29 = vrot.slane %v1413_v35, 1  ;;  %v340_v31 = vrot.slane %v1427_v62, 1 }
  0x72   : > { %v588_v19 = vmax.f32 %v556_v25, %v1427_v62  ;;  %v667_v11 = vmax.f32 %v628_v26, %v483_v10  ;;  %v484_v36 = vrot.slane %v1413_v35, 2  ;;  %v485_v37 = vrot.slane %v1427_v62, 2 }
  0x73   : > { %938 = vst.msk [vmem:[%s1244_s15 + $0x50] sm:$0xf] %vm917_vm2, %v1068_v22  ;;  %v778_v30 = vmax.f32 %v739_v28, %v483_v10  ;;  %v341_v39 = vsel %vm273_vm0, %v339_v29, %v340_v31  ;;  %v698_v40 = vmax.f32 %v666_v23, %v1413_v35  ;;  %v1111_v41 = vunpack.c.h.bf16 %v1122_v13 }
  0x74   : > { %v412_v42 = vmax.f32 %v1413_v35, %v341_v39  ;;  %v486_v43 = vsel %vm418_vm1, %v484_v36, %v485_v37  ;;  %v629_v34 = vmax.f32 %v587_v18, %v341_v39  ;;  %v212_v44 = vunpack.c.l.bf16 %v158_v32 }
  0x75   : > { %v1069_v45 = vpack.c.bf16 %v778_v30, %v778_v30  ;;  %v740_v6 = vmax.f32 %v698_v40, %v341_v39  ;;  %v699_v46 = vmax.f32 %v667_v11, %v1427_v62  ;;  %v1452_v48 = vunpack.c.l.bf16 %v162_v33  ;;  %v1123_v40 = vld [vmem:[%s1165_s11 + $0xc0] sm:$0xff]  }
  0x76   : > { %v557_v49 = vmax.f32 %v412_v42, %v486_v43  ;;  %v668_v50 = vmax.f32 %v629_v34, %v486_v43  ;;  %v342_v51 = vrot.slane %v212_v44, 1  ;;  %v487_v47 = vrot.slane %v212_v44, 2 }
  0x77   : > { %939 = vst.msk [vmem:[%s1244_s15 + $0x54] sm:$0xf] %vm917_vm2, %v1069_v45  ;;  %v779_v52 = vmax.f32 %v740_v6, %v486_v43  ;;  %v344_v53 = vrot.slane %v1110_v27, 1  ;;  %v345_v35 = vrot.slane %v1111_v41, 1  ;;  %v489_v54 = vrot.slane %v1110_v27, 2 }
  0x78   : > { %v589_v56 = vmax.f32 %v557_v49, %v1110_v27  ;;  %v343_v57 = vsel %vm273_vm0, %v340_v31, %v342_v51  ;;  %v488_v58 = vsel %vm418_vm1, %v485_v37, %v487_v47  ;;  %v490_v59 = vrot.slane %v1111_v41, 2 }
  0x79   : > { %v1070_v38 = vpack.c.bf16 %v779_v52, %v779_v52  ;;  %v413_v60 = vmax.f32 %v1427_v62, %v343_v57  ;;  %v630_v61 = vmax.f32 %v588_v19, %v343_v57  ;;  %v741_v0 = vmax.f32 %v699_v46, %v343_v57 }
  0x7a   : > { %v346_v1 = vsel %vm273_vm0, %v344_v53, %v345_v35  ;;  %v491_v2 = vsel %vm418_vm1, %v489_v54, %v490_v59  ;;  %v700_v4 = vmax.f32 %v668_v50, %v1110_v27  ;;  %v215_v7 = vunpack.c.l.bf16 %v161_v55 }
  0x7b   : > { %940 = vst.msk [vmem:[%s1244_s15 + $0x58] sm:$0xf] %vm917_vm2, %v1070_v38  ;;  %v558_v8 = vmax.f32 %v413_v60, %v488_v58  ;;  %v669_v9 = vmax.f32 %v630_v61, %v488_v58  ;;  %v780_v63 = vmax.f32 %v741_v0, %v488_v58  ;;  %v414_v12 = vmax.f32 %v1110_v27, %v346_v1  ;;  %v164_v27 = vld [vmem:[%s1165_s11 + $0xbc] sm:$0x1]  ;;  %v167_v58 = vld [vmem:[%s1165_s11 + $0xc8] sm:$0x1] }
  0x7c   : > { %v631_v3 = vmax.f32 %v589_v56, %v346_v1  ;;  %v742_v14 = vmax.f32 %v700_v4, %v346_v1  ;;  %v217_v15 = vunpack.c.h.bf16 %v162_v33  ;;  %v347_v62 = vrot.slane %v215_v7, 1 }
  0x7d   : > { %v590_v13 = vmax.f32 %v558_v8, %v1111_v41  ;;  %v1071_v17 = vpack.c.bf16 %v780_v63, %v780_v63  ;;  %v559_v5 = vmax.f32 %v414_v12, %v491_v2  ;;  %v492_v20 = vrot.slane %v215_v7, 2 }
  0x7e   : > { %v670_v21 = vmax.f32 %v631_v3, %v491_v2  ;;  %v781_v23 = vmax.f32 %v742_v14, %v491_v2  ;;  %v348_v16 = vsel %vm273_vm0, %v345_v35, %v347_v62  ;;  %v701_v10 = vmax.f32 %v669_v9, %v1111_v41 }
  0x7f   : > { %941 = vst.msk [vmem:[%s1244_s15 + $0x5c] sm:$0xf] %vm917_vm2, %v1071_v17  ;;  %v591_v24 = vmax.f32 %v559_v5, %v1452_v48  ;;  %v415_v18 = vmax.f32 %v1111_v41, %v348_v16  ;;  %v493_v25 = vsel %vm418_vm1, %v490_v59, %v492_v20  ;;  %v632_v26 = vmax.f32 %v590_v13, %v348_v16  ;;  %v168_v59 = vld [vmem:[%s1165_s11 + $0xcc] sm:$0xff]   ;;  %v170_v13 = vld [vmem:[%s1165_s11 + $0xd4] sm:$0x1] }
  0x80   : > { %v1072_v22 = vpack.c.bf16 %v781_v23, %v781_v23  ;;  %v743_v28 = vmax.f32 %v701_v10, %v348_v16  ;;  %v349_v29 = vrot.slane %v1452_v48, 1  ;;  %v350_v31 = vrot.slane %v217_v15, 1 }
  0x81   : > { %v560_v32 = vmax.f32 %v415_v18, %v493_v25  ;;  %v671_v19 = vmax.f32 %v632_v26, %v493_v25  ;;  %v494_v11 = vrot.slane %v1452_v48, 2  ;;  %v495_v36 = vrot.slane %v217_v15, 2 }
  0x82   : > { %942 = vst.msk [vmem:[%s1244_s15 + $0x60] sm:$0xf] %vm917_vm2, %v1072_v22  ;;  %v782_v37 = vmax.f32 %v743_v28, %v493_v25  ;;  %v351_v33 = vsel %vm273_vm0, %v349_v29, %v350_v31  ;;  %v702_v30 = vmax.f32 %v670_v21, %v1452_v48  ;;  %v218_v39 = vunpack.c.l.bf16 %v164_v27 }
  0x83   : > { %v592_v41 = vmax.f32 %v560_v32, %v217_v15  ;;  %v416_v42 = vmax.f32 %v1452_v48, %v351_v33  ;;  %v496_v43 = vsel %vm418_vm1, %v494_v11, %v495_v36  ;;  %v633_v34 = vmax.f32 %v591_v24, %v351_v33 }
  0x84   : > { %v1073_v44 = vpack.c.bf16 %v782_v37, %v782_v37  ;;  %v744_v45 = vmax.f32 %v702_v30, %v351_v33  ;;  %v352_v6 = vrot.slane %v218_v39, 1  ;;  %v497_v46 = vrot.slane %v218_v39, 2 }
  0x85   : > { %v561_v49 = vmax.f32 %v416_v42, %v496_v43  ;;  %v672_v50 = vmax.f32 %v633_v34, %v496_v43  ;;  %v703_v51 = vmax.f32 %v671_v19, %v217_v15  ;;  %v1114_v47 = vunpack.c.l.bf16 %v1123_v40 }
  0x86   : > { %943 = vst.msk [vmem:[%s1244_s15 + $0x64] sm:$0xf] %vm917_vm2, %v1073_v44  ;;  %v783_v52 = vmax.f32 %v744_v45, %v496_v43  ;;  %v353_v53 = vsel %vm273_vm0, %v350_v31, %v352_v6  ;;  %v498_v48 = vsel %vm418_vm1, %v495_v36, %v497_v46  ;;  %v1115_v35 = vunpack.c.h.bf16 %v1123_v40 }
  0x87   : > { %v417_v54 = vmax.f32 %v217_v15, %v353_v53  ;;  %v634_v55 = vmax.f32 %v592_v41, %v353_v53  ;;  %v745_v56 = vmax.f32 %v703_v51, %v353_v53  ;;  %v593_v57 = vmax.f32 %v561_v49, %v1114_v47 }
  0x88   : > { %v1074_v38 = vpack.c.bf16 %v783_v52, %v783_v52  ;;  %v598_v60 = vrot.slane %v1114_v47, 1  ;;  %v599_v61 = vrot.slane %v1115_v35, 1  ;;  %v637_v0 = vrot.slane %v1114_v47, 2 }
  0x89   : > { %v562_v1 = vmax.f32 %v417_v54, %v498_v48  ;;  %v673_v2 = vmax.f32 %v634_v55, %v498_v48  ;;  %v784_v4 = vmax.f32 %v745_v56, %v498_v48  ;;  %v638_v7 = vrot.slane %v1115_v35, 2 }
  0x8a   : > { %944 = vst.msk [vmem:[%s1244_s15 + $0x68] sm:$0xf] %vm917_vm2, %v1074_v38  ;;  %v600_v8 = vsel %vm273_vm0, %v598_v60, %v599_v61  ;;  %v704_v9 = vmax.f32 %v672_v50, %v1114_v47  ;;  %v221_v63 = vunpack.c.l.bf16 %v167_v58  ;;  %v222_v12 = vunpack.c.l.bf16 %v168_v59 }
  0x8b   : > { %v1075_v3 = vpack.c.bf16 %v784_v4, %v784_v4  ;;  %v635_v14 = vmax.f32 %v593_v57, %v600_v8  ;;  %v639_v15 = vsel %vm418_vm1, %v637_v0, %v638_v7  ;;  %v594_v62 = vmax.f32 %v562_v1, %v1115_v35 }
  0x8c   : > { %v746_v17 = vmax.f32 %v704_v9, %v600_v8  ;;  %v601_v5 = vrot.slane %v221_v63, 1  ;;  %v640_v20 = vrot.slane %v221_v63, 2  ;;  %v705_v21 = vmax.f32 %v673_v2, %v1115_v35 }
  0x8d   : > { %945 = vst.msk [vmem:[%s1244_s15 + $0x6c] sm:$0xf] %vm917_vm2, %v1075_v3  ;;  %v674_v23 = vmax.f32 %v635_v14, %v639_v15  ;;  %v223_v16 = vunpack.c.h.bf16 %v168_v59  ;;  %v711_v10 = vrot.slane %v222_v12, 1  ;;  %v750_v24 = vrot.slane %v222_v12, 2 }
  0x8e   : > { %v785_v18 = vmax.f32 %v746_v17, %v639_v15  ;;  %v602_v25 = vsel %vm273_vm0, %v599_v61, %v601_v5  ;;  %v641_v26 = vsel %vm418_vm1, %v638_v7, %v640_v20  ;;  %v224_v27 = vunpack.c.l.bf16 %v170_v13 }
  0x8f   : > { %v636_v22 = vmax.f32 %v594_v62, %v602_v25  ;;  %v747_v28 = vmax.f32 %v705_v21, %v602_v25  ;;  %v706_v29 = vmax.f32 %v674_v23, %v222_v12  ;;  %v712_v31 = vrot.slane %v223_v16, 1 }
  0x90   : > { %v1076_v32 = vpack.c.bf16 %v785_v18, %v785_v18  ;;  %v751_v19 = vrot.slane %v223_v16, 2  ;;  %v714_v11 = vrot.slane %v224_v27, 1  ;;  %v753_v36 = vrot.slane %v224_v27, 2 }
  0x91   : > { %v675_v37 = vmax.f32 %v636_v22, %v641_v26  ;;  %v786_v33 = vmax.f32 %v747_v28, %v641_v26  ;;  %v713_v30 = vsel %vm273_vm0, %v711_v10, %v712_v31 }
  0x92   : > { %946 = vst.msk [vmem:[%s1244_s15 + $0x70] sm:$0xf] %vm917_vm2, %v1076_v32  ;;  %v748_v39 = vmax.f32 %v706_v29, %v713_v30  ;;  %v752_v40 = vsel %vm418_vm1, %v750_v24, %v751_v19  ;;  %v715_v41 = vsel %vm273_vm0, %v712_v31, %v714_v11  ;;  %v754_v44 = vsel %vm418_vm1, %v751_v19, %v753_v36 }
  0x93   : > { %v1077_v42 = vpack.c.bf16 %v786_v33, %v786_v33  ;;  %v707_v43 = vmax.f32 %v675_v37, %v223_v16 }
  0x94   : > { %v787_v34 = vmax.f32 %v748_v39, %v752_v40 }
  0x95   : > { %947 = vst.msk [vmem:[%s1244_s15 + $0x74] sm:$0xf] %vm917_vm2, %v1077_v42  ;;  %v749_v45 = vmax.f32 %v707_v43, %v715_v41 }
  0x96   : > { %v1078_v6 = vpack.c.bf16 %v787_v34, %v787_v34 }
  0x97   : > { %v788_v46 = vmax.f32 %v749_v45, %v754_v44 }
  0x98   : > { %948 = vst.msk [vmem:[%s1244_s15 + $0x78] sm:$0xf] %vm917_vm2, %v1078_v6 }
  0x99   : > { %v1079_v49 = vpack.c.bf16 %v788_v46, %v788_v46 }
  0x9b   : > { %949 = vst.msk [vmem:[%s1244_s15 + $0x7c] sm:$0xf] %vm917_vm2, %v1079_v49 }
  0x9c PF: > { %s11_s6 = sadd.s32 1, %s1139_s6  }
  0x9d   : > { %p8_p4 = scmp.ge.s32.totalorder %s11_s6, 4  }
  0x9f   :  { %10 = sbr.rel (!%p8_p4) target bundleno = 1 (0x1), region = 54 }

// kernel: _lambda_.16
= control target key start
LH: loop header
LB: loop body
LE: loop exit
PB: predicated region body
PF: predicated region fallthrough
CT: control target
= control target key end

     0   :  { %s1736_s12 = smov 0   ;;  %s1738_s13 = smov 0   ;;  %s1981_s0 = inlined_call_operand.vmem [shape: bf16[512,640], index: 0, kind: input, shape index: {}]   ;;  %s1982_s1 = inlined_call_operand.vmem [shape: bf16[640,128], index: 1, kind: input, shape index: {}]   ;;  %s1983_s2 = inlined_call_operand.vmem [shape: f32[1,128], index: 2, kind: input, shape index: {}]   ;;  %s1984_s3 = inlined_call_operand.vmem [shape: bf16[512,128], index: 3, kind: output, shape index: {}]  }
   0x1   :  { %s1740_s14 = smov 0   ;;  %s1742_s15 = smov 0  }
   0x2   :  { %s1744_s16 = smov 0   ;;  %s1746_s17 = smov 0  }
   0x3   :  { %s1748_s18 = smov 0  }
   0x4 LB: > { %s25_s19 = sadd.s32 1, %s1705_s16  ;;  %s32_s20 = sadd.s32 1, %s1709_s17  ;;  %s1713_s18 = sphi %s1748_s18, %s13_s18   ;;  %s1709_s17 = sphi %s1746_s17, %s1990_s17   ;;  %s1705_s16 = sphi %s1744_s16, %s1989_s16   ;;  %s1701_s15 = sphi %s1742_s15, %s1988_s15   ;;  %s1697_s14 = sphi %s1740_s14, %s1987_s14   ;;  %s1693_s13 = sphi %s1738_s13, %s1986_s13   ;;  %s1689_s12 = sphi %s1736_s12, %s1985_s12  }
   0x5   : > { %p26_p0 = scmp.ge.s32.totalorder %s25_s19, 5  ;;  %p48_p1 = scmp.ne.s32.totalorder %s1693_s13, %s1689_s12 }
   0x6   : > { %p49_p2 = scmp.eq.s32.totalorder %s1713_s18, 0  ;;  %s41_s24 = sadd.s32 1, %s1693_s13 }
   0x7   : > { %s1992_s19 = smov (%p26_p0, %s25_s19), 0  ;;  %s1994_s20 = smov (!%p26_p0, %s32_s20), %s1709_s17 }
   0x8   : > { %p50_p3 = por %p49_p2, %p48_p1  ;;  %p34_p4 = scmp.ge.s32.totalorder %s1994_s20, 2 }
   0x9   : > { %s37_s21 = ssub.s32 %s1705_s16, %s1992_s19  ;;  %p1290_p6 = scmp.ge.s32.totalorder %s1713_s18, 10 }
   0xa   : > { %s1996_s20 = smov (%p34_p4, %s1994_s20), 0 }
   0xb   : > { %s36_s22 = ssub.s32 %s1709_s17, %s1996_s20  ;;  %162 = sbr.rel (%p1290_p6) target bundleno = 46 (0x2e), region = 20 }
   0xc   : > { %s38_s23 = sor.u32 %s37_s21, %s36_s22 }
   0xd   : > { %p39_p5 = scmp.eq.s32.totalorder %s38_s23, 0 }
   0xf   : > { %s1787_s25 = scalar_select %p39_p5, %s1693_s13, %s41_s24  }
  0x12   : > { %165 = sbr.rel (!%p50_p3) target bundleno = 46 (0x2e), region = 24  ;;  %s167_s26 = sand.u32 (%p50_p3), 1, %s1693_s13  }
  0x13   : > { %s1577_s27 = smul.u32 (%p50_p3), 160, %s1709_s17  ;;  %s1291_s28 = sshll.u32 (%p50_p3), %s167_s26, 7 }
  0x14   : > { %s1801_s7 = scalar_lea.vmem (%p50_p3), [#allocation3], %s1291_s28 }
  0x15   : > { %s172_s29 = sadd.s32 (%p50_p3), %s1705_s16, %s1577_s27 }
  0x16   : > { %s1294_s30 = sshll.u32 (%p50_p3), %s172_s29, 2 }
  0x17   : > { %s1796_s6 = scalar_lea.vmem (%p50_p3), %s1981_s0, %s1294_s30 }
  0x18   : > { %v190_v0 = vld [vmem:[%s1796_s6] sm:$0xf] (%p50_p3)  ;;  %v192_v1 = vld [vmem:[%s1796_s6 + $0x14] sm:$0xf] (%p50_p3)  ;;  %v194_v2 = vld [vmem:[%s1796_s6 + $0x28] sm:$0xf] (%p50_p3) }
  0x19   : > { %191 = vst [vmem:[%s1801_s7] sm:$0xf] %v190_v0  ;;  %193 = vst [vmem:[%s1801_s7 + $0x4] sm:$0xf] %v192_v1  ;;  %v196_v3 = vld [vmem:[%s1796_s6 + $0x3c] sm:$0xf] }
  0x1a   : > { %195 = vst [vmem:[%s1801_s7 + $0x8] sm:$0xf] %v194_v2  ;;  %v198_v4 = vld [vmem:[%s1796_s6 + $0x50] sm:$0xf]  ;;  %v200_v5 = vld [vmem:[%s1796_s6 + $0x64] sm:$0xf] }
  0x1b   : > { %197 = vst [vmem:[%s1801_s7 + $0xc] sm:$0xf] %v196_v3  ;;  %199 = vst [vmem:[%s1801_s7 + $0x10] sm:$0xf] %v198_v4  ;;  %v202_v6 = vld [vmem:[%s1796_s6 + $0x78] sm:$0xf] }
  0x1c   : > { %201 = vst [vmem:[%s1801_s7 + $0x14] sm:$0xf] %v200_v5  ;;  %v204_v7 = vld [vmem:[%s1796_s6 + $0x8c] sm:$0xf]  ;;  %v206_v8 = vld [vmem:[%s1796_s6 + $0xa0] sm:$0xf] }
  0x1d   : > { %203 = vst [vmem:[%s1801_s7 + $0x18] sm:$0xf] %v202_v6  ;;  %205 = vst [vmem:[%s1801_s7 + $0x1c] sm:$0xf] %v204_v7  ;;  %v208_v9 = vld [vmem:[%s1796_s6 + $0xb4] sm:$0xf] }
  0x1e   : > { %207 = vst [vmem:[%s1801_s7 + $0x20] sm:$0xf] %v206_v8  ;;  %v210_v10 = vld [vmem:[%s1796_s6 + $0xc8] sm:$0xf]  ;;  %v212_v11 = vld [vmem:[%s1796_s6 + $0xdc] sm:$0xf] }
  0x1f   : > { %209 = vst [vmem:[%s1801_s7 + $0x24] sm:$0xf] %v208_v9  ;;  %211 = vst [vmem:[%s1801_s7 + $0x28] sm:$0xf] %v210_v10  ;;  %v214_v12 = vld [vmem:[%s1796_s6 + $0xf0] sm:$0xf] }
  0x20   : > { %213 = vst [vmem:[%s1801_s7 + $0x2c] sm:$0xf] %v212_v11  ;;  %v216_v13 = vld [vmem:[%s1796_s6 + $0x104] sm:$0xf]  ;;  %v218_v14 = vld [vmem:[%s1796_s6 + $0x118] sm:$0xf] }
  0x21   : > { %215 = vst [vmem:[%s1801_s7 + $0x30] sm:$0xf] %v214_v12  ;;  %217 = vst [vmem:[%s1801_s7 + $0x34] sm:$0xf] %v216_v13  ;;  %v220_v15 = vld [vmem:[%s1796_s6 + $0x12c] sm:$0xf] }
  0x22   : > { %219 = vst [vmem:[%s1801_s7 + $0x38] sm:$0xf] %v218_v14  ;;  %v222_v16 = vld [vmem:[%s1796_s6 + $0x140] sm:$0xf]  ;;  %v224_v17 = vld [vmem:[%s1796_s6 + $0x154] sm:$0xf] }
  0x23   : > { %221 = vst [vmem:[%s1801_s7 + $0x3c] sm:$0xf] %v220_v15  ;;  %223 = vst [vmem:[%s1801_s7 + $0x40] sm:$0xf] %v222_v16  ;;  %v226_v18 = vld [vmem:[%s1796_s6 + $0x168] sm:$0xf] }
  0x24   : > { %225 = vst [vmem:[%s1801_s7 + $0x44] sm:$0xf] %v224_v17  ;;  %v228_v19 = vld [vmem:[%s1796_s6 + $0x17c] sm:$0xf]  ;;  %v230_v20 = vld [vmem:[%s1796_s6 + $0x190] sm:$0xf] }
  0x25   : > { %227 = vst [vmem:[%s1801_s7 + $0x48] sm:$0xf] %v226_v18  ;;  %229 = vst [vmem:[%s1801_s7 + $0x4c] sm:$0xf] %v228_v19  ;;  %v232_v21 = vld [vmem:[%s1796_s6 + $0x1a4] sm:$0xf] }
  0x26   : > { %231 = vst [vmem:[%s1801_s7 + $0x50] sm:$0xf] %v230_v20  ;;  %v234_v22 = vld [vmem:[%s1796_s6 + $0x1b8] sm:$0xf]  ;;  %v236_v23 = vld [vmem:[%s1796_s6 + $0x1cc] sm:$0xf] }
  0x27   : > { %233 = vst [vmem:[%s1801_s7 + $0x54] sm:$0xf] %v232_v21  ;;  %235 = vst [vmem:[%s1801_s7 + $0x58] sm:$0xf] %v234_v22  ;;  %v238_v24 = vld [vmem:[%s1796_s6 + $0x1e0] sm:$0xf] }
  0x28   : > { %237 = vst [vmem:[%s1801_s7 + $0x5c] sm:$0xf] %v236_v23  ;;  %v240_v25 = vld [vmem:[%s1796_s6 + $0x1f4] sm:$0xf]  ;;  %v242_v26 = vld [vmem:[%s1796_s6 + $0x208] sm:$0xf] }
  0x29   : > { %239 = vst [vmem:[%s1801_s7 + $0x60] sm:$0xf] %v238_v24  ;;  %241 = vst [vmem:[%s1801_s7 + $0x64] sm:$0xf] %v240_v25  ;;  %v244_v27 = vld [vmem:[%s1796_s6 + $0x21c] sm:$0xf] }
  0x2a   : > { %243 = vst [vmem:[%s1801_s7 + $0x68] sm:$0xf] %v242_v26  ;;  %v246_v28 = vld [vmem:[%s1796_s6 + $0x230] sm:$0xf]  ;;  %v248_v29 = vld [vmem:[%s1796_s6 + $0x244] sm:$0xf] }
  0x2b   : > { %245 = vst [vmem:[%s1801_s7 + $0x6c] sm:$0xf] %v244_v27  ;;  %247 = vst [vmem:[%s1801_s7 + $0x70] sm:$0xf] %v246_v28  ;;  %v250_v30 = vld [vmem:[%s1796_s6 + $0x258] sm:$0xf] }
  0x2c   : > { %249 = vst [vmem:[%s1801_s7 + $0x74] sm:$0xf] %v248_v29  ;;  %v252_v31 = vld [vmem:[%s1796_s6 + $0x26c] sm:$0xf]  ;;  %251 = vst [vmem:[%s1801_s7 + $0x78] sm:$0xf] %v250_v30 }
  0x2d   : > { %253 = vst [vmem:[%s1801_s7 + $0x7c] sm:$0xf] %v252_v31 }
  0x2e PF: > { %p1295_p7 = scmp.ge.s32.totalorder %s1713_s18, 1  ;;  %p351_p8 = scmp.lt.s32.totalorder %s1713_s18, 11 }
  0x30   : > { %p352_p9 = pnand %p1295_p7, %p351_p8 }
  0x31   : > { %s358_s8 = sand.u32 (!%p352_p9), 1, %s1689_s12   ;;  %s1297_s9 = sshll.u32 (!%p352_p9), %s1697_s14, 4 }
  0x32   : > { %355 = sbr.rel (%p352_p9) target bundleno = 366 (0x16e), region = 69  ;;  %s1296_s10 = sshll.u32 (!%p352_p9), %s358_s8, 7 }
  0x33   : > { %p397_p10 = scmp.lt.s32.totalorder (!%p352_p9), %s1297_s9, 79  ;;  %s1299_s11 = sshll.u32 (!%p352_p9), %s1701_s15, 5 }
  0x34   : > { %p409_p11 = scmp.lt.s32.totalorder (!%p352_p9), %s1299_s11, 63  ;;  %s1879_s12 = scalar_lea.vmem (!%p352_p9), [#allocation3], %s1296_s10 }
  0x35   : > { %p1301_p12 = scmp.ne.s32.totalorder (!%p352_p9), %s1697_s14, 0 }
  0x39   : > { %s1998_s9 = smov (!%p397_p10, %s1297_s9), 79  ;;  %s2000_s11 = smov (!%p409_p11, %s1299_s11), 63 }
  0x3a   : > { %s1298_s21 = sshll.u32 %s1998_s9, 2  ;;  %s1300_s26 = sshll.u32 %s2000_s11, 2  ;;  %v1715_v32 = vmov (!%p1301_p12), 0.0  }
  0x3b   : > { %s1872_s24 = scalar_lea.vmem %s1982_s1, %s1298_s21  ;;  %s1877_s29 = scalar_lea.vmem %s1984_s3, %s1300_s26  ;;  %422 = vst [vmem:[#allocation2] sm:$0xff] (!%p1301_p12), %v1715_v32  ;;  %423 = vst [vmem:[#allocation2 + $0x8] sm:$0xff] (!%p1301_p12), %v1715_v32 }
  0x3c   : > { %421 = sbr.rel (%p1301_p12) target bundleno = 75 (0x4b), region = 77  ;;  %424 = vst [vmem:[#allocation2 + $0x10] sm:$0xff] (!%p1301_p12), %v1715_v32  ;;  %425 = vst [vmem:[#allocation2 + $0x18] sm:$0xff] (!%p1301_p12), %v1715_v32 }
  0x3d   : > { %426 = vst [vmem:[#allocation2 + $0x20] sm:$0xff] (!%p1301_p12), %v1715_v32  ;;  %427 = vst [vmem:[#allocation2 + $0x28] sm:$0xff] (!%p1301_p12), %v1715_v32 }
  0x3e   : > { %428 = vst [vmem:[#allocation2 + $0x30] sm:$0xff] (!%p1301_p12), %v1715_v32  ;;  %429 = vst [vmem:[#allocation2 + $0x38] sm:$0xff] (!%p1301_p12), %v1715_v32 }
  0x3f   : > { %430 = vst [vmem:[#allocation2 + $0x40] sm:$0xff] (!%p1301_p12), %v1715_v32  ;;  %431 = vst [vmem:[#allocation2 + $0x48] sm:$0xff] (!%p1301_p12), %v1715_v32 }
  0x40   : > { %432 = vst [vmem:[#allocation2 + $0x50] sm:$0xff] (!%p1301_p12), %v1715_v32  ;;  %433 = vst [vmem:[#allocation2 + $0x58] sm:$0xff] (!%p1301_p12), %v1715_v32 }
  0x41   : > { %434 = vst [vmem:[#allocation2 + $0x60] sm:$0xff] (!%p1301_p12), %v1715_v32  ;;  %435 = vst [vmem:[#allocation2 + $0x68] sm:$0xff] (!%p1301_p12), %v1715_v32 }
  0x42   : > { %436 = vst [vmem:[#allocation2 + $0x70] sm:$0xff] (!%p1301_p12), %v1715_v32  ;;  %437 = vst [vmem:[#allocation2 + $0x78] sm:$0xff] (!%p1301_p12), %v1715_v32 }
  0x43   : > { %438 = vst [vmem:[#allocation2 + $0x80] sm:$0xff] %v1715_v32  ;;  %439 = vst [vmem:[#allocation2 + $0x88] sm:$0xff] %v1715_v32 }
  0x44   : > { %440 = vst [vmem:[#allocation2 + $0x90] sm:$0xff] %v1715_v32  ;;  %441 = vst [vmem:[#allocation2 + $0x98] sm:$0xff] %v1715_v32 }
  0x45   : > { %442 = vst [vmem:[#allocation2 + $0xa0] sm:$0xff] %v1715_v32  ;;  %443 = vst [vmem:[#allocation2 + $0xa8] sm:$0xff] %v1715_v32 }
  0x46   : > { %444 = vst [vmem:[#allocation2 + $0xb0] sm:$0xff] %v1715_v32  ;;  %445 = vst [vmem:[#allocation2 + $0xb8] sm:$0xff] %v1715_v32 }
  0x47   : > { %446 = vst [vmem:[#allocation2 + $0xc0] sm:$0xff] %v1715_v32  ;;  %447 = vst [vmem:[#allocation2 + $0xc8] sm:$0xff] %v1715_v32 }
  0x48   : > { %448 = vst [vmem:[#allocation2 + $0xd0] sm:$0xff] %v1715_v32  ;;  %449 = vst [vmem:[#allocation2 + $0xd8] sm:$0xff] %v1715_v32 }
  0x49   : > { %450 = vst [vmem:[#allocation2 + $0xe0] sm:$0xff] %v1715_v32  ;;  %451 = vst [vmem:[#allocation2 + $0xe8] sm:$0xff] %v1715_v32 }
  0x4a   : > { %452 = vst [vmem:[#allocation2 + $0xf0] sm:$0xff] %v1715_v32  ;;  %453 = vst [vmem:[#allocation2 + $0xf8] sm:$0xff] %v1715_v32 }
  0x4b PF: > { %v1635_v33 = vld [vmem:[%s1872_s24] sm:$0xff]   ;;  %v1636_v34 = vld [vmem:[%s1872_s24 + $0x8] sm:$0xff]   ;;  %v1637_v35 = vld [vmem:[%s1872_s24 + $0x10] sm:$0xff]   ;;  %p1326_p13 = scmp.ne.s32.totalorder %s1697_s14, 4 }
  0x4c   : > { %1513 = vmatprep.subr.bf16.mxu0 %v1635_v33  ;;  %1561 = vmatprep.subr.bf16.mxu1 %v1635_v33  ;;  %v1638_v36 = vld [vmem:[%s1872_s24 + $0x18] sm:$0xff]   ;;  %v1643_v37 = vld [vmem:[%s1879_s12] sm:$0xff]   ;;  %v1640_v40 = vld [vmem:[%s1872_s24 + $0x28] sm:$0xff]  }
  0x4d   : > { %1514 = vmatpush3.bf16.msra.mxu0 %v1635_v33  ;;  %1569 = vmatpush3.bf16.msra.mxu1 %v1635_v33  ;;  %v1644_v38 = vld [vmem:[%s1879_s12 + $0x40] sm:$0xff]   ;;  %v1641_v41 = vld [vmem:[%s1872_s24 + $0x30] sm:$0xff]   ;;  %v1642_v42 = vld [vmem:[%s1872_s24 + $0x38] sm:$0xff]  }
  0x4e   : > { %1515 = vmatprep.subr.bf16.mxu0 %v1636_v34  ;;  %1562 = vmatprep.subr.bf16.mxu1 %v1636_v34  ;;  %v1639_v39 = vld [vmem:[%s1872_s24 + $0x20] sm:$0xff]   ;;  %v1645_v43 = vld [vmem:[%s1879_s12 + $0x8] sm:$0xff]   ;;  %v1647_v45 = vld [vmem:[%s1879_s12 + $0x10] sm:$0xff]  }
  0x4f   : > { %1529 = vmatprep.mubr.bf16.mxu0 %v1643_v37  ;;  %1545 = vmatprep.mubr.bf16.mxu1 %v1644_v38  ;;  %v1646_v44 = vld [vmem:[%s1879_s12 + $0x48] sm:$0xff]   ;;  %v1648_v46 = vld [vmem:[%s1879_s12 + $0x50] sm:$0xff]   ;;  %v1649_v47 = vld [vmem:[%s1879_s12 + $0x18] sm:$0xff]  }
  0x50   : > { %v1650_v48 = vld [vmem:[%s1879_s12 + $0x58] sm:$0xff]   ;;  %v1651_v49 = vld [vmem:[%s1879_s12 + $0x20] sm:$0xff]   ;;  %v1653_v51 = vld [vmem:[%s1879_s12 + $0x28] sm:$0xff]  }
  0x51   : > { %1516 = vmatpush3.bf16.msra.mxu0 %v1636_v34  ;;  %1570 = vmatpush3.bf16.msra.mxu1 %v1636_v34  ;;  %v1652_v50 = vld [vmem:[%s1879_s12 + $0x60] sm:$0xff]   ;;  %v1654_v52 = vld [vmem:[%s1879_s12 + $0x68] sm:$0xff]   ;;  %v1655_v53 = vld [vmem:[%s1879_s12 + $0x30] sm:$0xff]  }
  0x52   : > { %1517 = vmatprep.subr.bf16.mxu0 %v1637_v35  ;;  %1563 = vmatprep.subr.bf16.mxu1 %v1637_v35  ;;  %v1656_v54 = vld [vmem:[%s1879_s12 + $0x70] sm:$0xff]   ;;  %v1657_v55 = vld [vmem:[%s1879_s12 + $0x38] sm:$0xff]   ;;  %v454_v59 = vld [vmem:[#allocation2] sm:$0xff] }
  0x53   : > { %v1658_v56 = vld [vmem:[%s1879_s12 + $0x78] sm:$0xff]   ;;  %v456_v57 = vld [vmem:[#allocation2 + $0x10] sm:$0xff]  ;;  %v470_v60 = vld [vmem:[#allocation2 + $0x80] sm:$0xff] }
  0x54   : > { %v472_v58 = vld [vmem:[#allocation2 + $0x90] sm:$0xff]  ;;  %v457_v63 = vld [vmem:[#allocation2 + $0x18] sm:$0xff]  ;;  %v455_v5 = vld [vmem:[#allocation2 + $0x8] sm:$0xff] }
  0x55   : > { %1518 = vmatpush3.bf16.msra.mxu0 %v1637_v35  ;;  %1571 = vmatpush3.bf16.msra.mxu1 %v1637_v35  ;;  %v473_v0 = vld [vmem:[#allocation2 + $0x98] sm:$0xff]  ;;  %v471_v6 = vld [vmem:[#allocation2 + $0x88] sm:$0xff]  ;;  %v460_v17 = vld [vmem:[#allocation2 + $0x30] sm:$0xff] }
  0x56   : > { %1519 = vmatprep.subr.bf16.mxu0 %v1638_v36  ;;  %1564 = vmatprep.subr.bf16.mxu1 %v1638_v36  ;;  %v476_v18 = vld [vmem:[#allocation2 + $0xb0] sm:$0xff]  ;;  %v458_v19 = vld [vmem:[#allocation2 + $0x20] sm:$0xff]  ;;  %v461_v23 = vld [vmem:[#allocation2 + $0x38] sm:$0xff] }
  0x57   : > { %v474_v20 = vld [vmem:[#allocation2 + $0xa0] sm:$0xff]  ;;  %v477_v24 = vld [vmem:[#allocation2 + $0xb8] sm:$0xff]  ;;  %v459_v29 = vld [vmem:[#allocation2 + $0x28] sm:$0xff] }
  0x58   : > { %v475_v30 = vld [vmem:[#allocation2 + $0xa8] sm:$0xff] }
  0x59   : > { %1520 = vmatpush3.bf16.msra.mxu0 %v1638_v36  ;;  %1572 = vmatpush3.bf16.msra.mxu1 %v1638_v36 }
  0x5a   : > { %1521 = vmatprep.subr.bf16.mxu0 %v1639_v39  ;;  %1565 = vmatprep.subr.bf16.mxu1 %v1639_v39 }
  0x5d   : > { %1522 = vmatpush3.bf16.msra.mxu0 %v1639_v39  ;;  %1573 = vmatpush3.bf16.msra.mxu1 %v1639_v39 }
  0x5e   : > { %1523 = vmatprep.subr.bf16.mxu0 %v1640_v40  ;;  %1566 = vmatprep.subr.bf16.mxu1 %v1640_v40 }
  0x61   : > { %1524 = vmatpush3.bf16.msra.mxu0 %v1640_v40  ;;  %1574 = vmatpush3.bf16.msra.mxu1 %v1640_v40 }
  0x62   : > { %1525 = vmatprep.subr.bf16.mxu0 %v1641_v41  ;;  %1567 = vmatprep.subr.bf16.mxu1 %v1641_v41 }
  0x65   : > { %1526 = vmatpush3.bf16.msra.mxu0 %v1641_v41  ;;  %1575 = vmatpush3.bf16.msra.mxu1 %v1641_v41  ;;  %v464_v41 = vld [vmem:[#allocation2 + $0x50] sm:$0xff] }
  0x66   : > { %1527 = vmatprep.subr.bf16.mxu0 %v1642_v42  ;;  %1568 = vmatprep.subr.bf16.mxu1 %v1642_v42 }
  0x69   : > { %1528 = vmatpush3.bf16.msra.mxu0 %v1642_v42  ;;  %1576 = vmatpush3.bf16.msra.mxu1 %v1642_v42  ;;  %v480_v42 = vld [vmem:[#allocation2 + $0xd0] sm:$0xff] }
  0x6c   : > { %1530 = vmatmul.mubr.bf16.vlgmr.msra.gmra.mrb[0].mxu0 %v1645_v43  ;;  %1546 = vmatmul.mubr.bf16.vlgmr.msra.gmra.mrb[0].mxu1 %v1646_v44  ;;  %v462_v43 = vld [vmem:[#allocation2 + $0x40] sm:$0xff] }
  0x6d   : > { %1533 = vmatprep.mubr.bf16.mxu0 %v1647_v45  ;;  %1549 = vmatprep.mubr.bf16.mxu1 %v1648_v46  ;;  %v478_v44 = vld [vmem:[#allocation2 + $0xc0] sm:$0xff] }
  0x74   : > { %1534 = vmatmul.mubr.bf16.gmra.mrb[4].mxu0 %v1649_v47  ;;  %1550 = vmatmul.mubr.bf16.gmra.mrb[4].mxu1 %v1650_v48  ;;  %v465_v47 = vld [vmem:[#allocation2 + $0x58] sm:$0xff] }
  0x75   : > { %1537 = vmatprep.mubr.bf16.mxu0 %v1651_v49  ;;  %1553 = vmatprep.mubr.bf16.mxu1 %v1652_v50  ;;  %v481_v48 = vld [vmem:[#allocation2 + $0xd8] sm:$0xff] }
  0x7c   : > { %1538 = vmatmul.mubr.bf16.gmra.mrb[8].mxu0 %v1653_v51  ;;  %1554 = vmatmul.mubr.bf16.gmra.mrb[8].mxu1 %v1654_v52 }
  0x7d   : > { %1541 = vmatprep.mubr.bf16.mxu0 %v1655_v53  ;;  %1557 = vmatprep.mubr.bf16.mxu1 %v1656_v54  ;;  %v463_v53 = vld [vmem:[#allocation2 + $0x48] sm:$0xff] }
  0x7e   : > { %v479_v54 = vld [vmem:[#allocation2 + $0xc8] sm:$0xff] }
  0x84   : > { %1542 = vmatmul.mubr.bf16.gmra.mrb[12].mxu0 %v1657_v55  ;;  %1558 = vmatmul.mubr.bf16.gmra.mrb[12].mxu1 %v1658_v56 }
 0x13f   : > { %v1531_v61 = vpop.f32.mrb[0].mxu0  ;;  %v1547_v62 = vpop.f32.mrb[0].mxu1 }
 0x140   : > { %v841_v1 = vadd.f32 %v1531_v61, %v456_v57  ;;  %v857_v2 = vadd.f32 %v1547_v62, %v472_v58  ;;  %v712_v3 = vpop.f32.mrb[1].mxu0  ;;  %v776_v4 = vpop.f32.mrb[1].mxu1 }
 0x141   : > { %v839_v7 = vadd.f32 %v712_v3, %v454_v59  ;;  %v855_v8 = vadd.f32 %v776_v4, %v470_v60  ;;  %v1532_v9 = vpop.f32.mrb[2].mxu0  ;;  %v1548_v10 = vpop.f32.mrb[2].mxu1  ;;  %v466_v3 = vld [vmem:[#allocation2 + $0x60] sm:$0xff] }
 0x142   : > { %873 = vst [vmem:[#allocation2 + $0x10] sm:$0xff] %v841_v1  ;;  %889 = vst [vmem:[#allocation2 + $0x90] sm:$0xff] %v857_v2  ;;  %v842_v11 = vadd.f32 %v1532_v9, %v457_v63  ;;  %v858_v12 = vadd.f32 %v1548_v10, %v473_v0  ;;  %v715_v13 = vpop.f32.mrb[3].mxu0  ;;  %v779_v14 = vpop.f32.mrb[3].mxu1  ;;  %v468_v1 = vld [vmem:[#allocation2 + $0x70] sm:$0xff]  ;;  %v482_v4 = vld [vmem:[#allocation2 + $0xe0] sm:$0xff] }
 0x143   : > { %871 = vst [vmem:[#allocation2] sm:$0xff] %v839_v7  ;;  %887 = vst [vmem:[#allocation2 + $0x80] sm:$0xff] %v855_v8  ;;  %v840_v15 = vadd.f32 %v715_v13, %v455_v5  ;;  %v856_v16 = vadd.f32 %v779_v14, %v471_v6  ;;  %v484_v2 = vld [vmem:[#allocation2 + $0xf0] sm:$0xff]  ;;  %v469_v7 = vld [vmem:[#allocation2 + $0x78] sm:$0xff] }
 0x144   : > { %874 = vst [vmem:[#allocation2 + $0x18] sm:$0xff] %v842_v11  ;;  %890 = vst [vmem:[#allocation2 + $0x98] sm:$0xff] %v858_v12  ;;  %v485_v8 = vld [vmem:[#allocation2 + $0xf8] sm:$0xff]  ;;  %v467_v13 = vld [vmem:[#allocation2 + $0x68] sm:$0xff] }
 0x145   : > { %872 = vst [vmem:[#allocation2 + $0x8] sm:$0xff] %v840_v15  ;;  %888 = vst [vmem:[#allocation2 + $0x88] sm:$0xff] %v856_v16  ;;  %v483_v14 = vld [vmem:[#allocation2 + $0xe8] sm:$0xff] }
 0x147   : > { %v1535_v21 = vpop.f32.mrb[4].mxu0  ;;  %v1551_v22 = vpop.f32.mrb[4].mxu1 }
 0x148   : > { %v845_v25 = vadd.f32 %v1535_v21, %v460_v17  ;;  %v861_v26 = vadd.f32 %v1551_v22, %v476_v18  ;;  %v728_v27 = vpop.f32.mrb[5].mxu0  ;;  %v792_v28 = vpop.f32.mrb[5].mxu1 }
 0x149   : > { %v843_v31 = vadd.f32 %v728_v27, %v458_v19  ;;  %v859_v32 = vadd.f32 %v792_v28, %v474_v20  ;;  %v1536_v33 = vpop.f32.mrb[6].mxu0  ;;  %v1552_v34 = vpop.f32.mrb[6].mxu1  ;;  %v1910_v27 = vld [vmem:[%s1983_s2] ss:$0 sm:$0xff] (!%p1326_p13) }
 0x14a   : > { %877 = vst [vmem:[#allocation2 + $0x30] sm:$0xff] %v845_v25  ;;  %893 = vst [vmem:[#allocation2 + $0xb0] sm:$0xff] %v861_v26  ;;  %v846_v35 = vadd.f32 %v1536_v33, %v461_v23  ;;  %v862_v36 = vadd.f32 %v1552_v34, %v477_v24  ;;  %v731_v37 = vpop.f32.mrb[7].mxu0  ;;  %v795_v38 = vpop.f32.mrb[7].mxu1  ;;  %v907_v25 = vld [vmem:[#allocation2] sm:$0xff] (!%p1326_p13) }
 0x14b   : > { %875 = vst [vmem:[#allocation2 + $0x20] sm:$0xff] %v843_v31  ;;  %891 = vst [vmem:[#allocation2 + $0xa0] sm:$0xff] %v859_v32  ;;  %v844_v39 = vadd.f32 %v731_v37, %v459_v29  ;;  %v860_v40 = vadd.f32 %v795_v38, %v475_v30  ;;  %v946_v28 = vadd.f32 (!%p1326_p13), %v1910_v27, %v907_v25  ;;  %v909_v30 = vld [vmem:[#allocation2 + $0x10] sm:$0xff] (!%p1326_p13)  ;;  %v910_v31 = vld [vmem:[#allocation2 + $0x18] sm:$0xff] (!%p1326_p13) }
 0x14c   : > { %878 = vst [vmem:[#allocation2 + $0x38] sm:$0xff] %v846_v35  ;;  %894 = vst [vmem:[#allocation2 + $0xb8] sm:$0xff] %v862_v36  ;;  %v908_v26 = vld [vmem:[#allocation2 + $0x8] sm:$0xff] (!%p1326_p13)  ;;  %v948_v33 = vadd.f32 (!%p1326_p13), %v1910_v27, %v909_v30  ;;  %v949_v34 = vadd.f32 (!%p1326_p13), %v1910_v27, %v910_v31 }
 0x14d   : > { %876 = vst [vmem:[#allocation2 + $0x28] sm:$0xff] %v844_v39  ;;  %892 = vst [vmem:[#allocation2 + $0xa8] sm:$0xff] %v860_v40  ;;  %v947_v29 = vadd.f32 (!%p1326_p13), %v1910_v27, %v908_v26  ;;  %v978_v39 = vmax.f32 (!%p1326_p13), %v946_v28, 0.0 }
 0x14f   : > { %v1539_v45 = vpop.f32.mrb[8].mxu0  ;;  %v1555_v46 = vpop.f32.mrb[8].mxu1  ;;  %v979_v40 = vmax.f32 (!%p1326_p13), %v947_v29, 0.0 }
 0x150   : > { %v849_v49 = vadd.f32 %v1539_v45, %v464_v41  ;;  %v865_v50 = vadd.f32 %v1555_v46, %v480_v42  ;;  %v744_v51 = vpop.f32.mrb[9].mxu0  ;;  %v808_v52 = vpop.f32.mrb[9].mxu1  ;;  %v980_v46 = vmax.f32 (!%p1326_p13), %v948_v33, 0.0 }
 0x151   : > { %v847_v55 = vadd.f32 %v744_v51, %v462_v43  ;;  %v863_v56 = vadd.f32 %v808_v52, %v478_v44  ;;  %v1540_v57 = vpop.f32.mrb[10].mxu0  ;;  %v1556_v58 = vpop.f32.mrb[10].mxu1  ;;  %v913_v37 = vld [vmem:[#allocation2 + $0x30] sm:$0xff] (!%p1326_p13)  ;;  %v1397_v52 = vpack.c.bf16 (!%p1326_p13), %v979_v40, %v978_v39 }
 0x152   : > { %881 = vst [vmem:[#allocation2 + $0x50] sm:$0xff] %v849_v49  ;;  %897 = vst [vmem:[#allocation2 + $0xd0] sm:$0xff] %v865_v50  ;;  %v850_v59 = vadd.f32 %v1540_v57, %v465_v47  ;;  %v866_v60 = vadd.f32 %v1556_v58, %v481_v48  ;;  %v747_v61 = vpop.f32.mrb[11].mxu0  ;;  %v811_v62 = vpop.f32.mrb[11].mxu1  ;;  %v911_v32 = vld [vmem:[#allocation2 + $0x20] sm:$0xff] (!%p1326_p13)  ;;  %v952_v42 = vadd.f32 (!%p1326_p13), %v1910_v27, %v913_v37  ;;  %v981_v47 = vmax.f32 (!%p1326_p13), %v949_v34, 0.0 }
 0x153   : > { %879 = vst [vmem:[#allocation2 + $0x40] sm:$0xff] %v847_v55  ;;  %895 = vst [vmem:[#allocation2 + $0xc0] sm:$0xff] %v863_v56  ;;  %v848_v63 = vadd.f32 %v747_v61, %v463_v53  ;;  %v864_v0 = vadd.f32 %v811_v62, %v479_v54  ;;  %v950_v36 = vadd.f32 (!%p1326_p13), %v1910_v27, %v911_v32  ;;  %v914_v38 = vld [vmem:[#allocation2 + $0x38] sm:$0xff] (!%p1326_p13)  ;;  %v929_v25 = vld [vmem:[#allocation2 + $0xb0] sm:$0xff] (!%p1326_p13) }
 0x154   : > { %882 = vst [vmem:[#allocation2 + $0x58] sm:$0xff] %v850_v59  ;;  %898 = vst [vmem:[#allocation2 + $0xd8] sm:$0xff] %v866_v60  ;;  %v912_v35 = vld [vmem:[#allocation2 + $0x28] sm:$0xff] (!%p1326_p13)  ;;  %v953_v49 = vadd.f32 (!%p1326_p13), %v1910_v27, %v914_v38  ;;  %v984_v54 = vmax.f32 (!%p1326_p13), %v952_v42, 0.0  ;;  %v1402_v57 = vpack.c.bf16 (!%p1326_p13), %v981_v47, %v980_v46  ;;  %v930_v26 = vld [vmem:[#allocation2 + $0xb8] sm:$0xff] (!%p1326_p13) }
 0x155   : > { %880 = vst [vmem:[#allocation2 + $0x48] sm:$0xff] %v848_v63  ;;  %896 = vst [vmem:[#allocation2 + $0xc8] sm:$0xff] %v864_v0  ;;  %v951_v41 = vadd.f32 (!%p1326_p13), %v1910_v27, %v912_v35  ;;  %v982_v48 = vmax.f32 (!%p1326_p13), %v950_v36, 0.0  ;;  %v969_v42 = vadd.f32 (!%p1326_p13), %v1910_v27, %v930_v26 }
 0x156   : > { %v985_v58 = vmax.f32 (!%p1326_p13), %v953_v49, 0.0  ;;  %1398 = vst [vmem:[%s1877_s29] sm:$0xff] (!%p1326_p13), %v1397_v52   ;;  %1474 = vst [vmem:[%s1877_s29 + $0x8] sm:$0xff] (!%p1326_p13), %v1402_v57  }
 0x157   : > { %v1543_v5 = vpop.f32.mrb[12].mxu0  ;;  %v1559_v6 = vpop.f32.mrb[12].mxu1  ;;  %906 = sbr.rel (%p1326_p13) target bundleno = 366 (0x16e), region = 81  ;;  %v983_v53 = vmax.f32 (!%p1326_p13), %v951_v41, 0.0  ;;  %v968_v41 = vadd.f32 (!%p1326_p13), %v1910_v27, %v929_v25  ;;  %v1001_v52 = vmax.f32 (!%p1326_p13), %v969_v42, 0.0 }
 0x158   : > { %v853_v9 = vadd.f32 %v1543_v5, %v468_v1  ;;  %v869_v10 = vadd.f32 %v1559_v6, %v484_v2  ;;  %v760_v11 = vpop.f32.mrb[13].mxu0  ;;  %v824_v12 = vpop.f32.mrb[13].mxu1  ;;  %v1412_v5 = vpack.c.bf16 (!%p1326_p13), %v985_v58, %v984_v54 }
 0x159   : > { %v851_v15 = vadd.f32 %v760_v11, %v466_v3  ;;  %v867_v16 = vadd.f32 %v824_v12, %v482_v4  ;;  %v1544_v17 = vpop.f32.mrb[14].mxu0  ;;  %v1560_v18 = vpop.f32.mrb[14].mxu1  ;;  %v917_v45 = vld [vmem:[#allocation2 + $0x50] sm:$0xff] (!%p1326_p13)  ;;  %v1407_v63 = vpack.c.bf16 (!%p1326_p13), %v983_v53, %v982_v48  ;;  %v923_v3 = vld [vmem:[#allocation2 + $0x80] sm:$0xff] (!%p1326_p13)  ;;  %v924_v4 = vld [vmem:[#allocation2 + $0x88] sm:$0xff] (!%p1326_p13) }
 0x15a   : > { %885 = vst [vmem:[#allocation2 + $0x70] sm:$0xff] %v853_v9  ;;  %901 = vst [vmem:[#allocation2 + $0xf0] sm:$0xff] %v869_v10  ;;  %v854_v19 = vadd.f32 %v1544_v17, %v469_v7  ;;  %v870_v20 = vadd.f32 %v1560_v18, %v485_v8  ;;  %v763_v21 = vpop.f32.mrb[15].mxu0  ;;  %v827_v22 = vpop.f32.mrb[15].mxu1  ;;  %v915_v43 = vld [vmem:[#allocation2 + $0x40] sm:$0xff] (!%p1326_p13)  ;;  %v956_v60 = vadd.f32 (!%p1326_p13), %v1910_v27, %v917_v45  ;;  %v925_v9 = vld [vmem:[#allocation2 + $0x90] sm:$0xff] (!%p1326_p13) }
 0x15b   : > { %883 = vst [vmem:[#allocation2 + $0x60] sm:$0xff] %v851_v15  ;;  %899 = vst [vmem:[#allocation2 + $0xe0] sm:$0xff] %v867_v16  ;;  %v852_v23 = vadd.f32 %v763_v21, %v467_v13  ;;  %v868_v24 = vadd.f32 %v827_v22, %v483_v14  ;;  %v918_v50 = vld [vmem:[#allocation2 + $0x58] sm:$0xff] (!%p1326_p13)  ;;  %v954_v55 = vadd.f32 (!%p1326_p13), %v1910_v27, %v915_v43  ;;  %v931_v32 = vld [vmem:[#allocation2 + $0xc0] sm:$0xff] (!%p1326_p13) }
 0x15c   : > { %886 = vst [vmem:[#allocation2 + $0x78] sm:$0xff] %v854_v19  ;;  %902 = vst [vmem:[#allocation2 + $0xf8] sm:$0xff] %v870_v20  ;;  %v916_v44 = vld [vmem:[#allocation2 + $0x48] sm:$0xff] (!%p1326_p13)  ;;  %v957_v1 = vadd.f32 (!%p1326_p13), %v1910_v27, %v918_v50  ;;  %v988_v7 = vmax.f32 (!%p1326_p13), %v956_v60, 0.0  ;;  %v926_v14 = vld [vmem:[#allocation2 + $0x98] sm:$0xff] (!%p1326_p13)  ;;  %v962_v17 = vadd.f32 (!%p1326_p13), %v1910_v27, %v923_v3  ;;  %v963_v18 = vadd.f32 (!%p1326_p13), %v1910_v27, %v924_v4 }
 0x15d   : > { %884 = vst [vmem:[#allocation2 + $0x68] sm:$0xff] %v852_v23  ;;  %900 = vst [vmem:[#allocation2 + $0xe8] sm:$0xff] %v868_v24  ;;  %v955_v59 = vadd.f32 (!%p1326_p13), %v1910_v27, %v916_v44  ;;  %v986_v0 = vmax.f32 (!%p1326_p13), %v954_v55, 0.0  ;;  %v927_v19 = vld [vmem:[#allocation2 + $0xa0] sm:$0xff] (!%p1326_p13)  ;;  %v928_v20 = vld [vmem:[#allocation2 + $0xa8] sm:$0xff] (!%p1326_p13)  ;;  %v964_v24 = vadd.f32 (!%p1326_p13), %v1910_v27, %v925_v9  ;;  %v965_v31 = vadd.f32 (!%p1326_p13), %v1910_v27, %v926_v14 }
 0x15e   : > { %1475 = vst [vmem:[%s1877_s29 + $0x10] sm:$0xff] %v1407_v63   ;;  %v989_v10 = vmax.f32 %v957_v1, 0.0  ;;  %1476 = vst [vmem:[%s1877_s29 + $0x18] sm:$0xff] %v1412_v5   ;;  %v994_v29 = vmax.f32 %v962_v17, 0.0  ;;  %v995_v30 = vmax.f32 %v963_v18, 0.0  ;;  %v932_v33 = vld [vmem:[#allocation2 + $0xc8] sm:$0xff]  ;;  %v966_v36 = vadd.f32 %v1910_v27, %v927_v19 }
 0x15f   : > { %v987_v6 = vmax.f32 %v955_v59, 0.0  ;;  %v996_v35 = vmax.f32 %v964_v24, 0.0  ;;  %v967_v37 = vadd.f32 %v1910_v27, %v928_v20  ;;  %v933_v38 = vld [vmem:[#allocation2 + $0xd0] sm:$0xff]  ;;  %v997_v40 = vmax.f32 %v965_v31, 0.0  ;;  %v934_v43 = vld [vmem:[#allocation2 + $0xd8] sm:$0xff] }
 0x160   : > { %v1422_v21 = vpack.c.bf16 %v989_v10, %v988_v7  ;;  %v1437_v39 = vpack.c.bf16 %v995_v30, %v994_v29  ;;  %v998_v44 = vmax.f32 %v966_v36, 0.0  ;;  %v970_v46 = vadd.f32 %v1910_v27, %v931_v32 }
 0x161   : > { %v921_v61 = vld [vmem:[#allocation2 + $0x70] sm:$0xff]  ;;  %v1417_v15 = vpack.c.bf16 %v987_v6, %v986_v0  ;;  %v999_v45 = vmax.f32 %v967_v37, 0.0  ;;  %v971_v47 = vadd.f32 %v1910_v27, %v932_v33  ;;  %v1442_v50 = vpack.c.bf16 %v997_v40, %v996_v35 }
 0x162   : > { %v919_v51 = vld [vmem:[#allocation2 + $0x60] sm:$0xff]  ;;  %v960_v12 = vadd.f32 %v1910_v27, %v921_v61  ;;  %1478 = vst [vmem:[%s1877_s29 + $0x28] sm:$0xff] %v1422_v21   ;;  %1481 = vst [vmem:[%s1877_s29 + $0x40] sm:$0xff] %v1437_v39   ;;  %v972_v53 = vadd.f32 %v1910_v27, %v933_v38  ;;  %v937_v54 = vld [vmem:[#allocation2 + $0xf0] sm:$0xff]  ;;  %v1002_v57 = vmax.f32 %v970_v46, 0.0  ;;  %v973_v59 = vadd.f32 %v1910_v27, %v934_v43 }
 0x163   : > { %v922_v62 = vld [vmem:[#allocation2 + $0x78] sm:$0xff]  ;;  %v958_v2 = vadd.f32 %v1910_v27, %v919_v51  ;;  %1477 = vst [vmem:[%s1877_s29 + $0x20] sm:$0xff] %v1417_v15   ;;  %v935_v48 = vld [vmem:[#allocation2 + $0xe0] sm:$0xff]  ;;  %v1000_v51 = vmax.f32 %v968_v41, 0.0  ;;  %v1003_v58 = vmax.f32 %v971_v47, 0.0  ;;  %1482 = vst [vmem:[%s1877_s29 + $0x48] sm:$0xff] %v1442_v50  }
 0x164   : > { %v920_v56 = vld [vmem:[#allocation2 + $0x68] sm:$0xff]  ;;  %v961_v13 = vadd.f32 %v1910_v27, %v922_v62  ;;  %v992_v22 = vmax.f32 %v960_v12, 0.0  ;;  %v938_v55 = vld [vmem:[#allocation2 + $0xf8] sm:$0xff]  ;;  %v1004_v61 = vmax.f32 %v972_v53, 0.0  ;;  %v974_v62 = vadd.f32 %v1910_v27, %v935_v48 }
 0x165   : > { %v959_v8 = vadd.f32 %v1910_v27, %v920_v56  ;;  %v990_v11 = vmax.f32 %v958_v2, 0.0  ;;  %v936_v49 = vld [vmem:[#allocation2 + $0xe8] sm:$0xff]  ;;  %v1447_v56 = vpack.c.bf16 %v999_v45, %v998_v44  ;;  %v1452_v60 = vpack.c.bf16 %v1001_v52, %v1000_v51 }
 0x166   : > { %v993_v23 = vmax.f32 %v961_v13, 0.0  ;;  %v975_v63 = vadd.f32 %v1910_v27, %v936_v49  ;;  %v1457_v0 = vpack.c.bf16 %v1003_v58, %v1002_v57  ;;  %v1005_v1 = vmax.f32 %v973_v59, 0.0 }
 0x167   : > { %v991_v16 = vmax.f32 %v959_v8, 0.0  ;;  %1483 = vst [vmem:[%s1877_s29 + $0x50] sm:$0xff] %v1447_v56   ;;  %v976_v2 = vadd.f32 %v1910_v27, %v937_v54  ;;  %v977_v3 = vadd.f32 %v1910_v27, %v938_v55  ;;  %1484 = vst [vmem:[%s1877_s29 + $0x58] sm:$0xff] %v1452_v60   ;;  %v1006_v4 = vmax.f32 %v974_v62, 0.0 }
 0x168   : > { %v1432_v34 = vpack.c.bf16 %v993_v23, %v992_v22  ;;  %v1007_v5 = vmax.f32 %v975_v63, 0.0  ;;  %1485 = vst [vmem:[%s1877_s29 + $0x60] sm:$0xff] %v1457_v0   ;;  %v1462_v6 = vpack.c.bf16 %v1005_v1, %v1004_v61 }
 0x169   : > { %v1427_v28 = vpack.c.bf16 %v991_v16, %v990_v11  ;;  %v1008_v7 = vmax.f32 %v976_v2, 0.0  ;;  %v1009_v8 = vmax.f32 %v977_v3, 0.0 }
 0x16a   : > { %1480 = vst [vmem:[%s1877_s29 + $0x38] sm:$0xff] %v1432_v34   ;;  %v1467_v9 = vpack.c.bf16 %v1007_v5, %v1006_v4  ;;  %1486 = vst [vmem:[%s1877_s29 + $0x68] sm:$0xff] %v1462_v6  }
 0x16b   : > { %1479 = vst [vmem:[%s1877_s29 + $0x30] sm:$0xff] %v1427_v28   ;;  %v1472_v10 = vpack.c.bf16 %v1009_v8, %v1008_v7 }
 0x16c   : > { %1487 = vst [vmem:[%s1877_s29 + $0x70] sm:$0xff] %v1467_v9  }
 0x16d   : > { %1488 = vst [vmem:[%s1877_s29 + $0x78] sm:$0xff] %v1472_v10  }
 0x16e PF: > { %s13_s18 = sadd.s32 1, %s1713_s18   ;;  %s1985_s12 = smov %s1693_s13 }
 0x16f   : > { %p10_p0 = scmp.ge.s32.totalorder %s13_s18, 12   ;;  %s1986_s13 = smov %s1787_s25 }
 0x170   : > { %s1987_s14 = smov %s1705_s16  ;;  %s1988_s15 = smov %s1709_s17 }
 0x171   : > { %s1989_s16 = smov %s1992_s19  ;;  %s1990_s17 = smov %s1996_s20 }
 0x172   :  { %12 = sbr.rel (!%p10_p0) target bundleno = 4 (0x4), region = 122 }

// kernel: _lambda_.17
= control target key start
LH: loop header
LB: loop body
LE: loop exit
PB: predicated region body
PF: predicated region fallthrough
CT: control target
= control target key end

     0   :  { %s1993_s15 = smov 0   ;;  %s1995_s16 = smov 0   ;;  %s2259_s0 = inlined_call_operand.vmem [shape: bf16[512,640], index: 0, kind: input, shape index: {}]   ;;  %s2260_s1 = inlined_call_operand.vmem [shape: bf16[640,128], index: 1, kind: input, shape index: {}]   ;;  %s2261_s2 = inlined_call_operand.vmem [shape: f32[1,128], index: 2, kind: input, shape index: {}]   ;;  %s2262_s3 = inlined_call_operand.vmem [shape: bf16[512,128], index: 3, kind: input, shape index: {}]   ;;  %s2263_s4 = inlined_call_operand.vmem [shape: bf16[512,128], index: 4, kind: output, shape index: {}]  }
   0x1   :  { %s1997_s17 = smov 0   ;;  %s1999_s18 = smov 0  }
   0x2   :  { %s2001_s19 = smov 0   ;;  %s2003_s20 = smov 0  }
   0x3   :  { %s2005_s21 = smov 0  }
   0x4 LB: > { %s26_s22 = sadd.s32 1, %s1957_s19  ;;  %s33_s23 = sadd.s32 1, %s1961_s20  ;;  %s1965_s21 = sphi %s2005_s21, %s14_s21   ;;  %s1961_s20 = sphi %s2003_s20, %s2269_s20   ;;  %s1957_s19 = sphi %s2001_s19, %s2268_s19   ;;  %s1953_s18 = sphi %s1999_s18, %s2267_s18   ;;  %s1949_s17 = sphi %s1997_s17, %s2266_s17   ;;  %s1945_s16 = sphi %s1995_s16, %s2265_s16   ;;  %s1941_s15 = sphi %s1993_s15, %s2264_s15  }
   0x5   : > { %p27_p0 = scmp.ge.s32.totalorder %s26_s22, 5  ;;  %p49_p1 = scmp.ne.s32.totalorder %s1945_s16, %s1941_s15 }
   0x6   : > { %p50_p2 = scmp.eq.s32.totalorder %s1965_s21, 0  ;;  %s42_s27 = sadd.s32 1, %s1945_s16 }
   0x7   : > { %s2271_s22 = smov (%p27_p0, %s26_s22), 0  ;;  %s2273_s23 = smov (!%p27_p0, %s33_s23), %s1961_s20 }
   0x8   : > { %p51_p3 = por %p50_p2, %p49_p1  ;;  %p35_p4 = scmp.ge.s32.totalorder %s2273_s23, 2 }
   0x9   : > { %s38_s24 = ssub.s32 %s1957_s19, %s2271_s22  ;;  %p1461_p6 = scmp.ge.s32.totalorder %s1965_s21, 10 }
   0xa   : > { %s2275_s23 = smov (%p35_p4, %s2273_s23), 0 }
   0xb   : > { %s37_s25 = ssub.s32 %s1961_s20, %s2275_s23  ;;  %191 = sbr.rel (%p1461_p6) target bundleno = 46 (0x2e), region = 20 }
   0xc   : > { %s39_s26 = sor.u32 %s38_s24, %s37_s25 }
   0xd   : > { %p40_p5 = scmp.eq.s32.totalorder %s39_s26, 0 }
   0xf   : > { %s2044_s28 = scalar_select %p40_p5, %s1945_s16, %s42_s27  }
  0x12   : > { %194 = sbr.rel (!%p51_p3) target bundleno = 46 (0x2e), region = 24  ;;  %s196_s29 = sand.u32 (%p51_p3), 1, %s1945_s16  }
  0x13   : > { %s1829_s30 = smul.u32 (%p51_p3), 160, %s1961_s20  ;;  %s1462_s5 = sshll.u32 (%p51_p3), %s196_s29, 7 }
  0x14   : > { %s2058_s11 = scalar_lea.vmem (%p51_p3), [#allocation3], %s1462_s5 }
  0x15   : > { %s201_s6 = sadd.s32 (%p51_p3), %s1957_s19, %s1829_s30 }
  0x16   : > { %s1465_s7 = sshll.u32 (%p51_p3), %s201_s6, 2 }
  0x17   : > { %s2053_s10 = scalar_lea.vmem (%p51_p3), %s2259_s0, %s1465_s7 }
  0x18   : > { %v219_v0 = vld [vmem:[%s2053_s10] sm:$0xf] (%p51_p3)  ;;  %v221_v1 = vld [vmem:[%s2053_s10 + $0x14] sm:$0xf] (%p51_p3)  ;;  %v223_v2 = vld [vmem:[%s2053_s10 + $0x28] sm:$0xf] (%p51_p3) }
  0x19   : > { %220 = vst [vmem:[%s2058_s11] sm:$0xf] %v219_v0  ;;  %222 = vst [vmem:[%s2058_s11 + $0x4] sm:$0xf] %v221_v1  ;;  %v225_v3 = vld [vmem:[%s2053_s10 + $0x3c] sm:$0xf] }
  0x1a   : > { %224 = vst [vmem:[%s2058_s11 + $0x8] sm:$0xf] %v223_v2  ;;  %v227_v4 = vld [vmem:[%s2053_s10 + $0x50] sm:$0xf]  ;;  %v229_v5 = vld [vmem:[%s2053_s10 + $0x64] sm:$0xf] }
  0x1b   : > { %226 = vst [vmem:[%s2058_s11 + $0xc] sm:$0xf] %v225_v3  ;;  %228 = vst [vmem:[%s2058_s11 + $0x10] sm:$0xf] %v227_v4  ;;  %v231_v6 = vld [vmem:[%s2053_s10 + $0x78] sm:$0xf] }
  0x1c   : > { %230 = vst [vmem:[%s2058_s11 + $0x14] sm:$0xf] %v229_v5  ;;  %v233_v7 = vld [vmem:[%s2053_s10 + $0x8c] sm:$0xf]  ;;  %v235_v8 = vld [vmem:[%s2053_s10 + $0xa0] sm:$0xf] }
  0x1d   : > { %232 = vst [vmem:[%s2058_s11 + $0x18] sm:$0xf] %v231_v6  ;;  %234 = vst [vmem:[%s2058_s11 + $0x1c] sm:$0xf] %v233_v7  ;;  %v237_v9 = vld [vmem:[%s2053_s10 + $0xb4] sm:$0xf] }
  0x1e   : > { %236 = vst [vmem:[%s2058_s11 + $0x20] sm:$0xf] %v235_v8  ;;  %v239_v10 = vld [vmem:[%s2053_s10 + $0xc8] sm:$0xf]  ;;  %v241_v11 = vld [vmem:[%s2053_s10 + $0xdc] sm:$0xf] }
  0x1f   : > { %238 = vst [vmem:[%s2058_s11 + $0x24] sm:$0xf] %v237_v9  ;;  %240 = vst [vmem:[%s2058_s11 + $0x28] sm:$0xf] %v239_v10  ;;  %v243_v12 = vld [vmem:[%s2053_s10 + $0xf0] sm:$0xf] }
  0x20   : > { %242 = vst [vmem:[%s2058_s11 + $0x2c] sm:$0xf] %v241_v11  ;;  %v245_v13 = vld [vmem:[%s2053_s10 + $0x104] sm:$0xf]  ;;  %v247_v14 = vld [vmem:[%s2053_s10 + $0x118] sm:$0xf] }
  0x21   : > { %244 = vst [vmem:[%s2058_s11 + $0x30] sm:$0xf] %v243_v12  ;;  %246 = vst [vmem:[%s2058_s11 + $0x34] sm:$0xf] %v245_v13  ;;  %v249_v15 = vld [vmem:[%s2053_s10 + $0x12c] sm:$0xf] }
  0x22   : > { %248 = vst [vmem:[%s2058_s11 + $0x38] sm:$0xf] %v247_v14  ;;  %v251_v16 = vld [vmem:[%s2053_s10 + $0x140] sm:$0xf]  ;;  %v253_v17 = vld [vmem:[%s2053_s10 + $0x154] sm:$0xf] }
  0x23   : > { %250 = vst [vmem:[%s2058_s11 + $0x3c] sm:$0xf] %v249_v15  ;;  %252 = vst [vmem:[%s2058_s11 + $0x40] sm:$0xf] %v251_v16  ;;  %v255_v18 = vld [vmem:[%s2053_s10 + $0x168] sm:$0xf] }
  0x24   : > { %254 = vst [vmem:[%s2058_s11 + $0x44] sm:$0xf] %v253_v17  ;;  %v257_v19 = vld [vmem:[%s2053_s10 + $0x17c] sm:$0xf]  ;;  %v259_v20 = vld [vmem:[%s2053_s10 + $0x190] sm:$0xf] }
  0x25   : > { %256 = vst [vmem:[%s2058_s11 + $0x48] sm:$0xf] %v255_v18  ;;  %258 = vst [vmem:[%s2058_s11 + $0x4c] sm:$0xf] %v257_v19  ;;  %v261_v21 = vld [vmem:[%s2053_s10 + $0x1a4] sm:$0xf] }
  0x26   : > { %260 = vst [vmem:[%s2058_s11 + $0x50] sm:$0xf] %v259_v20  ;;  %v263_v22 = vld [vmem:[%s2053_s10 + $0x1b8] sm:$0xf]  ;;  %v265_v23 = vld [vmem:[%s2053_s10 + $0x1cc] sm:$0xf] }
  0x27   : > { %262 = vst [vmem:[%s2058_s11 + $0x54] sm:$0xf] %v261_v21  ;;  %264 = vst [vmem:[%s2058_s11 + $0x58] sm:$0xf] %v263_v22  ;;  %v267_v24 = vld [vmem:[%s2053_s10 + $0x1e0] sm:$0xf] }
  0x28   : > { %266 = vst [vmem:[%s2058_s11 + $0x5c] sm:$0xf] %v265_v23  ;;  %v269_v25 = vld [vmem:[%s2053_s10 + $0x1f4] sm:$0xf]  ;;  %v271_v26 = vld [vmem:[%s2053_s10 + $0x208] sm:$0xf] }
  0x29   : > { %268 = vst [vmem:[%s2058_s11 + $0x60] sm:$0xf] %v267_v24  ;;  %270 = vst [vmem:[%s2058_s11 + $0x64] sm:$0xf] %v269_v25  ;;  %v273_v27 = vld [vmem:[%s2053_s10 + $0x21c] sm:$0xf] }
  0x2a   : > { %272 = vst [vmem:[%s2058_s11 + $0x68] sm:$0xf] %v271_v26  ;;  %v275_v28 = vld [vmem:[%s2053_s10 + $0x230] sm:$0xf]  ;;  %v277_v29 = vld [vmem:[%s2053_s10 + $0x244] sm:$0xf] }
  0x2b   : > { %274 = vst [vmem:[%s2058_s11 + $0x6c] sm:$0xf] %v273_v27  ;;  %276 = vst [vmem:[%s2058_s11 + $0x70] sm:$0xf] %v275_v28  ;;  %v279_v30 = vld [vmem:[%s2053_s10 + $0x258] sm:$0xf] }
  0x2c   : > { %278 = vst [vmem:[%s2058_s11 + $0x74] sm:$0xf] %v277_v29  ;;  %v281_v31 = vld [vmem:[%s2053_s10 + $0x26c] sm:$0xf]  ;;  %280 = vst [vmem:[%s2058_s11 + $0x78] sm:$0xf] %v279_v30 }
  0x2d   : > { %282 = vst [vmem:[%s2058_s11 + $0x7c] sm:$0xf] %v281_v31 }
  0x2e PF: > { %p1466_p7 = scmp.ge.s32.totalorder %s1965_s21, 1  ;;  %p392_p8 = scmp.lt.s32.totalorder %s1965_s21, 11 }
  0x30   : > { %p393_p9 = pnand %p1466_p7, %p392_p8 }
  0x31   : > { %s399_s12 = sand.u32 (!%p393_p9), 1, %s1941_s15   ;;  %s1468_s13 = sshll.u32 (!%p393_p9), %s1949_s17, 4 }
  0x32   : > { %396 = sbr.rel (%p393_p9) target bundleno = 382 (0x17e), region = 73  ;;  %s1467_s14 = sshll.u32 (!%p393_p9), %s399_s12, 7 }
  0x33   : > { %p448_p10 = scmp.lt.s32.totalorder (!%p393_p9), %s1468_s13, 79  ;;  %s1470_s24 = sshll.u32 (!%p393_p9), %s1953_s18, 5 }
  0x34   : > { %p460_p11 = scmp.lt.s32.totalorder (!%p393_p9), %s1470_s24, 63  ;;  %s2141_s18 = scalar_lea.vmem (!%p393_p9), [#allocation3], %s1467_s14 }
  0x35   : > { %p1474_p12 = scmp.ne.s32.totalorder (!%p393_p9), %s1949_s17, 0 }
  0x39   : > { %s2277_s13 = smov (!%p448_p10, %s1468_s13), 79  ;;  %s2279_s24 = smov (!%p460_p11, %s1470_s24), 63 }
  0x3a   : > { %s1469_s25 = sshll.u32 %s2277_s13, 2  ;;  %s1471_s30 = sshll.u32 %s2279_s24, 2  ;;  %v1967_v32 = vmov (!%p1474_p12), 0.0  }
  0x3b   : > { %s2129_s29 = scalar_lea.vmem %s2260_s1, %s1469_s25  ;;  %s2134_s7 = scalar_lea.vmem %s2262_s3, %s1471_s30  ;;  %482 = vst [vmem:[#allocation2] sm:$0xff] (!%p1474_p12), %v1967_v32  ;;  %483 = vst [vmem:[#allocation2 + $0x8] sm:$0xff] (!%p1474_p12), %v1967_v32 }
  0x3c   : > { %s2139_s9 = scalar_lea.vmem %s2263_s4, %s1471_s30  ;;  %481 = sbr.rel (%p1474_p12) target bundleno = 75 (0x4b), region = 81  ;;  %484 = vst [vmem:[#allocation2 + $0x10] sm:$0xff] (!%p1474_p12), %v1967_v32  ;;  %485 = vst [vmem:[#allocation2 + $0x18] sm:$0xff] (!%p1474_p12), %v1967_v32 }
  0x3d   : > { %486 = vst [vmem:[#allocation2 + $0x20] sm:$0xff] (!%p1474_p12), %v1967_v32  ;;  %487 = vst [vmem:[#allocation2 + $0x28] sm:$0xff] (!%p1474_p12), %v1967_v32 }
  0x3e   : > { %488 = vst [vmem:[#allocation2 + $0x30] sm:$0xff] (!%p1474_p12), %v1967_v32  ;;  %489 = vst [vmem:[#allocation2 + $0x38] sm:$0xff] (!%p1474_p12), %v1967_v32 }
  0x3f   : > { %490 = vst [vmem:[#allocation2 + $0x40] sm:$0xff] (!%p1474_p12), %v1967_v32  ;;  %491 = vst [vmem:[#allocation2 + $0x48] sm:$0xff] (!%p1474_p12), %v1967_v32 }
  0x40   : > { %492 = vst [vmem:[#allocation2 + $0x50] sm:$0xff] (!%p1474_p12), %v1967_v32  ;;  %493 = vst [vmem:[#allocation2 + $0x58] sm:$0xff] (!%p1474_p12), %v1967_v32 }
  0x41   : > { %494 = vst [vmem:[#allocation2 + $0x60] sm:$0xff] (!%p1474_p12), %v1967_v32  ;;  %495 = vst [vmem:[#allocation2 + $0x68] sm:$0xff] (!%p1474_p12), %v1967_v32 }
  0x42   : > { %496 = vst [vmem:[#allocation2 + $0x70] sm:$0xff] (!%p1474_p12), %v1967_v32  ;;  %497 = vst [vmem:[#allocation2 + $0x78] sm:$0xff] (!%p1474_p12), %v1967_v32 }
  0x43   : > { %498 = vst [vmem:[#allocation2 + $0x80] sm:$0xff] %v1967_v32  ;;  %499 = vst [vmem:[#allocation2 + $0x88] sm:$0xff] %v1967_v32 }
  0x44   : > { %500 = vst [vmem:[#allocation2 + $0x90] sm:$0xff] %v1967_v32  ;;  %501 = vst [vmem:[#allocation2 + $0x98] sm:$0xff] %v1967_v32 }
  0x45   : > { %502 = vst [vmem:[#allocation2 + $0xa0] sm:$0xff] %v1967_v32  ;;  %503 = vst [vmem:[#allocation2 + $0xa8] sm:$0xff] %v1967_v32 }
  0x46   : > { %504 = vst [vmem:[#allocation2 + $0xb0] sm:$0xff] %v1967_v32  ;;  %505 = vst [vmem:[#allocation2 + $0xb8] sm:$0xff] %v1967_v32 }
  0x47   : > { %506 = vst [vmem:[#allocation2 + $0xc0] sm:$0xff] %v1967_v32  ;;  %507 = vst [vmem:[#allocation2 + $0xc8] sm:$0xff] %v1967_v32 }
  0x48   : > { %508 = vst [vmem:[#allocation2 + $0xd0] sm:$0xff] %v1967_v32  ;;  %509 = vst [vmem:[#allocation2 + $0xd8] sm:$0xff] %v1967_v32 }
  0x49   : > { %510 = vst [vmem:[#allocation2 + $0xe0] sm:$0xff] %v1967_v32  ;;  %511 = vst [vmem:[#allocation2 + $0xe8] sm:$0xff] %v1967_v32 }
  0x4a   : > { %512 = vst [vmem:[#allocation2 + $0xf0] sm:$0xff] %v1967_v32  ;;  %513 = vst [vmem:[#allocation2 + $0xf8] sm:$0xff] %v1967_v32 }
  0x4b PF: > { %v1887_v33 = vld [vmem:[%s2129_s29] sm:$0xff]   ;;  %v1888_v34 = vld [vmem:[%s2129_s29 + $0x8] sm:$0xff]   ;;  %v1889_v35 = vld [vmem:[%s2129_s29 + $0x10] sm:$0xff]   ;;  %p1499_p13 = scmp.ne.s32.totalorder %s1949_s17, 4 }
  0x4c   : > { %1765 = vmatprep.subr.bf16.mxu0 %v1887_v33  ;;  %1813 = vmatprep.subr.bf16.mxu1 %v1887_v33  ;;  %v1890_v36 = vld [vmem:[%s2129_s29 + $0x18] sm:$0xff]   ;;  %v1895_v37 = vld [vmem:[%s2141_s18] sm:$0xff]   ;;  %v1892_v40 = vld [vmem:[%s2129_s29 + $0x28] sm:$0xff]  }
  0x4d   : > { %1766 = vmatpush3.bf16.msra.mxu0 %v1887_v33  ;;  %1821 = vmatpush3.bf16.msra.mxu1 %v1887_v33  ;;  %v1896_v38 = vld [vmem:[%s2141_s18 + $0x40] sm:$0xff]   ;;  %v1893_v41 = vld [vmem:[%s2129_s29 + $0x30] sm:$0xff]   ;;  %v1894_v42 = vld [vmem:[%s2129_s29 + $0x38] sm:$0xff]  }
  0x4e   : > { %1767 = vmatprep.subr.bf16.mxu0 %v1888_v34  ;;  %1814 = vmatprep.subr.bf16.mxu1 %v1888_v34  ;;  %v1891_v39 = vld [vmem:[%s2129_s29 + $0x20] sm:$0xff]   ;;  %v1897_v43 = vld [vmem:[%s2141_s18 + $0x8] sm:$0xff]   ;;  %v1899_v45 = vld [vmem:[%s2141_s18 + $0x10] sm:$0xff]  }
  0x4f   : > { %1781 = vmatprep.mubr.bf16.mxu0 %v1895_v37  ;;  %1797 = vmatprep.mubr.bf16.mxu1 %v1896_v38  ;;  %v1898_v44 = vld [vmem:[%s2141_s18 + $0x48] sm:$0xff]   ;;  %v1900_v46 = vld [vmem:[%s2141_s18 + $0x50] sm:$0xff]   ;;  %v1901_v47 = vld [vmem:[%s2141_s18 + $0x18] sm:$0xff]  }
  0x50   : > { %v1902_v48 = vld [vmem:[%s2141_s18 + $0x58] sm:$0xff]   ;;  %v1903_v49 = vld [vmem:[%s2141_s18 + $0x20] sm:$0xff]   ;;  %v1905_v51 = vld [vmem:[%s2141_s18 + $0x28] sm:$0xff]  }
  0x51   : > { %1768 = vmatpush3.bf16.msra.mxu0 %v1888_v34  ;;  %1822 = vmatpush3.bf16.msra.mxu1 %v1888_v34  ;;  %v1904_v50 = vld [vmem:[%s2141_s18 + $0x60] sm:$0xff]   ;;  %v1906_v52 = vld [vmem:[%s2141_s18 + $0x68] sm:$0xff]   ;;  %v1907_v53 = vld [vmem:[%s2141_s18 + $0x30] sm:$0xff]  }
  0x52   : > { %1769 = vmatprep.subr.bf16.mxu0 %v1889_v35  ;;  %1815 = vmatprep.subr.bf16.mxu1 %v1889_v35  ;;  %v1908_v54 = vld [vmem:[%s2141_s18 + $0x70] sm:$0xff]   ;;  %v1909_v55 = vld [vmem:[%s2141_s18 + $0x38] sm:$0xff]   ;;  %v514_v59 = vld [vmem:[#allocation2] sm:$0xff] }
  0x53   : > { %v1910_v56 = vld [vmem:[%s2141_s18 + $0x78] sm:$0xff]   ;;  %v516_v57 = vld [vmem:[#allocation2 + $0x10] sm:$0xff]  ;;  %v530_v60 = vld [vmem:[#allocation2 + $0x80] sm:$0xff] }
  0x54   : > { %v532_v58 = vld [vmem:[#allocation2 + $0x90] sm:$0xff]  ;;  %v517_v63 = vld [vmem:[#allocation2 + $0x18] sm:$0xff]  ;;  %v515_v5 = vld [vmem:[#allocation2 + $0x8] sm:$0xff] }
  0x55   : > { %1770 = vmatpush3.bf16.msra.mxu0 %v1889_v35  ;;  %1823 = vmatpush3.bf16.msra.mxu1 %v1889_v35  ;;  %v533_v0 = vld [vmem:[#allocation2 + $0x98] sm:$0xff]  ;;  %v531_v6 = vld [vmem:[#allocation2 + $0x88] sm:$0xff]  ;;  %v520_v17 = vld [vmem:[#allocation2 + $0x30] sm:$0xff] }
  0x56   : > { %1771 = vmatprep.subr.bf16.mxu0 %v1890_v36  ;;  %1816 = vmatprep.subr.bf16.mxu1 %v1890_v36  ;;  %v536_v18 = vld [vmem:[#allocation2 + $0xb0] sm:$0xff]  ;;  %v518_v19 = vld [vmem:[#allocation2 + $0x20] sm:$0xff]  ;;  %v521_v23 = vld [vmem:[#allocation2 + $0x38] sm:$0xff] }
  0x57   : > { %v534_v20 = vld [vmem:[#allocation2 + $0xa0] sm:$0xff]  ;;  %v537_v24 = vld [vmem:[#allocation2 + $0xb8] sm:$0xff]  ;;  %v519_v29 = vld [vmem:[#allocation2 + $0x28] sm:$0xff] }
  0x58   : > { %v535_v30 = vld [vmem:[#allocation2 + $0xa8] sm:$0xff] }
  0x59   : > { %1772 = vmatpush3.bf16.msra.mxu0 %v1890_v36  ;;  %1824 = vmatpush3.bf16.msra.mxu1 %v1890_v36 }
  0x5a   : > { %1773 = vmatprep.subr.bf16.mxu0 %v1891_v39  ;;  %1817 = vmatprep.subr.bf16.mxu1 %v1891_v39 }
  0x5d   : > { %1774 = vmatpush3.bf16.msra.mxu0 %v1891_v39  ;;  %1825 = vmatpush3.bf16.msra.mxu1 %v1891_v39 }
  0x5e   : > { %1775 = vmatprep.subr.bf16.mxu0 %v1892_v40  ;;  %1818 = vmatprep.subr.bf16.mxu1 %v1892_v40 }
  0x61   : > { %1776 = vmatpush3.bf16.msra.mxu0 %v1892_v40  ;;  %1826 = vmatpush3.bf16.msra.mxu1 %v1892_v40 }
  0x62   : > { %1777 = vmatprep.subr.bf16.mxu0 %v1893_v41  ;;  %1819 = vmatprep.subr.bf16.mxu1 %v1893_v41 }
  0x65   : > { %1778 = vmatpush3.bf16.msra.mxu0 %v1893_v41  ;;  %1827 = vmatpush3.bf16.msra.mxu1 %v1893_v41  ;;  %v524_v41 = vld [vmem:[#allocation2 + $0x50] sm:$0xff] }
  0x66   : > { %1779 = vmatprep.subr.bf16.mxu0 %v1894_v42  ;;  %1820 = vmatprep.subr.bf16.mxu1 %v1894_v42 }
  0x69   : > { %1780 = vmatpush3.bf16.msra.mxu0 %v1894_v42  ;;  %1828 = vmatpush3.bf16.msra.mxu1 %v1894_v42  ;;  %v540_v42 = vld [vmem:[#allocation2 + $0xd0] sm:$0xff] }
  0x6c   : > { %1782 = vmatmul.mubr.bf16.vlgmr.msra.gmra.mrb[0].mxu0 %v1897_v43  ;;  %1798 = vmatmul.mubr.bf16.vlgmr.msra.gmra.mrb[0].mxu1 %v1898_v44  ;;  %v522_v43 = vld [vmem:[#allocation2 + $0x40] sm:$0xff] }
  0x6d   : > { %1785 = vmatprep.mubr.bf16.mxu0 %v1899_v45  ;;  %1801 = vmatprep.mubr.bf16.mxu1 %v1900_v46  ;;  %v538_v44 = vld [vmem:[#allocation2 + $0xc0] sm:$0xff] }
  0x74   : > { %1786 = vmatmul.mubr.bf16.gmra.mrb[4].mxu0 %v1901_v47  ;;  %1802 = vmatmul.mubr.bf16.gmra.mrb[4].mxu1 %v1902_v48  ;;  %v525_v47 = vld [vmem:[#allocation2 + $0x58] sm:$0xff] }
  0x75   : > { %1789 = vmatprep.mubr.bf16.mxu0 %v1903_v49  ;;  %1805 = vmatprep.mubr.bf16.mxu1 %v1904_v50  ;;  %v541_v48 = vld [vmem:[#allocation2 + $0xd8] sm:$0xff] }
  0x7c   : > { %1790 = vmatmul.mubr.bf16.gmra.mrb[8].mxu0 %v1905_v51  ;;  %1806 = vmatmul.mubr.bf16.gmra.mrb[8].mxu1 %v1906_v52 }
  0x7d   : > { %1793 = vmatprep.mubr.bf16.mxu0 %v1907_v53  ;;  %1809 = vmatprep.mubr.bf16.mxu1 %v1908_v54  ;;  %v523_v53 = vld [vmem:[#allocation2 + $0x48] sm:$0xff] }
  0x7e   : > { %v539_v54 = vld [vmem:[#allocation2 + $0xc8] sm:$0xff] }
  0x84   : > { %1794 = vmatmul.mubr.bf16.gmra.mrb[12].mxu0 %v1909_v55  ;;  %1810 = vmatmul.mubr.bf16.gmra.mrb[12].mxu1 %v1910_v56 }
 0x13f   : > { %v1783_v61 = vpop.f32.mrb[0].mxu0  ;;  %v1799_v62 = vpop.f32.mrb[0].mxu1 }
 0x140   : > { %v901_v1 = vadd.f32 %v1783_v61, %v516_v57  ;;  %v917_v2 = vadd.f32 %v1799_v62, %v532_v58  ;;  %v772_v3 = vpop.f32.mrb[1].mxu0  ;;  %v836_v4 = vpop.f32.mrb[1].mxu1 }
 0x141   : > { %v899_v7 = vadd.f32 %v772_v3, %v514_v59  ;;  %v915_v8 = vadd.f32 %v836_v4, %v530_v60  ;;  %v1784_v9 = vpop.f32.mrb[2].mxu0  ;;  %v1800_v10 = vpop.f32.mrb[2].mxu1  ;;  %v526_v3 = vld [vmem:[#allocation2 + $0x60] sm:$0xff] }
 0x142   : > { %933 = vst [vmem:[#allocation2 + $0x10] sm:$0xff] %v901_v1  ;;  %949 = vst [vmem:[#allocation2 + $0x90] sm:$0xff] %v917_v2  ;;  %v902_v11 = vadd.f32 %v1784_v9, %v517_v63  ;;  %v918_v12 = vadd.f32 %v1800_v10, %v533_v0  ;;  %v775_v13 = vpop.f32.mrb[3].mxu0  ;;  %v839_v14 = vpop.f32.mrb[3].mxu1  ;;  %v528_v1 = vld [vmem:[#allocation2 + $0x70] sm:$0xff]  ;;  %v542_v4 = vld [vmem:[#allocation2 + $0xe0] sm:$0xff] }
 0x143   : > { %931 = vst [vmem:[#allocation2] sm:$0xff] %v899_v7  ;;  %947 = vst [vmem:[#allocation2 + $0x80] sm:$0xff] %v915_v8  ;;  %v900_v15 = vadd.f32 %v775_v13, %v515_v5  ;;  %v916_v16 = vadd.f32 %v839_v14, %v531_v6  ;;  %v544_v2 = vld [vmem:[#allocation2 + $0xf0] sm:$0xff]  ;;  %v529_v7 = vld [vmem:[#allocation2 + $0x78] sm:$0xff] }
 0x144   : > { %934 = vst [vmem:[#allocation2 + $0x18] sm:$0xff] %v902_v11  ;;  %950 = vst [vmem:[#allocation2 + $0x98] sm:$0xff] %v918_v12  ;;  %v545_v8 = vld [vmem:[#allocation2 + $0xf8] sm:$0xff]  ;;  %v527_v13 = vld [vmem:[#allocation2 + $0x68] sm:$0xff] }
 0x145   : > { %932 = vst [vmem:[#allocation2 + $0x8] sm:$0xff] %v900_v15  ;;  %948 = vst [vmem:[#allocation2 + $0x88] sm:$0xff] %v916_v16  ;;  %v543_v14 = vld [vmem:[#allocation2 + $0xe8] sm:$0xff] }
 0x147   : > { %v1787_v21 = vpop.f32.mrb[4].mxu0  ;;  %v1803_v22 = vpop.f32.mrb[4].mxu1 }
 0x148   : > { %v905_v25 = vadd.f32 %v1787_v21, %v520_v17  ;;  %v921_v26 = vadd.f32 %v1803_v22, %v536_v18  ;;  %v788_v27 = vpop.f32.mrb[5].mxu0  ;;  %v852_v28 = vpop.f32.mrb[5].mxu1 }
 0x149   : > { %v903_v31 = vadd.f32 %v788_v27, %v518_v19  ;;  %v919_v32 = vadd.f32 %v852_v28, %v534_v20  ;;  %v1788_v33 = vpop.f32.mrb[6].mxu0  ;;  %v1804_v34 = vpop.f32.mrb[6].mxu1  ;;  %v2172_v27 = vld [vmem:[%s2261_s2] ss:$0 sm:$0xff] (!%p1499_p13) }
 0x14a   : > { %937 = vst [vmem:[#allocation2 + $0x30] sm:$0xff] %v905_v25  ;;  %953 = vst [vmem:[#allocation2 + $0xb0] sm:$0xff] %v921_v26  ;;  %v906_v35 = vadd.f32 %v1788_v33, %v521_v23  ;;  %v922_v36 = vadd.f32 %v1804_v34, %v537_v24  ;;  %v791_v37 = vpop.f32.mrb[7].mxu0  ;;  %v855_v38 = vpop.f32.mrb[7].mxu1  ;;  %v967_v25 = vld [vmem:[#allocation2] sm:$0xff] (!%p1499_p13) }
 0x14b   : > { %935 = vst [vmem:[#allocation2 + $0x20] sm:$0xff] %v903_v31  ;;  %951 = vst [vmem:[#allocation2 + $0xa0] sm:$0xff] %v919_v32  ;;  %v904_v39 = vadd.f32 %v791_v37, %v519_v29  ;;  %v920_v40 = vadd.f32 %v855_v38, %v535_v30  ;;  %v1006_v28 = vadd.f32 (!%p1499_p13), %v2172_v27, %v967_v25  ;;  %v1568_v30 = vld [vmem:[%s2134_s7] sm:$0xff] (!%p1499_p13)   ;;  %v969_v31 = vld [vmem:[#allocation2 + $0x10] sm:$0xff] (!%p1499_p13) }
 0x14c   : > { %938 = vst [vmem:[#allocation2 + $0x38] sm:$0xff] %v906_v35  ;;  %954 = vst [vmem:[#allocation2 + $0xb8] sm:$0xff] %v922_v36  ;;  %v968_v26 = vld [vmem:[#allocation2 + $0x8] sm:$0xff] (!%p1499_p13)  ;;  %v970_v32 = vld [vmem:[#allocation2 + $0x18] sm:$0xff] (!%p1499_p13)  ;;  %v1569_v33 = vunpack.c.l.bf16 (!%p1499_p13), %v1568_v30  ;;  %v1570_v34 = vunpack.c.h.bf16 (!%p1499_p13), %v1568_v30  ;;  %v1008_v35 = vadd.f32 (!%p1499_p13), %v2172_v27, %v969_v31 }
 0x14d   : > { %936 = vst [vmem:[#allocation2 + $0x28] sm:$0xff] %v904_v39  ;;  %952 = vst [vmem:[#allocation2 + $0xa8] sm:$0xff] %v920_v40  ;;  %v1007_v29 = vadd.f32 (!%p1499_p13), %v2172_v27, %v968_v26  ;;  %v1009_v36 = vadd.f32 (!%p1499_p13), %v2172_v27, %v970_v32  ;;  %v1711_v37 = vld [vmem:[%s2134_s7 + $0x8] sm:$0xff] (!%p1499_p13)  }
 0x14e   : > { %v1573_v40 = vunpack.c.l.bf16 (!%p1499_p13), %v1711_v37 }
 0x14f   : > { %v1791_v45 = vpop.f32.mrb[8].mxu0  ;;  %v1807_v46 = vpop.f32.mrb[8].mxu1 }
 0x150   : > { %v909_v49 = vadd.f32 %v1791_v45, %v524_v41  ;;  %v925_v50 = vadd.f32 %v1807_v46, %v540_v42  ;;  %v804_v51 = vpop.f32.mrb[9].mxu0  ;;  %v868_v52 = vpop.f32.mrb[9].mxu1  ;;  %v1574_v41 = vunpack.c.h.bf16 (!%p1499_p13), %v1711_v37 }
 0x151   : > { %v907_v55 = vadd.f32 %v804_v51, %v522_v43  ;;  %v923_v56 = vadd.f32 %v868_v52, %v538_v44  ;;  %v1792_v57 = vpop.f32.mrb[10].mxu0  ;;  %v1808_v58 = vpop.f32.mrb[10].mxu1  ;;  %v1712_v44 = vld [vmem:[%s2134_s7 + $0x10] sm:$0xff] (!%p1499_p13)   ;;  %v1713_v51 = vld [vmem:[%s2134_s7 + $0x18] sm:$0xff] (!%p1499_p13)   ;;  %v1104_v52 = vadd.f32 (!%p1499_p13), %v1573_v40, %v1008_v35 }
 0x152   : > { %941 = vst [vmem:[#allocation2 + $0x50] sm:$0xff] %v909_v49  ;;  %957 = vst [vmem:[#allocation2 + $0xd0] sm:$0xff] %v925_v50  ;;  %v910_v59 = vadd.f32 %v1792_v57, %v525_v47  ;;  %v926_v60 = vadd.f32 %v1808_v58, %v541_v48  ;;  %v807_v61 = vpop.f32.mrb[11].mxu0  ;;  %v871_v62 = vpop.f32.mrb[11].mxu1  ;;  %v971_v38 = vld [vmem:[#allocation2 + $0x20] sm:$0xff] (!%p1499_p13)  ;;  %v973_v45 = vld [vmem:[#allocation2 + $0x30] sm:$0xff] (!%p1499_p13)  ;;  %v1102_v47 = vadd.f32 (!%p1499_p13), %v1569_v33, %v1006_v28  ;;  %v1577_v49 = vunpack.c.l.bf16 (!%p1499_p13), %v1712_v44 }
 0x153   : > { %939 = vst [vmem:[#allocation2 + $0x40] sm:$0xff] %v907_v55  ;;  %955 = vst [vmem:[#allocation2 + $0xc0] sm:$0xff] %v923_v56  ;;  %v908_v63 = vadd.f32 %v807_v61, %v523_v53  ;;  %v924_v0 = vadd.f32 %v871_v62, %v539_v54  ;;  %v1010_v42 = vadd.f32 (!%p1499_p13), %v2172_v27, %v971_v38  ;;  %v974_v46 = vld [vmem:[#allocation2 + $0x38] sm:$0xff] (!%p1499_p13)  ;;  %v1578_v50 = vunpack.c.h.bf16 (!%p1499_p13), %v1712_v44 }
 0x154   : > { %942 = vst [vmem:[#allocation2 + $0x58] sm:$0xff] %v910_v59  ;;  %958 = vst [vmem:[#allocation2 + $0xd8] sm:$0xff] %v926_v60  ;;  %v972_v39 = vld [vmem:[#allocation2 + $0x28] sm:$0xff] (!%p1499_p13)  ;;  %v1103_v48 = vadd.f32 (!%p1499_p13), %v1570_v34, %v1007_v29  ;;  %v1105_v53 = vadd.f32 (!%p1499_p13), %v1574_v41, %v1009_v36  ;;  %v1012_v54 = vadd.f32 (!%p1499_p13), %v2172_v27, %v973_v45  ;;  %v1134_v57 = vmax.f32 (!%p1499_p13), %v1102_v47, 0.0  ;;  %v1717_v36 = vld [vmem:[%s2134_s7 + $0x38] sm:$0xff] (!%p1499_p13)  }
 0x155   : > { %940 = vst [vmem:[#allocation2 + $0x48] sm:$0xff] %v908_v63  ;;  %956 = vst [vmem:[#allocation2 + $0xc8] sm:$0xff] %v924_v0  ;;  %v1011_v43 = vadd.f32 (!%p1499_p13), %v2172_v27, %v972_v39  ;;  %v1013_v55 = vadd.f32 (!%p1499_p13), %v2172_v27, %v974_v46  ;;  %v1106_v59 = vadd.f32 (!%p1499_p13), %v1577_v49, %v1010_v42  ;;  %v1136_v62 = vmax.f32 (!%p1499_p13), %v1104_v52, 0.0  ;;  %v983_v41 = vld [vmem:[#allocation2 + $0x80] sm:$0xff] (!%p1499_p13)  ;;  %v984_v42 = vld [vmem:[#allocation2 + $0x88] sm:$0xff] (!%p1499_p13) }
 0x156   : > { %v1135_v58 = vmax.f32 (!%p1499_p13), %v1103_v48, 0.0  ;;  %v1137_v63 = vmax.f32 (!%p1499_p13), %v1105_v53, 0.0  ;;  %v1581_v0 = vunpack.c.l.bf16 (!%p1499_p13), %v1713_v51  ;;  %v1718_v47 = vld [vmem:[%s2134_s7 + $0x40] sm:$0xff] (!%p1499_p13)   ;;  %v985_v52 = vld [vmem:[#allocation2 + $0x90] sm:$0xff] (!%p1499_p13)  ;;  %v986_v53 = vld [vmem:[#allocation2 + $0x98] sm:$0xff] (!%p1499_p13) }
 0x157   : > { %v1795_v5 = vpop.f32.mrb[12].mxu0  ;;  %v1811_v6 = vpop.f32.mrb[12].mxu1  ;;  %966 = sbr.rel (%p1499_p13) target bundleno = 382 (0x17e), region = 85  ;;  %v1107_v60 = vadd.f32 (!%p1499_p13), %v1578_v50, %v1011_v43 }
 0x158   : > { %v913_v9 = vadd.f32 %v1795_v5, %v528_v1  ;;  %v929_v10 = vadd.f32 %v1811_v6, %v544_v2  ;;  %v820_v11 = vpop.f32.mrb[13].mxu0  ;;  %v884_v12 = vpop.f32.mrb[13].mxu1  ;;  %v1582_v1 = vunpack.c.h.bf16 (!%p1499_p13), %v1713_v51  ;;  %v1714_v2 = vld [vmem:[%s2134_s7 + $0x20] sm:$0xff] (!%p1499_p13)   ;;  %v1138_v5 = vmax.f32 (!%p1499_p13), %v1106_v59, 0.0 }
 0x159   : > { %v911_v15 = vadd.f32 %v820_v11, %v526_v3  ;;  %v927_v16 = vadd.f32 %v884_v12, %v542_v4  ;;  %v1796_v17 = vpop.f32.mrb[14].mxu0  ;;  %v1812_v18 = vpop.f32.mrb[14].mxu1  ;;  %v977_v3 = vld [vmem:[#allocation2 + $0x50] sm:$0xff] (!%p1499_p13)  ;;  %v1634_v4 = vpack.c.bf16 (!%p1499_p13), %v1135_v58, %v1134_v57  ;;  %v1139_v6 = vmax.f32 (!%p1499_p13), %v1107_v60, 0.0  ;;  %v1719_v58 = vld [vmem:[%s2134_s7 + $0x48] sm:$0xff] (!%p1499_p13)  }
 0x15a   : > { %945 = vst [vmem:[#allocation2 + $0x70] sm:$0xff] %v913_v9  ;;  %961 = vst [vmem:[#allocation2 + $0xf0] sm:$0xff] %v929_v10  ;;  %v914_v19 = vadd.f32 %v1796_v17, %v529_v7  ;;  %v930_v20 = vadd.f32 %v1812_v18, %v545_v8  ;;  %v823_v21 = vpop.f32.mrb[15].mxu0  ;;  %v887_v22 = vpop.f32.mrb[15].mxu1  ;;  %v975_v56 = vld [vmem:[#allocation2 + $0x40] sm:$0xff] (!%p1499_p13)  ;;  %v1715_v9 = vld [vmem:[%s2134_s7 + $0x28] sm:$0xff] (!%p1499_p13)   ;;  %v1639_v10 = vpack.c.bf16 (!%p1499_p13), %v1137_v63, %v1136_v62  ;;  %v1586_v17 = vunpack.c.h.bf16 (!%p1499_p13), %v1714_v2 }
 0x15b   : > { %943 = vst [vmem:[#allocation2 + $0x60] sm:$0xff] %v911_v15  ;;  %959 = vst [vmem:[#allocation2 + $0xe0] sm:$0xff] %v927_v16  ;;  %v912_v23 = vadd.f32 %v823_v21, %v527_v13  ;;  %v928_v24 = vadd.f32 %v887_v22, %v543_v14  ;;  %v1014_v7 = vadd.f32 (!%p1499_p13), %v2172_v27, %v975_v56  ;;  %v978_v8 = vld [vmem:[#allocation2 + $0x58] sm:$0xff] (!%p1499_p13)  ;;  %v1585_v16 = vunpack.c.l.bf16 (!%p1499_p13), %v1714_v2  ;;  %v987_v63 = vld [vmem:[#allocation2 + $0xa0] sm:$0xff] (!%p1499_p13) }
 0x15c   : > { %946 = vst [vmem:[#allocation2 + $0x78] sm:$0xff] %v914_v19  ;;  %962 = vst [vmem:[#allocation2 + $0xf8] sm:$0xff] %v930_v20  ;;  %v976_v61 = vld [vmem:[#allocation2 + $0x48] sm:$0xff] (!%p1499_p13)  ;;  %v1108_v11 = vadd.f32 (!%p1499_p13), %v1581_v0, %v1012_v54  ;;  %v1109_v12 = vadd.f32 (!%p1499_p13), %v1582_v1, %v1013_v55  ;;  %v1644_v15 = vpack.c.bf16 (!%p1499_p13), %v1139_v6, %v1138_v5  ;;  %v1716_v20 = vld [vmem:[%s2134_s7 + $0x30] sm:$0xff] (!%p1499_p13)   ;;  %v1590_v28 = vunpack.c.h.bf16 (!%p1499_p13), %v1715_v9 }
 0x15d   : > { %944 = vst [vmem:[#allocation2 + $0x68] sm:$0xff] %v912_v23  ;;  %960 = vst [vmem:[#allocation2 + $0xe8] sm:$0xff] %v928_v24  ;;  %v1015_v13 = vadd.f32 (!%p1499_p13), %v2172_v27, %v976_v61  ;;  %v1016_v18 = vadd.f32 (!%p1499_p13), %v2172_v27, %v977_v3  ;;  %v1017_v23 = vadd.f32 (!%p1499_p13), %v2172_v27, %v978_v8  ;;  %v1589_v24 = vunpack.c.l.bf16 (!%p1499_p13), %v1715_v9  ;;  %v1720_v5 = vld [vmem:[%s2134_s7 + $0x50] sm:$0xff] (!%p1499_p13)  }
 0x15e   : > { %1635 = vst [vmem:[%s2139_s9] sm:$0xff] %v1634_v4   ;;  %1726 = vst [vmem:[%s2139_s9 + $0x8] sm:$0xff] %v1639_v10   ;;  %v1140_v21 = vmax.f32 %v1108_v11, 0.0  ;;  %v1141_v22 = vmax.f32 %v1109_v12, 0.0  ;;  %v1110_v25 = vadd.f32 %v1585_v16, %v1014_v7  ;;  %v1593_v35 = vunpack.c.l.bf16 %v1716_v20  ;;  %v988_v4 = vld [vmem:[#allocation2 + $0xa8] sm:$0xff] }
 0x15f   : > { %1727 = vst [vmem:[%s2139_s9 + $0x10] sm:$0xff] %v1644_v15   ;;  %v1111_v26 = vadd.f32 %v1586_v17, %v1015_v13  ;;  %v1112_v33 = vadd.f32 %v1589_v24, %v1016_v18  ;;  %v1113_v39 = vadd.f32 %v1590_v28, %v1017_v23  ;;  %v1594_v40 = vunpack.c.h.bf16 %v1716_v20  ;;  %v990_v15 = vld [vmem:[#allocation2 + $0xb8] sm:$0xff] }
 0x160   : > { %v1649_v32 = vpack.c.bf16 %v1141_v22, %v1140_v21  ;;  %v1142_v37 = vmax.f32 %v1110_v25, 0.0  ;;  %v1597_v51 = vunpack.c.l.bf16 %v1717_v36  ;;  %v1598_v55 = vunpack.c.h.bf16 %v1717_v36  ;;  %v1721_v20 = vld [vmem:[%s2134_s7 + $0x58] sm:$0xff]   ;;  %v991_v25 = vld [vmem:[#allocation2 + $0xc0] sm:$0xff] }
 0x161   : > { %v981_v30 = vld [vmem:[#allocation2 + $0x70] sm:$0xff]  ;;  %v1143_v38 = vmax.f32 %v1111_v26, 0.0  ;;  %v1144_v43 = vmax.f32 %v1112_v33, 0.0  ;;  %v1145_v49 = vmax.f32 %v1113_v39, 0.0  ;;  %v1022_v56 = vadd.f32 %v2172_v27, %v983_v41  ;;  %v992_v26 = vld [vmem:[#allocation2 + $0xc8] sm:$0xff] }
 0x162   : > { %v979_v14 = vld [vmem:[#allocation2 + $0x60] sm:$0xff]  ;;  %1728 = vst [vmem:[%s2139_s9 + $0x18] sm:$0xff] %v1649_v32   ;;  %v1020_v45 = vadd.f32 %v2172_v27, %v981_v30  ;;  %v1023_v57 = vadd.f32 %v2172_v27, %v984_v42  ;;  %v1601_v62 = vunpack.c.l.bf16 %v1718_v47  ;;  %v1602_v1 = vunpack.c.h.bf16 %v1718_v47 }
 0x163   : > { %v1018_v29 = vadd.f32 %v2172_v27, %v979_v14  ;;  %v982_v31 = vld [vmem:[#allocation2 + $0x78] sm:$0xff]  ;;  %v1654_v48 = vpack.c.bf16 %v1143_v38, %v1142_v37  ;;  %v1659_v59 = vpack.c.bf16 %v1145_v49, %v1144_v43  ;;  %v1024_v2 = vadd.f32 %v2172_v27, %v985_v52  ;;  %v989_v14 = vld [vmem:[#allocation2 + $0xb0] sm:$0xff]  ;;  %v1722_v32 = vld [vmem:[%s2134_s7 + $0x60] sm:$0xff]  }
 0x164   : > { %v980_v19 = vld [vmem:[#allocation2 + $0x68] sm:$0xff]  ;;  %v1021_v46 = vadd.f32 %v2172_v27, %v982_v31  ;;  %v1116_v61 = vadd.f32 %v1597_v51, %v1020_v45  ;;  %v1025_v3 = vadd.f32 %v2172_v27, %v986_v53  ;;  %v1118_v8 = vadd.f32 %v1601_v62, %v1022_v56  ;;  %v993_v37 = vld [vmem:[#allocation2 + $0xd0] sm:$0xff]  ;;  %v994_v38 = vld [vmem:[#allocation2 + $0xd8] sm:$0xff] }
 0x165   : > { %v1019_v34 = vadd.f32 %v2172_v27, %v980_v19  ;;  %v1114_v44 = vadd.f32 %v1593_v35, %v1018_v29  ;;  %1729 = vst [vmem:[%s2139_s9 + $0x20] sm:$0xff] %v1654_v48   ;;  %1730 = vst [vmem:[%s2139_s9 + $0x28] sm:$0xff] %v1659_v59   ;;  %v1605_v9 = vunpack.c.l.bf16 %v1719_v58  ;;  %v1119_v11 = vadd.f32 %v1602_v1, %v1023_v57  ;;  %v1723_v43 = vld [vmem:[%s2134_s7 + $0x68] sm:$0xff]   ;;  %v995_v48 = vld [vmem:[#allocation2 + $0xe0] sm:$0xff] }
 0x166   : > { %v1117_v0 = vadd.f32 %v1598_v55, %v1021_v46  ;;  %v1148_v7 = vmax.f32 %v1116_v61, 0.0  ;;  %v1606_v12 = vunpack.c.h.bf16 %v1719_v58  ;;  %v1026_v13 = vadd.f32 %v2172_v27, %v987_v63  ;;  %v996_v53 = vld [vmem:[#allocation2 + $0xe8] sm:$0xff]  ;;  %v997_v63 = vld [vmem:[#allocation2 + $0xf0] sm:$0xff] }
 0x167   : > { %v1115_v50 = vadd.f32 %v1594_v40, %v1019_v34  ;;  %v1146_v54 = vmax.f32 %v1114_v44, 0.0  ;;  %v1150_v16 = vmax.f32 %v1118_v8, 0.0  ;;  %v1120_v17 = vadd.f32 %v1605_v9, %v1024_v2 }
 0x168   : > { %v1149_v10 = vmax.f32 %v1117_v0, 0.0  ;;  %v1027_v18 = vadd.f32 %v2172_v27, %v988_v4  ;;  %v1609_v19 = vunpack.c.l.bf16 %v1720_v5  ;;  %v1151_v22 = vmax.f32 %v1119_v11, 0.0  ;;  %v998_v0 = vld [vmem:[#allocation2 + $0xf8] sm:$0xff] }
 0x169   : > { %v1147_v60 = vmax.f32 %v1115_v50, 0.0  ;;  %v1121_v23 = vadd.f32 %v1606_v12, %v1025_v3  ;;  %v1610_v24 = vunpack.c.h.bf16 %v1720_v5  ;;  %v1152_v28 = vmax.f32 %v1120_v17, 0.0  ;;  %v1725_v5 = vld [vmem:[%s2134_s7 + $0x78] sm:$0xff]  }
 0x16a   : > { %v1669_v21 = vpack.c.bf16 %v1149_v10, %v1148_v7  ;;  %v1122_v29 = vadd.f32 %v1609_v19, %v1026_v13  ;;  %v1028_v30 = vadd.f32 %v2172_v27, %v989_v14  ;;  %v1029_v31 = vadd.f32 %v2172_v27, %v990_v15 }
 0x16b   : > { %v1664_v6 = vpack.c.bf16 %v1147_v60, %v1146_v54  ;;  %v1674_v33 = vpack.c.bf16 %v1151_v22, %v1150_v16  ;;  %v1153_v34 = vmax.f32 %v1121_v23, 0.0  ;;  %v1123_v35 = vadd.f32 %v1610_v24, %v1027_v18  ;;  %v1724_v54 = vld [vmem:[%s2134_s7 + $0x70] sm:$0xff]  }
 0x16c   : > { %1732 = vst [vmem:[%s2139_s9 + $0x38] sm:$0xff] %v1669_v21   ;;  %v1613_v36 = vunpack.c.l.bf16 %v1721_v20  ;;  %v1154_v39 = vmax.f32 %v1122_v29, 0.0  ;;  %v1614_v40 = vunpack.c.h.bf16 %v1721_v20  ;;  %v1030_v41 = vadd.f32 %v2172_v27, %v991_v25 }
 0x16d   : > { %1731 = vst [vmem:[%s2139_s9 + $0x30] sm:$0xff] %v1664_v6   ;;  %v1031_v42 = vadd.f32 %v2172_v27, %v992_v26  ;;  %1733 = vst [vmem:[%s2139_s9 + $0x40] sm:$0xff] %v1674_v33   ;;  %v1679_v44 = vpack.c.bf16 %v1153_v34, %v1152_v28  ;;  %v1155_v45 = vmax.f32 %v1123_v35, 0.0  ;;  %v1617_v47 = vunpack.c.l.bf16 %v1722_v32 }
 0x16e   : > { %v1124_v46 = vadd.f32 %v1613_v36, %v1028_v30  ;;  %v1125_v49 = vadd.f32 %v1614_v40, %v1029_v31  ;;  %v1618_v50 = vunpack.c.h.bf16 %v1722_v32  ;;  %v1032_v51 = vadd.f32 %v2172_v27, %v993_v37 }
 0x16f   : > { %v1033_v52 = vadd.f32 %v2172_v27, %v994_v38  ;;  %1734 = vst [vmem:[%s2139_s9 + $0x48] sm:$0xff] %v1679_v44   ;;  %v1684_v55 = vpack.c.bf16 %v1155_v45, %v1154_v39  ;;  %v1126_v57 = vadd.f32 %v1617_v47, %v1030_v41  ;;  %v1621_v58 = vunpack.c.l.bf16 %v1723_v43 }
 0x170   : > { %v1156_v56 = vmax.f32 %v1124_v46, 0.0  ;;  %v1157_v59 = vmax.f32 %v1125_v49, 0.0  ;;  %v1127_v60 = vadd.f32 %v1618_v50, %v1031_v42  ;;  %v1622_v61 = vunpack.c.h.bf16 %v1723_v43 }
 0x171   : > { %v1034_v62 = vadd.f32 %v2172_v27, %v995_v48  ;;  %1735 = vst [vmem:[%s2139_s9 + $0x50] sm:$0xff] %v1684_v55   ;;  %v1158_v1 = vmax.f32 %v1126_v57, 0.0  ;;  %v1128_v2 = vadd.f32 %v1621_v58, %v1032_v51  ;;  %v1035_v3 = vadd.f32 %v2172_v27, %v996_v53 }
 0x172   : > { %v1625_v4 = vunpack.c.l.bf16 %v1724_v54  ;;  %v1689_v6 = vpack.c.bf16 %v1157_v59, %v1156_v56  ;;  %v1159_v7 = vmax.f32 %v1127_v60, 0.0  ;;  %v1129_v8 = vadd.f32 %v1622_v61, %v1033_v52 }
 0x173   : > { %v1626_v9 = vunpack.c.h.bf16 %v1724_v54  ;;  %v1160_v10 = vmax.f32 %v1128_v2, 0.0  ;;  %v1036_v12 = vadd.f32 %v2172_v27, %v997_v63  ;;  %v1037_v13 = vadd.f32 %v2172_v27, %v998_v0 }
 0x174   : > { %v1130_v11 = vadd.f32 %v1625_v4, %v1034_v62  ;;  %1736 = vst [vmem:[%s2139_s9 + $0x58] sm:$0xff] %v1689_v6   ;;  %v1694_v14 = vpack.c.bf16 %v1159_v7, %v1158_v1  ;;  %v1161_v15 = vmax.f32 %v1129_v8, 0.0  ;;  %v1629_v17 = vunpack.c.l.bf16 %v1725_v5 }
 0x175   : > { %v1131_v16 = vadd.f32 %v1626_v9, %v1035_v3  ;;  %v1630_v19 = vunpack.c.h.bf16 %v1725_v5 }
 0x176   : > { %v1162_v18 = vmax.f32 %v1130_v11, 0.0  ;;  %1737 = vst [vmem:[%s2139_s9 + $0x60] sm:$0xff] %v1694_v14   ;;  %v1699_v20 = vpack.c.bf16 %v1161_v15, %v1160_v10  ;;  %v1132_v22 = vadd.f32 %v1629_v17, %v1036_v12 }
 0x177   : > { %v1163_v21 = vmax.f32 %v1131_v16, 0.0  ;;  %v1133_v23 = vadd.f32 %v1630_v19, %v1037_v13 }
 0x178   : > { %1738 = vst [vmem:[%s2139_s9 + $0x68] sm:$0xff] %v1699_v20   ;;  %v1164_v25 = vmax.f32 %v1132_v22, 0.0 }
 0x179   : > { %v1704_v24 = vpack.c.bf16 %v1163_v21, %v1162_v18  ;;  %v1165_v26 = vmax.f32 %v1133_v23, 0.0 }
 0x17b   : > { %1739 = vst [vmem:[%s2139_s9 + $0x70] sm:$0xff] %v1704_v24   ;;  %v1709_v27 = vpack.c.bf16 %v1165_v26, %v1164_v25 }
 0x17d   : > { %1740 = vst [vmem:[%s2139_s9 + $0x78] sm:$0xff] %v1709_v27  }
 0x17e PF: > { %s14_s21 = sadd.s32 1, %s1965_s21   ;;  %s2264_s15 = smov %s1945_s16 }
 0x17f   : > { %p11_p0 = scmp.ge.s32.totalorder %s14_s21, 12   ;;  %s2265_s16 = smov %s2044_s28 }
 0x180   : > { %s2266_s17 = smov %s1957_s19  ;;  %s2267_s18 = smov %s1961_s20 }
 0x181   : > { %s2268_s19 = smov %s2271_s22  ;;  %s2269_s20 = smov %s2275_s23 }
 0x182   :  { %13 = sbr.rel (!%p11_p0) target bundleno = 4 (0x4), region = 129 }

// kernel: _lambda_.19
= control target key start
LH: loop header
LB: loop body
LE: loop exit
PB: predicated region body
PF: predicated region fallthrough
CT: control target
= control target key end

     0   :  { %s1190_s12 = smov 0   ;;  %s1192_s13 = smov 0   ;;  %s1322_s0 = inlined_call_operand.vmem [shape: bf16[128,640], index: 0, kind: input, shape index: {}]   ;;  %s1323_s1 = inlined_call_operand.vmem [shape: bf16[640,128], index: 1, kind: input, shape index: {}]   ;;  %s1324_s2 = inlined_call_operand.vmem [shape: f32[1,128], index: 2, kind: input, shape index: {}]   ;;  %s1325_s3 = inlined_call_operand.vmem [shape: bf16[128,128], index: 3, kind: output, shape index: {}]  }
   0x1   :  { %s1194_s14 = smov 0   ;;  %s1196_s15 = smov 0  }
   0x2   :  { %s1198_s16 = smov 0  }
   0x3 LB: > { %s25_s17 = sadd.s32 1, %s1163_s15  ;;  %p48_p1 = scmp.ne.s32.totalorder %s1155_s13, %s1151_s12  ;;  %s1167_s16 = sphi %s1198_s16, %s13_s16   ;;  %s1163_s15 = sphi %s1196_s15, %s1329_s15   ;;  %s1159_s14 = sphi %s1194_s14, %s1328_s14   ;;  %s1155_s13 = sphi %s1192_s13, %s1327_s13   ;;  %s1151_s12 = sphi %s1190_s12, %s1326_s12  }
   0x4   : > { %p26_p0 = scmp.ge.s32.totalorder %s25_s17, 5  ;;  %p49_p2 = scmp.eq.s32.totalorder %s1167_s16, 0 }
   0x5   : > { %s41_s19 = sadd.s32 1, %s1155_s13  ;;  %p899_p5 = scmp.ge.s32.totalorder %s1167_s16, 5 }
   0x6   : > { %s1331_s17 = smov (%p26_p0, %s25_s17), 0  ;;  %p50_p3 = por %p49_p2, %p48_p1 }
   0x7   : > { %s37_s18 = ssub.s32 %s1163_s15, %s1331_s17  ;;  %162 = sbr.rel (%p899_p5) target bundleno = 28 (0x1c), region = 20 }
   0x8   : > { %p39_p4 = scmp.eq.s32.totalorder %s37_s18, 0 }
   0xa   : > { %s1225_s20 = scalar_select %p39_p4, %s1155_s13, %s41_s19  }
   0xe   : > { %165 = sbr.rel (!%p50_p3) target bundleno = 28 (0x1c), region = 24  ;;  %s167_s21 = sand.u32 (%p50_p3), 1, %s1155_s13  }
   0xf   : > { %s901_s22 = sshll.u32 (%p50_p3), %s1163_s15, 2  ;;  %s900_s23 = sshll.u32 (%p50_p3), %s167_s21, 6 }
  0x10   : > { %s1233_s26 = scalar_lea.vmem (%p50_p3), %s1322_s0, %s901_s22  ;;  %s169_s27 = scalar_lea.vmem (%p50_p3), [#allocation3], %s900_s23 }
  0x11   : > { %v190_v0 = vld [vmem:[%s1233_s26] sm:$0xf] (%p50_p3)  ;;  %v192_v1 = vld [vmem:[%s1233_s26 + $0x14] sm:$0xf] (%p50_p3)  ;;  %v194_v2 = vld [vmem:[%s1233_s26 + $0x28] sm:$0xf] (%p50_p3) }
  0x12   : > { %191 = vst [vmem:[%s169_s27] sm:$0xf] (%p50_p3), %v190_v0  ;;  %193 = vst [vmem:[%s169_s27 + $0x4] sm:$0xf] (%p50_p3), %v192_v1  ;;  %v196_v3 = vld [vmem:[%s1233_s26 + $0x3c] sm:$0xf] (%p50_p3) }
  0x13   : > { %v198_v4 = vld [vmem:[%s1233_s26 + $0x50] sm:$0xf] (%p50_p3)  ;;  %195 = vst [vmem:[%s169_s27 + $0x8] sm:$0xf] (%p50_p3), %v194_v2  ;;  %197 = vst [vmem:[%s169_s27 + $0xc] sm:$0xf] (%p50_p3), %v196_v3 }
  0x14   : > { %199 = vst [vmem:[%s169_s27 + $0x10] sm:$0xf] (%p50_p3), %v198_v4  ;;  %v200_v5 = vld [vmem:[%s1233_s26 + $0x64] sm:$0xf] (%p50_p3)  ;;  %v202_v6 = vld [vmem:[%s1233_s26 + $0x78] sm:$0xf] (%p50_p3) }
  0x15   : > { %v204_v7 = vld [vmem:[%s1233_s26 + $0x8c] sm:$0xf]  ;;  %201 = vst [vmem:[%s169_s27 + $0x14] sm:$0xf] %v200_v5  ;;  %203 = vst [vmem:[%s169_s27 + $0x18] sm:$0xf] %v202_v6 }
  0x16   : > { %205 = vst [vmem:[%s169_s27 + $0x1c] sm:$0xf] %v204_v7  ;;  %v206_v8 = vld [vmem:[%s1233_s26 + $0xa0] sm:$0xf]  ;;  %v208_v9 = vld [vmem:[%s1233_s26 + $0xb4] sm:$0xf] }
  0x17   : > { %v210_v10 = vld [vmem:[%s1233_s26 + $0xc8] sm:$0xf]  ;;  %207 = vst [vmem:[%s169_s27 + $0x20] sm:$0xf] %v206_v8  ;;  %209 = vst [vmem:[%s169_s27 + $0x24] sm:$0xf] %v208_v9 }
  0x18   : > { %211 = vst [vmem:[%s169_s27 + $0x28] sm:$0xf] %v210_v10  ;;  %v212_v11 = vld [vmem:[%s1233_s26 + $0xdc] sm:$0xf]  ;;  %v214_v12 = vld [vmem:[%s1233_s26 + $0xf0] sm:$0xf] }
  0x19   : > { %v216_v13 = vld [vmem:[%s1233_s26 + $0x104] sm:$0xf]  ;;  %213 = vst [vmem:[%s169_s27 + $0x2c] sm:$0xf] %v212_v11  ;;  %215 = vst [vmem:[%s169_s27 + $0x30] sm:$0xf] %v214_v12 }
  0x1a   : > { %217 = vst [vmem:[%s169_s27 + $0x34] sm:$0xf] %v216_v13  ;;  %v218_v14 = vld [vmem:[%s1233_s26 + $0x118] sm:$0xf]  ;;  %v220_v15 = vld [vmem:[%s1233_s26 + $0x12c] sm:$0xf] }
  0x1b   : > { %219 = vst [vmem:[%s169_s27 + $0x38] sm:$0xf] %v218_v14  ;;  %221 = vst [vmem:[%s169_s27 + $0x3c] sm:$0xf] %v220_v15 }
  0x1c PF: > { %p902_p6 = scmp.ge.s32.totalorder %s1167_s16, 1  ;;  %p287_p7 = scmp.lt.s32.totalorder %s1167_s16, 6 }
  0x1e   : > { %p288_p8 = pnand %p902_p6, %p287_p7 }
  0x1f   : > { %s294_s28 = sand.u32 (!%p288_p8), 1, %s1151_s12   ;;  %s904_s29 = sshll.u32 (!%p288_p8), %s1159_s14, 4 }
  0x20   : > { %291 = sbr.rel (%p288_p8) target bundleno = 323 (0x143), region = 69  ;;  %s903_s30 = sshll.u32 (!%p288_p8), %s294_s28, 6 }
  0x21   : > { %p333_p9 = scmp.lt.s32.totalorder (!%p288_p8), %s904_s29, 79  ;;  %s1260_s8 = scalar_lea.vmem (!%p288_p8), [#allocation3], %s903_s30 }
  0x22   : > { %p906_p10 = scmp.ne.s32.totalorder (!%p288_p8), %s1159_s14, 0 }
  0x27   : > { %s1333_s29 = smov (!%p333_p9, %s904_s29), 79  ;;  %357 = sbr.rel (%p906_p10) target bundleno = 49 (0x31), region = 77 }
  0x28   : > { %s905_s4 = sshll.u32 %s1333_s29, 2  ;;  %v1169_v16 = vmov (!%p906_p10), 0.0  }
  0x29   : > { %s1258_s7 = scalar_lea.vmem %s1323_s1, %s905_s4  ;;  %358 = vst [vmem:[#allocation2] sm:$0xff] (!%p906_p10), %v1169_v16  ;;  %359 = vst [vmem:[#allocation2 + $0x8] sm:$0xff] (!%p906_p10), %v1169_v16 }
  0x2a   : > { %360 = vst [vmem:[#allocation2 + $0x10] sm:$0xff] (!%p906_p10), %v1169_v16  ;;  %361 = vst [vmem:[#allocation2 + $0x18] sm:$0xff] (!%p906_p10), %v1169_v16 }
  0x2b   : > { %362 = vst [vmem:[#allocation2 + $0x20] sm:$0xff] (!%p906_p10), %v1169_v16  ;;  %363 = vst [vmem:[#allocation2 + $0x28] sm:$0xff] (!%p906_p10), %v1169_v16 }
  0x2c   : > { %364 = vst [vmem:[#allocation2 + $0x30] sm:$0xff] (!%p906_p10), %v1169_v16  ;;  %365 = vst [vmem:[#allocation2 + $0x38] sm:$0xff] (!%p906_p10), %v1169_v16 }
  0x2d   : > { %366 = vst [vmem:[#allocation2 + $0x40] sm:$0xff] (!%p906_p10), %v1169_v16  ;;  %367 = vst [vmem:[#allocation2 + $0x48] sm:$0xff] (!%p906_p10), %v1169_v16 }
  0x2e   : > { %368 = vst [vmem:[#allocation2 + $0x50] sm:$0xff] %v1169_v16  ;;  %369 = vst [vmem:[#allocation2 + $0x58] sm:$0xff] %v1169_v16 }
  0x2f   : > { %370 = vst [vmem:[#allocation2 + $0x60] sm:$0xff] %v1169_v16  ;;  %371 = vst [vmem:[#allocation2 + $0x68] sm:$0xff] %v1169_v16 }
  0x30   : > { %372 = vst [vmem:[#allocation2 + $0x70] sm:$0xff] %v1169_v16  ;;  %373 = vst [vmem:[#allocation2 + $0x78] sm:$0xff] %v1169_v16 }
  0x31 PF: > { %v1113_v17 = vld [vmem:[%s1258_s7] sm:$0xff]   ;;  %v1114_v18 = vld [vmem:[%s1258_s7 + $0x8] sm:$0xff]   ;;  %v1115_v19 = vld [vmem:[%s1258_s7 + $0x10] sm:$0xff]   ;;  %p923_p11 = scmp.ne.s32.totalorder %s1159_s14, 4 }
  0x32   : > { %1024 = vmatprep.subr.bf16.mxu0 %v1113_v17  ;;  %1056 = vmatprep.subr.bf16.mxu1 %v1113_v17  ;;  %v1116_v20 = vld [vmem:[%s1258_s7 + $0x18] sm:$0xff]   ;;  %v1121_v21 = vld [vmem:[%s1260_s8] sm:$0xff]   ;;  %v1118_v24 = vld [vmem:[%s1258_s7 + $0x28] sm:$0xff]  }
  0x33   : > { %1025 = vmatpush3.bf16.msra.mxu0 %v1113_v17  ;;  %1064 = vmatpush3.bf16.msra.mxu1 %v1113_v17  ;;  %v1122_v22 = vld [vmem:[%s1260_s8 + $0x20] sm:$0xff]   ;;  %v1119_v25 = vld [vmem:[%s1258_s7 + $0x30] sm:$0xff]   ;;  %v1120_v26 = vld [vmem:[%s1258_s7 + $0x38] sm:$0xff]  }
  0x34   : > { %1026 = vmatprep.subr.bf16.mxu0 %v1114_v18  ;;  %1057 = vmatprep.subr.bf16.mxu1 %v1114_v18  ;;  %v1117_v23 = vld [vmem:[%s1258_s7 + $0x20] sm:$0xff]   ;;  %v1123_v27 = vld [vmem:[%s1260_s8 + $0x8] sm:$0xff]   ;;  %v1125_v29 = vld [vmem:[%s1260_s8 + $0x10] sm:$0xff]  }
  0x35   : > { %1040 = vmatprep.mubr.bf16.mxu0 %v1121_v21  ;;  %1048 = vmatprep.mubr.bf16.mxu1 %v1122_v22  ;;  %v1124_v28 = vld [vmem:[%s1260_s8 + $0x28] sm:$0xff]   ;;  %v1126_v30 = vld [vmem:[%s1260_s8 + $0x30] sm:$0xff]   ;;  %v1127_v31 = vld [vmem:[%s1260_s8 + $0x18] sm:$0xff]  }
  0x36   : > { %v1128_v32 = vld [vmem:[%s1260_s8 + $0x38] sm:$0xff]   ;;  %v376_v33 = vld [vmem:[#allocation2 + $0x10] sm:$0xff]  ;;  %v374_v35 = vld [vmem:[#allocation2] sm:$0xff] }
  0x37   : > { %1027 = vmatpush3.bf16.msra.mxu0 %v1114_v18  ;;  %1065 = vmatpush3.bf16.msra.mxu1 %v1114_v18  ;;  %v384_v34 = vld [vmem:[#allocation2 + $0x50] sm:$0xff]  ;;  %v382_v36 = vld [vmem:[#allocation2 + $0x40] sm:$0xff]  ;;  %v377_v39 = vld [vmem:[#allocation2 + $0x18] sm:$0xff] }
  0x38   : > { %1028 = vmatprep.subr.bf16.mxu0 %v1115_v19  ;;  %1058 = vmatprep.subr.bf16.mxu1 %v1115_v19  ;;  %v385_v40 = vld [vmem:[#allocation2 + $0x58] sm:$0xff]  ;;  %v375_v45 = vld [vmem:[#allocation2 + $0x8] sm:$0xff]  ;;  %v380_v57 = vld [vmem:[#allocation2 + $0x30] sm:$0xff] }
  0x39   : > { %v383_v46 = vld [vmem:[#allocation2 + $0x48] sm:$0xff]  ;;  %v388_v58 = vld [vmem:[#allocation2 + $0x70] sm:$0xff]  ;;  %v378_v59 = vld [vmem:[#allocation2 + $0x20] sm:$0xff] }
  0x3a   : > { %v386_v60 = vld [vmem:[#allocation2 + $0x60] sm:$0xff]  ;;  %v381_v63 = vld [vmem:[#allocation2 + $0x38] sm:$0xff]  ;;  %v379_v5 = vld [vmem:[#allocation2 + $0x28] sm:$0xff] }
  0x3b   : > { %1029 = vmatpush3.bf16.msra.mxu0 %v1115_v19  ;;  %1066 = vmatpush3.bf16.msra.mxu1 %v1115_v19  ;;  %v389_v0 = vld [vmem:[#allocation2 + $0x78] sm:$0xff]  ;;  %v387_v6 = vld [vmem:[#allocation2 + $0x68] sm:$0xff]  ;;  %v924_v19 = vld [vmem:[%s1324_s2] ss:$0 sm:$0xff] (!%p923_p11) }
  0x3c   : > { %1030 = vmatprep.subr.bf16.mxu0 %v1116_v20  ;;  %1059 = vmatprep.subr.bf16.mxu1 %v1116_v20 }
  0x3f   : > { %1031 = vmatpush3.bf16.msra.mxu0 %v1116_v20  ;;  %1067 = vmatpush3.bf16.msra.mxu1 %v1116_v20 }
  0x40   : > { %1032 = vmatprep.subr.bf16.mxu0 %v1117_v23  ;;  %1060 = vmatprep.subr.bf16.mxu1 %v1117_v23 }
  0x43   : > { %1033 = vmatpush3.bf16.msra.mxu0 %v1117_v23  ;;  %1068 = vmatpush3.bf16.msra.mxu1 %v1117_v23 }
  0x44   : > { %1034 = vmatprep.subr.bf16.mxu0 %v1118_v24  ;;  %1061 = vmatprep.subr.bf16.mxu1 %v1118_v24 }
  0x47   : > { %1035 = vmatpush3.bf16.msra.mxu0 %v1118_v24  ;;  %1069 = vmatpush3.bf16.msra.mxu1 %v1118_v24 }
  0x48   : > { %1036 = vmatprep.subr.bf16.mxu0 %v1119_v25  ;;  %1062 = vmatprep.subr.bf16.mxu1 %v1119_v25 }
  0x4b   : > { %1037 = vmatpush3.bf16.msra.mxu0 %v1119_v25  ;;  %1070 = vmatpush3.bf16.msra.mxu1 %v1119_v25 }
  0x4c   : > { %1038 = vmatprep.subr.bf16.mxu0 %v1120_v26  ;;  %1063 = vmatprep.subr.bf16.mxu1 %v1120_v26 }
  0x4f   : > { %1039 = vmatpush3.bf16.msra.mxu0 %v1120_v26  ;;  %1071 = vmatpush3.bf16.msra.mxu1 %v1120_v26 }
  0x52   : > { %1041 = vmatmul.mubr.bf16.vlgmr.msra.gmra.mrb[0].mxu0 %v1123_v27  ;;  %1049 = vmatmul.mubr.bf16.vlgmr.msra.gmra.mrb[0].mxu1 %v1124_v28 }
  0x53   : > { %1044 = vmatprep.mubr.bf16.mxu0 %v1125_v29  ;;  %1052 = vmatprep.mubr.bf16.mxu1 %v1126_v30 }
  0x5a   : > { %1045 = vmatmul.mubr.bf16.gmra.mrb[4].mxu0 %v1127_v31  ;;  %1053 = vmatmul.mubr.bf16.gmra.mrb[4].mxu1 %v1128_v32 }
 0x125   : > { %v1042_v37 = vpop.f32.mrb[0].mxu0  ;;  %v1050_v38 = vpop.f32.mrb[0].mxu1 }
 0x126   : > { %v617_v41 = vadd.f32 %v1042_v37, %v376_v33  ;;  %v625_v42 = vadd.f32 %v1050_v38, %v384_v34  ;;  %v552_v43 = vpop.f32.mrb[1].mxu0  ;;  %v584_v44 = vpop.f32.mrb[1].mxu1 }
 0x127   : > { %v615_v47 = vadd.f32 %v552_v43, %v374_v35  ;;  %v623_v48 = vadd.f32 %v584_v44, %v382_v36  ;;  %v1043_v49 = vpop.f32.mrb[2].mxu0  ;;  %v1051_v50 = vpop.f32.mrb[2].mxu1 }
 0x128   : > { %633 = vst [vmem:[#allocation2 + $0x10] sm:$0xff] %v617_v41  ;;  %641 = vst [vmem:[#allocation2 + $0x50] sm:$0xff] %v625_v42  ;;  %v618_v51 = vadd.f32 %v1043_v49, %v377_v39  ;;  %v626_v52 = vadd.f32 %v1051_v50, %v385_v40  ;;  %v555_v53 = vpop.f32.mrb[3].mxu0  ;;  %v587_v54 = vpop.f32.mrb[3].mxu1 }
 0x129   : > { %631 = vst [vmem:[#allocation2] sm:$0xff] %v615_v47  ;;  %639 = vst [vmem:[#allocation2 + $0x40] sm:$0xff] %v623_v48  ;;  %v616_v55 = vadd.f32 %v555_v53, %v375_v45  ;;  %v624_v56 = vadd.f32 %v587_v54, %v383_v46 }
 0x12a   : > { %634 = vst [vmem:[#allocation2 + $0x18] sm:$0xff] %v618_v51  ;;  %642 = vst [vmem:[#allocation2 + $0x58] sm:$0xff] %v626_v52 }
 0x12b   : > { %632 = vst [vmem:[#allocation2 + $0x8] sm:$0xff] %v616_v55  ;;  %640 = vst [vmem:[#allocation2 + $0x48] sm:$0xff] %v624_v56 }
 0x12d   : > { %v1046_v61 = vpop.f32.mrb[4].mxu0  ;;  %v1054_v62 = vpop.f32.mrb[4].mxu1  ;;  %650 = sbr.rel (%p923_p11) target bundleno = 323 (0x143), region = 81 }
 0x12e   : > { %v621_v1 = vadd.f32 %v1046_v61, %v380_v57  ;;  %v629_v2 = vadd.f32 %v1054_v62, %v388_v58  ;;  %v568_v3 = vpop.f32.mrb[5].mxu0  ;;  %v600_v4 = vpop.f32.mrb[5].mxu1 }
 0x12f   : > { %v619_v7 = vadd.f32 %v568_v3, %v378_v59  ;;  %v627_v8 = vadd.f32 %v600_v4, %v386_v60  ;;  %v1047_v9 = vpop.f32.mrb[6].mxu0  ;;  %v1055_v10 = vpop.f32.mrb[6].mxu1  ;;  %v653_v22 = vld [vmem:[#allocation2 + $0x10] sm:$0xff] (!%p923_p11) }
 0x130   : > { %637 = vst [vmem:[#allocation2 + $0x30] sm:$0xff] %v621_v1  ;;  %645 = vst [vmem:[#allocation2 + $0x70] sm:$0xff] %v629_v2  ;;  %v622_v11 = vadd.f32 %v1047_v9, %v381_v63  ;;  %v630_v12 = vadd.f32 %v1055_v10, %v389_v0  ;;  %v571_v13 = vpop.f32.mrb[7].mxu0  ;;  %v603_v14 = vpop.f32.mrb[7].mxu1  ;;  %v651_v17 = vld [vmem:[#allocation2] sm:$0xff] (!%p923_p11)  ;;  %v676_v25 = vadd.f32 (!%p923_p11), %v924_v19, %v653_v22  ;;  %v661_v37 = vld [vmem:[#allocation2 + $0x50] sm:$0xff] (!%p923_p11) }
 0x131   : > { %635 = vst [vmem:[#allocation2 + $0x20] sm:$0xff] %v619_v7  ;;  %643 = vst [vmem:[#allocation2 + $0x60] sm:$0xff] %v627_v8  ;;  %v620_v15 = vadd.f32 %v571_v13, %v379_v5  ;;  %v628_v16 = vadd.f32 %v603_v14, %v387_v6  ;;  %v674_v20 = vadd.f32 (!%p923_p11), %v924_v19, %v651_v17  ;;  %v654_v23 = vld [vmem:[#allocation2 + $0x18] sm:$0xff] (!%p923_p11)  ;;  %v659_v35 = vld [vmem:[#allocation2 + $0x40] sm:$0xff] (!%p923_p11) }
 0x132   : > { %638 = vst [vmem:[#allocation2 + $0x38] sm:$0xff] %v622_v11  ;;  %646 = vst [vmem:[#allocation2 + $0x78] sm:$0xff] %v630_v12  ;;  %v652_v18 = vld [vmem:[#allocation2 + $0x8] sm:$0xff] (!%p923_p11)  ;;  %v677_v26 = vadd.f32 (!%p923_p11), %v924_v19, %v654_v23  ;;  %v692_v38 = vmax.f32 (!%p923_p11), %v676_v25, 0.0  ;;  %v662_v42 = vld [vmem:[#allocation2 + $0x58] sm:$0xff] (!%p923_p11)  ;;  %v682_v47 = vadd.f32 (!%p923_p11), %v924_v19, %v659_v35  ;;  %v684_v52 = vadd.f32 (!%p923_p11), %v924_v19, %v661_v37 }
 0x133   : > { %636 = vst [vmem:[#allocation2 + $0x28] sm:$0xff] %v620_v15  ;;  %644 = vst [vmem:[#allocation2 + $0x68] sm:$0xff] %v628_v16  ;;  %v675_v21 = vadd.f32 (!%p923_p11), %v924_v19, %v652_v18  ;;  %v690_v31 = vmax.f32 (!%p923_p11), %v674_v20, 0.0  ;;  %v660_v36 = vld [vmem:[#allocation2 + $0x48] sm:$0xff] (!%p923_p11)  ;;  %v685_v57 = vadd.f32 (!%p923_p11), %v924_v19, %v662_v42 }
 0x134   : > { %v693_v39 = vmax.f32 %v677_v26, 0.0  ;;  %v683_v51 = vadd.f32 %v924_v19, %v660_v36  ;;  %v698_v56 = vmax.f32 %v682_v47, 0.0  ;;  %v700_v61 = vmax.f32 %v684_v52, 0.0 }
 0x135   : > { %v691_v32 = vmax.f32 %v675_v21, 0.0  ;;  %v701_v63 = vmax.f32 %v685_v57, 0.0 }
 0x136   : > { %v969_v49 = vpack.c.bf16 %v693_v39, %v692_v38  ;;  %v699_v60 = vmax.f32 %v683_v51, 0.0 }
 0x137   : > { %v657_v29 = vld [vmem:[#allocation2 + $0x30] sm:$0xff]  ;;  %v964_v44 = vpack.c.bf16 %v691_v32, %v690_v31  ;;  %v989_v5 = vpack.c.bf16 %v701_v63, %v700_v61 }
 0x138   : > { %v655_v24 = vld [vmem:[#allocation2 + $0x20] sm:$0xff]  ;;  %v680_v34 = vadd.f32 %v924_v19, %v657_v29  ;;  %v665_v53 = vld [vmem:[#allocation2 + $0x70] sm:$0xff]  ;;  %1001 = vst [vmem:[%s1325_s3 + $0x8] sm:$0xff] %v969_v49   ;;  %v984_v3 = vpack.c.bf16 %v699_v60, %v698_v56 }
 0x139   : > { %v678_v28 = vadd.f32 %v924_v19, %v655_v24  ;;  %v658_v30 = vld [vmem:[#allocation2 + $0x38] sm:$0xff]  ;;  %v663_v43 = vld [vmem:[#allocation2 + $0x60] sm:$0xff]  ;;  %965 = vst [vmem:[%s1325_s3] sm:$0xff] %v964_v44   ;;  %v688_v1 = vadd.f32 %v924_v19, %v665_v53  ;;  %1005 = vst [vmem:[%s1325_s3 + $0x28] sm:$0xff] %v989_v5  }
 0x13a   : > { %v656_v27 = vld [vmem:[#allocation2 + $0x28] sm:$0xff]  ;;  %v681_v41 = vadd.f32 %v924_v19, %v658_v30  ;;  %v696_v46 = vmax.f32 %v680_v34, 0.0  ;;  %v666_v54 = vld [vmem:[#allocation2 + $0x78] sm:$0xff]  ;;  %v686_v58 = vadd.f32 %v924_v19, %v663_v43  ;;  %1004 = vst [vmem:[%s1325_s3 + $0x20] sm:$0xff] %v984_v3  }
 0x13b   : > { %v679_v33 = vadd.f32 %v924_v19, %v656_v27  ;;  %v694_v40 = vmax.f32 %v678_v28, 0.0  ;;  %v664_v48 = vld [vmem:[#allocation2 + $0x68] sm:$0xff]  ;;  %v689_v2 = vadd.f32 %v924_v19, %v666_v54  ;;  %v704_v6 = vmax.f32 %v688_v1, 0.0 }
 0x13c   : > { %v697_v50 = vmax.f32 %v681_v41, 0.0  ;;  %v687_v62 = vadd.f32 %v924_v19, %v664_v48  ;;  %v702_v0 = vmax.f32 %v686_v58, 0.0 }
 0x13d   : > { %v695_v45 = vmax.f32 %v679_v33, 0.0  ;;  %v705_v7 = vmax.f32 %v689_v2, 0.0 }
 0x13e   : > { %v979_v59 = vpack.c.bf16 %v697_v50, %v696_v46  ;;  %v703_v4 = vmax.f32 %v687_v62, 0.0 }
 0x13f   : > { %v974_v55 = vpack.c.bf16 %v695_v45, %v694_v40  ;;  %v999_v9 = vpack.c.bf16 %v705_v7, %v704_v6 }
 0x140   : > { %1003 = vst [vmem:[%s1325_s3 + $0x18] sm:$0xff] %v979_v59   ;;  %v994_v8 = vpack.c.bf16 %v703_v4, %v702_v0 }
 0x141   : > { %1002 = vst [vmem:[%s1325_s3 + $0x10] sm:$0xff] %v974_v55   ;;  %1007 = vst [vmem:[%s1325_s3 + $0x38] sm:$0xff] %v999_v9  }
 0x142   : > { %1006 = vst [vmem:[%s1325_s3 + $0x30] sm:$0xff] %v994_v8  }
 0x143 PF: > { %s13_s16 = sadd.s32 1, %s1167_s16   ;;  %s1326_s12 = smov %s1155_s13 }
 0x144   : > { %p10_p12 = scmp.ge.s32.totalorder %s13_s16, 7   ;;  %s1327_s13 = smov %s1225_s20 }
 0x145   : > { %s1328_s14 = smov %s1163_s15  ;;  %s1329_s15 = smov %s1331_s17 }
 0x146   :  { %12 = sbr.rel (!%p10_p12) target bundleno = 3 (0x3), region = 122 }

// kernel: _lambda_.20
= control target key start
LH: loop header
LB: loop body
LE: loop exit
PB: predicated region body
PF: predicated region fallthrough
CT: control target
= control target key end

     0   :  { %s1361_s15 = smov 0   ;;  %s1363_s16 = smov 0   ;;  %s1535_s0 = inlined_call_operand.vmem [shape: bf16[128,1152], index: 0, kind: input, shape index: {}]   ;;  %s1536_s1 = inlined_call_operand.vmem [shape: bf16[1152,128], index: 1, kind: input, shape index: {}]   ;;  %s1537_s2 = inlined_call_operand.vmem [shape: f32[1,128], index: 2, kind: input, shape index: {}]   ;;  %s1538_s3 = inlined_call_operand.vmem [shape: bf16[128,128], index: 3, kind: input, shape index: {}]   ;;  %s1539_s4 = inlined_call_operand.vmem [shape: bf16[128,128], index: 4, kind: output, shape index: {}]  }
   0x1   :  { %s1365_s17 = smov 0   ;;  %s1367_s18 = smov 0  }
   0x2   :  { %s1369_s19 = smov 0  }
   0x3 LB: > { %s26_s20 = sadd.s32 1, %s1329_s18  ;;  %p49_p1 = scmp.ne.s32.totalorder %s1321_s16, %s1317_s15  ;;  %s1333_s19 = sphi %s1369_s19, %s14_s19   ;;  %s1329_s18 = sphi %s1367_s18, %s1543_s18   ;;  %s1325_s17 = sphi %s1365_s17, %s1542_s17   ;;  %s1321_s16 = sphi %s1363_s16, %s1541_s16   ;;  %s1317_s15 = sphi %s1361_s15, %s1540_s15  }
   0x4   : > { %p27_p0 = scmp.ge.s32.totalorder %s26_s20, 9  ;;  %p50_p2 = scmp.eq.s32.totalorder %s1333_s19, 0 }
   0x5   : > { %s42_s22 = sadd.s32 1, %s1321_s16  ;;  %p1026_p5 = scmp.ge.s32.totalorder %s1333_s19, 9 }
   0x6   : > { %s1545_s20 = smov (%p27_p0, %s26_s20), 0  ;;  %p51_p3 = por %p50_p2, %p49_p1 }
   0x7   : > { %s38_s21 = ssub.s32 %s1329_s18, %s1545_s20  ;;  %203 = sbr.rel (%p1026_p5) target bundleno = 28 (0x1c), region = 24 }
   0x8   : > { %p40_p4 = scmp.eq.s32.totalorder %s38_s21, 0 }
   0xa   : > { %s1396_s23 = scalar_select %p40_p4, %s1321_s16, %s42_s22  }
   0xe   : > { %206 = sbr.rel (!%p51_p3) target bundleno = 28 (0x1c), region = 28  ;;  %s208_s24 = sand.u32 (%p51_p3), 1, %s1321_s16  }
   0xf   : > { %s1028_s25 = sshll.u32 (%p51_p3), %s1329_s18, 2  ;;  %s1027_s26 = sshll.u32 (%p51_p3), %s208_s24, 6 }
  0x10   : > { %s1404_s29 = scalar_lea.vmem (%p51_p3), %s1535_s0, %s1028_s25  ;;  %s210_s30 = scalar_lea.vmem (%p51_p3), [#allocation3], %s1027_s26 }
  0x11   : > { %v231_v0 = vld [vmem:[%s1404_s29] sm:$0xf] (%p51_p3)  ;;  %v233_v1 = vld [vmem:[%s1404_s29 + $0x24] sm:$0xf] (%p51_p3)  ;;  %v235_v2 = vld [vmem:[%s1404_s29 + $0x48] sm:$0xf] (%p51_p3) }
  0x12   : > { %232 = vst [vmem:[%s210_s30] sm:$0xf] (%p51_p3), %v231_v0  ;;  %234 = vst [vmem:[%s210_s30 + $0x4] sm:$0xf] (%p51_p3), %v233_v1  ;;  %v237_v3 = vld [vmem:[%s1404_s29 + $0x6c] sm:$0xf] (%p51_p3) }
  0x13   : > { %v239_v4 = vld [vmem:[%s1404_s29 + $0x90] sm:$0xf] (%p51_p3)  ;;  %236 = vst [vmem:[%s210_s30 + $0x8] sm:$0xf] (%p51_p3), %v235_v2  ;;  %238 = vst [vmem:[%s210_s30 + $0xc] sm:$0xf] (%p51_p3), %v237_v3 }
  0x14   : > { %240 = vst [vmem:[%s210_s30 + $0x10] sm:$0xf] (%p51_p3), %v239_v4  ;;  %v241_v5 = vld [vmem:[%s1404_s29 + $0xb4] sm:$0xf] (%p51_p3)  ;;  %v243_v6 = vld [vmem:[%s1404_s29 + $0xd8] sm:$0xf] (%p51_p3) }
  0x15   : > { %v245_v7 = vld [vmem:[%s1404_s29 + $0xfc] sm:$0xf]  ;;  %242 = vst [vmem:[%s210_s30 + $0x14] sm:$0xf] %v241_v5  ;;  %244 = vst [vmem:[%s210_s30 + $0x18] sm:$0xf] %v243_v6 }
  0x16   : > { %246 = vst [vmem:[%s210_s30 + $0x1c] sm:$0xf] %v245_v7  ;;  %v247_v8 = vld [vmem:[%s1404_s29 + $0x120] sm:$0xf]  ;;  %v249_v9 = vld [vmem:[%s1404_s29 + $0x144] sm:$0xf] }
  0x17   : > { %v251_v10 = vld [vmem:[%s1404_s29 + $0x168] sm:$0xf]  ;;  %248 = vst [vmem:[%s210_s30 + $0x20] sm:$0xf] %v247_v8  ;;  %250 = vst [vmem:[%s210_s30 + $0x24] sm:$0xf] %v249_v9 }
  0x18   : > { %252 = vst [vmem:[%s210_s30 + $0x28] sm:$0xf] %v251_v10  ;;  %v253_v11 = vld [vmem:[%s1404_s29 + $0x18c] sm:$0xf]  ;;  %v255_v12 = vld [vmem:[%s1404_s29 + $0x1b0] sm:$0xf] }
  0x19   : > { %v257_v13 = vld [vmem:[%s1404_s29 + $0x1d4] sm:$0xf]  ;;  %254 = vst [vmem:[%s210_s30 + $0x2c] sm:$0xf] %v253_v11  ;;  %256 = vst [vmem:[%s210_s30 + $0x30] sm:$0xf] %v255_v12 }
  0x1a   : > { %258 = vst [vmem:[%s210_s30 + $0x34] sm:$0xf] %v257_v13  ;;  %v259_v14 = vld [vmem:[%s1404_s29 + $0x1f8] sm:$0xf]  ;;  %v261_v15 = vld [vmem:[%s1404_s29 + $0x21c] sm:$0xf] }
  0x1b   : > { %260 = vst [vmem:[%s210_s30 + $0x38] sm:$0xf] %v259_v14  ;;  %262 = vst [vmem:[%s210_s30 + $0x3c] sm:$0xf] %v261_v15 }
  0x1c PF: > { %p1029_p6 = scmp.ge.s32.totalorder %s1333_s19, 1  ;;  %p328_p7 = scmp.lt.s32.totalorder %s1333_s19, 10 }
  0x1e   : > { %p329_p8 = pnand %p1029_p6, %p328_p7 }
  0x1f   : > { %s335_s5 = sand.u32 (!%p329_p8), 1, %s1317_s15   ;;  %s1031_s6 = sshll.u32 (!%p329_p8), %s1325_s17, 4 }
  0x20   : > { %332 = sbr.rel (%p329_p8) target bundleno = 328 (0x148), region = 73  ;;  %s1030_s7 = sshll.u32 (!%p329_p8), %s335_s5, 6 }
  0x21   : > { %p384_p9 = scmp.lt.s32.totalorder (!%p329_p8), %s1031_s6, 143  ;;  %s1431_s12 = scalar_lea.vmem (!%p329_p8), [#allocation3], %s1030_s7 }
  0x22   : > { %p1033_p10 = scmp.ne.s32.totalorder (!%p329_p8), %s1325_s17, 0 }
  0x27   : > { %s1547_s6 = smov (!%p384_p9, %s1031_s6), 143  ;;  %417 = sbr.rel (%p1033_p10) target bundleno = 49 (0x31), region = 81 }
  0x28   : > { %s1032_s8 = sshll.u32 %s1547_s6, 2  ;;  %v1335_v16 = vmov (!%p1033_p10), 0.0  }
  0x29   : > { %s1429_s11 = scalar_lea.vmem %s1536_s1, %s1032_s8  ;;  %418 = vst [vmem:[#allocation2] sm:$0xff] (!%p1033_p10), %v1335_v16  ;;  %419 = vst [vmem:[#allocation2 + $0x8] sm:$0xff] (!%p1033_p10), %v1335_v16 }
  0x2a   : > { %420 = vst [vmem:[#allocation2 + $0x10] sm:$0xff] (!%p1033_p10), %v1335_v16  ;;  %421 = vst [vmem:[#allocation2 + $0x18] sm:$0xff] (!%p1033_p10), %v1335_v16 }
  0x2b   : > { %422 = vst [vmem:[#allocation2 + $0x20] sm:$0xff] (!%p1033_p10), %v1335_v16  ;;  %423 = vst [vmem:[#allocation2 + $0x28] sm:$0xff] (!%p1033_p10), %v1335_v16 }
  0x2c   : > { %424 = vst [vmem:[#allocation2 + $0x30] sm:$0xff] (!%p1033_p10), %v1335_v16  ;;  %425 = vst [vmem:[#allocation2 + $0x38] sm:$0xff] (!%p1033_p10), %v1335_v16 }
  0x2d   : > { %426 = vst [vmem:[#allocation2 + $0x40] sm:$0xff] (!%p1033_p10), %v1335_v16  ;;  %427 = vst [vmem:[#allocation2 + $0x48] sm:$0xff] (!%p1033_p10), %v1335_v16 }
  0x2e   : > { %428 = vst [vmem:[#allocation2 + $0x50] sm:$0xff] %v1335_v16  ;;  %429 = vst [vmem:[#allocation2 + $0x58] sm:$0xff] %v1335_v16 }
  0x2f   : > { %430 = vst [vmem:[#allocation2 + $0x60] sm:$0xff] %v1335_v16  ;;  %431 = vst [vmem:[#allocation2 + $0x68] sm:$0xff] %v1335_v16 }
  0x30   : > { %432 = vst [vmem:[#allocation2 + $0x70] sm:$0xff] %v1335_v16  ;;  %433 = vst [vmem:[#allocation2 + $0x78] sm:$0xff] %v1335_v16 }
  0x31 PF: > { %v1279_v17 = vld [vmem:[%s1429_s11] sm:$0xff]   ;;  %v1280_v18 = vld [vmem:[%s1429_s11 + $0x8] sm:$0xff]   ;;  %v1281_v19 = vld [vmem:[%s1429_s11 + $0x10] sm:$0xff]   ;;  %p1050_p11 = scmp.ne.s32.totalorder %s1325_s17, 8 }
  0x32   : > { %1190 = vmatprep.subr.bf16.mxu0 %v1279_v17  ;;  %1222 = vmatprep.subr.bf16.mxu1 %v1279_v17  ;;  %v1282_v20 = vld [vmem:[%s1429_s11 + $0x18] sm:$0xff]   ;;  %v1287_v21 = vld [vmem:[%s1431_s12] sm:$0xff]   ;;  %v1284_v24 = vld [vmem:[%s1429_s11 + $0x28] sm:$0xff]  }
  0x33   : > { %1191 = vmatpush3.bf16.msra.mxu0 %v1279_v17  ;;  %1230 = vmatpush3.bf16.msra.mxu1 %v1279_v17  ;;  %v1288_v22 = vld [vmem:[%s1431_s12 + $0x20] sm:$0xff]   ;;  %v1285_v25 = vld [vmem:[%s1429_s11 + $0x30] sm:$0xff]   ;;  %v1286_v26 = vld [vmem:[%s1429_s11 + $0x38] sm:$0xff]  }
  0x34   : > { %1192 = vmatprep.subr.bf16.mxu0 %v1280_v18  ;;  %1223 = vmatprep.subr.bf16.mxu1 %v1280_v18  ;;  %v1283_v23 = vld [vmem:[%s1429_s11 + $0x20] sm:$0xff]   ;;  %v1289_v27 = vld [vmem:[%s1431_s12 + $0x8] sm:$0xff]   ;;  %v1291_v29 = vld [vmem:[%s1431_s12 + $0x10] sm:$0xff]  }
  0x35   : > { %1206 = vmatprep.mubr.bf16.mxu0 %v1287_v21  ;;  %1214 = vmatprep.mubr.bf16.mxu1 %v1288_v22  ;;  %v1290_v28 = vld [vmem:[%s1431_s12 + $0x28] sm:$0xff]   ;;  %v1292_v30 = vld [vmem:[%s1431_s12 + $0x30] sm:$0xff]   ;;  %v1293_v31 = vld [vmem:[%s1431_s12 + $0x18] sm:$0xff]  }
  0x36   : > { %v1294_v32 = vld [vmem:[%s1431_s12 + $0x38] sm:$0xff]   ;;  %v436_v33 = vld [vmem:[#allocation2 + $0x10] sm:$0xff]  ;;  %v434_v35 = vld [vmem:[#allocation2] sm:$0xff] }
  0x37   : > { %1193 = vmatpush3.bf16.msra.mxu0 %v1280_v18  ;;  %1231 = vmatpush3.bf16.msra.mxu1 %v1280_v18  ;;  %v444_v34 = vld [vmem:[#allocation2 + $0x50] sm:$0xff]  ;;  %v442_v36 = vld [vmem:[#allocation2 + $0x40] sm:$0xff]  ;;  %v437_v39 = vld [vmem:[#allocation2 + $0x18] sm:$0xff] }
  0x38   : > { %1194 = vmatprep.subr.bf16.mxu0 %v1281_v19  ;;  %1224 = vmatprep.subr.bf16.mxu1 %v1281_v19  ;;  %v445_v40 = vld [vmem:[#allocation2 + $0x58] sm:$0xff]  ;;  %v435_v45 = vld [vmem:[#allocation2 + $0x8] sm:$0xff]  ;;  %v440_v57 = vld [vmem:[#allocation2 + $0x30] sm:$0xff] }
  0x39   : > { %v443_v46 = vld [vmem:[#allocation2 + $0x48] sm:$0xff]  ;;  %v448_v58 = vld [vmem:[#allocation2 + $0x70] sm:$0xff]  ;;  %v438_v59 = vld [vmem:[#allocation2 + $0x20] sm:$0xff] }
  0x3a   : > { %v446_v60 = vld [vmem:[#allocation2 + $0x60] sm:$0xff]  ;;  %v441_v63 = vld [vmem:[#allocation2 + $0x38] sm:$0xff]  ;;  %v439_v5 = vld [vmem:[#allocation2 + $0x28] sm:$0xff] }
  0x3b   : > { %1195 = vmatpush3.bf16.msra.mxu0 %v1281_v19  ;;  %1232 = vmatpush3.bf16.msra.mxu1 %v1281_v19  ;;  %v449_v0 = vld [vmem:[#allocation2 + $0x78] sm:$0xff]  ;;  %v447_v6 = vld [vmem:[#allocation2 + $0x68] sm:$0xff]  ;;  %v1454_v19 = vld [vmem:[%s1537_s2] ss:$0 sm:$0xff] (!%p1050_p11) }
  0x3c   : > { %1196 = vmatprep.subr.bf16.mxu0 %v1282_v20  ;;  %1225 = vmatprep.subr.bf16.mxu1 %v1282_v20  ;;  %v1089_v22 = vld [vmem:[%s1538_s3] sm:$0xff] (!%p1050_p11)  }
  0x3f   : > { %1197 = vmatpush3.bf16.msra.mxu0 %v1282_v20  ;;  %1233 = vmatpush3.bf16.msra.mxu1 %v1282_v20 }
  0x40   : > { %1198 = vmatprep.subr.bf16.mxu0 %v1283_v23  ;;  %1226 = vmatprep.subr.bf16.mxu1 %v1283_v23 }
  0x43   : > { %1199 = vmatpush3.bf16.msra.mxu0 %v1283_v23  ;;  %1234 = vmatpush3.bf16.msra.mxu1 %v1283_v23 }
  0x44   : > { %1200 = vmatprep.subr.bf16.mxu0 %v1284_v24  ;;  %1227 = vmatprep.subr.bf16.mxu1 %v1284_v24 }
  0x47   : > { %1201 = vmatpush3.bf16.msra.mxu0 %v1284_v24  ;;  %1235 = vmatpush3.bf16.msra.mxu1 %v1284_v24 }
  0x48   : > { %1202 = vmatprep.subr.bf16.mxu0 %v1285_v25  ;;  %1228 = vmatprep.subr.bf16.mxu1 %v1285_v25 }
  0x4b   : > { %1203 = vmatpush3.bf16.msra.mxu0 %v1285_v25  ;;  %1236 = vmatpush3.bf16.msra.mxu1 %v1285_v25  ;;  %v1090_v25 = vunpack.c.l.bf16 (!%p1050_p11), %v1089_v22 }
  0x4c   : > { %1204 = vmatprep.subr.bf16.mxu0 %v1286_v26  ;;  %1229 = vmatprep.subr.bf16.mxu1 %v1286_v26 }
  0x4f   : > { %1205 = vmatpush3.bf16.msra.mxu0 %v1286_v26  ;;  %1237 = vmatpush3.bf16.msra.mxu1 %v1286_v26  ;;  %v1091_v26 = vunpack.c.h.bf16 (!%p1050_p11), %v1089_v22 }
  0x52   : > { %1207 = vmatmul.mubr.bf16.vlgmr.msra.gmra.mrb[0].mxu0 %v1289_v27  ;;  %1215 = vmatmul.mubr.bf16.vlgmr.msra.gmra.mrb[0].mxu1 %v1290_v28 }
  0x53   : > { %1210 = vmatprep.mubr.bf16.mxu0 %v1291_v29  ;;  %1218 = vmatprep.mubr.bf16.mxu1 %v1292_v30  ;;  %v1160_v29 = vld [vmem:[%s1538_s3 + $0x8] sm:$0xff] (!%p1050_p11)  }
  0x5a   : > { %1211 = vmatmul.mubr.bf16.gmra.mrb[4].mxu0 %v1293_v31  ;;  %1219 = vmatmul.mubr.bf16.gmra.mrb[4].mxu1 %v1294_v32  ;;  %v1094_v32 = vunpack.c.l.bf16 (!%p1050_p11), %v1160_v29 }
 0x125   : > { %v1208_v37 = vpop.f32.mrb[0].mxu0  ;;  %v1216_v38 = vpop.f32.mrb[0].mxu1 }
 0x126   : > { %v677_v41 = vadd.f32 %v1208_v37, %v436_v33  ;;  %v685_v42 = vadd.f32 %v1216_v38, %v444_v34  ;;  %v612_v43 = vpop.f32.mrb[1].mxu0  ;;  %v644_v44 = vpop.f32.mrb[1].mxu1  ;;  %v1095_v33 = vunpack.c.h.bf16 (!%p1050_p11), %v1160_v29 }
 0x127   : > { %v675_v47 = vadd.f32 %v612_v43, %v434_v35  ;;  %v683_v48 = vadd.f32 %v644_v44, %v442_v36  ;;  %v1209_v49 = vpop.f32.mrb[2].mxu0  ;;  %v1217_v50 = vpop.f32.mrb[2].mxu1  ;;  %v1161_v36 = vld [vmem:[%s1538_s3 + $0x10] sm:$0xff] (!%p1050_p11)   ;;  %v1162_v43 = vld [vmem:[%s1538_s3 + $0x18] sm:$0xff] (!%p1050_p11)  }
 0x128   : > { %693 = vst [vmem:[#allocation2 + $0x10] sm:$0xff] %v677_v41  ;;  %701 = vst [vmem:[#allocation2 + $0x50] sm:$0xff] %v685_v42  ;;  %v678_v51 = vadd.f32 %v1209_v49, %v437_v39  ;;  %v686_v52 = vadd.f32 %v1217_v50, %v445_v40  ;;  %v615_v53 = vpop.f32.mrb[3].mxu0  ;;  %v647_v54 = vpop.f32.mrb[3].mxu1  ;;  %v1098_v41 = vunpack.c.l.bf16 (!%p1050_p11), %v1161_v36  ;;  %v1099_v42 = vunpack.c.h.bf16 (!%p1050_p11), %v1161_v36 }
 0x129   : > { %691 = vst [vmem:[#allocation2] sm:$0xff] %v675_v47  ;;  %699 = vst [vmem:[#allocation2 + $0x40] sm:$0xff] %v683_v48  ;;  %v676_v55 = vadd.f32 %v615_v53, %v435_v45  ;;  %v684_v56 = vadd.f32 %v647_v54, %v443_v46 }
 0x12a   : > { %694 = vst [vmem:[#allocation2 + $0x18] sm:$0xff] %v678_v51  ;;  %702 = vst [vmem:[#allocation2 + $0x58] sm:$0xff] %v686_v52 }
 0x12b   : > { %692 = vst [vmem:[#allocation2 + $0x8] sm:$0xff] %v676_v55  ;;  %700 = vst [vmem:[#allocation2 + $0x48] sm:$0xff] %v684_v56  ;;  %v1102_v56 = vunpack.c.l.bf16 (!%p1050_p11), %v1162_v43 }
 0x12d   : > { %v1212_v61 = vpop.f32.mrb[4].mxu0  ;;  %v1220_v62 = vpop.f32.mrb[4].mxu1  ;;  %710 = sbr.rel (%p1050_p11) target bundleno = 328 (0x148), region = 85 }
 0x12e   : > { %v681_v1 = vadd.f32 %v1212_v61, %v440_v57  ;;  %v689_v2 = vadd.f32 %v1220_v62, %v448_v58  ;;  %v628_v3 = vpop.f32.mrb[5].mxu0  ;;  %v660_v4 = vpop.f32.mrb[5].mxu1  ;;  %v1103_v57 = vunpack.c.h.bf16 (!%p1050_p11), %v1162_v43  ;;  %v1163_v58 = vld [vmem:[%s1538_s3 + $0x20] sm:$0xff] (!%p1050_p11)  }
 0x12f   : > { %v679_v7 = vadd.f32 %v628_v3, %v438_v59  ;;  %v687_v8 = vadd.f32 %v660_v4, %v446_v60  ;;  %v1213_v9 = vpop.f32.mrb[6].mxu0  ;;  %v1221_v10 = vpop.f32.mrb[6].mxu1  ;;  %v713_v23 = vld [vmem:[#allocation2 + $0x10] sm:$0xff] (!%p1050_p11) }
 0x130   : > { %697 = vst [vmem:[#allocation2 + $0x30] sm:$0xff] %v681_v1  ;;  %705 = vst [vmem:[#allocation2 + $0x70] sm:$0xff] %v689_v2  ;;  %v682_v11 = vadd.f32 %v1213_v9, %v441_v63  ;;  %v690_v12 = vadd.f32 %v1221_v10, %v449_v0  ;;  %v631_v13 = vpop.f32.mrb[7].mxu0  ;;  %v663_v14 = vpop.f32.mrb[7].mxu1  ;;  %v711_v17 = vld [vmem:[#allocation2] sm:$0xff] (!%p1050_p11)  ;;  %v736_v27 = vadd.f32 (!%p1050_p11), %v1454_v19, %v713_v23  ;;  %v721_v59 = vld [vmem:[#allocation2 + $0x50] sm:$0xff] (!%p1050_p11)  ;;  %v1107_v9 = vunpack.c.h.bf16 (!%p1050_p11), %v1163_v58 }
 0x131   : > { %695 = vst [vmem:[#allocation2 + $0x20] sm:$0xff] %v679_v7  ;;  %703 = vst [vmem:[#allocation2 + $0x60] sm:$0xff] %v687_v8  ;;  %v680_v15 = vadd.f32 %v631_v13, %v439_v5  ;;  %v688_v16 = vadd.f32 %v663_v14, %v447_v6  ;;  %v734_v20 = vadd.f32 (!%p1050_p11), %v1454_v19, %v711_v17  ;;  %v714_v24 = vld [vmem:[#allocation2 + $0x18] sm:$0xff] (!%p1050_p11)  ;;  %v719_v48 = vld [vmem:[#allocation2 + $0x40] sm:$0xff] (!%p1050_p11)  ;;  %v1106_v8 = vunpack.c.l.bf16 (!%p1050_p11), %v1163_v58 }
 0x132   : > { %698 = vst [vmem:[#allocation2 + $0x38] sm:$0xff] %v682_v11  ;;  %706 = vst [vmem:[#allocation2 + $0x78] sm:$0xff] %v690_v12  ;;  %v712_v18 = vld [vmem:[#allocation2 + $0x8] sm:$0xff] (!%p1050_p11)  ;;  %v737_v28 = vadd.f32 (!%p1050_p11), %v1454_v19, %v714_v24  ;;  %v784_v44 = vadd.f32 (!%p1050_p11), %v1094_v32, %v736_v27  ;;  %v742_v63 = vadd.f32 (!%p1050_p11), %v1454_v19, %v719_v48  ;;  %v722_v0 = vld [vmem:[#allocation2 + $0x58] sm:$0xff] (!%p1050_p11) }
 0x133   : > { %696 = vst [vmem:[#allocation2 + $0x28] sm:$0xff] %v680_v15  ;;  %704 = vst [vmem:[#allocation2 + $0x68] sm:$0xff] %v688_v16  ;;  %v735_v21 = vadd.f32 (!%p1050_p11), %v1454_v19, %v712_v18  ;;  %v782_v39 = vadd.f32 (!%p1050_p11), %v1090_v25, %v734_v20  ;;  %v720_v53 = vld [vmem:[#allocation2 + $0x48] sm:$0xff] (!%p1050_p11)  ;;  %v744_v10 = vadd.f32 (!%p1050_p11), %v1454_v19, %v721_v59  ;;  %v1165_v12 = vld [vmem:[%s1538_s3 + $0x30] sm:$0xff] (!%p1050_p11)  }
 0x134   : > { %v785_v45 = vadd.f32 %v1095_v33, %v737_v28  ;;  %v800_v54 = vmax.f32 %v784_v44, 0.0  ;;  %v1164_v1 = vld [vmem:[%s1538_s3 + $0x28] sm:$0xff]   ;;  %v743_v5 = vadd.f32 %v1454_v19, %v720_v53  ;;  %v745_v15 = vadd.f32 %v1454_v19, %v722_v0  ;;  %v1166_v28 = vld [vmem:[%s1538_s3 + $0x38] sm:$0xff]  }
 0x135   : > { %v783_v40 = vadd.f32 %v1091_v26, %v735_v21  ;;  %v798_v49 = vmax.f32 %v782_v39, 0.0  ;;  %v1110_v16 = vunpack.c.l.bf16 %v1164_v1  ;;  %v790_v17 = vadd.f32 %v1106_v8, %v742_v63 }
 0x136   : > { %v801_v55 = vmax.f32 %v785_v45, 0.0  ;;  %v791_v18 = vadd.f32 %v1107_v9, %v743_v5  ;;  %v1111_v20 = vunpack.c.h.bf16 %v1164_v1  ;;  %v1114_v27 = vunpack.c.l.bf16 %v1165_v12 }
 0x137   : > { %v717_v37 = vld [vmem:[#allocation2 + $0x30] sm:$0xff]  ;;  %v799_v50 = vmax.f32 %v783_v40, 0.0  ;;  %v792_v25 = vadd.f32 %v1110_v16, %v744_v10  ;;  %v806_v29 = vmax.f32 %v790_v17, 0.0  ;;  %v1115_v32 = vunpack.c.h.bf16 %v1165_v12 }
 0x138   : > { %v715_v30 = vld [vmem:[#allocation2 + $0x20] sm:$0xff]  ;;  %v740_v46 = vadd.f32 %v1454_v19, %v717_v37  ;;  %v1128_v2 = vpack.c.bf16 %v801_v55, %v800_v54  ;;  %v725_v22 = vld [vmem:[#allocation2 + $0x70] sm:$0xff]  ;;  %v1118_v40 = vunpack.c.l.bf16 %v1166_v28 }
 0x139   : > { %v738_v34 = vadd.f32 %v1454_v19, %v715_v30  ;;  %v718_v38 = vld [vmem:[#allocation2 + $0x38] sm:$0xff]  ;;  %v1123_v60 = vpack.c.bf16 %v799_v50, %v798_v49  ;;  %v723_v6 = vld [vmem:[#allocation2 + $0x60] sm:$0xff]  ;;  %v807_v30 = vmax.f32 %v791_v18, 0.0  ;;  %v808_v33 = vmax.f32 %v792_v25, 0.0 }
 0x13a   : > { %v716_v31 = vld [vmem:[#allocation2 + $0x28] sm:$0xff]  ;;  %v741_v47 = vadd.f32 %v1454_v19, %v718_v38  ;;  %v788_v3 = vadd.f32 %v1102_v56, %v740_v46  ;;  %1167 = vst [vmem:[%s1539_s4 + $0x8] sm:$0xff] %v1128_v2   ;;  %v746_v21 = vadd.f32 %v1454_v19, %v723_v6  ;;  %v726_v23 = vld [vmem:[#allocation2 + $0x78] sm:$0xff] }
 0x13b   : > { %v739_v35 = vadd.f32 %v1454_v19, %v716_v31  ;;  %v786_v51 = vadd.f32 %v1098_v41, %v738_v34  ;;  %1124 = vst [vmem:[%s1539_s4] sm:$0xff] %v1123_v60   ;;  %v724_v11 = vld [vmem:[#allocation2 + $0x68] sm:$0xff]  ;;  %v793_v31 = vadd.f32 %v1111_v20, %v745_v15  ;;  %v749_v36 = vadd.f32 %v1454_v19, %v726_v23 }
 0x13c   : > { %v789_v4 = vadd.f32 %v1103_v57, %v741_v47  ;;  %v804_v13 = vmax.f32 %v788_v3, 0.0  ;;  %v747_v26 = vadd.f32 %v1454_v19, %v724_v11  ;;  %v794_v34 = vadd.f32 %v1114_v27, %v746_v21 }
 0x13d   : > { %v787_v52 = vadd.f32 %v1099_v42, %v739_v35  ;;  %v802_v61 = vmax.f32 %v786_v51, 0.0  ;;  %v748_v35 = vadd.f32 %v1454_v19, %v725_v22  ;;  %v1143_v37 = vpack.c.bf16 %v807_v30, %v806_v29 }
 0x13e   : > { %v805_v14 = vmax.f32 %v789_v4, 0.0  ;;  %v809_v38 = vmax.f32 %v793_v31, 0.0  ;;  %v795_v39 = vadd.f32 %v1115_v32, %v747_v26  ;;  %v810_v41 = vmax.f32 %v794_v34, 0.0 }
 0x13f   : > { %v803_v62 = vmax.f32 %v787_v52, 0.0  ;;  %v1119_v42 = vunpack.c.h.bf16 %v1166_v28  ;;  %1170 = vst [vmem:[%s1539_s4 + $0x20] sm:$0xff] %v1143_v37   ;;  %v796_v45 = vadd.f32 %v1118_v40, %v748_v35 }
 0x140   : > { %v1138_v24 = vpack.c.bf16 %v805_v14, %v804_v13  ;;  %v1148_v43 = vpack.c.bf16 %v809_v38, %v808_v33  ;;  %v811_v44 = vmax.f32 %v795_v39, 0.0 }
 0x141   : > { %v1133_v7 = vpack.c.bf16 %v803_v62, %v802_v61  ;;  %v797_v46 = vadd.f32 %v1119_v42, %v749_v36  ;;  %v812_v19 = vmax.f32 %v796_v45, 0.0 }
 0x142   : > { %1169 = vst [vmem:[%s1539_s4 + $0x18] sm:$0xff] %v1138_v24   ;;  %1171 = vst [vmem:[%s1539_s4 + $0x28] sm:$0xff] %v1148_v43   ;;  %v1153_v47 = vpack.c.bf16 %v811_v44, %v810_v41 }
 0x143   : > { %1168 = vst [vmem:[%s1539_s4 + $0x10] sm:$0xff] %v1133_v7   ;;  %v813_v48 = vmax.f32 %v797_v46, 0.0 }
 0x144   : > { %1172 = vst [vmem:[%s1539_s4 + $0x30] sm:$0xff] %v1153_v47  }
 0x145   : > { %v1158_v49 = vpack.c.bf16 %v813_v48, %v812_v19 }
 0x147   : > { %1173 = vst [vmem:[%s1539_s4 + $0x38] sm:$0xff] %v1158_v49  }
 0x148 PF: > { %s14_s19 = sadd.s32 1, %s1333_s19   ;;  %s1540_s15 = smov %s1321_s16 }
 0x149   : > { %p11_p12 = scmp.ge.s32.totalorder %s14_s19, 11   ;;  %s1541_s16 = smov %s1396_s23 }
 0x14a   : > { %s1542_s17 = smov %s1329_s18  ;;  %s1543_s18 = smov %s1545_s20 }
 0x14b   :  { %13 = sbr.rel (!%p11_p12) target bundleno = 3 (0x3), region = 129 }

// kernel: _lambda_.18
= control target key start
LH: loop header
LB: loop body
LE: loop exit
PB: predicated region body
PF: predicated region fallthrough
CT: control target
= control target key end

     0   :  { %s705_s1 = inlined_call_operand.vmem [shape: bf16[128,128], index: 1, kind: input, shape index: {}]   ;;  %s706_s0 = inlined_call_operand.vmem [shape: bf16[128,128], index: 0, kind: input, shape index: {}]   ;;  %s707_s2 = inlined_call_operand.vmem [shape: f32[1,128], index: 2, kind: input, shape index: {}]   ;;  %s708_s3 = inlined_call_operand.vmem [shape: bf16[128,128], index: 3, kind: output, shape index: {}]  }
   0x1   :  { %v594_v0 = vld [vmem:[%s705_s1] sm:$0xff]   ;;  %v595_v1 = vld [vmem:[%s705_s1 + $0x8] sm:$0xff]   ;;  %v596_v2 = vld [vmem:[%s705_s1 + $0x10] sm:$0xff]  }
   0x2   :  { %546 = vmatprep.subr.bf16.mxu0 %v594_v0  ;;  %578 = vmatprep.subr.bf16.mxu1 %v594_v0  ;;  %v597_v3 = vld [vmem:[%s705_s1 + $0x18] sm:$0xff]   ;;  %v602_v4 = vld [vmem:[%s706_s0] sm:$0xff]   ;;  %v599_v7 = vld [vmem:[%s705_s1 + $0x28] sm:$0xff]  }
   0x3   :  { %547 = vmatpush3.bf16.msra.mxu0 %v594_v0  ;;  %586 = vmatpush3.bf16.msra.mxu1 %v594_v0  ;;  %v603_v5 = vld [vmem:[%s706_s0 + $0x20] sm:$0xff]   ;;  %v600_v8 = vld [vmem:[%s705_s1 + $0x30] sm:$0xff]   ;;  %v601_v9 = vld [vmem:[%s705_s1 + $0x38] sm:$0xff]  }
   0x4   :  { %548 = vmatprep.subr.bf16.mxu0 %v595_v1  ;;  %579 = vmatprep.subr.bf16.mxu1 %v595_v1  ;;  %v598_v6 = vld [vmem:[%s705_s1 + $0x20] sm:$0xff]   ;;  %v604_v10 = vld [vmem:[%s706_s0 + $0x8] sm:$0xff]   ;;  %v606_v12 = vld [vmem:[%s706_s0 + $0x10] sm:$0xff]  }
   0x5   :  { %562 = vmatprep.mubr.bf16.mxu0 %v602_v4  ;;  %570 = vmatprep.mubr.bf16.mxu1 %v603_v5  ;;  %v605_v11 = vld [vmem:[%s706_s0 + $0x28] sm:$0xff]   ;;  %v607_v13 = vld [vmem:[%s706_s0 + $0x30] sm:$0xff]   ;;  %v608_v14 = vld [vmem:[%s706_s0 + $0x18] sm:$0xff]  }
   0x6   :  { %v609_v15 = vld [vmem:[%s706_s0 + $0x38] sm:$0xff]   ;;  %v450_v17 = vld [vmem:[%s707_s2] ss:$0 sm:$0xff] }
   0x7   :  { %549 = vmatpush3.bf16.msra.mxu0 %v595_v1  ;;  %587 = vmatpush3.bf16.msra.mxu1 %v595_v1 }
   0x8   :  { %550 = vmatprep.subr.bf16.mxu0 %v596_v2  ;;  %580 = vmatprep.subr.bf16.mxu1 %v596_v2 }
   0xb   :  { %551 = vmatpush3.bf16.msra.mxu0 %v596_v2  ;;  %588 = vmatpush3.bf16.msra.mxu1 %v596_v2 }
   0xc   :  { %552 = vmatprep.subr.bf16.mxu0 %v597_v3  ;;  %581 = vmatprep.subr.bf16.mxu1 %v597_v3 }
   0xf   :  { %553 = vmatpush3.bf16.msra.mxu0 %v597_v3  ;;  %589 = vmatpush3.bf16.msra.mxu1 %v597_v3 }
  0x10   :  { %554 = vmatprep.subr.bf16.mxu0 %v598_v6  ;;  %582 = vmatprep.subr.bf16.mxu1 %v598_v6 }
  0x13   :  { %555 = vmatpush3.bf16.msra.mxu0 %v598_v6  ;;  %590 = vmatpush3.bf16.msra.mxu1 %v598_v6 }
  0x14   :  { %556 = vmatprep.subr.bf16.mxu0 %v599_v7  ;;  %583 = vmatprep.subr.bf16.mxu1 %v599_v7 }
  0x17   :  { %557 = vmatpush3.bf16.msra.mxu0 %v599_v7  ;;  %591 = vmatpush3.bf16.msra.mxu1 %v599_v7 }
  0x18   :  { %558 = vmatprep.subr.bf16.mxu0 %v600_v8  ;;  %584 = vmatprep.subr.bf16.mxu1 %v600_v8 }
  0x1b   :  { %559 = vmatpush3.bf16.msra.mxu0 %v600_v8  ;;  %592 = vmatpush3.bf16.msra.mxu1 %v600_v8 }
  0x1c   :  { %560 = vmatprep.subr.bf16.mxu0 %v601_v9  ;;  %585 = vmatprep.subr.bf16.mxu1 %v601_v9 }
  0x1f   :  { %561 = vmatpush3.bf16.msra.mxu0 %v601_v9  ;;  %593 = vmatpush3.bf16.msra.mxu1 %v601_v9 }
  0x22   :  { %563 = vmatmul.mubr.bf16.vlgmr.msra.gmra.mrb[0].mxu0 %v604_v10  ;;  %571 = vmatmul.mubr.bf16.vlgmr.msra.gmra.mrb[0].mxu1 %v605_v11 }
  0x23   :  { %566 = vmatprep.mubr.bf16.mxu0 %v606_v12  ;;  %574 = vmatprep.mubr.bf16.mxu1 %v607_v13 }
  0x2a   :  { %567 = vmatmul.mubr.bf16.gmra.mrb[4].mxu0 %v608_v14  ;;  %575 = vmatmul.mubr.bf16.gmra.mrb[4].mxu1 %v609_v15 }
  0xf5   :  { %v564_v16 = vpop.f32.mrb[0].mxu0  ;;  %v572_v18 = vpop.f32.mrb[0].mxu1 }
  0xf6   :  { %v213_v19 = vpop.f32.mrb[1].mxu0  ;;  %v245_v20 = vpop.f32.mrb[1].mxu1  ;;  %v336_v23 = vadd.f32 %v564_v16, %v450_v17  ;;  %v344_v24 = vadd.f32 %v572_v18, %v450_v17 }
  0xf7   :  { %v565_v21 = vpop.f32.mrb[2].mxu0  ;;  %v573_v22 = vpop.f32.mrb[2].mxu1  ;;  %v334_v29 = vadd.f32 %v450_v17, %v213_v19  ;;  %v342_v30 = vadd.f32 %v450_v17, %v245_v20 }
  0xf8   :  { %v337_v25 = vadd.f32 %v565_v21, %v450_v17  ;;  %v345_v26 = vadd.f32 %v573_v22, %v450_v17  ;;  %v216_v27 = vpop.f32.mrb[3].mxu0  ;;  %v248_v28 = vpop.f32.mrb[3].mxu1 }
  0xf9   :  { %v335_v31 = vadd.f32 %v450_v17, %v216_v27  ;;  %v343_v32 = vadd.f32 %v450_v17, %v248_v28 }
  0xfa   :  { %v491_v33 = vpack.c.bf16 %v337_v25, %v336_v23  ;;  %v511_v34 = vpack.c.bf16 %v345_v26, %v344_v24 }
  0xfb   :  { %v486_v35 = vpack.c.bf16 %v335_v31, %v334_v29  ;;  %v506_v36 = vpack.c.bf16 %v343_v32, %v342_v30 }
  0xfc   :  { %523 = vst [vmem:[%s708_s3 + $0x8] sm:$0xff] %v491_v33   ;;  %527 = vst [vmem:[%s708_s3 + $0x28] sm:$0xff] %v511_v34  }
  0xfd   :  { %487 = vst [vmem:[%s708_s3] sm:$0xff] %v486_v35   ;;  %526 = vst [vmem:[%s708_s3 + $0x20] sm:$0xff] %v506_v36   ;;  %v568_v37 = vpop.f32.mrb[4].mxu0  ;;  %v576_v38 = vpop.f32.mrb[4].mxu1 }
  0xfe   :  { %v229_v39 = vpop.f32.mrb[5].mxu0  ;;  %v261_v40 = vpop.f32.mrb[5].mxu1  ;;  %v340_v43 = vadd.f32 %v568_v37, %v450_v17  ;;  %v348_v44 = vadd.f32 %v576_v38, %v450_v17 }
  0xff   :  { %v569_v41 = vpop.f32.mrb[6].mxu0  ;;  %v577_v42 = vpop.f32.mrb[6].mxu1  ;;  %v338_v49 = vadd.f32 %v450_v17, %v229_v39  ;;  %v346_v50 = vadd.f32 %v450_v17, %v261_v40 }
 0x100   :  { %v341_v45 = vadd.f32 %v569_v41, %v450_v17  ;;  %v349_v46 = vadd.f32 %v577_v42, %v450_v17  ;;  %v232_v47 = vpop.f32.mrb[7].mxu0  ;;  %v264_v48 = vpop.f32.mrb[7].mxu1 }
 0x101   :  { %v339_v51 = vadd.f32 %v450_v17, %v232_v47  ;;  %v347_v52 = vadd.f32 %v450_v17, %v264_v48 }
 0x102   :  { %v501_v53 = vpack.c.bf16 %v341_v45, %v340_v43  ;;  %v521_v54 = vpack.c.bf16 %v349_v46, %v348_v44 }
 0x103   :  { %v496_v55 = vpack.c.bf16 %v339_v51, %v338_v49  ;;  %v516_v56 = vpack.c.bf16 %v347_v52, %v346_v50 }
 0x104   :  { %525 = vst [vmem:[%s708_s3 + $0x18] sm:$0xff] %v501_v53   ;;  %529 = vst [vmem:[%s708_s3 + $0x38] sm:$0xff] %v521_v54  }
 0x105   :  { %524 = vst [vmem:[%s708_s3 + $0x10] sm:$0xff] %v496_v55   ;;  %528 = vst [vmem:[%s708_s3 + $0x30] sm:$0xff] %v516_v56  }

// kernel: _lambda_.22
= control target key start
LH: loop header
LB: loop body
LE: loop exit
PB: predicated region body
PF: predicated region fallthrough
CT: control target
= control target key end

     0   :  { %s1349_s12 = smov 0   ;;  %s1351_s13 = smov 0   ;;  %s1557_s0 = inlined_call_operand.vmem [shape: bf16[128,1152], index: 0, kind: input, shape index: {}]   ;;  %s1558_s1 = inlined_call_operand.vmem [shape: bf16[1152,256], index: 1, kind: input, shape index: {}]   ;;  %s1559_s2 = inlined_call_operand.vmem [shape: f32[1,256], index: 2, kind: input, shape index: {}]   ;;  %s1560_s3 = inlined_call_operand.vmem [shape: bf16[128,256], index: 3, kind: output, shape index: {}]  }
   0x1   :  { %s1353_s14 = smov 0   ;;  %s1355_s15 = smov 0  }
   0x2   :  { %s1357_s16 = smov 0  }
   0x3 LB: > { %s25_s17 = sadd.s32 1, %s1321_s15  ;;  %p48_p1 = scmp.ne.s32.totalorder %s1313_s13, %s1309_s12  ;;  %s1325_s16 = sphi %s1357_s16, %s13_s16   ;;  %s1321_s15 = sphi %s1355_s15, %s1564_s15   ;;  %s1317_s14 = sphi %s1353_s14, %s1563_s14   ;;  %s1313_s13 = sphi %s1351_s13, %s1562_s13   ;;  %s1309_s12 = sphi %s1349_s12, %s1561_s12  }
   0x4   : > { %p26_p0 = scmp.ge.s32.totalorder %s25_s17, 9  ;;  %p49_p2 = scmp.eq.s32.totalorder %s1325_s16, 0 }
   0x5   : > { %s41_s19 = sadd.s32 1, %s1313_s13  ;;  %p1126_p5 = scmp.ge.s32.totalorder %s1325_s16, 9 }
   0x6   : > { %s1566_s17 = smov (%p26_p0, %s25_s17), 0  ;;  %p50_p3 = por %p49_p2, %p48_p1 }
   0x7   : > { %s37_s18 = ssub.s32 %s1321_s15, %s1566_s17  ;;  %164 = sbr.rel (%p1126_p5) target bundleno = 28 (0x1c), region = 20 }
   0x8   : > { %p39_p4 = scmp.eq.s32.totalorder %s37_s18, 0 }
   0xa   : > { %s1384_s20 = scalar_select %p39_p4, %s1313_s13, %s41_s19  }
   0xe   : > { %167 = sbr.rel (!%p50_p3) target bundleno = 28 (0x1c), region = 24  ;;  %s169_s21 = sand.u32 (%p50_p3), 1, %s1313_s13  }
   0xf   : > { %s1128_s22 = sshll.u32 (%p50_p3), %s1321_s15, 2  ;;  %s1127_s23 = sshll.u32 (%p50_p3), %s169_s21, 6 }
  0x10   : > { %s1392_s26 = scalar_lea.vmem (%p50_p3), %s1557_s0, %s1128_s22  ;;  %s171_s27 = scalar_lea.vmem (%p50_p3), [#allocation3], %s1127_s23 }
  0x11   : > { %v192_v0 = vld [vmem:[%s1392_s26] sm:$0xf] (%p50_p3)  ;;  %v194_v1 = vld [vmem:[%s1392_s26 + $0x24] sm:$0xf] (%p50_p3)  ;;  %v196_v2 = vld [vmem:[%s1392_s26 + $0x48] sm:$0xf] (%p50_p3) }
  0x12   : > { %193 = vst [vmem:[%s171_s27] sm:$0xf] (%p50_p3), %v192_v0  ;;  %195 = vst [vmem:[%s171_s27 + $0x4] sm:$0xf] (%p50_p3), %v194_v1  ;;  %v198_v3 = vld [vmem:[%s1392_s26 + $0x6c] sm:$0xf] (%p50_p3) }
  0x13   : > { %v200_v4 = vld [vmem:[%s1392_s26 + $0x90] sm:$0xf] (%p50_p3)  ;;  %197 = vst [vmem:[%s171_s27 + $0x8] sm:$0xf] (%p50_p3), %v196_v2  ;;  %199 = vst [vmem:[%s171_s27 + $0xc] sm:$0xf] (%p50_p3), %v198_v3 }
  0x14   : > { %201 = vst [vmem:[%s171_s27 + $0x10] sm:$0xf] (%p50_p3), %v200_v4  ;;  %v202_v5 = vld [vmem:[%s1392_s26 + $0xb4] sm:$0xf] (%p50_p3)  ;;  %v204_v6 = vld [vmem:[%s1392_s26 + $0xd8] sm:$0xf] (%p50_p3) }
  0x15   : > { %v206_v7 = vld [vmem:[%s1392_s26 + $0xfc] sm:$0xf]  ;;  %203 = vst [vmem:[%s171_s27 + $0x14] sm:$0xf] %v202_v5  ;;  %205 = vst [vmem:[%s171_s27 + $0x18] sm:$0xf] %v204_v6 }
  0x16   : > { %207 = vst [vmem:[%s171_s27 + $0x1c] sm:$0xf] %v206_v7  ;;  %v208_v8 = vld [vmem:[%s1392_s26 + $0x120] sm:$0xf]  ;;  %v210_v9 = vld [vmem:[%s1392_s26 + $0x144] sm:$0xf] }
  0x17   : > { %v212_v10 = vld [vmem:[%s1392_s26 + $0x168] sm:$0xf]  ;;  %209 = vst [vmem:[%s171_s27 + $0x20] sm:$0xf] %v208_v8  ;;  %211 = vst [vmem:[%s171_s27 + $0x24] sm:$0xf] %v210_v9 }
  0x18   : > { %213 = vst [vmem:[%s171_s27 + $0x28] sm:$0xf] %v212_v10  ;;  %v214_v11 = vld [vmem:[%s1392_s26 + $0x18c] sm:$0xf]  ;;  %v216_v12 = vld [vmem:[%s1392_s26 + $0x1b0] sm:$0xf] }
  0x19   : > { %v218_v13 = vld [vmem:[%s1392_s26 + $0x1d4] sm:$0xf]  ;;  %215 = vst [vmem:[%s171_s27 + $0x2c] sm:$0xf] %v214_v11  ;;  %217 = vst [vmem:[%s171_s27 + $0x30] sm:$0xf] %v216_v12 }
  0x1a   : > { %219 = vst [vmem:[%s171_s27 + $0x34] sm:$0xf] %v218_v13  ;;  %v220_v14 = vld [vmem:[%s1392_s26 + $0x1f8] sm:$0xf]  ;;  %v222_v15 = vld [vmem:[%s1392_s26 + $0x21c] sm:$0xf] }
  0x1b   : > { %221 = vst [vmem:[%s171_s27 + $0x38] sm:$0xf] %v220_v14  ;;  %223 = vst [vmem:[%s171_s27 + $0x3c] sm:$0xf] %v222_v15 }
  0x1c PF: > { %p1129_p6 = scmp.ge.s32.totalorder %s1325_s16, 1  ;;  %p292_p7 = scmp.lt.s32.totalorder %s1325_s16, 10 }
  0x1e   : > { %p293_p8 = pnand %p1129_p6, %p292_p7 }
  0x1f   : > { %s299_s28 = sand.u32 (!%p293_p8), 1, %s1309_s12   ;;  %s1131_s29 = sshll.u32 (!%p293_p8), %s1317_s14, 4 }
  0x20   : > { %296 = sbr.rel (%p293_p8) target bundleno = 349 (0x15d), region = 69  ;;  %s1130_s30 = sshll.u32 (!%p293_p8), %s299_s28, 6 }
  0x21   : > { %p344_p9 = scmp.lt.s32.totalorder (!%p293_p8), %s1131_s29, 143  ;;  %s1419_s8 = scalar_lea.vmem (!%p293_p8), [#allocation3], %s1130_s30 }
  0x22   : > { %p1134_p10 = scmp.ne.s32.totalorder (!%p293_p8), %s1317_s14, 0 }
  0x27   : > { %s1568_s29 = smov (!%p344_p9, %s1131_s29), 143  ;;  %375 = sbr.rel (%p1134_p10) target bundleno = 57 (0x39), region = 77 }
  0x28   : > { %s1180_s4 = sshll.u32 %s1568_s29, 3  ;;  %v1327_v16 = vmov (!%p1134_p10), 0.0  }
  0x29   : > { %s1417_s7 = scalar_lea.vmem %s1558_s1, %s1180_s4  ;;  %376 = vst [vmem:[#allocation2] sm:$0xff] (!%p1134_p10), %v1327_v16  ;;  %377 = vst [vmem:[#allocation2 + $0x8] sm:$0xff] (!%p1134_p10), %v1327_v16 }
  0x2a   : > { %378 = vst [vmem:[#allocation2 + $0x10] sm:$0xff] (!%p1134_p10), %v1327_v16  ;;  %379 = vst [vmem:[#allocation2 + $0x18] sm:$0xff] (!%p1134_p10), %v1327_v16 }
  0x2b   : > { %380 = vst [vmem:[#allocation2 + $0x20] sm:$0xff] (!%p1134_p10), %v1327_v16  ;;  %381 = vst [vmem:[#allocation2 + $0x28] sm:$0xff] (!%p1134_p10), %v1327_v16 }
  0x2c   : > { %382 = vst [vmem:[#allocation2 + $0x30] sm:$0xff] (!%p1134_p10), %v1327_v16  ;;  %383 = vst [vmem:[#allocation2 + $0x38] sm:$0xff] (!%p1134_p10), %v1327_v16 }
  0x2d   : > { %384 = vst [vmem:[#allocation2 + $0x40] sm:$0xff] (!%p1134_p10), %v1327_v16  ;;  %385 = vst [vmem:[#allocation2 + $0x48] sm:$0xff] (!%p1134_p10), %v1327_v16 }
  0x2e   : > { %386 = vst [vmem:[#allocation2 + $0x50] sm:$0xff] %v1327_v16  ;;  %387 = vst [vmem:[#allocation2 + $0x58] sm:$0xff] %v1327_v16 }
  0x2f   : > { %388 = vst [vmem:[#allocation2 + $0x60] sm:$0xff] %v1327_v16  ;;  %389 = vst [vmem:[#allocation2 + $0x68] sm:$0xff] %v1327_v16 }
  0x30   : > { %390 = vst [vmem:[#allocation2 + $0x70] sm:$0xff] %v1327_v16  ;;  %391 = vst [vmem:[#allocation2 + $0x78] sm:$0xff] %v1327_v16 }
  0x31   : > { %392 = vst [vmem:[#allocation2 + $0x80] sm:$0xff] %v1327_v16  ;;  %393 = vst [vmem:[#allocation2 + $0x88] sm:$0xff] %v1327_v16 }
  0x32   : > { %394 = vst [vmem:[#allocation2 + $0x90] sm:$0xff] %v1327_v16  ;;  %395 = vst [vmem:[#allocation2 + $0x98] sm:$0xff] %v1327_v16 }
  0x33   : > { %396 = vst [vmem:[#allocation2 + $0xa0] sm:$0xff] %v1327_v16  ;;  %397 = vst [vmem:[#allocation2 + $0xa8] sm:$0xff] %v1327_v16 }
  0x34   : > { %398 = vst [vmem:[#allocation2 + $0xb0] sm:$0xff] %v1327_v16  ;;  %399 = vst [vmem:[#allocation2 + $0xb8] sm:$0xff] %v1327_v16 }
  0x35   : > { %400 = vst [vmem:[#allocation2 + $0xc0] sm:$0xff] %v1327_v16  ;;  %401 = vst [vmem:[#allocation2 + $0xc8] sm:$0xff] %v1327_v16 }
  0x36   : > { %402 = vst [vmem:[#allocation2 + $0xd0] sm:$0xff] %v1327_v16  ;;  %403 = vst [vmem:[#allocation2 + $0xd8] sm:$0xff] %v1327_v16 }
  0x37   : > { %404 = vst [vmem:[#allocation2 + $0xe0] sm:$0xff] %v1327_v16  ;;  %405 = vst [vmem:[#allocation2 + $0xe8] sm:$0xff] %v1327_v16 }
  0x38   : > { %406 = vst [vmem:[#allocation2 + $0xf0] sm:$0xff] %v1327_v16  ;;  %407 = vst [vmem:[#allocation2 + $0xf8] sm:$0xff] %v1327_v16 }
  0x39 PF: > { %v1255_v17 = vld [vmem:[%s1417_s7 + $0x4] ss:$8 sps:$4 sm:$0xff]   ;;  %v1257_v18 = vld [vmem:[%s1417_s7] ss:$8 sps:$4 sm:$0xff]   ;;  %v1328_v19 = vmov 0   ;;  %v1283_v38 = vld [vmem:[%s1419_s8 + $0x10] sm:$0xff]  }
  0x3a   : > { %632 = vmatprep.mubr.bf16.mxu0 %v1328_v19  ;;  %672 = vmatprep.mubr.bf16.mxu1 %v1328_v19  ;;  %v1258_v20 = vld [vmem:[%s1417_s7 + $0x14] ss:$8 sps:$4 sm:$0xff]   ;;  %v1260_v21 = vld [vmem:[%s1417_s7 + $0x10] ss:$8 sps:$4 sm:$0xff]   ;;  %v1261_v22 = vld [vmem:[%s1417_s7 + $0x24] ss:$8 sps:$4 sm:$0xff]  }
  0x3b   : > { %600 = vmatprep.subr.bf16.mxu0 %v1255_v17  ;;  %1197 = vmatprep.subr.bf16.mxu1 %v1255_v17  ;;  %v1263_v23 = vld [vmem:[%s1417_s7 + $0x20] ss:$8 sps:$4 sm:$0xff]   ;;  %v1264_v24 = vld [vmem:[%s1417_s7 + $0x34] ss:$8 sps:$4 sm:$0xff]   ;;  %v1266_v25 = vld [vmem:[%s1417_s7 + $0x30] ss:$8 sps:$4 sm:$0xff]  }
  0x3c   : > { %601 = vmatpush1.bf16.msra.mxu0 %v1257_v18  ;;  %1205 = vmatpush1.bf16.msra.mxu1 %v1257_v18  ;;  %v1267_v26 = vld [vmem:[%s1417_s7 + $0x44] ss:$8 sps:$4 sm:$0xff]   ;;  %v1269_v27 = vld [vmem:[%s1417_s7 + $0x40] ss:$8 sps:$4 sm:$0xff]   ;;  %v1270_v28 = vld [vmem:[%s1417_s7 + $0x54] ss:$8 sps:$4 sm:$0xff]  }
  0x3d   : > { %602 = vmatprep.subr.bf16.mxu0 %v1258_v20  ;;  %1198 = vmatprep.subr.bf16.mxu1 %v1258_v20  ;;  %v1272_v29 = vld [vmem:[%s1417_s7 + $0x50] ss:$8 sps:$4 sm:$0xff]   ;;  %v1273_v30 = vld [vmem:[%s1417_s7 + $0x64] ss:$8 sps:$4 sm:$0xff]   ;;  %v1275_v31 = vld [vmem:[%s1417_s7 + $0x60] ss:$8 sps:$4 sm:$0xff]  }
  0x3e   : > { %v1276_v32 = vld [vmem:[%s1417_s7 + $0x74] ss:$8 sps:$4 sm:$0xff]   ;;  %v1278_v33 = vld [vmem:[%s1417_s7 + $0x70] ss:$8 sps:$4 sm:$0xff]   ;;  %v1279_v34 = vld [vmem:[%s1419_s8] sm:$0xff]   ;;  %p1159_p11 = scmp.ne.s32.totalorder %s1317_s14, 8 }
  0x3f   : > { %v1280_v35 = vld [vmem:[%s1419_s8 + $0x20] sm:$0xff]   ;;  %v1281_v36 = vld [vmem:[%s1419_s8 + $0x8] sm:$0xff]   ;;  %v1284_v39 = vld [vmem:[%s1419_s8 + $0x30] sm:$0xff]  }
  0x40   : > { %603 = vmatpush1.bf16.msra.mxu0 %v1260_v21  ;;  %1206 = vmatpush1.bf16.msra.mxu1 %v1260_v21  ;;  %v1282_v37 = vld [vmem:[%s1419_s8 + $0x28] sm:$0xff]   ;;  %v1285_v40 = vld [vmem:[%s1419_s8 + $0x18] sm:$0xff]   ;;  %v408_v42 = vld [vmem:[#allocation2] sm:$0xff] }
  0x41   : > { %604 = vmatprep.subr.bf16.mxu0 %v1261_v22  ;;  %1199 = vmatprep.subr.bf16.mxu1 %v1261_v22  ;;  %v1286_v41 = vld [vmem:[%s1419_s8 + $0x38] sm:$0xff]   ;;  %v424_v43 = vld [vmem:[#allocation2 + $0x80] sm:$0xff]  ;;  %v409_v44 = vld [vmem:[#allocation2 + $0x8] sm:$0xff] }
  0x42   : > { %v425_v45 = vld [vmem:[#allocation2 + $0x88] sm:$0xff]  ;;  %v410_v48 = vld [vmem:[#allocation2 + $0x10] sm:$0xff]  ;;  %v411_v54 = vld [vmem:[#allocation2 + $0x18] sm:$0xff] }
  0x43   : > { %v426_v49 = vld [vmem:[#allocation2 + $0x90] sm:$0xff]  ;;  %v427_v55 = vld [vmem:[#allocation2 + $0x98] sm:$0xff]  ;;  %v412_v2 = vld [vmem:[#allocation2 + $0x20] sm:$0xff] }
  0x44   : > { %605 = vmatpush1.bf16.msra.mxu0 %v1263_v23  ;;  %1207 = vmatpush1.bf16.msra.mxu1 %v1263_v23  ;;  %v428_v3 = vld [vmem:[#allocation2 + $0xa0] sm:$0xff]  ;;  %v413_v4 = vld [vmem:[#allocation2 + $0x28] sm:$0xff]  ;;  %v414_v8 = vld [vmem:[#allocation2 + $0x30] sm:$0xff] }
  0x45   : > { %606 = vmatprep.subr.bf16.mxu0 %v1264_v24  ;;  %1200 = vmatprep.subr.bf16.mxu1 %v1264_v24  ;;  %v429_v5 = vld [vmem:[#allocation2 + $0xa8] sm:$0xff]  ;;  %v430_v9 = vld [vmem:[#allocation2 + $0xb0] sm:$0xff]  ;;  %v415_v14 = vld [vmem:[#allocation2 + $0x38] sm:$0xff] }
  0x46   : > { %v431_v15 = vld [vmem:[#allocation2 + $0xb8] sm:$0xff] }
  0x48   : > { %607 = vmatpush1.bf16.msra.mxu0 %v1266_v25  ;;  %1208 = vmatpush1.bf16.msra.mxu1 %v1266_v25 }
  0x49   : > { %608 = vmatprep.subr.bf16.mxu0 %v1267_v26  ;;  %1201 = vmatprep.subr.bf16.mxu1 %v1267_v26  ;;  %v416_v26 = vld [vmem:[#allocation2 + $0x40] sm:$0xff] }
  0x4c   : > { %609 = vmatpush1.bf16.msra.mxu0 %v1269_v27  ;;  %1209 = vmatpush1.bf16.msra.mxu1 %v1269_v27  ;;  %v432_v27 = vld [vmem:[#allocation2 + $0xc0] sm:$0xff] }
  0x4d   : > { %610 = vmatprep.subr.bf16.mxu0 %v1270_v28  ;;  %1202 = vmatprep.subr.bf16.mxu1 %v1270_v28  ;;  %v417_v28 = vld [vmem:[#allocation2 + $0x48] sm:$0xff] }
  0x50   : > { %611 = vmatpush1.bf16.msra.mxu0 %v1272_v29  ;;  %1210 = vmatpush1.bf16.msra.mxu1 %v1272_v29  ;;  %v433_v29 = vld [vmem:[#allocation2 + $0xc8] sm:$0xff] }
  0x51   : > { %612 = vmatprep.subr.bf16.mxu0 %v1273_v30  ;;  %1203 = vmatprep.subr.bf16.mxu1 %v1273_v30 }
  0x54   : > { %613 = vmatpush1.bf16.msra.mxu0 %v1275_v31  ;;  %1211 = vmatpush1.bf16.msra.mxu1 %v1275_v31 }
  0x55   : > { %614 = vmatprep.subr.bf16.mxu0 %v1276_v32  ;;  %1204 = vmatprep.subr.bf16.mxu1 %v1276_v32  ;;  %v418_v32 = vld [vmem:[#allocation2 + $0x50] sm:$0xff] }
  0x58   : > { %615 = vmatpush1.bf16.msra.mxu0 %v1278_v33  ;;  %1212 = vmatpush1.bf16.msra.mxu1 %v1278_v33  ;;  %v434_v33 = vld [vmem:[#allocation2 + $0xd0] sm:$0xff] }
  0x5b   : > { %633 = vmatmul.mubr.bf16.vlgmr.msra.gmra.mrb[0].mxu0 %v1279_v34  ;;  %673 = vmatmul.mubr.bf16.vlgmr.msra.gmra.mrb[0].mxu1 %v1280_v35 }
  0x5c   : > { %642 = vmatprep.mubr.bf16.mxu0 %v1328_v19  ;;  %682 = vmatprep.mubr.bf16.mxu1 %v1328_v19 }
  0x63   : > { %643 = vmatmul.mubr.bf16.gmra.mrb[4].mxu0 %v1281_v36  ;;  %683 = vmatmul.mubr.bf16.gmra.mrb[4].mxu1 %v1282_v37 }
  0x64   : > { %652 = vmatprep.mubr.bf16.mxu0 %v1328_v19  ;;  %692 = vmatprep.mubr.bf16.mxu1 %v1328_v19 }
  0x6b   : > { %653 = vmatmul.mubr.bf16.gmra.mrb[8].mxu0 %v1283_v38  ;;  %693 = vmatmul.mubr.bf16.gmra.mrb[8].mxu1 %v1284_v39  ;;  %v419_v38 = vld [vmem:[#allocation2 + $0x58] sm:$0xff] }
  0x6c   : > { %662 = vmatprep.mubr.bf16.mxu0 %v1328_v19  ;;  %702 = vmatprep.mubr.bf16.mxu1 %v1328_v19  ;;  %v435_v39 = vld [vmem:[#allocation2 + $0xd8] sm:$0xff] }
  0x73   : > { %663 = vmatmul.mubr.bf16.gmra.mrb[12].mxu0 %v1285_v40  ;;  %703 = vmatmul.mubr.bf16.gmra.mrb[12].mxu1 %v1286_v41 }
 0x12e   : > { %v634_v46 = vpop.f32.mrb[0].mxu0  ;;  %v674_v47 = vpop.f32.mrb[0].mxu1 }
 0x12f   : > { %v713_v50 = vadd.f32 %v634_v46, %v408_v42  ;;  %v729_v51 = vadd.f32 %v674_v47, %v424_v43  ;;  %v636_v52 = vpop.f32.mrb[1].mxu0  ;;  %v676_v53 = vpop.f32.mrb[1].mxu1 }
 0x130   : > { %v714_v56 = vadd.f32 %v636_v52, %v409_v44  ;;  %v730_v57 = vadd.f32 %v676_v53, %v425_v45  ;;  %v638_v58 = vpop.f32.mrb[2].mxu0  ;;  %v678_v59 = vpop.f32.mrb[2].mxu1  ;;  %v421_v52 = vld [vmem:[#allocation2 + $0x68] sm:$0xff] }
 0x131   : > { %745 = vst [vmem:[#allocation2] sm:$0xff] %v713_v50  ;;  %761 = vst [vmem:[#allocation2 + $0x80] sm:$0xff] %v729_v51  ;;  %v715_v60 = vadd.f32 %v638_v58, %v410_v48  ;;  %v731_v61 = vadd.f32 %v678_v59, %v426_v49  ;;  %v640_v62 = vpop.f32.mrb[3].mxu0  ;;  %v680_v63 = vpop.f32.mrb[3].mxu1  ;;  %v420_v50 = vld [vmem:[#allocation2 + $0x60] sm:$0xff]  ;;  %v437_v53 = vld [vmem:[#allocation2 + $0xe8] sm:$0xff] }
 0x132   : > { %746 = vst [vmem:[#allocation2 + $0x8] sm:$0xff] %v714_v56  ;;  %762 = vst [vmem:[#allocation2 + $0x88] sm:$0xff] %v730_v57  ;;  %v716_v0 = vadd.f32 %v640_v62, %v411_v54  ;;  %v732_v1 = vadd.f32 %v680_v63, %v427_v55  ;;  %v436_v51 = vld [vmem:[#allocation2 + $0xe0] sm:$0xff]  ;;  %v422_v56 = vld [vmem:[#allocation2 + $0x70] sm:$0xff] }
 0x133   : > { %747 = vst [vmem:[#allocation2 + $0x10] sm:$0xff] %v715_v60  ;;  %763 = vst [vmem:[#allocation2 + $0x90] sm:$0xff] %v731_v61  ;;  %v438_v57 = vld [vmem:[#allocation2 + $0xf0] sm:$0xff]  ;;  %v423_v62 = vld [vmem:[#allocation2 + $0x78] sm:$0xff] }
 0x134   : > { %748 = vst [vmem:[#allocation2 + $0x18] sm:$0xff] %v716_v0  ;;  %764 = vst [vmem:[#allocation2 + $0x98] sm:$0xff] %v732_v1  ;;  %v439_v63 = vld [vmem:[#allocation2 + $0xf8] sm:$0xff] }
 0x136   : > { %v644_v6 = vpop.f32.mrb[4].mxu0  ;;  %v684_v7 = vpop.f32.mrb[4].mxu1 }
 0x137   : > { %v717_v10 = vadd.f32 %v644_v6, %v412_v2  ;;  %v733_v11 = vadd.f32 %v684_v7, %v428_v3  ;;  %v646_v12 = vpop.f32.mrb[5].mxu0  ;;  %v686_v13 = vpop.f32.mrb[5].mxu1 }
 0x138   : > { %v718_v16 = vadd.f32 %v646_v12, %v413_v4  ;;  %v734_v17 = vadd.f32 %v686_v13, %v429_v5  ;;  %v648_v18 = vpop.f32.mrb[6].mxu0  ;;  %v688_v19 = vpop.f32.mrb[6].mxu1  ;;  %v813_v12 = vld [vmem:[%s1559_s2] sm:$0x3] (!%p1159_p11) }
 0x139   : > { %749 = vst [vmem:[#allocation2 + $0x20] sm:$0xff] %v717_v10  ;;  %765 = vst [vmem:[#allocation2 + $0xa0] sm:$0xff] %v733_v11  ;;  %v719_v20 = vadd.f32 %v648_v18, %v414_v8  ;;  %v735_v21 = vadd.f32 %v688_v19, %v430_v9  ;;  %v650_v22 = vpop.f32.mrb[7].mxu0  ;;  %v690_v23 = vpop.f32.mrb[7].mxu1  ;;  %v815_v10 = vlaneseq (!%p1159_p11)  ;;  %v781_v13 = vld [vmem:[#allocation2] sm:$0xff] (!%p1159_p11) }
 0x13a   : > { %750 = vst [vmem:[#allocation2 + $0x28] sm:$0xff] %v718_v16  ;;  %766 = vst [vmem:[#allocation2 + $0xa8] sm:$0xff] %v734_v17  ;;  %v720_v24 = vadd.f32 %v650_v22, %v415_v14  ;;  %v736_v25 = vadd.f32 %v690_v23, %v431_v15  ;;  %v782_v14 = vld [vmem:[#allocation2 + $0x8] sm:$0xff] (!%p1159_p11)  ;;  %v783_v17 = vld [vmem:[#allocation2 + $0x10] sm:$0xff] (!%p1159_p11) }
 0x13b   : > { %751 = vst [vmem:[#allocation2 + $0x30] sm:$0xff] %v719_v20  ;;  %767 = vst [vmem:[#allocation2 + $0xb0] sm:$0xff] %v735_v21  ;;  %v816_v11 = vshrl.u32 (!%p1159_p11), %v815_v10, 7  ;;  %v784_v18 = vld [vmem:[#allocation2 + $0x18] sm:$0xff] (!%p1159_p11) }
 0x13c   : > { %752 = vst [vmem:[#allocation2 + $0x38] sm:$0xff] %v720_v24  ;;  %768 = vst [vmem:[#allocation2 + $0xb8] sm:$0xff] %v736_v25 }
 0x13d   : > { %v817_v15 = vsub.s32 (!%p1159_p11), 0, %v816_v11  ;;  %v821_v16 = vsub.s32 (!%p1159_p11), 1, %v816_v11 }
 0x13e   : > { %v654_v30 = vpop.f32.mrb[8].mxu0  ;;  %v694_v31 = vpop.f32.mrb[8].mxu1 }
 0x13f   : > { %v721_v34 = vadd.f32 %v654_v30, %v416_v26  ;;  %v737_v35 = vadd.f32 %v694_v31, %v432_v27  ;;  %v656_v36 = vpop.f32.mrb[9].mxu0  ;;  %v696_v37 = vpop.f32.mrb[9].mxu1  ;;  %v1458_v20 = vrot.slane (!%p1159_p11), %v813_v12, %v817_v15  ;;  %v1460_v21 = vrot.slane (!%p1159_p11), %v813_v12, %v821_v16 }
 0x140   : > { %v722_v40 = vadd.f32 %v656_v36, %v417_v28  ;;  %v738_v41 = vadd.f32 %v696_v37, %v433_v29  ;;  %v658_v42 = vpop.f32.mrb[10].mxu0  ;;  %v698_v43 = vpop.f32.mrb[10].mxu1  ;;  %v785_v19 = vld [vmem:[#allocation2 + $0x20] sm:$0xff] (!%p1159_p11) }
 0x141   : > { %753 = vst [vmem:[#allocation2 + $0x40] sm:$0xff] %v721_v34  ;;  %769 = vst [vmem:[#allocation2 + $0xc0] sm:$0xff] %v737_v35  ;;  %v723_v44 = vadd.f32 %v658_v42, %v418_v32  ;;  %v739_v45 = vadd.f32 %v698_v43, %v434_v33  ;;  %v660_v46 = vpop.f32.mrb[11].mxu0  ;;  %v700_v47 = vpop.f32.mrb[11].mxu1  ;;  %v786_v22 = vld [vmem:[#allocation2 + $0x28] sm:$0xff] (!%p1159_p11)  ;;  %v825_v25 = vadd.f32 (!%p1159_p11), %v1458_v20, %v781_v13 }
 0x142   : > { %754 = vst [vmem:[#allocation2 + $0x48] sm:$0xff] %v722_v40  ;;  %770 = vst [vmem:[#allocation2 + $0xc8] sm:$0xff] %v738_v41  ;;  %v724_v48 = vadd.f32 %v660_v46, %v419_v38  ;;  %v740_v49 = vadd.f32 %v700_v47, %v435_v39  ;;  %v787_v23 = vld [vmem:[#allocation2 + $0x30] sm:$0xff] (!%p1159_p11)  ;;  %v826_v26 = vadd.f32 (!%p1159_p11), %v1460_v21, %v782_v14  ;;  %v802_v10 = vld [vmem:[#allocation2 + $0xa8] sm:$0xff] (!%p1159_p11) }
 0x143   : > { %755 = vst [vmem:[#allocation2 + $0x50] sm:$0xff] %v723_v44  ;;  %771 = vst [vmem:[#allocation2 + $0xd0] sm:$0xff] %v739_v45  ;;  %v788_v24 = vld [vmem:[#allocation2 + $0x38] sm:$0xff] (!%p1159_p11)  ;;  %v827_v27 = vadd.f32 (!%p1159_p11), %v1458_v20, %v783_v17  ;;  %v828_v28 = vadd.f32 (!%p1159_p11), %v1460_v21, %v784_v18  ;;  %v829_v29 = vadd.f32 (!%p1159_p11), %v1458_v20, %v785_v19  ;;  %v857_v35 = vmax.f32 (!%p1159_p11), %v825_v25, 0.0  ;;  %v803_v15 = vld [vmem:[#allocation2 + $0xb0] sm:$0xff] (!%p1159_p11) }
 0x144   : > { %756 = vst [vmem:[#allocation2 + $0x58] sm:$0xff] %v724_v48  ;;  %772 = vst [vmem:[#allocation2 + $0xd8] sm:$0xff] %v740_v49  ;;  %v830_v30 = vadd.f32 (!%p1159_p11), %v1460_v21, %v786_v22  ;;  %v831_v31 = vadd.f32 (!%p1159_p11), %v1458_v20, %v787_v23  ;;  %v832_v32 = vadd.f32 (!%p1159_p11), %v1460_v21, %v788_v24  ;;  %v858_v36 = vmax.f32 (!%p1159_p11), %v826_v26, 0.0  ;;  %v804_v16 = vld [vmem:[#allocation2 + $0xb8] sm:$0xff] (!%p1159_p11) }
 0x145   : > { %v859_v37 = vmax.f32 (!%p1159_p11), %v827_v27, 0.0  ;;  %v860_v38 = vmax.f32 (!%p1159_p11), %v828_v28, 0.0  ;;  %v861_v41 = vmax.f32 (!%p1159_p11), %v829_v29, 0.0  ;;  %v846_v27 = vadd.f32 (!%p1159_p11), %v1460_v21, %v802_v10 }
 0x146   : > { %v664_v54 = vpop.f32.mrb[12].mxu0  ;;  %v704_v55 = vpop.f32.mrb[12].mxu1  ;;  %780 = sbr.rel (%p1159_p11) target bundleno = 349 (0x15d), region = 81  ;;  %v862_v42 = vmax.f32 (!%p1159_p11), %v830_v30, 0.0  ;;  %v863_v43 = vmax.f32 (!%p1159_p11), %v831_v31, 0.0  ;;  %v864_v44 = vmax.f32 (!%p1159_p11), %v832_v32, 0.0  ;;  %v1181_v47 = vpack.c.bf16 (!%p1159_p11), %v858_v36, %v857_v35 }
 0x147   : > { %v725_v58 = vadd.f32 %v664_v54, %v420_v50  ;;  %v741_v59 = vadd.f32 %v704_v55, %v436_v51  ;;  %v666_v60 = vpop.f32.mrb[13].mxu0  ;;  %v706_v61 = vpop.f32.mrb[13].mxu1  ;;  %v1182_v48 = vpack.c.bf16 (!%p1159_p11), %v860_v38, %v859_v37  ;;  %v847_v31 = vadd.f32 (!%p1159_p11), %v1458_v20, %v803_v15 }
 0x148   : > { %v726_v0 = vadd.f32 %v666_v60, %v421_v52  ;;  %v742_v1 = vadd.f32 %v706_v61, %v437_v53  ;;  %v668_v2 = vpop.f32.mrb[14].mxu0  ;;  %v708_v3 = vpop.f32.mrb[14].mxu1  ;;  %v789_v33 = vld [vmem:[#allocation2 + $0x40] sm:$0xff] (!%p1159_p11)  ;;  %v1183_v53 = vpack.c.bf16 (!%p1159_p11), %v862_v42, %v861_v41  ;;  %v1184_v54 = vpack.c.bf16 (!%p1159_p11), %v864_v44, %v863_v43  ;;  %985 = vst [vmem:[%s1560_s3] sm:$0xff] (!%p1159_p11), %v1181_v47 }
 0x149   : > { %757 = vst [vmem:[#allocation2 + $0x60] sm:$0xff] %v725_v58  ;;  %773 = vst [vmem:[#allocation2 + $0xe0] sm:$0xff] %v741_v59  ;;  %v727_v4 = vadd.f32 %v668_v2, %v422_v56  ;;  %v743_v5 = vadd.f32 %v708_v3, %v438_v57  ;;  %v670_v6 = vpop.f32.mrb[15].mxu0  ;;  %v710_v7 = vpop.f32.mrb[15].mxu1  ;;  %v790_v34 = vld [vmem:[#allocation2 + $0x48] sm:$0xff] (!%p1159_p11)  ;;  %v833_v49 = vadd.f32 (!%p1159_p11), %v1458_v20, %v789_v33  ;;  %v797_v57 = vld [vmem:[#allocation2 + $0x80] sm:$0xff] (!%p1159_p11) }
 0x14a   : > { %758 = vst [vmem:[#allocation2 + $0x68] sm:$0xff] %v726_v0  ;;  %774 = vst [vmem:[#allocation2 + $0xe8] sm:$0xff] %v742_v1  ;;  %v728_v8 = vadd.f32 %v670_v6, %v423_v62  ;;  %v744_v9 = vadd.f32 %v710_v7, %v439_v63  ;;  %v791_v39 = vld [vmem:[#allocation2 + $0x50] sm:$0xff] (!%p1159_p11)  ;;  %v834_v50 = vadd.f32 (!%p1159_p11), %v1460_v21, %v790_v34  ;;  %v798_v62 = vld [vmem:[#allocation2 + $0x88] sm:$0xff] (!%p1159_p11)  ;;  %v878_v37 = vmax.f32 (!%p1159_p11), %v846_v27, 0.0 }
 0x14b   : > { %759 = vst [vmem:[#allocation2 + $0x70] sm:$0xff] %v727_v4  ;;  %775 = vst [vmem:[#allocation2 + $0xf0] sm:$0xff] %v743_v5  ;;  %v792_v40 = vld [vmem:[#allocation2 + $0x58] sm:$0xff] (!%p1159_p11)  ;;  %v835_v55 = vadd.f32 (!%p1159_p11), %v1458_v20, %v791_v39  ;;  %v865_v58 = vmax.f32 (!%p1159_p11), %v833_v49, 0.0  ;;  %v799_v3 = vld [vmem:[#allocation2 + $0x90] sm:$0xff] (!%p1159_p11)  ;;  %v842_v14 = vadd.f32 (!%p1159_p11), %v1460_v21, %v798_v62  ;;  %v848_v32 = vadd.f32 (!%p1159_p11), %v1460_v21, %v804_v16 }
 0x14c   : > { %760 = vst [vmem:[#allocation2 + $0x78] sm:$0xff] %v728_v8  ;;  %776 = vst [vmem:[#allocation2 + $0xf8] sm:$0xff] %v744_v9  ;;  %v836_v56 = vadd.f32 (!%p1159_p11), %v1460_v21, %v792_v40  ;;  %v866_v59 = vmax.f32 (!%p1159_p11), %v834_v50, 0.0  ;;  %v800_v4 = vld [vmem:[#allocation2 + $0x98] sm:$0xff] (!%p1159_p11)  ;;  %v841_v8 = vadd.f32 (!%p1159_p11), %v1458_v20, %v797_v57  ;;  %v801_v9 = vld [vmem:[#allocation2 + $0xa0] sm:$0xff] (!%p1159_p11)  ;;  %v843_v19 = vadd.f32 (!%p1159_p11), %v1458_v20, %v799_v3 }
 0x14d   : > { %986 = vst [vmem:[%s1560_s3 + $0x8] sm:$0xff] %v1182_v48  ;;  %987 = vst [vmem:[%s1560_s3 + $0x10] sm:$0xff] %v1183_v53  ;;  %v867_v63 = vmax.f32 %v835_v55, 0.0  ;;  %v844_v22 = vadd.f32 %v1460_v21, %v800_v4  ;;  %v805_v23 = vld [vmem:[#allocation2 + $0xc0] sm:$0xff]  ;;  %v874_v25 = vmax.f32 %v842_v14, 0.0  ;;  %v845_v26 = vadd.f32 %v1458_v20, %v801_v9  ;;  %v806_v28 = vld [vmem:[#allocation2 + $0xc8] sm:$0xff] }
 0x14e   : > { %988 = vst [vmem:[%s1560_s3 + $0x18] sm:$0xff] %v1184_v54  ;;  %v868_v0 = vmax.f32 %v836_v56, 0.0  ;;  %v1185_v5 = vpack.c.bf16 %v866_v59, %v865_v58  ;;  %v873_v18 = vmax.f32 %v841_v8, 0.0  ;;  %v875_v29 = vmax.f32 %v843_v19, 0.0  ;;  %v807_v33 = vld [vmem:[#allocation2 + $0xd0] sm:$0xff]  ;;  %v808_v34 = vld [vmem:[#allocation2 + $0xd8] sm:$0xff] }
 0x14f   : > { %v876_v30 = vmax.f32 %v844_v22, 0.0  ;;  %v877_v36 = vmax.f32 %v845_v26, 0.0  ;;  %v849_v38 = vadd.f32 %v1458_v20, %v805_v23  ;;  %v879_v42 = vmax.f32 %v847_v31, 0.0 }
 0x150   : > { %v793_v45 = vld [vmem:[#allocation2 + $0x60] sm:$0xff]  ;;  %v1186_v11 = vpack.c.bf16 %v868_v0, %v867_v63  ;;  %989 = vst [vmem:[%s1560_s3 + $0x20] sm:$0xff] %v1185_v5  ;;  %v1189_v35 = vpack.c.bf16 %v874_v25, %v873_v18  ;;  %v880_v43 = vmax.f32 %v848_v32, 0.0  ;;  %v850_v44 = vadd.f32 %v1460_v21, %v806_v28 }
 0x151   : > { %v794_v46 = vld [vmem:[#allocation2 + $0x68] sm:$0xff]  ;;  %v837_v60 = vadd.f32 %v1458_v20, %v793_v45  ;;  %v809_v39 = vld [vmem:[#allocation2 + $0xe0] sm:$0xff]  ;;  %v1190_v41 = vpack.c.bf16 %v876_v30, %v875_v29  ;;  %v1191_v47 = vpack.c.bf16 %v878_v37, %v877_v36  ;;  %v881_v48 = vmax.f32 %v849_v38, 0.0 }
 0x152   : > { %v795_v51 = vld [vmem:[#allocation2 + $0x70] sm:$0xff]  ;;  %v838_v61 = vadd.f32 %v1460_v21, %v794_v46  ;;  %990 = vst [vmem:[%s1560_s3 + $0x28] sm:$0xff] %v1186_v11  ;;  %v810_v40 = vld [vmem:[#allocation2 + $0xe8] sm:$0xff]  ;;  %993 = vst [vmem:[%s1560_s3 + $0x40] sm:$0xff] %v1189_v35  ;;  %v851_v49 = vadd.f32 %v1458_v20, %v807_v33  ;;  %v852_v50 = vadd.f32 %v1460_v21, %v808_v34 }
 0x153   : > { %v796_v52 = vld [vmem:[#allocation2 + $0x78] sm:$0xff]  ;;  %v839_v1 = vadd.f32 %v1458_v20, %v795_v51  ;;  %v869_v6 = vmax.f32 %v837_v60, 0.0  ;;  %v811_v45 = vld [vmem:[#allocation2 + $0xf0] sm:$0xff]  ;;  %994 = vst [vmem:[%s1560_s3 + $0x48] sm:$0xff] %v1190_v41  ;;  %v1192_v51 = vpack.c.bf16 %v880_v43, %v879_v42  ;;  %v853_v53 = vadd.f32 %v1458_v20, %v809_v39  ;;  %995 = vst [vmem:[%s1560_s3 + $0x50] sm:$0xff] %v1191_v47 }
 0x154   : > { %v840_v2 = vadd.f32 %v1460_v21, %v796_v52  ;;  %v870_v7 = vmax.f32 %v838_v61, 0.0  ;;  %v812_v46 = vld [vmem:[#allocation2 + $0xf8] sm:$0xff]  ;;  %v882_v52 = vmax.f32 %v850_v44, 0.0  ;;  %v854_v54 = vadd.f32 %v1460_v21, %v810_v40 }
 0x155   : > { %v871_v12 = vmax.f32 %v839_v1, 0.0  ;;  %v883_v55 = vmax.f32 %v851_v49, 0.0  ;;  %v884_v56 = vmax.f32 %v852_v50, 0.0  ;;  %v855_v57 = vadd.f32 %v1458_v20, %v811_v45  ;;  %996 = vst [vmem:[%s1560_s3 + $0x58] sm:$0xff] %v1192_v51 }
 0x156   : > { %v872_v13 = vmax.f32 %v840_v2, 0.0  ;;  %v1187_v17 = vpack.c.bf16 %v870_v7, %v869_v6  ;;  %v856_v58 = vadd.f32 %v1460_v21, %v812_v46  ;;  %v1193_v59 = vpack.c.bf16 %v882_v52, %v881_v48 }
 0x157   : > { %v885_v60 = vmax.f32 %v853_v53, 0.0  ;;  %v886_v61 = vmax.f32 %v854_v54, 0.0  ;;  %v1194_v62 = vpack.c.bf16 %v884_v56, %v883_v55  ;;  %v887_v63 = vmax.f32 %v855_v57, 0.0 }
 0x158   : > { %v1188_v24 = vpack.c.bf16 %v872_v13, %v871_v12  ;;  %991 = vst [vmem:[%s1560_s3 + $0x30] sm:$0xff] %v1187_v17  ;;  %v888_v0 = vmax.f32 %v856_v58, 0.0  ;;  %997 = vst [vmem:[%s1560_s3 + $0x60] sm:$0xff] %v1193_v59 }
 0x159   : > { %v1195_v1 = vpack.c.bf16 %v886_v61, %v885_v60  ;;  %998 = vst [vmem:[%s1560_s3 + $0x68] sm:$0xff] %v1194_v62 }
 0x15a   : > { %992 = vst [vmem:[%s1560_s3 + $0x38] sm:$0xff] %v1188_v24  ;;  %v1196_v20 = vpack.c.bf16 %v888_v0, %v887_v63 }
 0x15b   : > { %999 = vst [vmem:[%s1560_s3 + $0x70] sm:$0xff] %v1195_v1 }
 0x15c   : > { %1000 = vst [vmem:[%s1560_s3 + $0x78] sm:$0xff] %v1196_v20 }
 0x15d PF: > { %s13_s16 = sadd.s32 1, %s1325_s16   ;;  %s1561_s12 = smov %s1313_s13 }
 0x15e   : > { %p10_p12 = scmp.ge.s32.totalorder %s13_s16, 11   ;;  %s1562_s13 = smov %s1384_s20 }
 0x15f   : > { %s1563_s14 = smov %s1321_s15  ;;  %s1564_s15 = smov %s1566_s17 }
 0x160   :  { %12 = sbr.rel (!%p10_p12) target bundleno = 3 (0x3), region = 122 }

// kernel: _lambda_.21
= control target key start
LH: loop header
LB: loop body
LE: loop exit
PB: predicated region body
PF: predicated region fallthrough
CT: control target
= control target key end

     0   :  { %v720_v1 = vmov 0   ;;  %v457_v25 = vlaneseq  ;;  %s908_s1 = inlined_call_operand.vmem [shape: bf16[128,256], index: 1, kind: input, shape index: {}]   ;;  %s909_s0 = inlined_call_operand.vmem [shape: bf16[128,128], index: 0, kind: input, shape index: {}]   ;;  %s910_s2 = inlined_call_operand.vmem [shape: f32[1,256], index: 2, kind: input, shape index: {}]   ;;  %s911_s3 = inlined_call_operand.vmem [shape: bf16[128,256], index: 3, kind: output, shape index: {}]  }
   0x1   :  { %v688_v0 = vld [vmem:[%s908_s1 + $0x4] ss:$8 sps:$4 sm:$0xff]   ;;  %275 = vmatprep.mubr.bf16.mxu0 %v720_v1  ;;  %315 = vmatprep.mubr.bf16.mxu1 %v720_v1  ;;  %v690_v2 = vld [vmem:[%s908_s1] ss:$8 sps:$4 sm:$0xff]   ;;  %v691_v3 = vld [vmem:[%s908_s1 + $0x14] ss:$8 sps:$4 sm:$0xff]  }
   0x2   :  { %243 = vmatprep.subr.bf16.mxu0 %v688_v0  ;;  %671 = vmatprep.subr.bf16.mxu1 %v688_v0  ;;  %v693_v4 = vld [vmem:[%s908_s1 + $0x10] ss:$8 sps:$4 sm:$0xff]   ;;  %v694_v5 = vld [vmem:[%s908_s1 + $0x24] ss:$8 sps:$4 sm:$0xff]   ;;  %v696_v6 = vld [vmem:[%s908_s1 + $0x20] ss:$8 sps:$4 sm:$0xff]  }
   0x3   :  { %244 = vmatpush1.bf16.msra.mxu0 %v690_v2  ;;  %679 = vmatpush1.bf16.msra.mxu1 %v690_v2  ;;  %v697_v7 = vld [vmem:[%s908_s1 + $0x34] ss:$8 sps:$4 sm:$0xff]   ;;  %v699_v8 = vld [vmem:[%s908_s1 + $0x30] ss:$8 sps:$4 sm:$0xff]   ;;  %v700_v9 = vld [vmem:[%s908_s1 + $0x44] ss:$8 sps:$4 sm:$0xff]  }
   0x4   :  { %245 = vmatprep.subr.bf16.mxu0 %v691_v3  ;;  %672 = vmatprep.subr.bf16.mxu1 %v691_v3  ;;  %v702_v10 = vld [vmem:[%s908_s1 + $0x40] ss:$8 sps:$4 sm:$0xff]   ;;  %v703_v11 = vld [vmem:[%s908_s1 + $0x54] ss:$8 sps:$4 sm:$0xff]   ;;  %v705_v12 = vld [vmem:[%s908_s1 + $0x50] ss:$8 sps:$4 sm:$0xff]  }
   0x5   :  { %v706_v13 = vld [vmem:[%s908_s1 + $0x64] ss:$8 sps:$4 sm:$0xff]   ;;  %v708_v14 = vld [vmem:[%s908_s1 + $0x60] ss:$8 sps:$4 sm:$0xff]   ;;  %v709_v15 = vld [vmem:[%s908_s1 + $0x74] ss:$8 sps:$4 sm:$0xff]  }
   0x6   :  { %v711_v16 = vld [vmem:[%s908_s1 + $0x70] ss:$8 sps:$4 sm:$0xff]   ;;  %v712_v17 = vld [vmem:[%s909_s0] sm:$0xff]   ;;  %v714_v19 = vld [vmem:[%s909_s0 + $0x8] sm:$0xff]   ;;  %v458_v26 = vshrl.u32 %v457_v25, 7 }
   0x7   :  { %246 = vmatpush1.bf16.msra.mxu0 %v693_v4  ;;  %680 = vmatpush1.bf16.msra.mxu1 %v693_v4  ;;  %v713_v18 = vld [vmem:[%s909_s0 + $0x20] sm:$0xff]   ;;  %v715_v20 = vld [vmem:[%s909_s0 + $0x28] sm:$0xff]   ;;  %v716_v21 = vld [vmem:[%s909_s0 + $0x10] sm:$0xff]  }
   0x8   :  { %247 = vmatprep.subr.bf16.mxu0 %v694_v5  ;;  %673 = vmatprep.subr.bf16.mxu1 %v694_v5  ;;  %v717_v22 = vld [vmem:[%s909_s0 + $0x30] sm:$0xff]   ;;  %v718_v23 = vld [vmem:[%s909_s0 + $0x18] sm:$0xff]   ;;  %v459_v27 = vsub.s32 0, %v458_v26  ;;  %v455_v28 = vld [vmem:[%s910_s2] sm:$0x3]  ;;  %v463_v29 = vsub.s32 1, %v458_v26 }
   0x9   :  { %v719_v24 = vld [vmem:[%s909_s0 + $0x38] sm:$0xff]  }
   0xa   :  { %v824_v30 = vrot.slane %v455_v28, %v459_v27  ;;  %v826_v31 = vrot.slane %v455_v28, %v463_v29 }
   0xb   :  { %248 = vmatpush1.bf16.msra.mxu0 %v696_v6  ;;  %681 = vmatpush1.bf16.msra.mxu1 %v696_v6 }
   0xc   :  { %249 = vmatprep.subr.bf16.mxu0 %v697_v7  ;;  %674 = vmatprep.subr.bf16.mxu1 %v697_v7 }
   0xf   :  { %250 = vmatpush1.bf16.msra.mxu0 %v699_v8  ;;  %682 = vmatpush1.bf16.msra.mxu1 %v699_v8 }
  0x10   :  { %251 = vmatprep.subr.bf16.mxu0 %v700_v9  ;;  %675 = vmatprep.subr.bf16.mxu1 %v700_v9 }
  0x13   :  { %252 = vmatpush1.bf16.msra.mxu0 %v702_v10  ;;  %683 = vmatpush1.bf16.msra.mxu1 %v702_v10 }
  0x14   :  { %253 = vmatprep.subr.bf16.mxu0 %v703_v11  ;;  %676 = vmatprep.subr.bf16.mxu1 %v703_v11 }
  0x17   :  { %254 = vmatpush1.bf16.msra.mxu0 %v705_v12  ;;  %684 = vmatpush1.bf16.msra.mxu1 %v705_v12 }
  0x18   :  { %255 = vmatprep.subr.bf16.mxu0 %v706_v13  ;;  %677 = vmatprep.subr.bf16.mxu1 %v706_v13 }
  0x1b   :  { %256 = vmatpush1.bf16.msra.mxu0 %v708_v14  ;;  %685 = vmatpush1.bf16.msra.mxu1 %v708_v14 }
  0x1c   :  { %257 = vmatprep.subr.bf16.mxu0 %v709_v15  ;;  %678 = vmatprep.subr.bf16.mxu1 %v709_v15 }
  0x1f   :  { %258 = vmatpush1.bf16.msra.mxu0 %v711_v16  ;;  %686 = vmatpush1.bf16.msra.mxu1 %v711_v16 }
  0x22   :  { %276 = vmatmul.mubr.bf16.vlgmr.msra.gmra.mrb[0].mxu0 %v712_v17  ;;  %316 = vmatmul.mubr.bf16.vlgmr.msra.gmra.mrb[0].mxu1 %v713_v18 }
  0x23   :  { %285 = vmatprep.mubr.bf16.mxu0 %v720_v1  ;;  %325 = vmatprep.mubr.bf16.mxu1 %v720_v1 }
  0x2a   :  { %286 = vmatmul.mubr.bf16.gmra.mrb[4].mxu0 %v714_v19  ;;  %326 = vmatmul.mubr.bf16.gmra.mrb[4].mxu1 %v715_v20 }
  0x2b   :  { %295 = vmatprep.mubr.bf16.mxu0 %v720_v1  ;;  %335 = vmatprep.mubr.bf16.mxu1 %v720_v1 }
  0x32   :  { %296 = vmatmul.mubr.bf16.gmra.mrb[8].mxu0 %v716_v21  ;;  %336 = vmatmul.mubr.bf16.gmra.mrb[8].mxu1 %v717_v22 }
  0x33   :  { %305 = vmatprep.mubr.bf16.mxu0 %v720_v1  ;;  %345 = vmatprep.mubr.bf16.mxu1 %v720_v1 }
  0x3a   :  { %306 = vmatmul.mubr.bf16.gmra.mrb[12].mxu0 %v718_v23  ;;  %346 = vmatmul.mubr.bf16.gmra.mrb[12].mxu1 %v719_v24 }
  0xf5   :  { %v277_v32 = vpop.f32.mrb[0].mxu0  ;;  %v317_v33 = vpop.f32.mrb[0].mxu1 }
  0xf6   :  { %v467_v34 = vadd.f32 %v824_v30, %v277_v32  ;;  %v483_v35 = vadd.f32 %v824_v30, %v317_v33  ;;  %v279_v36 = vpop.f32.mrb[1].mxu0  ;;  %v319_v37 = vpop.f32.mrb[1].mxu1 }
  0xf7   :  { %v468_v38 = vadd.f32 %v826_v31, %v279_v36  ;;  %v484_v39 = vadd.f32 %v826_v31, %v319_v37  ;;  %v281_v40 = vpop.f32.mrb[2].mxu0  ;;  %v321_v41 = vpop.f32.mrb[2].mxu1 }
  0xf8   :  { %v469_v42 = vadd.f32 %v824_v30, %v281_v40  ;;  %v485_v43 = vadd.f32 %v824_v30, %v321_v41  ;;  %v283_v44 = vpop.f32.mrb[3].mxu0  ;;  %v323_v45 = vpop.f32.mrb[3].mxu1 }
  0xf9   :  { %v655_v46 = vpack.c.bf16 %v468_v38, %v467_v34  ;;  %v663_v47 = vpack.c.bf16 %v484_v39, %v483_v35  ;;  %v470_v48 = vadd.f32 %v826_v31, %v283_v44  ;;  %v486_v49 = vadd.f32 %v826_v31, %v323_v45 }
  0xfb   :  { %595 = vst [vmem:[%s911_s3] sm:$0xff] %v655_v46  ;;  %603 = vst [vmem:[%s911_s3 + $0x40] sm:$0xff] %v663_v47  ;;  %v656_v50 = vpack.c.bf16 %v470_v48, %v469_v42  ;;  %v664_v51 = vpack.c.bf16 %v486_v49, %v485_v43 }
  0xfd   :  { %596 = vst [vmem:[%s911_s3 + $0x8] sm:$0xff] %v656_v50  ;;  %604 = vst [vmem:[%s911_s3 + $0x48] sm:$0xff] %v664_v51  ;;  %v287_v52 = vpop.f32.mrb[4].mxu0  ;;  %v327_v53 = vpop.f32.mrb[4].mxu1 }
  0xfe   :  { %v471_v54 = vadd.f32 %v824_v30, %v287_v52  ;;  %v487_v55 = vadd.f32 %v824_v30, %v327_v53  ;;  %v289_v56 = vpop.f32.mrb[5].mxu0  ;;  %v329_v57 = vpop.f32.mrb[5].mxu1 }
  0xff   :  { %v472_v58 = vadd.f32 %v826_v31, %v289_v56  ;;  %v488_v59 = vadd.f32 %v826_v31, %v329_v57  ;;  %v291_v60 = vpop.f32.mrb[6].mxu0  ;;  %v331_v61 = vpop.f32.mrb[6].mxu1 }
 0x100   :  { %v473_v62 = vadd.f32 %v824_v30, %v291_v60  ;;  %v489_v63 = vadd.f32 %v824_v30, %v331_v61  ;;  %v293_v0 = vpop.f32.mrb[7].mxu0  ;;  %v333_v1 = vpop.f32.mrb[7].mxu1 }
 0x101   :  { %v657_v2 = vpack.c.bf16 %v472_v58, %v471_v54  ;;  %v665_v3 = vpack.c.bf16 %v488_v59, %v487_v55  ;;  %v474_v4 = vadd.f32 %v826_v31, %v293_v0  ;;  %v490_v5 = vadd.f32 %v826_v31, %v333_v1 }
 0x103   :  { %597 = vst [vmem:[%s911_s3 + $0x10] sm:$0xff] %v657_v2  ;;  %605 = vst [vmem:[%s911_s3 + $0x50] sm:$0xff] %v665_v3  ;;  %v658_v6 = vpack.c.bf16 %v474_v4, %v473_v62  ;;  %v666_v7 = vpack.c.bf16 %v490_v5, %v489_v63 }
 0x105   :  { %598 = vst [vmem:[%s911_s3 + $0x18] sm:$0xff] %v658_v6  ;;  %606 = vst [vmem:[%s911_s3 + $0x58] sm:$0xff] %v666_v7  ;;  %v297_v8 = vpop.f32.mrb[8].mxu0  ;;  %v337_v9 = vpop.f32.mrb[8].mxu1 }
 0x106   :  { %v475_v10 = vadd.f32 %v824_v30, %v297_v8  ;;  %v491_v11 = vadd.f32 %v824_v30, %v337_v9  ;;  %v299_v12 = vpop.f32.mrb[9].mxu0  ;;  %v339_v13 = vpop.f32.mrb[9].mxu1 }
 0x107   :  { %v476_v14 = vadd.f32 %v826_v31, %v299_v12  ;;  %v492_v15 = vadd.f32 %v826_v31, %v339_v13  ;;  %v301_v16 = vpop.f32.mrb[10].mxu0  ;;  %v341_v17 = vpop.f32.mrb[10].mxu1 }
 0x108   :  { %v477_v18 = vadd.f32 %v824_v30, %v301_v16  ;;  %v493_v19 = vadd.f32 %v824_v30, %v341_v17  ;;  %v303_v20 = vpop.f32.mrb[11].mxu0  ;;  %v343_v21 = vpop.f32.mrb[11].mxu1 }
 0x109   :  { %v659_v22 = vpack.c.bf16 %v476_v14, %v475_v10  ;;  %v667_v23 = vpack.c.bf16 %v492_v15, %v491_v11  ;;  %v478_v24 = vadd.f32 %v826_v31, %v303_v20  ;;  %v494_v25 = vadd.f32 %v826_v31, %v343_v21 }
 0x10b   :  { %599 = vst [vmem:[%s911_s3 + $0x20] sm:$0xff] %v659_v22  ;;  %607 = vst [vmem:[%s911_s3 + $0x60] sm:$0xff] %v667_v23  ;;  %v660_v26 = vpack.c.bf16 %v478_v24, %v477_v18  ;;  %v668_v27 = vpack.c.bf16 %v494_v25, %v493_v19 }
 0x10d   :  { %600 = vst [vmem:[%s911_s3 + $0x28] sm:$0xff] %v660_v26  ;;  %608 = vst [vmem:[%s911_s3 + $0x68] sm:$0xff] %v668_v27  ;;  %v307_v28 = vpop.f32.mrb[12].mxu0  ;;  %v347_v29 = vpop.f32.mrb[12].mxu1 }
 0x10e   :  { %v479_v32 = vadd.f32 %v824_v30, %v307_v28  ;;  %v495_v33 = vadd.f32 %v824_v30, %v347_v29  ;;  %v309_v34 = vpop.f32.mrb[13].mxu0  ;;  %v349_v35 = vpop.f32.mrb[13].mxu1 }
 0x10f   :  { %v480_v36 = vadd.f32 %v826_v31, %v309_v34  ;;  %v496_v37 = vadd.f32 %v826_v31, %v349_v35  ;;  %v311_v38 = vpop.f32.mrb[14].mxu0  ;;  %v351_v39 = vpop.f32.mrb[14].mxu1 }
 0x110   :  { %v481_v40 = vadd.f32 %v824_v30, %v311_v38  ;;  %v497_v41 = vadd.f32 %v824_v30, %v351_v39  ;;  %v313_v42 = vpop.f32.mrb[15].mxu0  ;;  %v353_v43 = vpop.f32.mrb[15].mxu1 }
 0x111   :  { %v661_v44 = vpack.c.bf16 %v480_v36, %v479_v32  ;;  %v669_v45 = vpack.c.bf16 %v496_v37, %v495_v33  ;;  %v482_v46 = vadd.f32 %v826_v31, %v313_v42  ;;  %v498_v47 = vadd.f32 %v826_v31, %v353_v43 }
 0x113   :  { %601 = vst [vmem:[%s911_s3 + $0x30] sm:$0xff] %v661_v44  ;;  %609 = vst [vmem:[%s911_s3 + $0x70] sm:$0xff] %v669_v45  ;;  %v662_v48 = vpack.c.bf16 %v482_v46, %v481_v40  ;;  %v670_v49 = vpack.c.bf16 %v498_v47, %v497_v41 }
 0x115   :  { %602 = vst [vmem:[%s911_s3 + $0x38] sm:$0xff] %v662_v48  ;;  %610 = vst [vmem:[%s911_s3 + $0x78] sm:$0xff] %v670_v49 }

// kernel: _lambda_.23
= control target key start
LH: loop header
LB: loop body
LE: loop exit
PB: predicated region body
PF: predicated region fallthrough
CT: control target
= control target key end

     0   :  { %s1727_s15 = smov 0   ;;  %s1729_s16 = smov 0   ;;  %s1999_s0 = inlined_call_operand.vmem [shape: bf16[128,2304], index: 0, kind: input, shape index: {}]   ;;  %s2000_s1 = inlined_call_operand.vmem [shape: bf16[2304,256], index: 1, kind: input, shape index: {}]   ;;  %s2001_s2 = inlined_call_operand.vmem [shape: f32[1,256], index: 2, kind: input, shape index: {}]   ;;  %s2002_s3 = inlined_call_operand.vmem [shape: bf16[128,256], index: 3, kind: input, shape index: {}]   ;;  %s2003_s4 = inlined_call_operand.vmem [shape: bf16[128,256], index: 4, kind: output, shape index: {}]  }
   0x1   :  { %s1731_s17 = smov 0   ;;  %s1733_s18 = smov 0  }
   0x2   :  { %s1735_s19 = smov 0  }
   0x3 LB: > { %s26_s20 = sadd.s32 1, %s1695_s18  ;;  %p49_p1 = scmp.ne.s32.totalorder %s1687_s16, %s1683_s15  ;;  %s1699_s19 = sphi %s1735_s19, %s14_s19   ;;  %s1695_s18 = sphi %s1733_s18, %s2007_s18   ;;  %s1691_s17 = sphi %s1731_s17, %s2006_s17   ;;  %s1687_s16 = sphi %s1729_s16, %s2005_s16   ;;  %s1683_s15 = sphi %s1727_s15, %s2004_s15  }
   0x4   : > { %p27_p0 = scmp.ge.s32.totalorder %s26_s20, 9  ;;  %p50_p2 = scmp.eq.s32.totalorder %s1699_s19, 0 }
   0x5   : > { %s42_s22 = sadd.s32 1, %s1687_s16  ;;  %p1419_p5 = scmp.ge.s32.totalorder %s1699_s19, 9 }
   0x6   : > { %s2009_s20 = smov (%p27_p0, %s26_s20), 0  ;;  %p51_p3 = por %p50_p2, %p49_p1 }
   0x7   : > { %s38_s21 = ssub.s32 %s1695_s18, %s2009_s20  ;;  %208 = sbr.rel (%p1419_p5) target bundleno = 26 (0x1a), region = 24 }
   0x8   : > { %p40_p4 = scmp.eq.s32.totalorder %s38_s21, 0 }
   0xa   : > { %s1762_s23 = scalar_select %p40_p4, %s1687_s16, %s42_s22  }
   0xe   : > { %211 = sbr.rel (!%p51_p3) target bundleno = 26 (0x1a), region = 28  ;;  %s213_s24 = sand.u32 (%p51_p3), 1, %s1687_s16  }
   0xf   : > { %s1498_s25 = sshll.u32 (%p51_p3), %s1695_s18, 3  ;;  %s1420_s26 = sshll.u32 (%p51_p3), %s213_s24, 7 }
  0x10   : > { %s1770_s29 = scalar_lea.vmem (%p51_p3), %s1999_s0, %s1498_s25  ;;  %s215_s30 = scalar_lea.vmem (%p51_p3), [#allocation3], %s1420_s26 }
  0x11   : > { %v279_v0 = vld [vmem:[%s1770_s29] sm:$0xff] (%p51_p3)  ;;  %v281_v1 = vld [vmem:[%s1770_s29 + $0x48] sm:$0xff] (%p51_p3)  ;;  %v283_v2 = vld [vmem:[%s1770_s29 + $0x90] sm:$0xff] (%p51_p3) }
  0x12   : > { %280 = vst [vmem:[%s215_s30] sm:$0xff] (%p51_p3), %v279_v0  ;;  %282 = vst [vmem:[%s215_s30 + $0x8] sm:$0xff] (%p51_p3), %v281_v1  ;;  %v285_v3 = vld [vmem:[%s1770_s29 + $0xd8] sm:$0xff] (%p51_p3)  ;;  %v287_v4 = vld [vmem:[%s1770_s29 + $0x120] sm:$0xff] (%p51_p3) }
  0x13   : > { %284 = vst [vmem:[%s215_s30 + $0x10] sm:$0xff] (%p51_p3), %v283_v2  ;;  %v289_v5 = vld [vmem:[%s1770_s29 + $0x168] sm:$0xff] (%p51_p3)  ;;  %286 = vst [vmem:[%s215_s30 + $0x18] sm:$0xff] (%p51_p3), %v285_v3  ;;  %v291_v6 = vld [vmem:[%s1770_s29 + $0x1b0] sm:$0xff] (%p51_p3) }
  0x14   : > { %288 = vst [vmem:[%s215_s30 + $0x20] sm:$0xff] (%p51_p3), %v287_v4  ;;  %290 = vst [vmem:[%s215_s30 + $0x28] sm:$0xff] (%p51_p3), %v289_v5  ;;  %v293_v7 = vld [vmem:[%s1770_s29 + $0x1f8] sm:$0xff] (%p51_p3)  ;;  %v295_v8 = vld [vmem:[%s1770_s29 + $0x240] sm:$0xff] (%p51_p3) }
  0x15   : > { %292 = vst [vmem:[%s215_s30 + $0x30] sm:$0xff] %v291_v6  ;;  %294 = vst [vmem:[%s215_s30 + $0x38] sm:$0xff] %v293_v7  ;;  %v297_v9 = vld [vmem:[%s1770_s29 + $0x288] sm:$0xff]  ;;  %v299_v10 = vld [vmem:[%s1770_s29 + $0x2d0] sm:$0xff] }
  0x16   : > { %296 = vst [vmem:[%s215_s30 + $0x40] sm:$0xff] %v295_v8  ;;  %v301_v11 = vld [vmem:[%s1770_s29 + $0x318] sm:$0xff]  ;;  %298 = vst [vmem:[%s215_s30 + $0x48] sm:$0xff] %v297_v9  ;;  %v303_v12 = vld [vmem:[%s1770_s29 + $0x360] sm:$0xff] }
  0x17   : > { %300 = vst [vmem:[%s215_s30 + $0x50] sm:$0xff] %v299_v10  ;;  %302 = vst [vmem:[%s215_s30 + $0x58] sm:$0xff] %v301_v11  ;;  %v305_v13 = vld [vmem:[%s1770_s29 + $0x3a8] sm:$0xff]  ;;  %v307_v14 = vld [vmem:[%s1770_s29 + $0x3f0] sm:$0xff] }
  0x18   : > { %304 = vst [vmem:[%s215_s30 + $0x60] sm:$0xff] %v303_v12  ;;  %306 = vst [vmem:[%s215_s30 + $0x68] sm:$0xff] %v305_v13  ;;  %v309_v15 = vld [vmem:[%s1770_s29 + $0x438] sm:$0xff] }
  0x19   : > { %308 = vst [vmem:[%s215_s30 + $0x70] sm:$0xff] %v307_v14  ;;  %310 = vst [vmem:[%s215_s30 + $0x78] sm:$0xff] %v309_v15 }
  0x1a PF: > { %p1423_p6 = scmp.ge.s32.totalorder %s1699_s19, 1  ;;  %p330_p7 = scmp.lt.s32.totalorder %s1699_s19, 10 }
  0x1c   : > { %p331_p8 = pnand %p1423_p6, %p330_p7 }
  0x1d   : > { %s337_s5 = sand.u32 (!%p331_p8), 1, %s1683_s15   ;;  %s1425_s6 = sshll.u32 (!%p331_p8), %s1691_s17, 5 }
  0x1e   : > { %334 = sbr.rel (%p331_p8) target bundleno = 395 (0x18b), region = 70  ;;  %s1424_s7 = sshll.u32 (!%p331_p8), %s337_s5, 7 }
  0x1f   : > { %p395_p9 = scmp.lt.s32.totalorder (!%p331_p8), %s1425_s6, 287  ;;  %s1797_s12 = scalar_lea.vmem (!%p331_p8), [#allocation3], %s1424_s7 }
  0x20   : > { %p1428_p10 = scmp.ne.s32.totalorder (!%p331_p8), %s1691_s17, 0 }
  0x25   : > { %s2011_s6 = smov (!%p395_p9, %s1425_s6), 287  ;;  %437 = sbr.rel (%p1428_p10) target bundleno = 55 (0x37), region = 78 }
  0x26   : > { %s1499_s8 = sshll.u32 %s2011_s6, 3  ;;  %v1701_v16 = vmov (!%p1428_p10), 0.0  }
  0x27   : > { %s1795_s11 = scalar_lea.vmem %s2000_s1, %s1499_s8  ;;  %438 = vst [vmem:[#allocation2] sm:$0xff] (!%p1428_p10), %v1701_v16  ;;  %439 = vst [vmem:[#allocation2 + $0x8] sm:$0xff] (!%p1428_p10), %v1701_v16 }
  0x28   : > { %440 = vst [vmem:[#allocation2 + $0x10] sm:$0xff] (!%p1428_p10), %v1701_v16  ;;  %441 = vst [vmem:[#allocation2 + $0x18] sm:$0xff] (!%p1428_p10), %v1701_v16 }
  0x29   : > { %442 = vst [vmem:[#allocation2 + $0x20] sm:$0xff] (!%p1428_p10), %v1701_v16  ;;  %443 = vst [vmem:[#allocation2 + $0x28] sm:$0xff] (!%p1428_p10), %v1701_v16 }
  0x2a   : > { %444 = vst [vmem:[#allocation2 + $0x30] sm:$0xff] (!%p1428_p10), %v1701_v16  ;;  %445 = vst [vmem:[#allocation2 + $0x38] sm:$0xff] (!%p1428_p10), %v1701_v16 }
  0x2b   : > { %446 = vst [vmem:[#allocation2 + $0x40] sm:$0xff] (!%p1428_p10), %v1701_v16  ;;  %447 = vst [vmem:[#allocation2 + $0x48] sm:$0xff] (!%p1428_p10), %v1701_v16 }
  0x2c   : > { %448 = vst [vmem:[#allocation2 + $0x50] sm:$0xff] %v1701_v16  ;;  %449 = vst [vmem:[#allocation2 + $0x58] sm:$0xff] %v1701_v16 }
  0x2d   : > { %450 = vst [vmem:[#allocation2 + $0x60] sm:$0xff] %v1701_v16  ;;  %451 = vst [vmem:[#allocation2 + $0x68] sm:$0xff] %v1701_v16 }
  0x2e   : > { %452 = vst [vmem:[#allocation2 + $0x70] sm:$0xff] %v1701_v16  ;;  %453 = vst [vmem:[#allocation2 + $0x78] sm:$0xff] %v1701_v16 }
  0x2f   : > { %454 = vst [vmem:[#allocation2 + $0x80] sm:$0xff] %v1701_v16  ;;  %455 = vst [vmem:[#allocation2 + $0x88] sm:$0xff] %v1701_v16 }
  0x30   : > { %456 = vst [vmem:[#allocation2 + $0x90] sm:$0xff] %v1701_v16  ;;  %457 = vst [vmem:[#allocation2 + $0x98] sm:$0xff] %v1701_v16 }
  0x31   : > { %458 = vst [vmem:[#allocation2 + $0xa0] sm:$0xff] %v1701_v16  ;;  %459 = vst [vmem:[#allocation2 + $0xa8] sm:$0xff] %v1701_v16 }
  0x32   : > { %460 = vst [vmem:[#allocation2 + $0xb0] sm:$0xff] %v1701_v16  ;;  %461 = vst [vmem:[#allocation2 + $0xb8] sm:$0xff] %v1701_v16 }
  0x33   : > { %462 = vst [vmem:[#allocation2 + $0xc0] sm:$0xff] %v1701_v16  ;;  %463 = vst [vmem:[#allocation2 + $0xc8] sm:$0xff] %v1701_v16 }
  0x34   : > { %464 = vst [vmem:[#allocation2 + $0xd0] sm:$0xff] %v1701_v16  ;;  %465 = vst [vmem:[#allocation2 + $0xd8] sm:$0xff] %v1701_v16 }
  0x35   : > { %466 = vst [vmem:[#allocation2 + $0xe0] sm:$0xff] %v1701_v16  ;;  %467 = vst [vmem:[#allocation2 + $0xe8] sm:$0xff] %v1701_v16 }
  0x36   : > { %468 = vst [vmem:[#allocation2 + $0xf0] sm:$0xff] %v1701_v16  ;;  %469 = vst [vmem:[#allocation2 + $0xf8] sm:$0xff] %v1701_v16 }
  0x37 PF: > { %v1589_v17 = vld [vmem:[%s1795_s11 + $0x4] ss:$8 sps:$4 sm:$0xff]   ;;  %v1591_v18 = vld [vmem:[%s1795_s11] ss:$8 sps:$4 sm:$0xff]   ;;  %v1592_v19 = vld [vmem:[%s1795_s11 + $0x14] ss:$8 sps:$4 sm:$0xff]  }
  0x38   : > { %790 = vmatprep.subr.bf16.mxu0 %v1589_v17  ;;  %1516 = vmatprep.subr.bf16.mxu1 %v1589_v17  ;;  %v1594_v20 = vld [vmem:[%s1795_s11 + $0x10] ss:$8 sps:$4 sm:$0xff]   ;;  %v1595_v21 = vld [vmem:[%s1795_s11 + $0x24] ss:$8 sps:$4 sm:$0xff]   ;;  %v1597_v22 = vld [vmem:[%s1795_s11 + $0x20] ss:$8 sps:$4 sm:$0xff]  }
  0x39   : > { %791 = vmatpush1.bf16.msra.mxu0 %v1591_v18  ;;  %1532 = vmatpush1.bf16.msra.mxu1 %v1591_v18  ;;  %v1598_v23 = vld [vmem:[%s1795_s11 + $0x34] ss:$8 sps:$4 sm:$0xff]   ;;  %v1600_v24 = vld [vmem:[%s1795_s11 + $0x30] ss:$8 sps:$4 sm:$0xff]   ;;  %v1601_v25 = vld [vmem:[%s1795_s11 + $0x44] ss:$8 sps:$4 sm:$0xff]  }
  0x3a   : > { %792 = vmatprep.subr.bf16.mxu0 %v1592_v19  ;;  %1517 = vmatprep.subr.bf16.mxu1 %v1592_v19  ;;  %v1603_v26 = vld [vmem:[%s1795_s11 + $0x40] ss:$8 sps:$4 sm:$0xff]   ;;  %v1604_v27 = vld [vmem:[%s1795_s11 + $0x54] ss:$8 sps:$4 sm:$0xff]   ;;  %v1606_v28 = vld [vmem:[%s1795_s11 + $0x50] ss:$8 sps:$4 sm:$0xff]  }
  0x3b   : > { %v1607_v29 = vld [vmem:[%s1795_s11 + $0x64] ss:$8 sps:$4 sm:$0xff]   ;;  %v1609_v31 = vld [vmem:[%s1795_s11 + $0x60] ss:$8 sps:$4 sm:$0xff]   ;;  %v1610_v33 = vld [vmem:[%s1795_s11 + $0x74] ss:$8 sps:$4 sm:$0xff]  }
  0x3c   : > { %v1639_v30 = vld [vmem:[%s1797_s12 + $0x4] ss:$8 sps:$4 sm:$0xff]   ;;  %v1612_v34 = vld [vmem:[%s1795_s11 + $0x70] ss:$8 sps:$4 sm:$0xff]   ;;  %v1615_v36 = vld [vmem:[%s1795_s11 + $0x80] ss:$8 sps:$4 sm:$0xff]  }
  0x3d   : > { %793 = vmatpush1.bf16.msra.mxu0 %v1594_v20  ;;  %1533 = vmatpush1.bf16.msra.mxu1 %v1594_v20  ;;  %v1642_v32 = vld [vmem:[%s1797_s12 + $0x44] ss:$8 sps:$4 sm:$0xff]   ;;  %v1616_v37 = vld [vmem:[%s1795_s11 + $0x94] ss:$8 sps:$4 sm:$0xff]   ;;  %v1618_v38 = vld [vmem:[%s1795_s11 + $0x90] ss:$8 sps:$4 sm:$0xff]  }
  0x3e   : > { %794 = vmatprep.subr.bf16.mxu0 %v1595_v21  ;;  %1518 = vmatprep.subr.bf16.mxu1 %v1595_v21  ;;  %v1613_v35 = vld [vmem:[%s1795_s11 + $0x84] ss:$8 sps:$4 sm:$0xff]   ;;  %v1621_v40 = vld [vmem:[%s1795_s11 + $0xa0] ss:$8 sps:$4 sm:$0xff]   ;;  %v1622_v41 = vld [vmem:[%s1795_s11 + $0xb4] ss:$8 sps:$4 sm:$0xff]  }
  0x3f   : > { %822 = vmatprep.mubr.bf16.mxu0 %v1639_v30  ;;  %862 = vmatprep.mubr.bf16.mxu1 %v1642_v32  ;;  %v1619_v39 = vld [vmem:[%s1795_s11 + $0xa4] ss:$8 sps:$4 sm:$0xff]   ;;  %v1624_v42 = vld [vmem:[%s1795_s11 + $0xb0] ss:$8 sps:$4 sm:$0xff]   ;;  %v1627_v44 = vld [vmem:[%s1795_s11 + $0xc0] ss:$8 sps:$4 sm:$0xff]  }
  0x40   : > { %v1625_v43 = vld [vmem:[%s1795_s11 + $0xc4] ss:$8 sps:$4 sm:$0xff]   ;;  %v1628_v45 = vld [vmem:[%s1795_s11 + $0xd4] ss:$8 sps:$4 sm:$0xff]   ;;  %v1630_v46 = vld [vmem:[%s1795_s11 + $0xd0] ss:$8 sps:$4 sm:$0xff]  }
  0x41   : > { %795 = vmatpush1.bf16.msra.mxu0 %v1597_v22  ;;  %1534 = vmatpush1.bf16.msra.mxu1 %v1597_v22  ;;  %v1631_v47 = vld [vmem:[%s1795_s11 + $0xe4] ss:$8 sps:$4 sm:$0xff]   ;;  %v1633_v48 = vld [vmem:[%s1795_s11 + $0xe0] ss:$8 sps:$4 sm:$0xff]   ;;  %v1634_v49 = vld [vmem:[%s1795_s11 + $0xf4] ss:$8 sps:$4 sm:$0xff]  }
  0x42   : > { %796 = vmatprep.subr.bf16.mxu0 %v1598_v23  ;;  %1519 = vmatprep.subr.bf16.mxu1 %v1598_v23  ;;  %v1636_v50 = vld [vmem:[%s1795_s11 + $0xf0] ss:$8 sps:$4 sm:$0xff]   ;;  %v1637_v51 = vld [vmem:[%s1797_s12] ss:$8 sps:$4 sm:$0xff]   ;;  %v1643_v53 = vld [vmem:[%s1797_s12 + $0x14] ss:$8 sps:$4 sm:$0xff]  }
  0x43   : > { %v1640_v52 = vld [vmem:[%s1797_s12 + $0x40] ss:$8 sps:$4 sm:$0xff]   ;;  %v1645_v54 = vld [vmem:[%s1797_s12 + $0x54] ss:$8 sps:$4 sm:$0xff]   ;;  %v1647_v55 = vld [vmem:[%s1797_s12 + $0x10] ss:$8 sps:$4 sm:$0xff]  }
  0x44   : > { %v1648_v56 = vld [vmem:[%s1797_s12 + $0x50] ss:$8 sps:$4 sm:$0xff]   ;;  %v1649_v57 = vld [vmem:[%s1797_s12 + $0x24] ss:$8 sps:$4 sm:$0xff]   ;;  %v1653_v59 = vld [vmem:[%s1797_s12 + $0x20] ss:$8 sps:$4 sm:$0xff]  }
  0x45   : > { %797 = vmatpush1.bf16.msra.mxu0 %v1600_v24  ;;  %1535 = vmatpush1.bf16.msra.mxu1 %v1600_v24  ;;  %v1651_v58 = vld [vmem:[%s1797_s12 + $0x64] ss:$8 sps:$4 sm:$0xff]   ;;  %v1654_v60 = vld [vmem:[%s1797_s12 + $0x60] ss:$8 sps:$4 sm:$0xff]   ;;  %v1655_v61 = vld [vmem:[%s1797_s12 + $0x34] ss:$8 sps:$4 sm:$0xff]  }
  0x46   : > { %798 = vmatprep.subr.bf16.mxu0 %v1601_v25  ;;  %1520 = vmatprep.subr.bf16.mxu1 %v1601_v25  ;;  %v1657_v62 = vld [vmem:[%s1797_s12 + $0x74] ss:$8 sps:$4 sm:$0xff]   ;;  %v1659_v63 = vld [vmem:[%s1797_s12 + $0x30] ss:$8 sps:$4 sm:$0xff]   ;;  %v470_v1 = vld [vmem:[#allocation2] sm:$0xff]  ;;  %p1477_p11 = scmp.ne.s32.totalorder %s1691_s17, 8 }
  0x47   : > { %v1660_v0 = vld [vmem:[%s1797_s12 + $0x70] ss:$8 sps:$4 sm:$0xff]   ;;  %v486_v2 = vld [vmem:[#allocation2 + $0x80] sm:$0xff]  ;;  %v471_v3 = vld [vmem:[#allocation2 + $0x8] sm:$0xff] }
  0x48   : > { %v487_v4 = vld [vmem:[#allocation2 + $0x88] sm:$0xff]  ;;  %v472_v7 = vld [vmem:[#allocation2 + $0x10] sm:$0xff]  ;;  %v473_v13 = vld [vmem:[#allocation2 + $0x18] sm:$0xff] }
  0x49   : > { %799 = vmatpush1.bf16.msra.mxu0 %v1603_v26  ;;  %1536 = vmatpush1.bf16.msra.mxu1 %v1603_v26  ;;  %v488_v8 = vld [vmem:[#allocation2 + $0x90] sm:$0xff]  ;;  %v489_v14 = vld [vmem:[#allocation2 + $0x98] sm:$0xff]  ;;  %v474_v25 = vld [vmem:[#allocation2 + $0x20] sm:$0xff] }
  0x4a   : > { %800 = vmatprep.subr.bf16.mxu0 %v1604_v27  ;;  %1521 = vmatprep.subr.bf16.mxu1 %v1604_v27  ;;  %v490_v26 = vld [vmem:[#allocation2 + $0xa0] sm:$0xff]  ;;  %v475_v27 = vld [vmem:[#allocation2 + $0x28] sm:$0xff]  ;;  %v492_v32 = vld [vmem:[#allocation2 + $0xb0] sm:$0xff] }
  0x4d   : > { %801 = vmatpush1.bf16.msra.mxu0 %v1606_v28  ;;  %1537 = vmatpush1.bf16.msra.mxu1 %v1606_v28  ;;  %v491_v28 = vld [vmem:[#allocation2 + $0xa8] sm:$0xff] }
  0x4e   : > { %802 = vmatprep.subr.bf16.mxu0 %v1607_v29  ;;  %1522 = vmatprep.subr.bf16.mxu1 %v1607_v29 }
  0x51   : > { %803 = vmatpush1.bf16.msra.mxu0 %v1609_v31  ;;  %1538 = vmatpush1.bf16.msra.mxu1 %v1609_v31  ;;  %v476_v31 = vld [vmem:[#allocation2 + $0x30] sm:$0xff] }
  0x52   : > { %804 = vmatprep.subr.bf16.mxu0 %v1610_v33  ;;  %1523 = vmatprep.subr.bf16.mxu1 %v1610_v33 }
  0x55   : > { %805 = vmatpush1.bf16.msra.mxu0 %v1612_v34  ;;  %1539 = vmatpush1.bf16.msra.mxu1 %v1612_v34 }
  0x56   : > { %806 = vmatprep.subr.bf16.mxu0 %v1613_v35  ;;  %1524 = vmatprep.subr.bf16.mxu1 %v1613_v35 }
  0x59   : > { %807 = vmatpush1.bf16.msra.mxu0 %v1615_v36  ;;  %1540 = vmatpush1.bf16.msra.mxu1 %v1615_v36 }
  0x5a   : > { %808 = vmatprep.subr.bf16.mxu0 %v1616_v37  ;;  %1525 = vmatprep.subr.bf16.mxu1 %v1616_v37  ;;  %v477_v37 = vld [vmem:[#allocation2 + $0x38] sm:$0xff] }
  0x5d   : > { %809 = vmatpush1.bf16.msra.mxu0 %v1618_v38  ;;  %1541 = vmatpush1.bf16.msra.mxu1 %v1618_v38  ;;  %v493_v38 = vld [vmem:[#allocation2 + $0xb8] sm:$0xff] }
  0x5e   : > { %810 = vmatprep.subr.bf16.mxu0 %v1619_v39  ;;  %1526 = vmatprep.subr.bf16.mxu1 %v1619_v39 }
  0x61   : > { %811 = vmatpush1.bf16.msra.mxu0 %v1621_v40  ;;  %1542 = vmatpush1.bf16.msra.mxu1 %v1621_v40 }
  0x62   : > { %812 = vmatprep.subr.bf16.mxu0 %v1622_v41  ;;  %1527 = vmatprep.subr.bf16.mxu1 %v1622_v41 }
  0x65   : > { %813 = vmatpush1.bf16.msra.mxu0 %v1624_v42  ;;  %1543 = vmatpush1.bf16.msra.mxu1 %v1624_v42 }
  0x66   : > { %814 = vmatprep.subr.bf16.mxu0 %v1625_v43  ;;  %1528 = vmatprep.subr.bf16.mxu1 %v1625_v43 }
  0x69   : > { %815 = vmatpush1.bf16.msra.mxu0 %v1627_v44  ;;  %1544 = vmatpush1.bf16.msra.mxu1 %v1627_v44 }
  0x6a   : > { %816 = vmatprep.subr.bf16.mxu0 %v1628_v45  ;;  %1529 = vmatprep.subr.bf16.mxu1 %v1628_v45 }
  0x6d   : > { %817 = vmatpush1.bf16.msra.mxu0 %v1630_v46  ;;  %1545 = vmatpush1.bf16.msra.mxu1 %v1630_v46 }
  0x6e   : > { %818 = vmatprep.subr.bf16.mxu0 %v1631_v47  ;;  %1530 = vmatprep.subr.bf16.mxu1 %v1631_v47 }
  0x71   : > { %819 = vmatpush1.bf16.msra.mxu0 %v1633_v48  ;;  %1546 = vmatpush1.bf16.msra.mxu1 %v1633_v48 }
  0x72   : > { %820 = vmatprep.subr.bf16.mxu0 %v1634_v49  ;;  %1531 = vmatprep.subr.bf16.mxu1 %v1634_v49  ;;  %v478_v49 = vld [vmem:[#allocation2 + $0x40] sm:$0xff] }
  0x75   : > { %821 = vmatpush1.bf16.msra.mxu0 %v1636_v50  ;;  %1547 = vmatpush1.bf16.msra.mxu1 %v1636_v50  ;;  %v494_v50 = vld [vmem:[#allocation2 + $0xc0] sm:$0xff] }
  0x78   : > { %823 = vmatmul.mubr.bf16.vlgmr.msra.gmra.mrb[0].mxu0 %v1637_v51  ;;  %863 = vmatmul.mubr.bf16.vlgmr.msra.gmra.mrb[0].mxu1 %v1640_v52  ;;  %v479_v51 = vld [vmem:[#allocation2 + $0x48] sm:$0xff] }
  0x79   : > { %832 = vmatprep.mubr.bf16.mxu0 %v1643_v53  ;;  %872 = vmatprep.mubr.bf16.mxu1 %v1645_v54  ;;  %v495_v52 = vld [vmem:[#allocation2 + $0xc8] sm:$0xff] }
  0x80   : > { %833 = vmatmul.mubr.bf16.gmra.mrb[4].mxu0 %v1647_v55  ;;  %873 = vmatmul.mubr.bf16.gmra.mrb[4].mxu1 %v1648_v56  ;;  %v480_v55 = vld [vmem:[#allocation2 + $0x50] sm:$0xff] }
  0x81   : > { %842 = vmatprep.mubr.bf16.mxu0 %v1649_v57  ;;  %882 = vmatprep.mubr.bf16.mxu1 %v1651_v58  ;;  %v496_v56 = vld [vmem:[#allocation2 + $0xd0] sm:$0xff] }
  0x88   : > { %843 = vmatmul.mubr.bf16.gmra.mrb[8].mxu0 %v1653_v59  ;;  %883 = vmatmul.mubr.bf16.gmra.mrb[8].mxu1 %v1654_v60 }
  0x89   : > { %852 = vmatprep.mubr.bf16.mxu0 %v1655_v61  ;;  %892 = vmatprep.mubr.bf16.mxu1 %v1657_v62  ;;  %v481_v61 = vld [vmem:[#allocation2 + $0x58] sm:$0xff] }
  0x8a   : > { %v497_v62 = vld [vmem:[#allocation2 + $0xd8] sm:$0xff] }
  0x90   : > { %853 = vmatmul.mubr.bf16.gmra.mrb[12].mxu0 %v1659_v63  ;;  %893 = vmatmul.mubr.bf16.gmra.mrb[12].mxu1 %v1660_v0 }
 0x14b   : > { %v824_v5 = vpop.f32.mrb[0].mxu0  ;;  %v864_v6 = vpop.f32.mrb[0].mxu1 }
 0x14c   : > { %v903_v9 = vadd.f32 %v824_v5, %v470_v1  ;;  %v919_v10 = vadd.f32 %v864_v6, %v486_v2  ;;  %v826_v11 = vpop.f32.mrb[1].mxu0  ;;  %v866_v12 = vpop.f32.mrb[1].mxu1 }
 0x14d   : > { %v904_v15 = vadd.f32 %v826_v11, %v471_v3  ;;  %v920_v16 = vadd.f32 %v866_v12, %v487_v4  ;;  %v828_v17 = vpop.f32.mrb[2].mxu0  ;;  %v868_v18 = vpop.f32.mrb[2].mxu1  ;;  %v483_v11 = vld [vmem:[#allocation2 + $0x68] sm:$0xff] }
 0x14e   : > { %935 = vst [vmem:[#allocation2] sm:$0xff] %v903_v9  ;;  %951 = vst [vmem:[#allocation2 + $0x80] sm:$0xff] %v919_v10  ;;  %v905_v19 = vadd.f32 %v828_v17, %v472_v7  ;;  %v921_v20 = vadd.f32 %v868_v18, %v488_v8  ;;  %v830_v21 = vpop.f32.mrb[3].mxu0  ;;  %v870_v22 = vpop.f32.mrb[3].mxu1  ;;  %v482_v9 = vld [vmem:[#allocation2 + $0x60] sm:$0xff]  ;;  %v499_v12 = vld [vmem:[#allocation2 + $0xe8] sm:$0xff] }
 0x14f   : > { %936 = vst [vmem:[#allocation2 + $0x8] sm:$0xff] %v904_v15  ;;  %952 = vst [vmem:[#allocation2 + $0x88] sm:$0xff] %v920_v16  ;;  %v906_v23 = vadd.f32 %v830_v21, %v473_v13  ;;  %v922_v24 = vadd.f32 %v870_v22, %v489_v14  ;;  %v498_v10 = vld [vmem:[#allocation2 + $0xe0] sm:$0xff]  ;;  %v484_v15 = vld [vmem:[#allocation2 + $0x70] sm:$0xff] }
 0x150   : > { %937 = vst [vmem:[#allocation2 + $0x10] sm:$0xff] %v905_v19  ;;  %953 = vst [vmem:[#allocation2 + $0x90] sm:$0xff] %v921_v20  ;;  %v500_v16 = vld [vmem:[#allocation2 + $0xf0] sm:$0xff]  ;;  %v485_v21 = vld [vmem:[#allocation2 + $0x78] sm:$0xff] }
 0x151   : > { %938 = vst [vmem:[#allocation2 + $0x18] sm:$0xff] %v906_v23  ;;  %954 = vst [vmem:[#allocation2 + $0x98] sm:$0xff] %v922_v24  ;;  %v501_v22 = vld [vmem:[#allocation2 + $0xf8] sm:$0xff] }
 0x153   : > { %v834_v29 = vpop.f32.mrb[4].mxu0  ;;  %v874_v30 = vpop.f32.mrb[4].mxu1 }
 0x154   : > { %v907_v33 = vadd.f32 %v834_v29, %v474_v25  ;;  %v923_v34 = vadd.f32 %v874_v30, %v490_v26  ;;  %v836_v35 = vpop.f32.mrb[5].mxu0  ;;  %v876_v36 = vpop.f32.mrb[5].mxu1 }
 0x155   : > { %v908_v39 = vadd.f32 %v836_v35, %v475_v27  ;;  %v924_v40 = vadd.f32 %v876_v36, %v491_v28  ;;  %v838_v41 = vpop.f32.mrb[6].mxu0  ;;  %v878_v42 = vpop.f32.mrb[6].mxu1  ;;  %v1048_v36 = vld [vmem:[%s2002_s3 + $0x8] sm:$0xff] (!%p1477_p11) }
 0x156   : > { %939 = vst [vmem:[#allocation2 + $0x20] sm:$0xff] %v907_v33  ;;  %955 = vst [vmem:[#allocation2 + $0xa0] sm:$0xff] %v923_v34  ;;  %v909_v43 = vadd.f32 %v838_v41, %v476_v31  ;;  %v925_v44 = vadd.f32 %v878_v42, %v492_v32  ;;  %v840_v45 = vpop.f32.mrb[7].mxu0  ;;  %v880_v46 = vpop.f32.mrb[7].mxu1  ;;  %v1005_v33 = vlaneseq (!%p1477_p11)  ;;  %v1047_v34 = vld [vmem:[%s2002_s3] sm:$0xff] (!%p1477_p11) }
 0x157   : > { %940 = vst [vmem:[#allocation2 + $0x28] sm:$0xff] %v908_v39  ;;  %956 = vst [vmem:[#allocation2 + $0xa8] sm:$0xff] %v924_v40  ;;  %v910_v47 = vadd.f32 %v840_v45, %v477_v37  ;;  %v926_v48 = vadd.f32 %v880_v46, %v493_v38  ;;  %v971_v37 = vld [vmem:[#allocation2] sm:$0xff] (!%p1477_p11)  ;;  %v972_v38 = vld [vmem:[#allocation2 + $0x8] sm:$0xff] (!%p1477_p11) }
 0x158   : > { %941 = vst [vmem:[#allocation2 + $0x30] sm:$0xff] %v909_v43  ;;  %957 = vst [vmem:[#allocation2 + $0xb0] sm:$0xff] %v925_v44  ;;  %v1006_v35 = vshrl.u32 (!%p1477_p11), %v1005_v33, 7  ;;  %v1003_v39 = vld [vmem:[%s2001_s2] sm:$0x3] (!%p1477_p11)  ;;  %v1049_v40 = vld [vmem:[%s2002_s3 + $0x10] sm:$0xff] (!%p1477_p11)  ;;  %v1063_v43 = vunpack.c.l.bf16 (!%p1477_p11), %v1047_v34  ;;  %v1064_v44 = vunpack.c.h.bf16 (!%p1477_p11), %v1047_v34 }
 0x159   : > { %942 = vst [vmem:[#allocation2 + $0x38] sm:$0xff] %v910_v47  ;;  %958 = vst [vmem:[#allocation2 + $0xb8] sm:$0xff] %v926_v48  ;;  %v973_v45 = vld [vmem:[#allocation2 + $0x10] sm:$0xff] (!%p1477_p11)  ;;  %v974_v46 = vld [vmem:[#allocation2 + $0x18] sm:$0xff] (!%p1477_p11)  ;;  %v1065_v48 = vunpack.c.l.bf16 (!%p1477_p11), %v1048_v36 }
 0x15a   : > { %v1007_v41 = vsub.s32 (!%p1477_p11), 0, %v1006_v35  ;;  %v1011_v42 = vsub.s32 (!%p1477_p11), 1, %v1006_v35  ;;  %v1050_v47 = vld [vmem:[%s2002_s3 + $0x18] sm:$0xff] (!%p1477_p11) }
 0x15b   : > { %v844_v53 = vpop.f32.mrb[8].mxu0  ;;  %v884_v54 = vpop.f32.mrb[8].mxu1 }
 0x15c   : > { %v911_v57 = vadd.f32 %v844_v53, %v478_v49  ;;  %v927_v58 = vadd.f32 %v884_v54, %v494_v50  ;;  %v846_v59 = vpop.f32.mrb[9].mxu0  ;;  %v886_v60 = vpop.f32.mrb[9].mxu1  ;;  %v1066_v49 = vunpack.c.h.bf16 (!%p1477_p11), %v1048_v36  ;;  %v1068_v53 = vunpack.c.h.bf16 (!%p1477_p11), %v1049_v40  ;;  %v1051_v54 = vld [vmem:[%s2002_s3 + $0x20] sm:$0xff] (!%p1477_p11)  ;;  %v1053_v36 = vld [vmem:[%s2002_s3 + $0x30] sm:$0xff] (!%p1477_p11) }
 0x15d   : > { %v912_v63 = vadd.f32 %v846_v59, %v479_v51  ;;  %v928_v0 = vadd.f32 %v886_v60, %v495_v52  ;;  %v848_v1 = vpop.f32.mrb[10].mxu0  ;;  %v888_v2 = vpop.f32.mrb[10].mxu1  ;;  %v975_v50 = vld [vmem:[#allocation2 + $0x20] sm:$0xff] (!%p1477_p11)  ;;  %v1067_v52 = vunpack.c.l.bf16 (!%p1477_p11), %v1049_v40  ;;  %v1069_v59 = vunpack.c.l.bf16 (!%p1477_p11), %v1050_v47 }
 0x15e   : > { %943 = vst [vmem:[#allocation2 + $0x40] sm:$0xff] %v911_v57  ;;  %959 = vst [vmem:[#allocation2 + $0xc0] sm:$0xff] %v927_v58  ;;  %v913_v3 = vadd.f32 %v848_v1, %v480_v55  ;;  %v929_v4 = vadd.f32 %v888_v2, %v496_v56  ;;  %v850_v5 = vpop.f32.mrb[11].mxu0  ;;  %v890_v6 = vpop.f32.mrb[11].mxu1  ;;  %v976_v51 = vld [vmem:[#allocation2 + $0x28] sm:$0xff] (!%p1477_p11)  ;;  %v1867_v55 = vrot.slane (!%p1477_p11), %v1003_v39, %v1007_v41  ;;  %v1070_v60 = vunpack.c.h.bf16 (!%p1477_p11), %v1050_v47 }
 0x15f   : > { %944 = vst [vmem:[#allocation2 + $0x48] sm:$0xff] %v912_v63  ;;  %960 = vst [vmem:[#allocation2 + $0xc8] sm:$0xff] %v928_v0  ;;  %v914_v7 = vadd.f32 %v850_v5, %v481_v61  ;;  %v930_v8 = vadd.f32 %v890_v6, %v497_v62  ;;  %v1869_v56 = vrot.slane (!%p1477_p11), %v1003_v39, %v1011_v42  ;;  %v977_v57 = vld [vmem:[#allocation2 + $0x30] sm:$0xff] (!%p1477_p11)  ;;  %v1052_v61 = vld [vmem:[%s2002_s3 + $0x28] sm:$0xff] (!%p1477_p11)  ;;  %v1071_v62 = vunpack.c.l.bf16 (!%p1477_p11), %v1051_v54 }
 0x160   : > { %945 = vst [vmem:[#allocation2 + $0x50] sm:$0xff] %v913_v3  ;;  %961 = vst [vmem:[#allocation2 + $0xd0] sm:$0xff] %v929_v4  ;;  %v978_v58 = vld [vmem:[#allocation2 + $0x38] sm:$0xff] (!%p1477_p11)  ;;  %v1072_v63 = vunpack.c.h.bf16 (!%p1477_p11), %v1051_v54  ;;  %v1073_v0 = vunpack.c.l.bf16 (!%p1477_p11), %v1052_v61  ;;  %v1074_v1 = vunpack.c.h.bf16 (!%p1477_p11), %v1052_v61  ;;  %v1015_v2 = vadd.f32 (!%p1477_p11), %v1867_v55, %v971_v37 }
 0x161   : > { %946 = vst [vmem:[#allocation2 + $0x58] sm:$0xff] %v914_v7  ;;  %962 = vst [vmem:[#allocation2 + $0xd8] sm:$0xff] %v930_v8  ;;  %v1016_v3 = vadd.f32 (!%p1477_p11), %v1869_v56, %v972_v38  ;;  %v1017_v4 = vadd.f32 (!%p1477_p11), %v1867_v55, %v973_v45  ;;  %v1018_v5 = vadd.f32 (!%p1477_p11), %v1869_v56, %v974_v46 }
 0x162   : > { %v1019_v6 = vadd.f32 (!%p1477_p11), %v1867_v55, %v975_v50  ;;  %v1020_v7 = vadd.f32 (!%p1477_p11), %v1869_v56, %v976_v51  ;;  %v1021_v8 = vadd.f32 (!%p1477_p11), %v1867_v55, %v977_v57  ;;  %v1076_v50 = vunpack.c.h.bf16 (!%p1477_p11), %v1053_v36  ;;  %v1054_v51 = vld [vmem:[%s2002_s3 + $0x38] sm:$0xff] (!%p1477_p11) }
 0x163   : > { %v854_v13 = vpop.f32.mrb[12].mxu0  ;;  %v894_v14 = vpop.f32.mrb[12].mxu1  ;;  %970 = sbr.rel (%p1477_p11) target bundleno = 395 (0x18b), region = 82 }
 0x164   : > { %v915_v17 = vadd.f32 %v854_v13, %v482_v9  ;;  %v931_v18 = vadd.f32 %v894_v14, %v498_v10  ;;  %v856_v19 = vpop.f32.mrb[13].mxu0  ;;  %v896_v20 = vpop.f32.mrb[13].mxu1  ;;  %v1022_v9 = vadd.f32 (!%p1477_p11), %v1869_v56, %v978_v58  ;;  %v1095_v10 = vadd.f32 (!%p1477_p11), %v1063_v43, %v1015_v2 }
 0x165   : > { %v916_v23 = vadd.f32 %v856_v19, %v483_v11  ;;  %v932_v24 = vadd.f32 %v896_v20, %v499_v12  ;;  %v858_v25 = vpop.f32.mrb[14].mxu0  ;;  %v898_v26 = vpop.f32.mrb[14].mxu1  ;;  %v1096_v11 = vadd.f32 (!%p1477_p11), %v1064_v44, %v1016_v3  ;;  %v1097_v12 = vadd.f32 (!%p1477_p11), %v1065_v48, %v1017_v4 }
 0x166   : > { %947 = vst [vmem:[#allocation2 + $0x60] sm:$0xff] %v915_v17  ;;  %963 = vst [vmem:[#allocation2 + $0xe0] sm:$0xff] %v931_v18  ;;  %v917_v27 = vadd.f32 %v858_v25, %v484_v15  ;;  %v933_v28 = vadd.f32 %v898_v26, %v500_v16  ;;  %v860_v29 = vpop.f32.mrb[15].mxu0  ;;  %v900_v30 = vpop.f32.mrb[15].mxu1  ;;  %v1098_v13 = vadd.f32 (!%p1477_p11), %v1066_v49, %v1018_v5  ;;  %v979_v18 = vld [vmem:[#allocation2 + $0x40] sm:$0xff] (!%p1477_p11)  ;;  %v980_v19 = vld [vmem:[#allocation2 + $0x48] sm:$0xff] (!%p1477_p11)  ;;  %v1075_v49 = vunpack.c.l.bf16 (!%p1477_p11), %v1053_v36 }
 0x167   : > { %948 = vst [vmem:[#allocation2 + $0x68] sm:$0xff] %v916_v23  ;;  %964 = vst [vmem:[#allocation2 + $0xe8] sm:$0xff] %v932_v24  ;;  %v918_v31 = vadd.f32 %v860_v29, %v485_v21  ;;  %v934_v32 = vadd.f32 %v900_v30, %v501_v22  ;;  %v1099_v14 = vadd.f32 (!%p1477_p11), %v1067_v52, %v1019_v6  ;;  %v1127_v20 = vmax.f32 (!%p1477_p11), %v1095_v10, 0.0  ;;  %v981_v24 = vld [vmem:[#allocation2 + $0x50] sm:$0xff] (!%p1477_p11)  ;;  %v987_v52 = vld [vmem:[#allocation2 + $0x80] sm:$0xff] (!%p1477_p11) }
 0x168   : > { %949 = vst [vmem:[#allocation2 + $0x70] sm:$0xff] %v917_v27  ;;  %965 = vst [vmem:[#allocation2 + $0xf0] sm:$0xff] %v933_v28  ;;  %v1100_v15 = vadd.f32 (!%p1477_p11), %v1068_v53, %v1020_v7  ;;  %v1101_v16 = vadd.f32 (!%p1477_p11), %v1069_v59, %v1021_v8  ;;  %v1102_v17 = vadd.f32 (!%p1477_p11), %v1070_v60, %v1022_v9  ;;  %v1128_v21 = vmax.f32 (!%p1477_p11), %v1096_v11, 0.0  ;;  %v982_v25 = vld [vmem:[#allocation2 + $0x58] sm:$0xff] (!%p1477_p11)  ;;  %v988_v59 = vld [vmem:[#allocation2 + $0x88] sm:$0xff] (!%p1477_p11) }
 0x169   : > { %950 = vst [vmem:[#allocation2 + $0x78] sm:$0xff] %v918_v31  ;;  %966 = vst [vmem:[#allocation2 + $0xf8] sm:$0xff] %v934_v32  ;;  %v1129_v22 = vmax.f32 (!%p1477_p11), %v1097_v12, 0.0  ;;  %v1130_v23 = vmax.f32 (!%p1477_p11), %v1098_v13, 0.0  ;;  %v1131_v26 = vmax.f32 (!%p1477_p11), %v1099_v14, 0.0  ;;  %v1023_v34 = vadd.f32 (!%p1477_p11), %v1867_v55, %v979_v18  ;;  %v989_v5 = vld [vmem:[#allocation2 + $0x90] sm:$0xff] (!%p1477_p11) }
 0x16a   : > { %v1132_v27 = vmax.f32 %v1100_v15, 0.0  ;;  %v1133_v28 = vmax.f32 %v1101_v16, 0.0  ;;  %v1134_v29 = vmax.f32 %v1102_v17, 0.0  ;;  %v1500_v32 = vpack.c.bf16 %v1128_v21, %v1127_v20  ;;  %v990_v6 = vld [vmem:[#allocation2 + $0x98] sm:$0xff]  ;;  %v1056_v7 = vld [vmem:[%s2002_s3 + $0x48] sm:$0xff]  ;;  %v991_v16 = vld [vmem:[#allocation2 + $0xa0] sm:$0xff] }
 0x16b   : > { %v1501_v33 = vpack.c.bf16 %v1130_v23, %v1129_v22  ;;  %v1024_v35 = vadd.f32 %v1869_v56, %v980_v19  ;;  %v1025_v39 = vadd.f32 %v1867_v55, %v981_v24  ;;  %v1026_v40 = vadd.f32 %v1869_v56, %v982_v25  ;;  %v992_v17 = vld [vmem:[#allocation2 + $0xa8] sm:$0xff]  ;;  %v1057_v22 = vld [vmem:[%s2002_s3 + $0x50] sm:$0xff] }
 0x16c   : > { %v1502_v37 = vpack.c.bf16 %v1132_v27, %v1131_v26  ;;  %v1503_v38 = vpack.c.bf16 %v1134_v29, %v1133_v28  ;;  %1255 = vst [vmem:[%s2003_s4] sm:$0xff] %v1500_v32  ;;  %v1103_v43 = vadd.f32 %v1071_v62, %v1023_v34  ;;  %v1077_v2 = vunpack.c.l.bf16 %v1054_v51  ;;  %v993_v27 = vld [vmem:[#allocation2 + $0xb0] sm:$0xff]  ;;  %v994_v32 = vld [vmem:[#allocation2 + $0xb8] sm:$0xff] }
 0x16d   : > { %v983_v30 = vld [vmem:[#allocation2 + $0x60] sm:$0xff]  ;;  %1256 = vst [vmem:[%s2003_s4 + $0x8] sm:$0xff] %v1501_v33  ;;  %v1104_v44 = vadd.f32 %v1072_v63, %v1024_v35  ;;  %v1105_v47 = vadd.f32 %v1073_v0, %v1025_v39  ;;  %v1106_v48 = vadd.f32 %v1074_v1, %v1026_v40  ;;  %v1078_v3 = vunpack.c.h.bf16 %v1054_v51  ;;  %v1058_v33 = vld [vmem:[%s2002_s3 + $0x58] sm:$0xff] }
 0x16e   : > { %v984_v31 = vld [vmem:[#allocation2 + $0x68] sm:$0xff]  ;;  %v1027_v45 = vadd.f32 %v1867_v55, %v983_v30  ;;  %1257 = vst [vmem:[%s2003_s4 + $0x10] sm:$0xff] %v1502_v37  ;;  %1258 = vst [vmem:[%s2003_s4 + $0x18] sm:$0xff] %v1503_v38  ;;  %v1135_v53 = vmax.f32 %v1103_v43, 0.0  ;;  %v1055_v0 = vld [vmem:[%s2002_s3 + $0x40] sm:$0xff]  ;;  %v1031_v4 = vadd.f32 %v1867_v55, %v987_v52  ;;  %v1032_v11 = vadd.f32 %v1869_v56, %v988_v59 }
 0x16f   : > { %v985_v41 = vld [vmem:[#allocation2 + $0x70] sm:$0xff]  ;;  %v1028_v46 = vadd.f32 %v1869_v56, %v984_v31  ;;  %v1136_v54 = vmax.f32 %v1104_v44, 0.0  ;;  %v1137_v60 = vmax.f32 %v1105_v47, 0.0  ;;  %v1138_v61 = vmax.f32 %v1106_v48, 0.0  ;;  %v995_v38 = vld [vmem:[#allocation2 + $0xc0] sm:$0xff]  ;;  %v996_v43 = vld [vmem:[#allocation2 + $0xc8] sm:$0xff] }
 0x170   : > { %v986_v42 = vld [vmem:[#allocation2 + $0x78] sm:$0xff]  ;;  %v1029_v57 = vadd.f32 %v1867_v55, %v985_v41  ;;  %v1107_v62 = vadd.f32 %v1075_v49, %v1027_v45  ;;  %v1079_v14 = vunpack.c.l.bf16 %v1055_v0  ;;  %v1080_v15 = vunpack.c.h.bf16 %v1055_v0  ;;  %v1059_v44 = vld [vmem:[%s2002_s3 + $0x60] sm:$0xff] }
 0x171   : > { %v1030_v58 = vadd.f32 %v1869_v56, %v986_v42  ;;  %v1108_v63 = vadd.f32 %v1076_v50, %v1028_v46  ;;  %v1504_v1 = vpack.c.bf16 %v1136_v54, %v1135_v53  ;;  %v1505_v8 = vpack.c.bf16 %v1138_v61, %v1137_v60  ;;  %v997_v53 = vld [vmem:[#allocation2 + $0xd0] sm:$0xff]  ;;  %v998_v54 = vld [vmem:[#allocation2 + $0xd8] sm:$0xff]  ;;  %v1060_v61 = vld [vmem:[%s2002_s3 + $0x68] sm:$0xff] }
 0x172   : > { %v1139_v9 = vmax.f32 %v1107_v62, 0.0  ;;  %v1109_v12 = vadd.f32 %v1077_v2, %v1029_v57  ;;  %v1033_v19 = vadd.f32 %v1867_v55, %v989_v5  ;;  %v1034_v20 = vadd.f32 %v1869_v56, %v990_v6  ;;  %v999_v2 = vld [vmem:[#allocation2 + $0xe0] sm:$0xff] }
 0x173   : > { %v1140_v10 = vmax.f32 %v1108_v63, 0.0  ;;  %1259 = vst [vmem:[%s2003_s4 + $0x20] sm:$0xff] %v1504_v1  ;;  %v1110_v13 = vadd.f32 %v1078_v3, %v1030_v58  ;;  %1260 = vst [vmem:[%s2003_s4 + $0x28] sm:$0xff] %v1505_v8  ;;  %v1081_v21 = vunpack.c.l.bf16 %v1056_v7  ;;  %v1111_v25 = vadd.f32 %v1079_v14, %v1031_v4  ;;  %v1000_v3 = vld [vmem:[#allocation2 + $0xe8] sm:$0xff]  ;;  %v1061_v8 = vld [vmem:[%s2002_s3 + $0x70] sm:$0xff] }
 0x174   : > { %v1141_v23 = vmax.f32 %v1109_v12, 0.0  ;;  %v1112_v26 = vadd.f32 %v1080_v15, %v1032_v11  ;;  %v1082_v28 = vunpack.c.h.bf16 %v1056_v7  ;;  %v1035_v30 = vadd.f32 %v1867_v55, %v991_v16  ;;  %v1002_v14 = vld [vmem:[#allocation2 + $0xf8] sm:$0xff] }
 0x175   : > { %v1506_v18 = vpack.c.bf16 %v1140_v10, %v1139_v9  ;;  %v1142_v24 = vmax.f32 %v1110_v13, 0.0  ;;  %v1113_v29 = vadd.f32 %v1081_v21, %v1033_v19  ;;  %v1036_v31 = vadd.f32 %v1869_v56, %v992_v17  ;;  %v1001_v13 = vld [vmem:[#allocation2 + $0xf0] sm:$0xff]  ;;  %v1062_v19 = vld [vmem:[%s2002_s3 + $0x78] sm:$0xff] }
 0x176   : > { %v1143_v35 = vmax.f32 %v1111_v25, 0.0  ;;  %v1144_v36 = vmax.f32 %v1112_v26, 0.0  ;;  %v1083_v37 = vunpack.c.l.bf16 %v1057_v22  ;;  %v1114_v39 = vadd.f32 %v1082_v28, %v1034_v20 }
 0x177   : > { %1261 = vst [vmem:[%s2003_s4 + $0x30] sm:$0xff] %v1506_v18  ;;  %v1507_v34 = vpack.c.bf16 %v1142_v24, %v1141_v23  ;;  %v1145_v40 = vmax.f32 %v1113_v29, 0.0  ;;  %v1084_v41 = vunpack.c.h.bf16 %v1057_v22  ;;  %v1037_v42 = vadd.f32 %v1867_v55, %v993_v27 }
 0x178   : > { %v1508_v45 = vpack.c.bf16 %v1144_v36, %v1143_v35  ;;  %v1115_v46 = vadd.f32 %v1083_v37, %v1035_v30  ;;  %v1038_v47 = vadd.f32 %v1869_v56, %v994_v32  ;;  %v1085_v48 = vunpack.c.l.bf16 %v1058_v33 }
 0x179   : > { %1262 = vst [vmem:[%s2003_s4 + $0x38] sm:$0xff] %v1507_v34  ;;  %v1146_v49 = vmax.f32 %v1114_v39, 0.0  ;;  %v1116_v50 = vadd.f32 %v1084_v41, %v1036_v31  ;;  %v1086_v51 = vunpack.c.h.bf16 %v1058_v33  ;;  %v1039_v52 = vadd.f32 %v1867_v55, %v995_v38 }
 0x17a   : > { %1263 = vst [vmem:[%s2003_s4 + $0x40] sm:$0xff] %v1508_v45  ;;  %v1147_v57 = vmax.f32 %v1115_v46, 0.0  ;;  %v1117_v58 = vadd.f32 %v1085_v48, %v1037_v42  ;;  %v1040_v59 = vadd.f32 %v1869_v56, %v996_v43  ;;  %v1087_v60 = vunpack.c.l.bf16 %v1059_v44 }
 0x17b   : > { %v1509_v62 = vpack.c.bf16 %v1146_v49, %v1145_v40  ;;  %v1148_v63 = vmax.f32 %v1116_v50, 0.0  ;;  %v1118_v0 = vadd.f32 %v1086_v51, %v1038_v47  ;;  %v1088_v1 = vunpack.c.h.bf16 %v1059_v44 }
 0x17c   : > { %v1149_v4 = vmax.f32 %v1117_v58, 0.0  ;;  %v1119_v5 = vadd.f32 %v1087_v60, %v1039_v52  ;;  %v1041_v6 = vadd.f32 %v1867_v55, %v997_v53  ;;  %v1042_v7 = vadd.f32 %v1869_v56, %v998_v54 }
 0x17d   : > { %1264 = vst [vmem:[%s2003_s4 + $0x48] sm:$0xff] %v1509_v62  ;;  %v1510_v9 = vpack.c.bf16 %v1148_v63, %v1147_v57  ;;  %v1150_v10 = vmax.f32 %v1118_v0, 0.0  ;;  %v1120_v11 = vadd.f32 %v1088_v1, %v1040_v59  ;;  %v1089_v12 = vunpack.c.l.bf16 %v1060_v61 }
 0x17e   : > { %v1151_v15 = vmax.f32 %v1119_v5, 0.0  ;;  %v1090_v16 = vunpack.c.h.bf16 %v1060_v61  ;;  %v1043_v17 = vadd.f32 %v1867_v55, %v999_v2  ;;  %v1044_v18 = vadd.f32 %v1869_v56, %v1000_v3 }
 0x17f   : > { %1265 = vst [vmem:[%s2003_s4 + $0x50] sm:$0xff] %v1510_v9  ;;  %v1511_v20 = vpack.c.bf16 %v1150_v10, %v1149_v4  ;;  %v1152_v21 = vmax.f32 %v1120_v11, 0.0  ;;  %v1121_v22 = vadd.f32 %v1089_v12, %v1041_v6  ;;  %v1091_v23 = vunpack.c.l.bf16 %v1061_v8 }
 0x180   : > { %v1122_v24 = vadd.f32 %v1090_v16, %v1042_v7  ;;  %v1092_v25 = vunpack.c.h.bf16 %v1061_v8  ;;  %v1045_v26 = vadd.f32 %v1867_v55, %v1001_v13  ;;  %v1046_v27 = vadd.f32 %v1869_v56, %v1002_v14 }
 0x181   : > { %1266 = vst [vmem:[%s2003_s4 + $0x58] sm:$0xff] %v1511_v20  ;;  %v1512_v28 = vpack.c.bf16 %v1152_v21, %v1151_v15  ;;  %v1153_v29 = vmax.f32 %v1121_v22, 0.0  ;;  %v1123_v30 = vadd.f32 %v1091_v23, %v1043_v17  ;;  %v1093_v31 = vunpack.c.l.bf16 %v1062_v19 }
 0x182   : > { %v1154_v32 = vmax.f32 %v1122_v24, 0.0  ;;  %v1124_v33 = vadd.f32 %v1092_v25, %v1044_v18  ;;  %v1094_v34 = vunpack.c.h.bf16 %v1062_v19 }
 0x183   : > { %1267 = vst [vmem:[%s2003_s4 + $0x60] sm:$0xff] %v1512_v28  ;;  %v1155_v35 = vmax.f32 %v1123_v30, 0.0  ;;  %v1125_v36 = vadd.f32 %v1093_v31, %v1045_v26 }
 0x184   : > { %v1513_v55 = vpack.c.bf16 %v1154_v32, %v1153_v29  ;;  %v1156_v37 = vmax.f32 %v1124_v33, 0.0  ;;  %v1126_v56 = vadd.f32 %v1094_v34, %v1046_v27 }
 0x185   : > { %v1157_v38 = vmax.f32 %v1125_v36, 0.0 }
 0x186   : > { %1268 = vst [vmem:[%s2003_s4 + $0x68] sm:$0xff] %v1513_v55  ;;  %v1514_v39 = vpack.c.bf16 %v1156_v37, %v1155_v35  ;;  %v1158_v40 = vmax.f32 %v1126_v56, 0.0 }
 0x188   : > { %1269 = vst [vmem:[%s2003_s4 + $0x70] sm:$0xff] %v1514_v39  ;;  %v1515_v41 = vpack.c.bf16 %v1158_v40, %v1157_v38 }
 0x18a   : > { %1270 = vst [vmem:[%s2003_s4 + $0x78] sm:$0xff] %v1515_v41 }
 0x18b PF: > { %s14_s19 = sadd.s32 1, %s1699_s19   ;;  %s2004_s15 = smov %s1687_s16 }
 0x18c   : > { %p11_p12 = scmp.ge.s32.totalorder %s14_s19, 11   ;;  %s2005_s16 = smov %s1762_s23 }
 0x18d   : > { %s2006_s17 = smov %s1695_s18  ;;  %s2007_s18 = smov %s2009_s20 }
 0x18e   :  { %13 = sbr.rel (!%p11_p12) target bundleno = 3 (0x3), region = 126 }

// kernel: _lambda_.25
= control target key start
LH: loop header
LB: loop body
LE: loop exit
PB: predicated region body
PF: predicated region fallthrough
CT: control target
= control target key end

     0   :  { %s2253_s0 = inlined_call_operand.vmem [shape: bf16[128,2304], index: 0, kind: input, shape index: {}]   ;;  %s2254_s1 = inlined_call_operand.vmem [shape: bf16[2304,512], index: 1, kind: input, shape index: {}]   ;;  %s2255_s2 = inlined_call_operand.vmem [shape: f32[1,512], index: 2, kind: input, shape index: {}]   ;;  %s2256_s3 = inlined_call_operand.vmem [shape: bf16[128,512], index: 3, kind: output, shape index: {}]  }
   0x1   :  { %2258 = sst [smem:[#allocation7_spill]] %s2253_s0 }
   0x2   :  { %2259 = sst [smem:[#allocation8_spill]] %s2254_s1 }
   0x3   :  { %s1873_s12 = smov 0   ;;  %s1875_s13 = smov 0  }
   0x4   :  { %s1877_s14 = smov 0   ;;  %s1879_s15 = smov 0  }
   0x5   :  { %s1881_s16 = smov 0   ;;  %s1883_s17 = smov 0  }
   0x6   :  { %s1885_s18 = smov 0   ;;  %s1887_s19 = smov 0  }
   0x7   :  { %s1889_s20 = smov 0   ;;  %s1891_s21 = smov 0  }
   0x8   :  { %s1893_s22 = smov 0  }
   0x9 LB: > { %s1464_s23 = sadd.s32 4294967295, %s1850_s22   ;;  %s25_s24 = sadd.s32 1, %s1842_s20  ;;  %s1850_s22 = sphi %s1893_s22, %s13_s22   ;;  %s1846_s21 = sphi %s1891_s21, %s2276_s21   ;;  %s1842_s20 = sphi %s1889_s20, %s2275_s20   ;;  %s1838_s19 = sphi %s1887_s19, %s2274_s19   ;;  %s1834_s18 = sphi %s1885_s18, %s2273_s18   ;;  %s1830_s17 = sphi %s1883_s17, %s2272_s17   ;;  %s1826_s16 = sphi %s1881_s16, %s2271_s16   ;;  %s1822_s15 = sphi %s1879_s15, %s2270_s15   ;;  %s1818_s14 = sphi %s1877_s14, %s2269_s14   ;;  %s1814_s13 = sphi %s1875_s13, %s2268_s13   ;;  %s1810_s12 = sphi %s1873_s12, %s2267_s12  }
   0xa   : > { %p26_p0 = scmp.ge.s32.totalorder %s25_s24, 9  ;;  %s28_s25 = sadd.s32 1, %s1846_s21 }
   0xb   : > { %s41_s26 = sadd.s32 1, %s1830_s17  ;;  %p48_p1 = scmp.ne.s32.totalorder %s1830_s17, %s1826_s16 }
   0xc   : > { %s2278_s24 = smov (%p26_p0, %s25_s24), 0  ;;  %s2280_s25 = smov (!%p26_p0, %s28_s25), %s1846_s21 }
   0xd   : > { %s37_s27 = ssub.s32 %s1842_s20, %s2278_s24  ;;  %p49_p2 = scmp.eq.s32.totalorder %s1850_s22, 0 }
   0xe   : > { %p30_p3 = scmp.ge.s32.totalorder %s2280_s25, 2  ;;  %p39_p4 = scmp.eq.s32.totalorder %s37_s27, 0 }
   0xf   : > { %p1940_p5 = por %p49_p2, %p48_p1  ;;  %s69_s29 = sadd.s32 1, %s1822_s15 }
  0x10   : > { %s2282_s25 = smov (%p30_p3, %s2280_s25), 0  ;;  %p76_p6 = scmp.ne.s32.totalorder %s1822_s15, %s1818_s14 }
  0x11   : > { %2261 = sst [smem:[#allocation6_spill]] %s2282_s25  ;;  %s65_s4 = ssub.s32 %s1846_s21, %s2282_s25 }
  0x12   : > { %s1948_s30 = scalar_select %p39_p4, %s1830_s17, %s41_s26  }
  0x13   : > { %s66_s5 = sor.u32 %s65_s4, %s37_s27  ;;  %p121_p7 = scmp.eq.s32.totalorder %s65_s4, 0 }
  0x14   : > { %p67_p8 = scmp.eq.s32.totalorder %s66_s5, 0  ;;  %p1954_p9 = por %p76_p6, %p49_p2 }
  0x15   : > { %s123_s7 = sadd.s32 1, %s1814_s13  ;;  %p133_p10 = scmp.ne.s32.totalorder %s1814_s13, %s1810_s12 }
  0x16   : > { %s1962_s8 = scalar_select %p67_p8, %s1822_s15, %s69_s29  }
  0x17   : > { %s1965_s9 = scalar_select %p121_p7, %s1814_s13, %s123_s7  }
  0x18   : > { %p134_p11 = scmp.eq.s32.totalorder %s1464_s23, 17  ;;  %p1467_p13 = scmp.ge.s32.totalorder %s1850_s22, 18 }
  0x1a   : > { %p1967_p12 = por %p134_p11, %p133_p10  ;;  %156 = sbr.rel (%p1467_p13) target bundleno = 77 (0x4d), region = 16 }
  0x21   : > { %159 = sbr.rel (!%p1940_p5) target bundleno = 51 (0x33), region = 20  ;;  %s161_s11 = sand.u32 (%p1940_p5), 1, %s1830_s17  }
  0x22   : > { %s1552_s26 = sshll.u32 (%p1940_p5), %s1842_s20, 3  ;;  %s1468_s27 = sshll.u32 (%p1940_p5), %s161_s11, 7 }
  0x23   : > { %s2264_s0 = sld [smem:[#allocation7_spill]] (%p1940_p5)  ;;  %s163_s23 = scalar_lea.vmem (%p1940_p5), [#allocation3], %s1468_s27 }
  0x29   : > { %s1979_s5 = scalar_lea.vmem %s2264_s0, %s1552_s26 }
  0x2a   : > { %v227_v0 = vld [vmem:[%s1979_s5] sm:$0xff]  ;;  %v229_v1 = vld [vmem:[%s1979_s5 + $0x48] sm:$0xff]  ;;  %v231_v2 = vld [vmem:[%s1979_s5 + $0x90] sm:$0xff] }
  0x2b   : > { %228 = vst [vmem:[%s163_s23] sm:$0xff] %v227_v0  ;;  %230 = vst [vmem:[%s163_s23 + $0x8] sm:$0xff] %v229_v1  ;;  %v233_v3 = vld [vmem:[%s1979_s5 + $0xd8] sm:$0xff]  ;;  %v235_v4 = vld [vmem:[%s1979_s5 + $0x120] sm:$0xff] }
  0x2c   : > { %232 = vst [vmem:[%s163_s23 + $0x10] sm:$0xff] %v231_v2  ;;  %v237_v5 = vld [vmem:[%s1979_s5 + $0x168] sm:$0xff]  ;;  %234 = vst [vmem:[%s163_s23 + $0x18] sm:$0xff] %v233_v3  ;;  %v239_v6 = vld [vmem:[%s1979_s5 + $0x1b0] sm:$0xff] }
  0x2d   : > { %236 = vst [vmem:[%s163_s23 + $0x20] sm:$0xff] %v235_v4  ;;  %238 = vst [vmem:[%s163_s23 + $0x28] sm:$0xff] %v237_v5  ;;  %v241_v7 = vld [vmem:[%s1979_s5 + $0x1f8] sm:$0xff]  ;;  %v243_v8 = vld [vmem:[%s1979_s5 + $0x240] sm:$0xff] }
  0x2e   : > { %240 = vst [vmem:[%s163_s23 + $0x30] sm:$0xff] %v239_v6  ;;  %242 = vst [vmem:[%s163_s23 + $0x38] sm:$0xff] %v241_v7  ;;  %v245_v9 = vld [vmem:[%s1979_s5 + $0x288] sm:$0xff]  ;;  %v247_v10 = vld [vmem:[%s1979_s5 + $0x2d0] sm:$0xff] }
  0x2f   : > { %244 = vst [vmem:[%s163_s23 + $0x40] sm:$0xff] %v243_v8  ;;  %v249_v11 = vld [vmem:[%s1979_s5 + $0x318] sm:$0xff]  ;;  %246 = vst [vmem:[%s163_s23 + $0x48] sm:$0xff] %v245_v9  ;;  %v251_v12 = vld [vmem:[%s1979_s5 + $0x360] sm:$0xff] }
  0x30   : > { %248 = vst [vmem:[%s163_s23 + $0x50] sm:$0xff] %v247_v10  ;;  %250 = vst [vmem:[%s163_s23 + $0x58] sm:$0xff] %v249_v11  ;;  %v253_v13 = vld [vmem:[%s1979_s5 + $0x3a8] sm:$0xff]  ;;  %v255_v14 = vld [vmem:[%s1979_s5 + $0x3f0] sm:$0xff] }
  0x31   : > { %252 = vst [vmem:[%s163_s23 + $0x60] sm:$0xff] %v251_v12  ;;  %254 = vst [vmem:[%s163_s23 + $0x68] sm:$0xff] %v253_v13  ;;  %v257_v15 = vld [vmem:[%s1979_s5 + $0x438] sm:$0xff] }
  0x32   : > { %256 = vst [vmem:[%s163_s23 + $0x70] sm:$0xff] %v255_v14  ;;  %258 = vst [vmem:[%s163_s23 + $0x78] sm:$0xff] %v257_v15 }
  0x33 PF: > { %264 = sbr.rel (!%p1954_p9) target bundleno = 77 (0x4d), region = 58  ;;  %s266_s28 = sand.u32 (%p1954_p9), 1, %s1822_s15  }
  0x34   : > { %s1473_s7 = sshll.u32 (%p1954_p9), %s1846_s21, 1  ;;  %s1471_s11 = sshll.u32 (%p1954_p9), %s266_s28, 8 }
  0x35   : > { %s1553_s26 = sshll.u32 (%p1954_p9), %s1842_s20, 7  ;;  %s2265_s1 = sld [smem:[#allocation8_spill]] (%p1954_p9) }
  0x36   : > { %s272_s27 = sadd.s32 (%p1954_p9), %s1553_s26, %s1473_s7  ;;  %s2010_s6 = scalar_lea.vmem (%p1954_p9), [#allocation4], %s1471_s11 }
  0x37   : > { %s1475_s29 = sshll.u32 (%p1954_p9), %s272_s27, 2 }
  0x3b   : > { %s2005_s25 = scalar_lea.vmem %s2265_s1, %s1475_s29 }
  0x3c   : > { %v364_v16 = vld [vmem:[%s2005_s25] sm:$0xff]  ;;  %v366_v17 = vld [vmem:[%s2005_s25 + $0x10] sm:$0xff] }
  0x3d   : > { %v368_v18 = vld [vmem:[%s2005_s25 + $0x20] sm:$0xff]  ;;  %365 = vst [vmem:[%s2010_s6] sm:$0xff] %v364_v16  ;;  %367 = vst [vmem:[%s2010_s6 + $0x8] sm:$0xff] %v366_v17  ;;  %v370_v19 = vld [vmem:[%s2005_s25 + $0x30] sm:$0xff] }
  0x3e   : > { %369 = vst [vmem:[%s2010_s6 + $0x10] sm:$0xff] %v368_v18  ;;  %v372_v20 = vld [vmem:[%s2005_s25 + $0x40] sm:$0xff]  ;;  %v374_v21 = vld [vmem:[%s2005_s25 + $0x50] sm:$0xff]  ;;  %371 = vst [vmem:[%s2010_s6 + $0x18] sm:$0xff] %v370_v19 }
  0x3f   : > { %373 = vst [vmem:[%s2010_s6 + $0x20] sm:$0xff] %v372_v20  ;;  %375 = vst [vmem:[%s2010_s6 + $0x28] sm:$0xff] %v374_v21  ;;  %v376_v22 = vld [vmem:[%s2005_s25 + $0x60] sm:$0xff]  ;;  %v378_v23 = vld [vmem:[%s2005_s25 + $0x70] sm:$0xff] }
  0x40   : > { %v380_v24 = vld [vmem:[%s2005_s25 + $0x80] sm:$0xff]  ;;  %377 = vst [vmem:[%s2010_s6 + $0x30] sm:$0xff] %v376_v22  ;;  %379 = vst [vmem:[%s2010_s6 + $0x38] sm:$0xff] %v378_v23  ;;  %v382_v25 = vld [vmem:[%s2005_s25 + $0x90] sm:$0xff] }
  0x41   : > { %381 = vst [vmem:[%s2010_s6 + $0x40] sm:$0xff] %v380_v24  ;;  %v384_v26 = vld [vmem:[%s2005_s25 + $0xa0] sm:$0xff]  ;;  %v386_v27 = vld [vmem:[%s2005_s25 + $0xb0] sm:$0xff]  ;;  %383 = vst [vmem:[%s2010_s6 + $0x48] sm:$0xff] %v382_v25 }
  0x42   : > { %385 = vst [vmem:[%s2010_s6 + $0x50] sm:$0xff] %v384_v26  ;;  %387 = vst [vmem:[%s2010_s6 + $0x58] sm:$0xff] %v386_v27  ;;  %v388_v28 = vld [vmem:[%s2005_s25 + $0xc0] sm:$0xff]  ;;  %v390_v29 = vld [vmem:[%s2005_s25 + $0xd0] sm:$0xff] }
  0x43   : > { %v392_v30 = vld [vmem:[%s2005_s25 + $0xe0] sm:$0xff]  ;;  %389 = vst [vmem:[%s2010_s6 + $0x60] sm:$0xff] %v388_v28  ;;  %391 = vst [vmem:[%s2010_s6 + $0x68] sm:$0xff] %v390_v29  ;;  %v394_v31 = vld [vmem:[%s2005_s25 + $0xf0] sm:$0xff] }
  0x44   : > { %393 = vst [vmem:[%s2010_s6 + $0x70] sm:$0xff] %v392_v30  ;;  %v396_v32 = vld [vmem:[%s2005_s25 + $0x100] sm:$0xff]  ;;  %v398_v33 = vld [vmem:[%s2005_s25 + $0x110] sm:$0xff]  ;;  %395 = vst [vmem:[%s2010_s6 + $0x78] sm:$0xff] %v394_v31 }
  0x45   : > { %397 = vst [vmem:[%s2010_s6 + $0x80] sm:$0xff] %v396_v32  ;;  %399 = vst [vmem:[%s2010_s6 + $0x88] sm:$0xff] %v398_v33  ;;  %v400_v34 = vld [vmem:[%s2005_s25 + $0x120] sm:$0xff]  ;;  %v402_v35 = vld [vmem:[%s2005_s25 + $0x130] sm:$0xff] }
  0x46   : > { %v404_v36 = vld [vmem:[%s2005_s25 + $0x140] sm:$0xff]  ;;  %401 = vst [vmem:[%s2010_s6 + $0x90] sm:$0xff] %v400_v34  ;;  %403 = vst [vmem:[%s2010_s6 + $0x98] sm:$0xff] %v402_v35  ;;  %v406_v37 = vld [vmem:[%s2005_s25 + $0x150] sm:$0xff] }
  0x47   : > { %405 = vst [vmem:[%s2010_s6 + $0xa0] sm:$0xff] %v404_v36  ;;  %v408_v38 = vld [vmem:[%s2005_s25 + $0x160] sm:$0xff]  ;;  %v410_v39 = vld [vmem:[%s2005_s25 + $0x170] sm:$0xff]  ;;  %407 = vst [vmem:[%s2010_s6 + $0xa8] sm:$0xff] %v406_v37 }
  0x48   : > { %409 = vst [vmem:[%s2010_s6 + $0xb0] sm:$0xff] %v408_v38  ;;  %411 = vst [vmem:[%s2010_s6 + $0xb8] sm:$0xff] %v410_v39  ;;  %v412_v40 = vld [vmem:[%s2005_s25 + $0x180] sm:$0xff]  ;;  %v414_v41 = vld [vmem:[%s2005_s25 + $0x190] sm:$0xff] }
  0x49   : > { %v416_v42 = vld [vmem:[%s2005_s25 + $0x1a0] sm:$0xff]  ;;  %413 = vst [vmem:[%s2010_s6 + $0xc0] sm:$0xff] %v412_v40  ;;  %415 = vst [vmem:[%s2010_s6 + $0xc8] sm:$0xff] %v414_v41  ;;  %v418_v43 = vld [vmem:[%s2005_s25 + $0x1b0] sm:$0xff] }
  0x4a   : > { %417 = vst [vmem:[%s2010_s6 + $0xd0] sm:$0xff] %v416_v42  ;;  %v420_v44 = vld [vmem:[%s2005_s25 + $0x1c0] sm:$0xff]  ;;  %v422_v45 = vld [vmem:[%s2005_s25 + $0x1d0] sm:$0xff]  ;;  %419 = vst [vmem:[%s2010_s6 + $0xd8] sm:$0xff] %v418_v43 }
  0x4b   : > { %421 = vst [vmem:[%s2010_s6 + $0xe0] sm:$0xff] %v420_v44  ;;  %423 = vst [vmem:[%s2010_s6 + $0xe8] sm:$0xff] %v422_v45  ;;  %v424_v46 = vld [vmem:[%s2005_s25 + $0x1e0] sm:$0xff]  ;;  %v426_v47 = vld [vmem:[%s2005_s25 + $0x1f0] sm:$0xff] }
  0x4c   : > { %425 = vst [vmem:[%s2010_s6 + $0xf0] sm:$0xff] %v424_v46  ;;  %427 = vst [vmem:[%s2010_s6 + $0xf8] sm:$0xff] %v426_v47 }
  0x4d PF: > { %p1476_p0 = scmp.ge.s32.totalorder %s1850_s22, 1  ;;  %p440_p1 = scmp.lt.s32.totalorder %s1850_s22, 19 }
  0x4f   : > { %p441_p2 = pnand %p1476_p0, %p440_p1 }
  0x50   : > { %s447_s0 = sand.u32 (!%p441_p2), 1, %s1826_s16   ;;  %s454_s5 = sand.u32 (!%p441_p2), 1, %s1818_s14  }
  0x51   : > { %444 = sbr.rel (%p441_p2) target bundleno = 439 (0x1b7), region = 100  ;;  %s1477_s23 = sshll.u32 (!%p441_p2), %s447_s0, 7 }
  0x52   : > { %s1478_s28 = sshll.u32 (!%p441_p2), %s454_s5, 8  ;;  %s481_s7 = sand.u32 (!%p441_p2), 1, %s1810_s12  }
  0x53   : > { %s1480_s25 = sshll.u32 (!%p441_p2), %s1838_s19, 1  ;;  %s1479_s11 = sshll.u32 (!%p441_p2), %s481_s7, 7 }
  0x54   : > { %p489_p3 = scmp.lt.s32.totalorder (!%p441_p2), %s1480_s25, 3  ;;  %s2085_s4 = scalar_lea.vmem (!%p441_p2), [#allocation3], %s1477_s23 }
  0x55   : > { %s2087_s6 = scalar_lea.vmem (!%p441_p2), [#allocation4], %s1478_s28  ;;  %s2089_s1 = scalar_lea.vmem (!%p441_p2), [#allocation5], %s1479_s11 }
  0x56   : > { %p1481_p4 = scmp.ne.s32.totalorder (!%p441_p2), %s1834_s18, 0 }
  0x58   : > { %s2284_s25 = smov (!%p489_p3, %s1480_s25), 3  ;;  %498 = sbr.rel (%p1481_p4) target bundleno = 106 (0x6a), region = 112 }
  0x59   : > { %s491_s29 = scalar_lea.vmem %s2255_s2, %s2284_s25  ;;  %v1852_v48 = vmov (!%p1481_p4), 0.0  }
  0x5a   : > { %499 = vst [vmem:[#allocation2] sm:$0xff] (!%p1481_p4), %v1852_v48  ;;  %500 = vst [vmem:[#allocation2 + $0x8] sm:$0xff] (!%p1481_p4), %v1852_v48 }
  0x5b   : > { %501 = vst [vmem:[#allocation2 + $0x10] sm:$0xff] (!%p1481_p4), %v1852_v48  ;;  %502 = vst [vmem:[#allocation2 + $0x18] sm:$0xff] (!%p1481_p4), %v1852_v48 }
  0x5c   : > { %503 = vst [vmem:[#allocation2 + $0x20] sm:$0xff] (!%p1481_p4), %v1852_v48  ;;  %504 = vst [vmem:[#allocation2 + $0x28] sm:$0xff] (!%p1481_p4), %v1852_v48 }
  0x5d   : > { %505 = vst [vmem:[#allocation2 + $0x30] sm:$0xff] (!%p1481_p4), %v1852_v48  ;;  %506 = vst [vmem:[#allocation2 + $0x38] sm:$0xff] (!%p1481_p4), %v1852_v48 }
  0x5e   : > { %507 = vst [vmem:[#allocation2 + $0x40] sm:$0xff] (!%p1481_p4), %v1852_v48  ;;  %508 = vst [vmem:[#allocation2 + $0x48] sm:$0xff] (!%p1481_p4), %v1852_v48 }
  0x5f   : > { %509 = vst [vmem:[#allocation2 + $0x50] sm:$0xff] %v1852_v48  ;;  %510 = vst [vmem:[#allocation2 + $0x58] sm:$0xff] %v1852_v48 }
  0x60   : > { %511 = vst [vmem:[#allocation2 + $0x60] sm:$0xff] %v1852_v48  ;;  %512 = vst [vmem:[#allocation2 + $0x68] sm:$0xff] %v1852_v48 }
  0x61   : > { %513 = vst [vmem:[#allocation2 + $0x70] sm:$0xff] %v1852_v48  ;;  %514 = vst [vmem:[#allocation2 + $0x78] sm:$0xff] %v1852_v48 }
  0x62   : > { %515 = vst [vmem:[#allocation2 + $0x80] sm:$0xff] %v1852_v48  ;;  %516 = vst [vmem:[#allocation2 + $0x88] sm:$0xff] %v1852_v48 }
  0x63   : > { %517 = vst [vmem:[#allocation2 + $0x90] sm:$0xff] %v1852_v48  ;;  %518 = vst [vmem:[#allocation2 + $0x98] sm:$0xff] %v1852_v48 }
  0x64   : > { %519 = vst [vmem:[#allocation2 + $0xa0] sm:$0xff] %v1852_v48  ;;  %520 = vst [vmem:[#allocation2 + $0xa8] sm:$0xff] %v1852_v48 }
  0x65   : > { %521 = vst [vmem:[#allocation2 + $0xb0] sm:$0xff] %v1852_v48  ;;  %522 = vst [vmem:[#allocation2 + $0xb8] sm:$0xff] %v1852_v48 }
  0x66   : > { %523 = vst [vmem:[#allocation2 + $0xc0] sm:$0xff] %v1852_v48  ;;  %524 = vst [vmem:[#allocation2 + $0xc8] sm:$0xff] %v1852_v48 }
  0x67   : > { %525 = vst [vmem:[#allocation2 + $0xd0] sm:$0xff] %v1852_v48  ;;  %526 = vst [vmem:[#allocation2 + $0xd8] sm:$0xff] %v1852_v48 }
  0x68   : > { %527 = vst [vmem:[#allocation2 + $0xe0] sm:$0xff] %v1852_v48  ;;  %528 = vst [vmem:[#allocation2 + $0xe8] sm:$0xff] %v1852_v48 }
  0x69   : > { %529 = vst [vmem:[#allocation2 + $0xf0] sm:$0xff] %v1852_v48  ;;  %530 = vst [vmem:[#allocation2 + $0xf8] sm:$0xff] %v1852_v48 }
  0x6a PF: > { %v1692_v49 = vld [vmem:[%s2087_s6 + $0x4] ss:$8 sps:$4 sm:$0xff]   ;;  %v1694_v50 = vld [vmem:[%s2087_s6] ss:$8 sps:$4 sm:$0xff]   ;;  %v1695_v51 = vld [vmem:[%s2087_s6 + $0x14] ss:$8 sps:$4 sm:$0xff]  }
  0x6b   : > { %851 = vmatprep.subr.bf16.mxu0 %v1692_v49  ;;  %1571 = vmatprep.subr.bf16.mxu1 %v1692_v49  ;;  %v1697_v52 = vld [vmem:[%s2087_s6 + $0x10] ss:$8 sps:$4 sm:$0xff]   ;;  %v1698_v53 = vld [vmem:[%s2087_s6 + $0x24] ss:$8 sps:$4 sm:$0xff]   ;;  %v1700_v54 = vld [vmem:[%s2087_s6 + $0x20] ss:$8 sps:$4 sm:$0xff]  }
  0x6c   : > { %852 = vmatpush1.bf16.msra.mxu0 %v1694_v50  ;;  %1587 = vmatpush1.bf16.msra.mxu1 %v1694_v50  ;;  %v1701_v55 = vld [vmem:[%s2087_s6 + $0x34] ss:$8 sps:$4 sm:$0xff]   ;;  %v1703_v56 = vld [vmem:[%s2087_s6 + $0x30] ss:$8 sps:$4 sm:$0xff]   ;;  %v1704_v57 = vld [vmem:[%s2087_s6 + $0x44] ss:$8 sps:$4 sm:$0xff]  }
  0x6d   : > { %853 = vmatprep.subr.bf16.mxu0 %v1695_v51  ;;  %1572 = vmatprep.subr.bf16.mxu1 %v1695_v51  ;;  %v1706_v58 = vld [vmem:[%s2087_s6 + $0x40] ss:$8 sps:$4 sm:$0xff]   ;;  %v1707_v59 = vld [vmem:[%s2087_s6 + $0x54] ss:$8 sps:$4 sm:$0xff]   ;;  %v1709_v60 = vld [vmem:[%s2087_s6 + $0x50] ss:$8 sps:$4 sm:$0xff]  }
  0x6e   : > { %v1710_v61 = vld [vmem:[%s2087_s6 + $0x64] ss:$8 sps:$4 sm:$0xff]   ;;  %v1712_v63 = vld [vmem:[%s2087_s6 + $0x60] ss:$8 sps:$4 sm:$0xff]   ;;  %v1713_v1 = vld [vmem:[%s2087_s6 + $0x74] ss:$8 sps:$4 sm:$0xff]  }
  0x6f   : > { %v1742_v62 = vld [vmem:[%s2085_s4 + $0x4] ss:$8 sps:$4 sm:$0xff]   ;;  %v1715_v2 = vld [vmem:[%s2087_s6 + $0x70] ss:$8 sps:$4 sm:$0xff]   ;;  %v1718_v4 = vld [vmem:[%s2087_s6 + $0x80] ss:$8 sps:$4 sm:$0xff]  }
  0x70   : > { %854 = vmatpush1.bf16.msra.mxu0 %v1697_v52  ;;  %1588 = vmatpush1.bf16.msra.mxu1 %v1697_v52  ;;  %v1745_v0 = vld [vmem:[%s2085_s4 + $0x44] ss:$8 sps:$4 sm:$0xff]   ;;  %v1719_v5 = vld [vmem:[%s2087_s6 + $0x94] ss:$8 sps:$4 sm:$0xff]   ;;  %v1721_v6 = vld [vmem:[%s2087_s6 + $0x90] ss:$8 sps:$4 sm:$0xff]  }
  0x71   : > { %855 = vmatprep.subr.bf16.mxu0 %v1698_v53  ;;  %1573 = vmatprep.subr.bf16.mxu1 %v1698_v53  ;;  %v1716_v3 = vld [vmem:[%s2087_s6 + $0x84] ss:$8 sps:$4 sm:$0xff]   ;;  %v1724_v8 = vld [vmem:[%s2087_s6 + $0xa0] ss:$8 sps:$4 sm:$0xff]   ;;  %v1725_v9 = vld [vmem:[%s2087_s6 + $0xb4] ss:$8 sps:$4 sm:$0xff]  }
  0x72   : > { %883 = vmatprep.mubr.bf16.mxu0 %v1742_v62  ;;  %923 = vmatprep.mubr.bf16.mxu1 %v1745_v0  ;;  %v1722_v7 = vld [vmem:[%s2087_s6 + $0xa4] ss:$8 sps:$4 sm:$0xff]   ;;  %v1727_v10 = vld [vmem:[%s2087_s6 + $0xb0] ss:$8 sps:$4 sm:$0xff]   ;;  %v1730_v12 = vld [vmem:[%s2087_s6 + $0xc0] ss:$8 sps:$4 sm:$0xff]  }
  0x73   : > { %v1728_v11 = vld [vmem:[%s2087_s6 + $0xc4] ss:$8 sps:$4 sm:$0xff]   ;;  %v1731_v13 = vld [vmem:[%s2087_s6 + $0xd4] ss:$8 sps:$4 sm:$0xff]   ;;  %v1733_v14 = vld [vmem:[%s2087_s6 + $0xd0] ss:$8 sps:$4 sm:$0xff]  }
  0x74   : > { %856 = vmatpush1.bf16.msra.mxu0 %v1700_v54  ;;  %1589 = vmatpush1.bf16.msra.mxu1 %v1700_v54  ;;  %v1734_v15 = vld [vmem:[%s2087_s6 + $0xe4] ss:$8 sps:$4 sm:$0xff]   ;;  %v1736_v16 = vld [vmem:[%s2087_s6 + $0xe0] ss:$8 sps:$4 sm:$0xff]   ;;  %v1737_v17 = vld [vmem:[%s2087_s6 + $0xf4] ss:$8 sps:$4 sm:$0xff]  }
  0x75   : > { %857 = vmatprep.subr.bf16.mxu0 %v1701_v55  ;;  %1574 = vmatprep.subr.bf16.mxu1 %v1701_v55  ;;  %v1739_v18 = vld [vmem:[%s2087_s6 + $0xf0] ss:$8 sps:$4 sm:$0xff]   ;;  %v1740_v19 = vld [vmem:[%s2085_s4] ss:$8 sps:$4 sm:$0xff]   ;;  %v1746_v21 = vld [vmem:[%s2085_s4 + $0x14] ss:$8 sps:$4 sm:$0xff]  }
  0x76   : > { %v1743_v20 = vld [vmem:[%s2085_s4 + $0x40] ss:$8 sps:$4 sm:$0xff]   ;;  %v1748_v22 = vld [vmem:[%s2085_s4 + $0x54] ss:$8 sps:$4 sm:$0xff]   ;;  %v1750_v23 = vld [vmem:[%s2085_s4 + $0x10] ss:$8 sps:$4 sm:$0xff]  }
  0x77   : > { %v1751_v24 = vld [vmem:[%s2085_s4 + $0x50] ss:$8 sps:$4 sm:$0xff]   ;;  %v1752_v25 = vld [vmem:[%s2085_s4 + $0x24] ss:$8 sps:$4 sm:$0xff]   ;;  %v1756_v27 = vld [vmem:[%s2085_s4 + $0x20] ss:$8 sps:$4 sm:$0xff]  }
  0x78   : > { %858 = vmatpush1.bf16.msra.mxu0 %v1703_v56  ;;  %1590 = vmatpush1.bf16.msra.mxu1 %v1703_v56  ;;  %v1754_v26 = vld [vmem:[%s2085_s4 + $0x64] ss:$8 sps:$4 sm:$0xff]   ;;  %v1757_v28 = vld [vmem:[%s2085_s4 + $0x60] ss:$8 sps:$4 sm:$0xff]   ;;  %v1758_v29 = vld [vmem:[%s2085_s4 + $0x34] ss:$8 sps:$4 sm:$0xff]  }
  0x79   : > { %859 = vmatprep.subr.bf16.mxu0 %v1704_v57  ;;  %1575 = vmatprep.subr.bf16.mxu1 %v1704_v57  ;;  %v1760_v30 = vld [vmem:[%s2085_s4 + $0x74] ss:$8 sps:$4 sm:$0xff]   ;;  %v1762_v31 = vld [vmem:[%s2085_s4 + $0x30] ss:$8 sps:$4 sm:$0xff]   ;;  %v531_v33 = vld [vmem:[#allocation2] sm:$0xff]  ;;  %p1530_p5 = scmp.ne.s32.totalorder %s1834_s18, 8 }
  0x7a   : > { %v1763_v32 = vld [vmem:[%s2085_s4 + $0x70] ss:$8 sps:$4 sm:$0xff]   ;;  %v547_v34 = vld [vmem:[#allocation2 + $0x80] sm:$0xff]  ;;  %v532_v35 = vld [vmem:[#allocation2 + $0x8] sm:$0xff] }
  0x7b   : > { %v548_v36 = vld [vmem:[#allocation2 + $0x88] sm:$0xff]  ;;  %v533_v39 = vld [vmem:[#allocation2 + $0x10] sm:$0xff]  ;;  %v534_v45 = vld [vmem:[#allocation2 + $0x18] sm:$0xff] }
  0x7c   : > { %860 = vmatpush1.bf16.msra.mxu0 %v1706_v58  ;;  %1591 = vmatpush1.bf16.msra.mxu1 %v1706_v58  ;;  %v549_v40 = vld [vmem:[#allocation2 + $0x90] sm:$0xff]  ;;  %v550_v46 = vld [vmem:[#allocation2 + $0x98] sm:$0xff]  ;;  %v535_v57 = vld [vmem:[#allocation2 + $0x20] sm:$0xff] }
  0x7d   : > { %861 = vmatprep.subr.bf16.mxu0 %v1707_v59  ;;  %1576 = vmatprep.subr.bf16.mxu1 %v1707_v59  ;;  %v551_v58 = vld [vmem:[#allocation2 + $0xa0] sm:$0xff]  ;;  %v536_v59 = vld [vmem:[#allocation2 + $0x28] sm:$0xff]  ;;  %v553_v0 = vld [vmem:[#allocation2 + $0xb0] sm:$0xff] }
  0x80   : > { %862 = vmatpush1.bf16.msra.mxu0 %v1709_v60  ;;  %1592 = vmatpush1.bf16.msra.mxu1 %v1709_v60  ;;  %v552_v60 = vld [vmem:[#allocation2 + $0xa8] sm:$0xff] }
  0x81   : > { %863 = vmatprep.subr.bf16.mxu0 %v1710_v61  ;;  %1577 = vmatprep.subr.bf16.mxu1 %v1710_v61 }
  0x84   : > { %864 = vmatpush1.bf16.msra.mxu0 %v1712_v63  ;;  %1593 = vmatpush1.bf16.msra.mxu1 %v1712_v63  ;;  %v537_v63 = vld [vmem:[#allocation2 + $0x30] sm:$0xff] }
  0x85   : > { %865 = vmatprep.subr.bf16.mxu0 %v1713_v1  ;;  %1578 = vmatprep.subr.bf16.mxu1 %v1713_v1 }
  0x88   : > { %866 = vmatpush1.bf16.msra.mxu0 %v1715_v2  ;;  %1594 = vmatpush1.bf16.msra.mxu1 %v1715_v2 }
  0x89   : > { %867 = vmatprep.subr.bf16.mxu0 %v1716_v3  ;;  %1579 = vmatprep.subr.bf16.mxu1 %v1716_v3 }
  0x8c   : > { %868 = vmatpush1.bf16.msra.mxu0 %v1718_v4  ;;  %1595 = vmatpush1.bf16.msra.mxu1 %v1718_v4 }
  0x8d   : > { %869 = vmatprep.subr.bf16.mxu0 %v1719_v5  ;;  %1580 = vmatprep.subr.bf16.mxu1 %v1719_v5  ;;  %v538_v5 = vld [vmem:[#allocation2 + $0x38] sm:$0xff] }
  0x90   : > { %870 = vmatpush1.bf16.msra.mxu0 %v1721_v6  ;;  %1596 = vmatpush1.bf16.msra.mxu1 %v1721_v6  ;;  %v554_v6 = vld [vmem:[#allocation2 + $0xb8] sm:$0xff] }
  0x91   : > { %871 = vmatprep.subr.bf16.mxu0 %v1722_v7  ;;  %1581 = vmatprep.subr.bf16.mxu1 %v1722_v7 }
  0x94   : > { %872 = vmatpush1.bf16.msra.mxu0 %v1724_v8  ;;  %1597 = vmatpush1.bf16.msra.mxu1 %v1724_v8 }
  0x95   : > { %873 = vmatprep.subr.bf16.mxu0 %v1725_v9  ;;  %1582 = vmatprep.subr.bf16.mxu1 %v1725_v9 }
  0x98   : > { %874 = vmatpush1.bf16.msra.mxu0 %v1727_v10  ;;  %1598 = vmatpush1.bf16.msra.mxu1 %v1727_v10 }
  0x99   : > { %875 = vmatprep.subr.bf16.mxu0 %v1728_v11  ;;  %1583 = vmatprep.subr.bf16.mxu1 %v1728_v11 }
  0x9c   : > { %876 = vmatpush1.bf16.msra.mxu0 %v1730_v12  ;;  %1599 = vmatpush1.bf16.msra.mxu1 %v1730_v12 }
  0x9d   : > { %877 = vmatprep.subr.bf16.mxu0 %v1731_v13  ;;  %1584 = vmatprep.subr.bf16.mxu1 %v1731_v13 }
  0xa0   : > { %878 = vmatpush1.bf16.msra.mxu0 %v1733_v14  ;;  %1600 = vmatpush1.bf16.msra.mxu1 %v1733_v14 }
  0xa1   : > { %879 = vmatprep.subr.bf16.mxu0 %v1734_v15  ;;  %1585 = vmatprep.subr.bf16.mxu1 %v1734_v15 }
  0xa4   : > { %880 = vmatpush1.bf16.msra.mxu0 %v1736_v16  ;;  %1601 = vmatpush1.bf16.msra.mxu1 %v1736_v16 }
  0xa5   : > { %881 = vmatprep.subr.bf16.mxu0 %v1737_v17  ;;  %1586 = vmatprep.subr.bf16.mxu1 %v1737_v17  ;;  %v539_v17 = vld [vmem:[#allocation2 + $0x40] sm:$0xff] }
  0xa8   : > { %882 = vmatpush1.bf16.msra.mxu0 %v1739_v18  ;;  %1602 = vmatpush1.bf16.msra.mxu1 %v1739_v18  ;;  %v555_v18 = vld [vmem:[#allocation2 + $0xc0] sm:$0xff] }
  0xab   : > { %884 = vmatmul.mubr.bf16.vlgmr.msra.gmra.mrb[0].mxu0 %v1740_v19  ;;  %924 = vmatmul.mubr.bf16.vlgmr.msra.gmra.mrb[0].mxu1 %v1743_v20  ;;  %v540_v19 = vld [vmem:[#allocation2 + $0x48] sm:$0xff] }
  0xac   : > { %893 = vmatprep.mubr.bf16.mxu0 %v1746_v21  ;;  %933 = vmatprep.mubr.bf16.mxu1 %v1748_v22  ;;  %v556_v20 = vld [vmem:[#allocation2 + $0xc8] sm:$0xff] }
  0xb3   : > { %894 = vmatmul.mubr.bf16.gmra.mrb[4].mxu0 %v1750_v23  ;;  %934 = vmatmul.mubr.bf16.gmra.mrb[4].mxu1 %v1751_v24  ;;  %v541_v23 = vld [vmem:[#allocation2 + $0x50] sm:$0xff] }
  0xb4   : > { %903 = vmatprep.mubr.bf16.mxu0 %v1752_v25  ;;  %943 = vmatprep.mubr.bf16.mxu1 %v1754_v26  ;;  %v557_v24 = vld [vmem:[#allocation2 + $0xd0] sm:$0xff] }
  0xbb   : > { %904 = vmatmul.mubr.bf16.gmra.mrb[8].mxu0 %v1756_v27  ;;  %944 = vmatmul.mubr.bf16.gmra.mrb[8].mxu1 %v1757_v28 }
  0xbc   : > { %913 = vmatprep.mubr.bf16.mxu0 %v1758_v29  ;;  %953 = vmatprep.mubr.bf16.mxu1 %v1760_v30  ;;  %v542_v29 = vld [vmem:[#allocation2 + $0x58] sm:$0xff] }
  0xbd   : > { %v558_v30 = vld [vmem:[#allocation2 + $0xd8] sm:$0xff] }
  0xc3   : > { %914 = vmatmul.mubr.bf16.gmra.mrb[12].mxu0 %v1762_v31  ;;  %954 = vmatmul.mubr.bf16.gmra.mrb[12].mxu1 %v1763_v32 }
 0x17e   : > { %v885_v37 = vpop.f32.mrb[0].mxu0  ;;  %v925_v38 = vpop.f32.mrb[0].mxu1 }
 0x17f   : > { %v964_v41 = vadd.f32 %v885_v37, %v531_v33  ;;  %v980_v42 = vadd.f32 %v925_v38, %v547_v34  ;;  %v887_v43 = vpop.f32.mrb[1].mxu0  ;;  %v927_v44 = vpop.f32.mrb[1].mxu1 }
 0x180   : > { %v965_v47 = vadd.f32 %v887_v43, %v532_v35  ;;  %v981_v48 = vadd.f32 %v927_v44, %v548_v36  ;;  %v889_v49 = vpop.f32.mrb[2].mxu0  ;;  %v929_v50 = vpop.f32.mrb[2].mxu1  ;;  %v544_v43 = vld [vmem:[#allocation2 + $0x68] sm:$0xff] }
 0x181   : > { %996 = vst [vmem:[#allocation2] sm:$0xff] %v964_v41  ;;  %1012 = vst [vmem:[#allocation2 + $0x80] sm:$0xff] %v980_v42  ;;  %v966_v51 = vadd.f32 %v889_v49, %v533_v39  ;;  %v982_v52 = vadd.f32 %v929_v50, %v549_v40  ;;  %v891_v53 = vpop.f32.mrb[3].mxu0  ;;  %v931_v54 = vpop.f32.mrb[3].mxu1  ;;  %v543_v41 = vld [vmem:[#allocation2 + $0x60] sm:$0xff]  ;;  %v560_v44 = vld [vmem:[#allocation2 + $0xe8] sm:$0xff] }
 0x182   : > { %997 = vst [vmem:[#allocation2 + $0x8] sm:$0xff] %v965_v47  ;;  %1013 = vst [vmem:[#allocation2 + $0x88] sm:$0xff] %v981_v48  ;;  %v967_v55 = vadd.f32 %v891_v53, %v534_v45  ;;  %v983_v56 = vadd.f32 %v931_v54, %v550_v46  ;;  %v559_v42 = vld [vmem:[#allocation2 + $0xe0] sm:$0xff]  ;;  %v545_v47 = vld [vmem:[#allocation2 + $0x70] sm:$0xff] }
 0x183   : > { %998 = vst [vmem:[#allocation2 + $0x10] sm:$0xff] %v966_v51  ;;  %1014 = vst [vmem:[#allocation2 + $0x90] sm:$0xff] %v982_v52  ;;  %v561_v48 = vld [vmem:[#allocation2 + $0xf0] sm:$0xff]  ;;  %v546_v53 = vld [vmem:[#allocation2 + $0x78] sm:$0xff] }
 0x184   : > { %999 = vst [vmem:[#allocation2 + $0x18] sm:$0xff] %v967_v55  ;;  %1015 = vst [vmem:[#allocation2 + $0x98] sm:$0xff] %v983_v56  ;;  %v562_v54 = vld [vmem:[#allocation2 + $0xf8] sm:$0xff] }
 0x186   : > { %v895_v61 = vpop.f32.mrb[4].mxu0  ;;  %v935_v62 = vpop.f32.mrb[4].mxu1 }
 0x187   : > { %v968_v1 = vadd.f32 %v895_v61, %v535_v57  ;;  %v984_v2 = vadd.f32 %v935_v62, %v551_v58  ;;  %v897_v3 = vpop.f32.mrb[5].mxu0  ;;  %v937_v4 = vpop.f32.mrb[5].mxu1 }
 0x188   : > { %v969_v7 = vadd.f32 %v897_v3, %v536_v59  ;;  %v985_v8 = vadd.f32 %v937_v4, %v552_v60  ;;  %v899_v9 = vpop.f32.mrb[6].mxu0  ;;  %v939_v10 = vpop.f32.mrb[6].mxu1  ;;  %v1064_v3 = vld [vmem:[%s491_s29] sm:$0x3] (!%p1530_p5) }
 0x189   : > { %1000 = vst [vmem:[#allocation2 + $0x20] sm:$0xff] %v968_v1  ;;  %1016 = vst [vmem:[#allocation2 + $0xa0] sm:$0xff] %v984_v2  ;;  %v970_v11 = vadd.f32 %v899_v9, %v537_v63  ;;  %v986_v12 = vadd.f32 %v939_v10, %v553_v0  ;;  %v901_v13 = vpop.f32.mrb[7].mxu0  ;;  %v941_v14 = vpop.f32.mrb[7].mxu1  ;;  %v1066_v1 = vlaneseq (!%p1530_p5)  ;;  %v1032_v4 = vld [vmem:[#allocation2] sm:$0xff] (!%p1530_p5) }
 0x18a   : > { %1001 = vst [vmem:[#allocation2 + $0x28] sm:$0xff] %v969_v7  ;;  %1017 = vst [vmem:[#allocation2 + $0xa8] sm:$0xff] %v985_v8  ;;  %v971_v15 = vadd.f32 %v901_v13, %v538_v5  ;;  %v987_v16 = vadd.f32 %v941_v14, %v554_v6  ;;  %v1033_v5 = vld [vmem:[#allocation2 + $0x8] sm:$0xff] (!%p1530_p5)  ;;  %v1034_v8 = vld [vmem:[#allocation2 + $0x10] sm:$0xff] (!%p1530_p5) }
 0x18b   : > { %1002 = vst [vmem:[#allocation2 + $0x30] sm:$0xff] %v970_v11  ;;  %1018 = vst [vmem:[#allocation2 + $0xb0] sm:$0xff] %v986_v12  ;;  %v1067_v2 = vshrl.u32 (!%p1530_p5), %v1066_v1, 7  ;;  %v1035_v9 = vld [vmem:[#allocation2 + $0x18] sm:$0xff] (!%p1530_p5) }
 0x18c   : > { %1003 = vst [vmem:[#allocation2 + $0x38] sm:$0xff] %v971_v15  ;;  %1019 = vst [vmem:[#allocation2 + $0xb8] sm:$0xff] %v987_v16 }
 0x18d   : > { %v1068_v6 = vsub.s32 (!%p1530_p5), 0, %v1067_v2  ;;  %v1072_v7 = vsub.s32 (!%p1530_p5), 1, %v1067_v2 }
 0x18e   : > { %v905_v21 = vpop.f32.mrb[8].mxu0  ;;  %v945_v22 = vpop.f32.mrb[8].mxu1 }
 0x18f   : > { %v972_v25 = vadd.f32 %v905_v21, %v539_v17  ;;  %v988_v26 = vadd.f32 %v945_v22, %v555_v18  ;;  %v907_v27 = vpop.f32.mrb[9].mxu0  ;;  %v947_v28 = vpop.f32.mrb[9].mxu1  ;;  %v2146_v11 = vrot.slane (!%p1530_p5), %v1064_v3, %v1068_v6  ;;  %v2148_v12 = vrot.slane (!%p1530_p5), %v1064_v3, %v1072_v7 }
 0x190   : > { %v973_v31 = vadd.f32 %v907_v27, %v540_v19  ;;  %v989_v32 = vadd.f32 %v947_v28, %v556_v20  ;;  %v909_v33 = vpop.f32.mrb[10].mxu0  ;;  %v949_v34 = vpop.f32.mrb[10].mxu1  ;;  %v1036_v10 = vld [vmem:[#allocation2 + $0x20] sm:$0xff] (!%p1530_p5) }
 0x191   : > { %1004 = vst [vmem:[#allocation2 + $0x40] sm:$0xff] %v972_v25  ;;  %1020 = vst [vmem:[#allocation2 + $0xc0] sm:$0xff] %v988_v26  ;;  %v974_v35 = vadd.f32 %v909_v33, %v541_v23  ;;  %v990_v36 = vadd.f32 %v949_v34, %v557_v24  ;;  %v911_v37 = vpop.f32.mrb[11].mxu0  ;;  %v951_v38 = vpop.f32.mrb[11].mxu1  ;;  %v1037_v13 = vld [vmem:[#allocation2 + $0x28] sm:$0xff] (!%p1530_p5)  ;;  %v1076_v16 = vadd.f32 (!%p1530_p5), %v2146_v11, %v1032_v4 }
 0x192   : > { %1005 = vst [vmem:[#allocation2 + $0x48] sm:$0xff] %v973_v31  ;;  %1021 = vst [vmem:[#allocation2 + $0xc8] sm:$0xff] %v989_v32  ;;  %v975_v39 = vadd.f32 %v911_v37, %v542_v29  ;;  %v991_v40 = vadd.f32 %v951_v38, %v558_v30  ;;  %v1038_v14 = vld [vmem:[#allocation2 + $0x30] sm:$0xff] (!%p1530_p5)  ;;  %v1077_v17 = vadd.f32 (!%p1530_p5), %v2148_v12, %v1033_v5  ;;  %v1053_v1 = vld [vmem:[#allocation2 + $0xa8] sm:$0xff] (!%p1530_p5) }
 0x193   : > { %1006 = vst [vmem:[#allocation2 + $0x50] sm:$0xff] %v974_v35  ;;  %1022 = vst [vmem:[#allocation2 + $0xd0] sm:$0xff] %v990_v36  ;;  %v1039_v15 = vld [vmem:[#allocation2 + $0x38] sm:$0xff] (!%p1530_p5)  ;;  %v1078_v18 = vadd.f32 (!%p1530_p5), %v2146_v11, %v1034_v8  ;;  %v1079_v19 = vadd.f32 (!%p1530_p5), %v2148_v12, %v1035_v9  ;;  %v1080_v20 = vadd.f32 (!%p1530_p5), %v2146_v11, %v1036_v10  ;;  %v1108_v26 = vmax.f32 (!%p1530_p5), %v1076_v16, 0.0  ;;  %v1054_v6 = vld [vmem:[#allocation2 + $0xb0] sm:$0xff] (!%p1530_p5) }
 0x194   : > { %1007 = vst [vmem:[#allocation2 + $0x58] sm:$0xff] %v975_v39  ;;  %1023 = vst [vmem:[#allocation2 + $0xd8] sm:$0xff] %v991_v40  ;;  %v1081_v21 = vadd.f32 (!%p1530_p5), %v2148_v12, %v1037_v13  ;;  %v1082_v22 = vadd.f32 (!%p1530_p5), %v2146_v11, %v1038_v14  ;;  %v1083_v23 = vadd.f32 (!%p1530_p5), %v2148_v12, %v1039_v15  ;;  %v1109_v27 = vmax.f32 (!%p1530_p5), %v1077_v17, 0.0  ;;  %v1055_v7 = vld [vmem:[#allocation2 + $0xb8] sm:$0xff] (!%p1530_p5) }
 0x195   : > { %v1110_v28 = vmax.f32 (!%p1530_p5), %v1078_v18, 0.0  ;;  %v1111_v29 = vmax.f32 (!%p1530_p5), %v1079_v19, 0.0  ;;  %v1112_v32 = vmax.f32 (!%p1530_p5), %v1080_v20, 0.0  ;;  %v1097_v18 = vadd.f32 (!%p1530_p5), %v2148_v12, %v1053_v1 }
 0x196   : > { %v915_v45 = vpop.f32.mrb[12].mxu0  ;;  %v955_v46 = vpop.f32.mrb[12].mxu1  ;;  %1031 = sbr.rel (%p1530_p5) target bundleno = 429 (0x1ad), region = 116  ;;  %v1113_v33 = vmax.f32 (!%p1530_p5), %v1081_v21, 0.0  ;;  %v1114_v34 = vmax.f32 (!%p1530_p5), %v1082_v22, 0.0  ;;  %v1115_v35 = vmax.f32 (!%p1530_p5), %v1083_v23, 0.0  ;;  %v1554_v38 = vpack.c.bf16 (!%p1530_p5), %v1109_v27, %v1108_v26 }
 0x197   : > { %v976_v49 = vadd.f32 %v915_v45, %v543_v41  ;;  %v992_v50 = vadd.f32 %v955_v46, %v559_v42  ;;  %v917_v51 = vpop.f32.mrb[13].mxu0  ;;  %v957_v52 = vpop.f32.mrb[13].mxu1  ;;  %v1555_v39 = vpack.c.bf16 (!%p1530_p5), %v1111_v29, %v1110_v28  ;;  %v1098_v22 = vadd.f32 (!%p1530_p5), %v2146_v11, %v1054_v6 }
 0x198   : > { %v977_v55 = vadd.f32 %v917_v51, %v544_v43  ;;  %v993_v56 = vadd.f32 %v957_v52, %v560_v44  ;;  %v919_v57 = vpop.f32.mrb[14].mxu0  ;;  %v959_v58 = vpop.f32.mrb[14].mxu1  ;;  %v1040_v24 = vld [vmem:[#allocation2 + $0x40] sm:$0xff] (!%p1530_p5)  ;;  %v1556_v44 = vpack.c.bf16 (!%p1530_p5), %v1113_v33, %v1112_v32  ;;  %v1557_v45 = vpack.c.bf16 (!%p1530_p5), %v1115_v35, %v1114_v34  ;;  %1236 = vst [vmem:[%s2089_s1] sm:$0xff] (!%p1530_p5), %v1554_v38 }
 0x199   : > { %1008 = vst [vmem:[#allocation2 + $0x60] sm:$0xff] %v976_v49  ;;  %1024 = vst [vmem:[#allocation2 + $0xe0] sm:$0xff] %v992_v50  ;;  %v978_v59 = vadd.f32 %v919_v57, %v545_v47  ;;  %v994_v60 = vadd.f32 %v959_v58, %v561_v48  ;;  %v921_v61 = vpop.f32.mrb[15].mxu0  ;;  %v961_v62 = vpop.f32.mrb[15].mxu1  ;;  %v1041_v25 = vld [vmem:[#allocation2 + $0x48] sm:$0xff] (!%p1530_p5)  ;;  %v1084_v40 = vadd.f32 (!%p1530_p5), %v2146_v11, %v1040_v24  ;;  %v1048_v48 = vld [vmem:[#allocation2 + $0x80] sm:$0xff] (!%p1530_p5) }
 0x19a   : > { %1009 = vst [vmem:[#allocation2 + $0x68] sm:$0xff] %v977_v55  ;;  %1025 = vst [vmem:[#allocation2 + $0xe8] sm:$0xff] %v993_v56  ;;  %v979_v63 = vadd.f32 %v921_v61, %v546_v53  ;;  %v995_v0 = vadd.f32 %v961_v62, %v562_v54  ;;  %v1042_v30 = vld [vmem:[#allocation2 + $0x50] sm:$0xff] (!%p1530_p5)  ;;  %v1085_v41 = vadd.f32 (!%p1530_p5), %v2148_v12, %v1041_v25  ;;  %v1049_v53 = vld [vmem:[#allocation2 + $0x88] sm:$0xff] (!%p1530_p5)  ;;  %v1129_v28 = vmax.f32 (!%p1530_p5), %v1097_v18, 0.0 }
 0x19b   : > { %1010 = vst [vmem:[#allocation2 + $0x70] sm:$0xff] %v978_v59  ;;  %1026 = vst [vmem:[#allocation2 + $0xf0] sm:$0xff] %v994_v60  ;;  %v1043_v31 = vld [vmem:[#allocation2 + $0x58] sm:$0xff] (!%p1530_p5)  ;;  %v1086_v46 = vadd.f32 (!%p1530_p5), %v2146_v11, %v1042_v30  ;;  %v1116_v49 = vmax.f32 (!%p1530_p5), %v1084_v40, 0.0  ;;  %v1050_v58 = vld [vmem:[#allocation2 + $0x90] sm:$0xff] (!%p1530_p5)  ;;  %v1093_v5 = vadd.f32 (!%p1530_p5), %v2148_v12, %v1049_v53  ;;  %v1099_v23 = vadd.f32 (!%p1530_p5), %v2148_v12, %v1055_v7 }
 0x19c   : > { %1011 = vst [vmem:[#allocation2 + $0x78] sm:$0xff] %v979_v63  ;;  %1027 = vst [vmem:[#allocation2 + $0xf8] sm:$0xff] %v995_v0  ;;  %v1087_v47 = vadd.f32 (!%p1530_p5), %v2148_v12, %v1043_v31  ;;  %v1117_v50 = vmax.f32 (!%p1530_p5), %v1085_v41, 0.0  ;;  %v1051_v59 = vld [vmem:[#allocation2 + $0x98] sm:$0xff] (!%p1530_p5)  ;;  %v1092_v63 = vadd.f32 (!%p1530_p5), %v2146_v11, %v1048_v48  ;;  %v1052_v0 = vld [vmem:[#allocation2 + $0xa0] sm:$0xff] (!%p1530_p5)  ;;  %v1094_v10 = vadd.f32 (!%p1530_p5), %v2146_v11, %v1050_v58 }
 0x19d   : > { %1237 = vst [vmem:[%s2089_s1 + $0x8] sm:$0xff] %v1555_v39  ;;  %1238 = vst [vmem:[%s2089_s1 + $0x10] sm:$0xff] %v1556_v44  ;;  %v1118_v54 = vmax.f32 %v1086_v46, 0.0  ;;  %v1095_v13 = vadd.f32 %v2148_v12, %v1051_v59  ;;  %v1056_v14 = vld [vmem:[#allocation2 + $0xc0] sm:$0xff]  ;;  %v1125_v16 = vmax.f32 %v1093_v5, 0.0  ;;  %v1096_v17 = vadd.f32 %v2146_v11, %v1052_v0  ;;  %v1057_v19 = vld [vmem:[#allocation2 + $0xc8] sm:$0xff] }
 0x19e   : > { %1239 = vst [vmem:[%s2089_s1 + $0x18] sm:$0xff] %v1557_v45  ;;  %v1119_v55 = vmax.f32 %v1087_v47, 0.0  ;;  %v1558_v60 = vpack.c.bf16 %v1117_v50, %v1116_v49  ;;  %v1124_v9 = vmax.f32 %v1092_v63, 0.0  ;;  %v1126_v20 = vmax.f32 %v1094_v10, 0.0  ;;  %v1058_v24 = vld [vmem:[#allocation2 + $0xd0] sm:$0xff]  ;;  %v1059_v25 = vld [vmem:[#allocation2 + $0xd8] sm:$0xff] }
 0x19f   : > { %v1127_v21 = vmax.f32 %v1095_v13, 0.0  ;;  %v1128_v27 = vmax.f32 %v1096_v17, 0.0  ;;  %v1100_v29 = vadd.f32 %v2146_v11, %v1056_v14  ;;  %v1130_v33 = vmax.f32 %v1098_v22, 0.0 }
 0x1a0   : > { %v1044_v36 = vld [vmem:[#allocation2 + $0x60] sm:$0xff]  ;;  %v1559_v2 = vpack.c.bf16 %v1119_v55, %v1118_v54  ;;  %1240 = vst [vmem:[%s2089_s1 + $0x20] sm:$0xff] %v1558_v60  ;;  %v1562_v26 = vpack.c.bf16 %v1125_v16, %v1124_v9  ;;  %v1131_v34 = vmax.f32 %v1099_v23, 0.0  ;;  %v1101_v35 = vadd.f32 %v2148_v12, %v1057_v19 }
 0x1a1   : > { %v1045_v37 = vld [vmem:[#allocation2 + $0x68] sm:$0xff]  ;;  %v1088_v51 = vadd.f32 %v2146_v11, %v1044_v36  ;;  %v1060_v30 = vld [vmem:[#allocation2 + $0xe0] sm:$0xff]  ;;  %v1563_v32 = vpack.c.bf16 %v1127_v21, %v1126_v20  ;;  %v1564_v38 = vpack.c.bf16 %v1129_v28, %v1128_v27  ;;  %v1132_v39 = vmax.f32 %v1100_v29, 0.0 }
 0x1a2   : > { %v1046_v42 = vld [vmem:[#allocation2 + $0x70] sm:$0xff]  ;;  %v1089_v52 = vadd.f32 %v2148_v12, %v1045_v37  ;;  %1241 = vst [vmem:[%s2089_s1 + $0x28] sm:$0xff] %v1559_v2  ;;  %v1061_v31 = vld [vmem:[#allocation2 + $0xe8] sm:$0xff]  ;;  %1244 = vst [vmem:[%s2089_s1 + $0x40] sm:$0xff] %v1562_v26  ;;  %v1102_v40 = vadd.f32 %v2146_v11, %v1058_v24  ;;  %v1103_v41 = vadd.f32 %v2148_v12, %v1059_v25 }
 0x1a3   : > { %v1047_v43 = vld [vmem:[#allocation2 + $0x78] sm:$0xff]  ;;  %v1090_v56 = vadd.f32 %v2146_v11, %v1046_v42  ;;  %v1120_v61 = vmax.f32 %v1088_v51, 0.0  ;;  %v1062_v36 = vld [vmem:[#allocation2 + $0xf0] sm:$0xff]  ;;  %1245 = vst [vmem:[%s2089_s1 + $0x48] sm:$0xff] %v1563_v32  ;;  %v1565_v42 = vpack.c.bf16 %v1131_v34, %v1130_v33  ;;  %v1104_v44 = vadd.f32 %v2146_v11, %v1060_v30  ;;  %1246 = vst [vmem:[%s2089_s1 + $0x50] sm:$0xff] %v1564_v38 }
 0x1a4   : > { %v1091_v57 = vadd.f32 %v2148_v12, %v1047_v43  ;;  %v1121_v62 = vmax.f32 %v1089_v52, 0.0  ;;  %v1063_v37 = vld [vmem:[#allocation2 + $0xf8] sm:$0xff]  ;;  %v1133_v43 = vmax.f32 %v1101_v35, 0.0  ;;  %v1105_v45 = vadd.f32 %v2148_v12, %v1061_v31 }
 0x1a5   : > { %v1122_v3 = vmax.f32 %v1090_v56, 0.0  ;;  %v1134_v46 = vmax.f32 %v1102_v40, 0.0  ;;  %v1135_v47 = vmax.f32 %v1103_v41, 0.0  ;;  %v1106_v48 = vadd.f32 %v2146_v11, %v1062_v36  ;;  %1247 = vst [vmem:[%s2089_s1 + $0x58] sm:$0xff] %v1565_v42 }
 0x1a6   : > { %v1123_v4 = vmax.f32 %v1091_v57, 0.0  ;;  %v1560_v8 = vpack.c.bf16 %v1121_v62, %v1120_v61  ;;  %v1107_v49 = vadd.f32 %v2148_v12, %v1063_v37  ;;  %v1566_v50 = vpack.c.bf16 %v1133_v43, %v1132_v39 }
 0x1a7   : > { %v1136_v51 = vmax.f32 %v1104_v44, 0.0  ;;  %v1137_v52 = vmax.f32 %v1105_v45, 0.0  ;;  %v1567_v53 = vpack.c.bf16 %v1135_v47, %v1134_v46  ;;  %v1138_v54 = vmax.f32 %v1106_v48, 0.0 }
 0x1a8   : > { %v1561_v15 = vpack.c.bf16 %v1123_v4, %v1122_v3  ;;  %1242 = vst [vmem:[%s2089_s1 + $0x30] sm:$0xff] %v1560_v8  ;;  %v1139_v55 = vmax.f32 %v1107_v49, 0.0  ;;  %1248 = vst [vmem:[%s2089_s1 + $0x60] sm:$0xff] %v1566_v50 }
 0x1a9   : > { %v1568_v56 = vpack.c.bf16 %v1137_v52, %v1136_v51  ;;  %1249 = vst [vmem:[%s2089_s1 + $0x68] sm:$0xff] %v1567_v53 }
 0x1aa   : > { %1243 = vst [vmem:[%s2089_s1 + $0x38] sm:$0xff] %v1561_v15  ;;  %v1569_v57 = vpack.c.bf16 %v1139_v55, %v1138_v54 }
 0x1ab   : > { %1250 = vst [vmem:[%s2089_s1 + $0x70] sm:$0xff] %v1568_v56 }
 0x1ac   : > { %1251 = vst [vmem:[%s2089_s1 + $0x78] sm:$0xff] %v1569_v57 }
 0x1ad PF: > { %1258 = sbr.rel (!%p1967_p12) target bundleno = 439 (0x1b7), region = 120  ;;  %s1570_s16 = sshll.u32 (%p1967_p12), %s1838_s19, 3  ;;  %v1328_v59 = vld [vmem:[%s2089_s1 + $0x18] sm:$0xff] (%p1967_p12)  ;;  %v1330_v60 = vld [vmem:[%s2089_s1 + $0x20] sm:$0xff] (%p1967_p12)  ;;  %v1332_v61 = vld [vmem:[%s2089_s1 + $0x28] sm:$0xff] (%p1967_p12) }
 0x1ae   : > { %s1264_s5 = scalar_lea.vmem (%p1967_p12), %s2256_s3, %s1570_s16  ;;  %v1338_v0 = vld [vmem:[%s2089_s1 + $0x40] sm:$0xff] (%p1967_p12)  ;;  %v1340_v1 = vld [vmem:[%s2089_s1 + $0x48] sm:$0xff] (%p1967_p12)  ;;  %v1342_v2 = vld [vmem:[%s2089_s1 + $0x50] sm:$0xff] (%p1967_p12) }
 0x1af   : > { %v1322_v11 = vld [vmem:[%s2089_s1] sm:$0xff] (%p1967_p12)  ;;  %1329 = vst [vmem:[%s1264_s5 + $0x30] sm:$0xff] (%p1967_p12), %v1328_v59  ;;  %1331 = vst [vmem:[%s1264_s5 + $0x40] sm:$0xff] (%p1967_p12), %v1330_v60  ;;  %v1334_v62 = vld [vmem:[%s2089_s1 + $0x30] sm:$0xff] (%p1967_p12) }
 0x1b0   : > { %1323 = vst [vmem:[%s1264_s5] sm:$0xff] (%p1967_p12), %v1322_v11  ;;  %1333 = vst [vmem:[%s1264_s5 + $0x50] sm:$0xff] (%p1967_p12), %v1332_v61  ;;  %v1344_v3 = vld [vmem:[%s2089_s1 + $0x58] sm:$0xff] (%p1967_p12)  ;;  %v1346_v4 = vld [vmem:[%s2089_s1 + $0x60] sm:$0xff] (%p1967_p12) }
 0x1b1   : > { %v1336_v63 = vld [vmem:[%s2089_s1 + $0x38] sm:$0xff] (%p1967_p12)  ;;  %1335 = vst [vmem:[%s1264_s5 + $0x60] sm:$0xff] (%p1967_p12), %v1334_v62  ;;  %1339 = vst [vmem:[%s1264_s5 + $0x80] sm:$0xff] (%p1967_p12), %v1338_v0  ;;  %v1348_v5 = vld [vmem:[%s2089_s1 + $0x68] sm:$0xff] (%p1967_p12) }
 0x1b2   : > { %1337 = vst [vmem:[%s1264_s5 + $0x70] sm:$0xff] (%p1967_p12), %v1336_v63  ;;  %1341 = vst [vmem:[%s1264_s5 + $0x90] sm:$0xff] (%p1967_p12), %v1340_v1  ;;  %v1350_v6 = vld [vmem:[%s2089_s1 + $0x70] sm:$0xff] (%p1967_p12) }
 0x1b3   : > { %1343 = vst [vmem:[%s1264_s5 + $0xa0] sm:$0xff] (%p1967_p12), %v1342_v2  ;;  %1345 = vst [vmem:[%s1264_s5 + $0xb0] sm:$0xff] (%p1967_p12), %v1344_v3  ;;  %v1352_v7 = vld [vmem:[%s2089_s1 + $0x78] sm:$0xff] (%p1967_p12) }
 0x1b4   : > { %v1324_v12 = vld [vmem:[%s2089_s1 + $0x8] sm:$0xff]  ;;  %v1326_v58 = vld [vmem:[%s2089_s1 + $0x10] sm:$0xff]  ;;  %1347 = vst [vmem:[%s1264_s5 + $0xc0] sm:$0xff] %v1346_v4  ;;  %1349 = vst [vmem:[%s1264_s5 + $0xd0] sm:$0xff] %v1348_v5 }
 0x1b5   : > { %1325 = vst [vmem:[%s1264_s5 + $0x10] sm:$0xff] %v1324_v12  ;;  %1327 = vst [vmem:[%s1264_s5 + $0x20] sm:$0xff] %v1326_v58 }
 0x1b6   : > { %1351 = vst [vmem:[%s1264_s5 + $0xe0] sm:$0xff] %v1350_v6  ;;  %1353 = vst [vmem:[%s1264_s5 + $0xf0] sm:$0xff] %v1352_v7 }
 0x1b7 PF: > { %s13_s22 = sadd.s32 1, %s1850_s22   ;;  %s2266_s10 = sld [smem:[#allocation6_spill]] }
 0x1b8   : > { %p10_p6 = scmp.ge.s32.totalorder %s13_s22, 20   ;;  %s2267_s12 = smov %s1814_s13 }
 0x1b9   : > { %s2268_s13 = smov %s1965_s9  ;;  %s2269_s14 = smov %s1822_s15 }
 0x1ba   : > { %s2270_s15 = smov %s1962_s8  ;;  %s2271_s16 = smov %s1830_s17 }
 0x1bb   : > { %s2272_s17 = smov %s1948_s30  ;;  %s2273_s18 = smov %s1842_s20 }
 0x1bc   : > { %s2274_s19 = smov %s1846_s21  ;;  %s2275_s20 = smov %s2278_s24 }
 0x1bd   : > { %s2276_s21 = smov %s2266_s10  ;;  %12 = sbr.rel (!%p10_p6) target bundleno = 9 (0x9), region = 200 }

// kernel: _lambda_.27
= control target key start
LH: loop header
LB: loop body
LE: loop exit
PB: predicated region body
PF: predicated region fallthrough
CT: control target
= control target key end

     0   :  { %v607_v52 = vmov 1983009808   ;;  %v31_v54 = vlaneseq  ;;  %vm111_vm0 = vcmask 1041408   ;;  %s884_s0 = inlined_call_operand.vmem [shape: bf16[2,2,2,512], index: 0, kind: input, shape index: {}]   ;;  %s885_s1 = inlined_call_operand.vmem [shape: f32[512,10], index: 1, kind: input, shape index: {}]   ;;  %s886_s2 = inlined_call_operand.vmem [shape: f32[1,10], index: 2, kind: input, shape index: {}]   ;;  %s887_s3 = inlined_call_operand.hbm [shape: f32[2,10], index: 3, kind: output, shape index: {}]  }
   0x1   :  { %v209_v0 = vld [vmem:[%s885_s1 + $0x80] sm:$0xff]  ;;  %v210_v1 = vld [vmem:[%s885_s1 + $0x88] sm:$0xff]  ;;  %v211_v11 = vld [vmem:[%s885_s1 + $0x90] sm:$0xff]  ;;  %v29_v53 = vunpack.c.l.s4 %v607_v52 }
   0x2   :  { %v193_v2 = vld [vmem:[%s885_s1] sm:$0xff]  ;;  %v517_v3 = vpack.c.bf16 %v210_v1, %v209_v0  ;;  %v194_v4 = vld [vmem:[%s885_s1 + $0x8] sm:$0xff]  ;;  %v212_v13 = vld [vmem:[%s885_s1 + $0x98] sm:$0xff] }
   0x3   :  { %v241_v5 = vld [vmem:[%s885_s1 + $0x180] sm:$0xff]  ;;  %v242_v6 = vld [vmem:[%s885_s1 + $0x188] sm:$0xff]  ;;  %v519_v7 = vpack.c.bf16 %v194_v4, %v193_v2  ;;  %v195_v14 = vld [vmem:[%s885_s1 + $0x10] sm:$0xff]  ;;  %v521_v16 = vpack.c.bf16 %v212_v13, %v211_v11 }
   0x4   :  { %v549_v8 = vpack.c.bf16 %v242_v6, %v241_v5  ;;  %v225_v9 = vld [vmem:[%s885_s1 + $0x100] sm:$0xff]  ;;  %v226_v10 = vld [vmem:[%s885_s1 + $0x108] sm:$0xff]  ;;  %518 = vmatprep.subr.bf16.mxu0 %v517_v3  ;;  %v196_v15 = vld [vmem:[%s885_s1 + $0x18] sm:$0xff] }
   0x5   :  { %v551_v12 = vpack.c.bf16 %v226_v10, %v225_v9  ;;  %520 = vmatpush3.bf16.msra.mxu0 %v519_v7  ;;  %v523_v17 = vpack.c.bf16 %v196_v15, %v195_v14  ;;  %v243_v18 = vld [vmem:[%s885_s1 + $0x190] sm:$0xff]  ;;  %v244_v19 = vld [vmem:[%s885_s1 + $0x198] sm:$0xff]  ;;  %v213_v23 = vld [vmem:[%s885_s1 + $0xa0] sm:$0xff]  ;;  %v30_v9 = vunpack.c.0.s8 %v29_v53  ;;  %v32_v10 = vshrl.u32 %v31_v54, 7 }
   0x6   :  { %550 = vmatprep.subr.bf16.mxu1 %v549_v8  ;;  %v227_v20 = vld [vmem:[%s885_s1 + $0x110] sm:$0xff]  ;;  %v553_v21 = vpack.c.bf16 %v244_v19, %v243_v18  ;;  %v228_v22 = vld [vmem:[%s885_s1 + $0x118] sm:$0xff]  ;;  %v214_v24 = vld [vmem:[%s885_s1 + $0xa8] sm:$0xff]  ;;  %522 = vmatprep.subr.bf16.mxu0 %v521_v16 }
   0x7   :  { %552 = vmatpush3.bf16.msra.mxu1 %v551_v12  ;;  %v555_v25 = vpack.c.bf16 %v228_v22, %v227_v20  ;;  %v525_v26 = vpack.c.bf16 %v214_v24, %v213_v23  ;;  %v197_v27 = vld [vmem:[%s885_s1 + $0x20] sm:$0xff]  ;;  %v198_v28 = vld [vmem:[%s885_s1 + $0x28] sm:$0xff]  ;;  %v215_v35 = vld [vmem:[%s885_s1 + $0xb0] sm:$0xff] }
   0x8   :  { %v245_v29 = vld [vmem:[%s885_s1 + $0x1a0] sm:$0xff]  ;;  %554 = vmatprep.subr.bf16.mxu1 %v553_v21  ;;  %v246_v30 = vld [vmem:[%s885_s1 + $0x1a8] sm:$0xff]  ;;  %v527_v33 = vpack.c.bf16 %v198_v28, %v197_v27  ;;  %v216_v36 = vld [vmem:[%s885_s1 + $0xb8] sm:$0xff] }
   0x9   :  { %v229_v31 = vld [vmem:[%s885_s1 + $0x120] sm:$0xff]  ;;  %v230_v32 = vld [vmem:[%s885_s1 + $0x128] sm:$0xff]  ;;  %524 = vmatpush3.bf16.msra.mxu0 %v523_v17  ;;  %v557_v34 = vpack.c.bf16 %v246_v30, %v245_v29  ;;  %v199_v37 = vld [vmem:[%s885_s1 + $0x30] sm:$0xff]  ;;  %v529_v39 = vpack.c.bf16 %v216_v36, %v215_v35  ;;  %v826_v29 = vsub.s32 %v30_v9, %v32_v10 }
   0xa   :  { %526 = vmatprep.subr.bf16.mxu0 %v525_v26  ;;  %v559_v38 = vpack.c.bf16 %v230_v32, %v229_v31  ;;  %v200_v40 = vld [vmem:[%s885_s1 + $0x38] sm:$0xff]  ;;  %v247_v41 = vld [vmem:[%s885_s1 + $0x1b0] sm:$0xff]  ;;  %v217_v46 = vld [vmem:[%s885_s1 + $0xc0] sm:$0xff] }
   0xb   :  { %556 = vmatpush3.bf16.msra.mxu1 %v555_v25  ;;  %v248_v42 = vld [vmem:[%s885_s1 + $0x1b8] sm:$0xff]  ;;  %v231_v44 = vld [vmem:[%s885_s1 + $0x130] sm:$0xff]  ;;  %v218_v47 = vld [vmem:[%s885_s1 + $0xc8] sm:$0xff]  ;;  %v531_v48 = vpack.c.bf16 %v200_v40, %v199_v37 }
   0xc   :  { %558 = vmatprep.subr.bf16.mxu1 %v557_v34  ;;  %v561_v43 = vpack.c.bf16 %v248_v42, %v247_v41  ;;  %v232_v45 = vld [vmem:[%s885_s1 + $0x138] sm:$0xff]  ;;  %v201_v49 = vld [vmem:[%s885_s1 + $0x40] sm:$0xff]  ;;  %v250_v51 = vld [vmem:[%s885_s1 + $0x1c8] sm:$0xff]  ;;  %v533_v56 = vpack.c.bf16 %v218_v47, %v217_v46 }
   0xd   :  { %528 = vmatpush3.bf16.msra.mxu0 %v527_v33  ;;  %v249_v50 = vld [vmem:[%s885_s1 + $0x1c0] sm:$0xff]  ;;  %v563_v55 = vpack.c.bf16 %v232_v45, %v231_v44  ;;  %v202_v57 = vld [vmem:[%s885_s1 + $0x48] sm:$0xff]  ;;  %v219_v61 = vld [vmem:[%s885_s1 + $0xd0] sm:$0xff] }
   0xe   :  { %530 = vmatprep.subr.bf16.mxu0 %v529_v39  ;;  %v233_v58 = vld [vmem:[%s885_s1 + $0x140] sm:$0xff]  ;;  %v234_v59 = vld [vmem:[%s885_s1 + $0x148] sm:$0xff]  ;;  %v565_v60 = vpack.c.bf16 %v250_v51, %v249_v50  ;;  %v220_v62 = vld [vmem:[%s885_s1 + $0xd8] sm:$0xff]  ;;  %v535_v5 = vpack.c.bf16 %v202_v57, %v201_v49 }
   0xf   :  { %560 = vmatpush3.bf16.msra.mxu1 %v559_v38  ;;  %v251_v63 = vld [vmem:[%s885_s1 + $0x1d0] sm:$0xff]  ;;  %v204_v1 = vld [vmem:[%s885_s1 + $0x58] sm:$0xff]  ;;  %v221_v6 = vld [vmem:[%s885_s1 + $0xe0] sm:$0xff]  ;;  %v567_v11 = vpack.c.bf16 %v234_v59, %v233_v58  ;;  %v537_v12 = vpack.c.bf16 %v220_v62, %v219_v61 }
  0x10   :  { %562 = vmatprep.subr.bf16.mxu1 %v561_v43  ;;  %v203_v0 = vld [vmem:[%s885_s1 + $0x50] sm:$0xff]  ;;  %v252_v2 = vld [vmem:[%s885_s1 + $0x1d8] sm:$0xff]  ;;  %v222_v7 = vld [vmem:[%s885_s1 + $0xe8] sm:$0xff] }
  0x11   :  { %v235_v3 = vld [vmem:[%s885_s1 + $0x150] sm:$0xff]  ;;  %v236_v4 = vld [vmem:[%s885_s1 + $0x158] sm:$0xff]  ;;  %532 = vmatpush3.bf16.msra.mxu0 %v531_v48  ;;  %v782_v8 = vld [vmem:[%s885_s1 + $0x60] sm:$0xff]  ;;  %v569_v16 = vpack.c.bf16 %v252_v2, %v251_v63  ;;  %v539_v23 = vpack.c.bf16 %v204_v1, %v203_v0  ;;  %v541_v25 = vpack.c.bf16 %v222_v7, %v221_v6 }
  0x12   :  { %534 = vmatprep.subr.bf16.mxu0 %v533_v56  ;;  %v206_v13 = vld [vmem:[%s885_s1 + $0x68] sm:$0xff]  ;;  %v253_v14 = vld [vmem:[%s885_s1 + $0x1e0] sm:$0xff]  ;;  %v223_v19 = vld [vmem:[%s885_s1 + $0xf0] sm:$0xff]  ;;  %v571_v24 = vpack.c.bf16 %v236_v4, %v235_v3 }
  0x13   :  { %564 = vmatpush3.bf16.msra.mxu1 %v563_v55  ;;  %v254_v15 = vld [vmem:[%s885_s1 + $0x1e8] sm:$0xff]  ;;  %v237_v17 = vld [vmem:[%s885_s1 + $0x160] sm:$0xff]  ;;  %v224_v20 = vld [vmem:[%s885_s1 + $0xf8] sm:$0xff]  ;;  %v543_v30 = vpack.c.bf16 %v206_v13, %v782_v8 }
  0x14   :  { %566 = vmatprep.subr.bf16.mxu1 %v565_v60  ;;  %v238_v18 = vld [vmem:[%s885_s1 + $0x168] sm:$0xff]  ;;  %v808_v21 = vld [vmem:[%s885_s1 + $0x70] sm:$0xff]  ;;  %v813_v22 = vld [vmem:[%s885_s1 + $0x78] sm:$0xff]  ;;  %v573_v31 = vpack.c.bf16 %v254_v15, %v253_v14  ;;  %v545_v36 = vpack.c.bf16 %v224_v20, %v223_v19 }
  0x15   :  { %536 = vmatpush3.bf16.msra.mxu0 %v535_v5  ;;  %v255_v26 = vld [vmem:[%s885_s1 + $0x1f0] sm:$0xff]  ;;  %v256_v27 = vld [vmem:[%s885_s1 + $0x1f8] sm:$0xff]  ;;  %v575_v32 = vpack.c.bf16 %v238_v18, %v237_v17  ;;  %v439_v34 = vld [vmem:[%s884_s0] sm:$0xff]  }
  0x16   :  { %v824_v28 = vld [vmem:[%s885_s1 + $0x170] sm:$0xff]  ;;  %538 = vmatprep.subr.bf16.mxu0 %v537_v12  ;;  %v240_v33 = vld [vmem:[%s885_s1 + $0x178] sm:$0xff]  ;;  %v446_v35 = vld [vmem:[%s884_s0 + $0x8] sm:$0xff]   ;;  %v440_v37 = vunpack.c.l.bf16 %v439_v34  ;;  %v441_v38 = vunpack.c.h.bf16 %v439_v34 }
  0x17   :  { %568 = vmatpush3.bf16.msra.mxu1 %v567_v11  ;;  %v444_v39 = vunpack.c.l.bf16 %v446_v35 }
  0x18   :  { %570 = vmatprep.subr.bf16.mxu1 %v569_v16 }
  0x19   :  { %8 = vsyncpa [#allocation3], 0  ;;  %v547_v40 = vpack.c.bf16 %v813_v22, %v808_v21  ;;  %v577_v41 = vpack.c.bf16 %v256_v27, %v255_v26  ;;  %v579_v42 = vpack.c.bf16 %v240_v33, %v824_v28  ;;  %v445_v43 = vunpack.c.h.bf16 %v446_v35  ;;  %540 = vmatpush3.bf16.msra.mxu0 %v539_v23  ;;  %s608_s9 = smov [#allocation2]  }
  0x1a   :  { %v34_v44 = vrot.slane %v440_v37, %v826_v29  ;;  %v51_v45 = vrot.slane %v441_v38, %v826_v29  ;;  %v68_v46 = vrot.slane %v444_v39, %v826_v29  ;;  %v27_v47 = vcombine.high %v440_v37, %v440_v37  ;;  %542 = vmatprep.subr.bf16.mxu0 %v541_v25  ;;  %s429_s10 = sshll.u32 %s608_s9, 4  ;;  %s430_s10 = int_to_ptr.vmem [resolvable:$true] %s429_s10 }
  0x1b   :  { %572 = vmatpush3.bf16.msra.mxu1 %v571_v24  ;;  %v85_v48 = vrot.slane %v445_v43, %v826_v29  ;;  %v44_v49 = vcombine.high %v441_v38, %v441_v38  ;;  %v61_v50 = vcombine.high %v444_v39, %v444_v39  ;;  %v78_v10 = vcombine.high %v445_v43, %v445_v43  ;;  %s583_s11 = scalar_lea.vmem %s430_s10, 32  ;;  %p588_p1 = scmp.lt.s32.totalorder %s430_s10, %s430_s10 }
  0x1c   :  { %574 = vmatprep.subr.bf16.mxu1 %v573_v31  ;;  %v42_v51 = vcombine.high %v34_v44, %v34_v44  ;;  %v59_v52 = vcombine.high %v51_v45, %v51_v45  ;;  %v76_v53 = vcombine.high %v68_v46, %v68_v46  ;;  %v112_v54 = vsel %vm111_vm0, %v34_v44, 0.0  ;;  %p584_p0 = scmp.ne.s32.totalorder %s430_s10, %s583_s11  ;;  %p589_p2 = scmp.lt.s32.totalorder %s583_s11, %s583_s11 }
  0x1d   :  { %v93_v55 = vcombine.high %v85_v48, %v85_v48  ;;  %v113_v56 = vsel %vm111_vm0, %v51_v45, 0.0  ;;  %v148_v57 = vsel %vm111_vm0, %v68_v46, 0.0  ;;  %v149_v58 = vsel %vm111_vm0, %v85_v48, 0.0  ;;  %544 = vmatpush3.bf16.msra.mxu0 %v543_v30 }
  0x1e   :  { %v121_v59 = vsel %vm111_vm0, %v42_v51, 0.0  ;;  %v122_v60 = vsel %vm111_vm0, %v59_v52, 0.0  ;;  %v157_v61 = vsel %vm111_vm0, %v76_v53, 0.0  ;;  %v114_v62 = vadd.f32 %v113_v56, %v112_v54  ;;  %546 = vmatprep.subr.bf16.mxu0 %v545_v36  ;;  %p590_p3 = por %p589_p2, %p588_p1 }
  0x1f   :  { %576 = vmatpush3.bf16.msra.mxu1 %v575_v32  ;;  %v123_v63 = vadd.f32 %v122_v60, %v121_v59  ;;  %v158_v0 = vsel %vm111_vm0, %v93_v55, 0.0  ;;  %v150_v1 = vadd.f32 %v149_v58, %v148_v57  ;;  %v41_v2 = vrot.slane %v27_v47, %v826_v29 }
  0x20   :  { %578 = vmatprep.subr.bf16.mxu1 %v577_v41  ;;  %v159_v3 = vadd.f32 %v158_v0, %v157_v61  ;;  %v115_v4 = vrot.slane %v114_v62, 4  ;;  %v58_v5 = vrot.slane %v44_v49, %v826_v29  ;;  %v75_v6 = vrot.slane %v61_v50, %v826_v29  ;;  %p591_p4 = pnand %p590_p3, %p584_p0 }
  0x21   :  { %v124_v7 = vrot.slane %v123_v63, 4  ;;  %v151_v8 = vrot.slane %v150_v1, 4  ;;  %v43_v9 = vcombine.high %v41_v2, %v41_v2  ;;  %548 = vmatpush3.bf16.msra.mxu0 %v547_v40  ;;  %v92_v17 = vrot.slane %v78_v10, %v826_v29 }
  0x22   :  { %v160_v11 = vrot.slane %v159_v3, 4  ;;  %v116_v12 = vadd.f32 %v115_v4, %v114_v62  ;;  %v60_v13 = vcombine.high %v58_v5, %v58_v5  ;;  %v77_v14 = vcombine.high %v75_v6, %v75_v6 }
  0x23   :  { %580 = vmatpush3.bf16.msra.mxu1 %v579_v42  ;;  %v125_v15 = vadd.f32 %v124_v7, %v123_v63  ;;  %v152_v16 = vadd.f32 %v151_v8, %v150_v1  ;;  %v139_v18 = vsel %vm111_vm0, %v43_v9, 0.0  ;;  %vm272_vm1 = vcmask 1041409  }
  0x24   :  { %v161_v19 = vadd.f32 %v160_v11, %v159_v3  ;;  %v117_v20 = vrot.slane %v116_v12, 2  ;;  %v140_v21 = vsel %vm111_vm0, %v60_v13, 0.0  ;;  %v175_v22 = vsel %vm111_vm0, %v77_v14, 0.0 }
  0x25   :  { %v126_v23 = vrot.slane %v125_v15, 2  ;;  %v153_v24 = vrot.slane %v152_v16, 2  ;;  %v94_v25 = vcombine.high %v92_v17, %v92_v17  ;;  %v141_v26 = vadd.f32 %v140_v21, %v139_v18 }
  0x26   :  { %v162_v27 = vrot.slane %v161_v19, 2  ;;  %v118_v28 = vadd.f32 %v117_v20, %v116_v12  ;;  %v130_v30 = vsel %vm111_vm0, %v41_v2, 0.0  ;;  %v131_v31 = vsel %vm111_vm0, %v58_v5, 0.0 }
  0x27   :  { %v127_v29 = vadd.f32 %v126_v23, %v125_v15  ;;  %v154_v32 = vadd.f32 %v153_v24, %v152_v16  ;;  %v142_v33 = vrot.slane %v141_v26, 4  ;;  %v176_v34 = vsel %vm111_vm0, %v94_v25, 0.0  ;;  %v437_v23 = vld [vmem:[%s886_s2] ss:$0 sm:$0xff] }
  0x28   :  { %v163_v35 = vadd.f32 %v162_v27, %v161_v19  ;;  %v119_v36 = vrot.slane %v118_v28, 1  ;;  %v177_v37 = vadd.f32 %v176_v34, %v175_v22  ;;  %v132_v38 = vadd.f32 %v131_v31, %v130_v30 }
  0x29   :  { %v128_v39 = vrot.slane %v127_v29, 1  ;;  %v155_v40 = vrot.slane %v154_v32, 1  ;;  %v143_v41 = vadd.f32 %v142_v33, %v141_v26  ;;  %v166_v42 = vsel %vm111_vm0, %v75_v6, 0.0 }
  0x2a   :  { %v164_v43 = vrot.slane %v163_v35, 1  ;;  %v120_v44 = vadd.f32 %v119_v36, %v118_v28  ;;  %v178_v45 = vrot.slane %v177_v37, 4  ;;  %v133_v46 = vrot.slane %v132_v38, 4 }
  0x2b   :  { %v129_v47 = vadd.f32 %v128_v39, %v127_v29  ;;  %v156_v48 = vadd.f32 %v155_v40, %v154_v32  ;;  %v144_v49 = vrot.slane %v143_v41, 2  ;;  %v167_v50 = vsel %vm111_vm0, %v92_v17, 0.0 }
  0x2c   :  { %v165_v51 = vadd.f32 %v164_v43, %v163_v35  ;;  %v185_v52 = vmul.f32 0.25, %v120_v44  ;;  %v179_v53 = vadd.f32 %v178_v45, %v177_v37  ;;  %v134_v54 = vadd.f32 %v133_v46, %v132_v38 }
  0x2d   :  { %v186_v55 = vmul.f32 0.25, %v129_v47  ;;  %v189_v56 = vmul.f32 0.25, %v156_v48  ;;  %v145_v57 = vadd.f32 %v144_v49, %v143_v41  ;;  %v168_v58 = vadd.f32 %v167_v50, %v166_v42 }
  0x2e   :  { %v190_v59 = vmul.f32 0.25, %v165_v51  ;;  %v180_v60 = vrot.slane %v179_v53, 2  ;;  %v135_v61 = vrot.slane %v134_v54, 2  ;;  %vm421_vm2 = vcmask 74752  }
  0x2f   :  { %v273_v62 = vsel %vm272_vm1, %v189_v56, %v185_v52  ;;  %v146_v63 = vrot.slane %v145_v57, 1  ;;  %v169_v0 = vrot.slane %v168_v58, 4 }
  0x30   :  { %v274_v1 = vsel %vm272_vm1, %v190_v59, %v186_v55  ;;  %v181_v2 = vadd.f32 %v180_v60, %v179_v53  ;;  %v136_v3 = vadd.f32 %v135_v61, %v134_v54 }
  0x31   :  { %345 = vmatprep.mubr.f32.mxu0 %v274_v1  ;;  %v147_v4 = vadd.f32 %v146_v63, %v145_v57  ;;  %v170_v5 = vadd.f32 %v169_v0, %v168_v58 }
  0x32   :  { %346 = vmatmul.mubr.f32.vlgmr.msra.gmra.mrb[0].mxu0 %v273_v62  ;;  %v182_v6 = vrot.slane %v181_v2, 1  ;;  %v137_v7 = vrot.slane %v136_v3, 1 }
  0x33   :  { %v171_v8 = vrot.slane %v170_v5, 2  ;;  %v188_v10 = vmul.f32 0.25, %v147_v4 }
  0x34   :  { %v183_v9 = vadd.f32 %v182_v6, %v181_v2  ;;  %v138_v11 = vadd.f32 %v137_v7, %v136_v3 }
  0x35   :  { %v172_v12 = vadd.f32 %v171_v8, %v170_v5 }
  0x36   :  { %v192_v13 = vmul.f32 0.25, %v183_v9  ;;  %v187_v17 = vmul.f32 0.25, %v138_v11 }
  0x37   :  { %v173_v14 = vrot.slane %v172_v12, 1 }
  0x38   :  { %v276_v15 = vsel %vm272_vm1, %v192_v13, %v188_v10 }
  0x39   :  { %415 = vmatprep.mubr.f32.mxu1 %v276_v15  ;;  %v174_v16 = vadd.f32 %v173_v14, %v172_v12 }
  0x3b   :  { %v191_v18 = vmul.f32 0.25, %v174_v16 }
  0x3d   :  { %v275_v19 = vsel %vm272_vm1, %v191_v18, %v187_v17 }
  0x3e   :  { %416 = vmatmul.mubr.f32.vlgmr.msra.gmra.mrb[0].mxu1 %v275_v19 }
 0x105   :  { %v479_v20 = vpop.f32.mrb[0].mxu0 }
 0x106   :  { %v480_v21 = vpop.f32.mrb[1].mxu0 }
 0x107   :  { %v481_v22 = vadd.f32 %v480_v21, %v479_v20 }
 0x109   :  { %v348_v24 = vadd.f32 %v481_v22, %v437_v23 }
 0x111   :  { %v514_v25 = vpop.f32.mrb[0].mxu1 }
 0x112   :  { %v515_v26 = vpop.f32.mrb[1].mxu1 }
 0x113   :  { %v516_v27 = vadd.f32 %v515_v26, %v514_v25 }
 0x115   :  { %v418_v28 = vadd.f32 %v516_v27, %v348_v24 }
 0x117   :  { %422 = vst.msk [vmem:[#allocation2] sm:$0x3] %vm421_vm2, %v418_v28 }
 0x118   :  { %594 = shalt.err (!%p591_p4)
}
 0x119   :  { %s595_s2 = scalar_lea.hbm %s887_s3, 32 }
 0x11a   :  { %p596_p5 = scmp.ne.s32.totalorder %s887_s3, %s595_s2  ;;  %p599_p6 = scmp.lt.u32.totalorder %s595_s2, %s887_s3 }
 0x11c   :  { %p601_p7 = pnand %p599_p6, %p596_p5 }
 0x11e   :  { %604 = shalt.err (!%p601_p7)
}
 0x11f   :  { %432 = dma.vmem_to_hbm [thread:$0]  %s430_s10, 32, %s887_s3, [#allocation3]  }
 0x120   :  { %605 = dma.done.wait [#allocation3], 32  }
 0x121   :  { %606 = vsyncadd [#allocation3], 4294967264 }
 0x122   :  { %436 = vsyncpa [#allocation3], 1 }

// kernel: _lambda_.24
= control target key start
LH: loop header
LB: loop body
LE: loop exit
PB: predicated region body
PF: predicated region fallthrough
CT: control target
= control target key end

     0   :  { %s1650_s12 = smov 0   ;;  %s1652_s13 = smov 0   ;;  %s1950_s0 = inlined_call_operand.vmem [shape: bf16[128,256], index: 0, kind: input, shape index: {}]   ;;  %s1951_s1 = inlined_call_operand.vmem [shape: bf16[256,512], index: 1, kind: input, shape index: {}]   ;;  %s1952_s2 = inlined_call_operand.vmem [shape: f32[1,512], index: 2, kind: input, shape index: {}]   ;;  %s1953_s3 = inlined_call_operand.vmem [shape: bf16[128,512], index: 3, kind: output, shape index: {}]  }
   0x1   :  { %s1654_s14 = smov 0   ;;  %s1656_s15 = smov 0  }
   0x2   :  { %s1658_s16 = smov 0  }
   0x3 LB: > { %s28_s17 = sadd.s32 1, %s1624_s15  ;;  %s1347_s18 = sadd.s32 4294967295, %s1628_s16   ;;  %s1628_s16 = sphi %s1658_s16, %s13_s16   ;;  %s1624_s15 = sphi %s1656_s15, %s1958_s15   ;;  %s1620_s14 = sphi %s1654_s14, %s1957_s14   ;;  %s1616_s13 = sphi %s1652_s13, %s1956_s13   ;;  %s1612_s12 = sphi %s1650_s12, %s1955_s12  }
   0x4   : > { %p30_p0 = scmp.ge.s32.totalorder %s28_s17, 2  ;;  %p76_p1 = scmp.ne.s32.totalorder %s1616_s13, %s1612_s12 }
   0x5   : > { %p77_p2 = scmp.eq.s32.totalorder %s1628_s16, 0  ;;  %p134_p4 = scmp.eq.s32.totalorder %s1347_s18, 1 }
   0x6   : > { %s1960_s17 = smov (%p30_p0, %s28_s17), 0  ;;  %s69_s20 = sadd.s32 1, %s1616_s13 }
   0x7   : > { %p78_p3 = por %p77_p2, %p76_p1  ;;  %s65_s19 = ssub.s32 %s1624_s15, %s1960_s17 }
   0x8   : > { %p67_p5 = scmp.eq.s32.totalorder %s65_s19, 0  ;;  %p1685_p6 = por %p134_p4, %p76_p1 }
   0x9   : > { %p1351_p7 = scmp.ge.s32.totalorder %s1628_s16, 2 }
   0xa   : > { %s1690_s22 = scalar_select %p67_p5, %s1616_s13, %s69_s20  }
   0xb   : > { %171 = sbr.rel (%p1351_p7) target bundleno = 38 (0x26), region = 20 }
  0x12   : > { %174 = sbr.rel (!%p78_p3) target bundleno = 38 (0x26), region = 24  ;;  %s176_s23 = sand.u32 (%p78_p3), 1, %s1616_s13  }
  0x13   : > { %s1428_s24 = sshll.u32 (%p78_p3), %s1624_s15, 3  ;;  %s1352_s25 = sshll.u32 (%p78_p3), %s176_s23, 8 }
  0x14   : > { %s1698_s28 = scalar_lea.vmem (%p78_p3), %s1951_s1, %s1428_s24  ;;  %s1703_s29 = scalar_lea.vmem (%p78_p3), [#allocation3], %s1352_s25 }
  0x15   : > { %v274_v0 = vld [vmem:[%s1698_s28] sm:$0xff] (%p78_p3)  ;;  %v276_v1 = vld [vmem:[%s1698_s28 + $0x10] sm:$0xff] (%p78_p3) }
  0x16   : > { %v278_v2 = vld [vmem:[%s1698_s28 + $0x20] sm:$0xff] (%p78_p3)  ;;  %275 = vst [vmem:[%s1703_s29] sm:$0xff] (%p78_p3), %v274_v0  ;;  %277 = vst [vmem:[%s1703_s29 + $0x8] sm:$0xff] (%p78_p3), %v276_v1  ;;  %v280_v3 = vld [vmem:[%s1698_s28 + $0x30] sm:$0xff] (%p78_p3) }
  0x17   : > { %279 = vst [vmem:[%s1703_s29 + $0x10] sm:$0xff] (%p78_p3), %v278_v2  ;;  %v282_v4 = vld [vmem:[%s1698_s28 + $0x40] sm:$0xff] (%p78_p3)  ;;  %v284_v5 = vld [vmem:[%s1698_s28 + $0x50] sm:$0xff] (%p78_p3)  ;;  %281 = vst [vmem:[%s1703_s29 + $0x18] sm:$0xff] (%p78_p3), %v280_v3 }
  0x18   : > { %283 = vst [vmem:[%s1703_s29 + $0x20] sm:$0xff] (%p78_p3), %v282_v4  ;;  %285 = vst [vmem:[%s1703_s29 + $0x28] sm:$0xff] (%p78_p3), %v284_v5  ;;  %v286_v6 = vld [vmem:[%s1698_s28 + $0x60] sm:$0xff] (%p78_p3)  ;;  %v288_v7 = vld [vmem:[%s1698_s28 + $0x70] sm:$0xff] (%p78_p3) }
  0x19   : > { %v290_v8 = vld [vmem:[%s1698_s28 + $0x80] sm:$0xff]  ;;  %287 = vst [vmem:[%s1703_s29 + $0x30] sm:$0xff] %v286_v6  ;;  %289 = vst [vmem:[%s1703_s29 + $0x38] sm:$0xff] %v288_v7  ;;  %v292_v9 = vld [vmem:[%s1698_s28 + $0x90] sm:$0xff] }
  0x1a   : > { %291 = vst [vmem:[%s1703_s29 + $0x40] sm:$0xff] %v290_v8  ;;  %v294_v10 = vld [vmem:[%s1698_s28 + $0xa0] sm:$0xff]  ;;  %v296_v11 = vld [vmem:[%s1698_s28 + $0xb0] sm:$0xff]  ;;  %293 = vst [vmem:[%s1703_s29 + $0x48] sm:$0xff] %v292_v9 }
  0x1b   : > { %295 = vst [vmem:[%s1703_s29 + $0x50] sm:$0xff] %v294_v10  ;;  %297 = vst [vmem:[%s1703_s29 + $0x58] sm:$0xff] %v296_v11  ;;  %v298_v12 = vld [vmem:[%s1698_s28 + $0xc0] sm:$0xff]  ;;  %v300_v13 = vld [vmem:[%s1698_s28 + $0xd0] sm:$0xff] }
  0x1c   : > { %v302_v14 = vld [vmem:[%s1698_s28 + $0xe0] sm:$0xff]  ;;  %299 = vst [vmem:[%s1703_s29 + $0x60] sm:$0xff] %v298_v12  ;;  %301 = vst [vmem:[%s1703_s29 + $0x68] sm:$0xff] %v300_v13  ;;  %v304_v15 = vld [vmem:[%s1698_s28 + $0xf0] sm:$0xff] }
  0x1d   : > { %303 = vst [vmem:[%s1703_s29 + $0x70] sm:$0xff] %v302_v14  ;;  %v306_v16 = vld [vmem:[%s1698_s28 + $0x100] sm:$0xff]  ;;  %v308_v17 = vld [vmem:[%s1698_s28 + $0x110] sm:$0xff]  ;;  %305 = vst [vmem:[%s1703_s29 + $0x78] sm:$0xff] %v304_v15 }
  0x1e   : > { %307 = vst [vmem:[%s1703_s29 + $0x80] sm:$0xff] %v306_v16  ;;  %309 = vst [vmem:[%s1703_s29 + $0x88] sm:$0xff] %v308_v17  ;;  %v310_v18 = vld [vmem:[%s1698_s28 + $0x120] sm:$0xff]  ;;  %v312_v19 = vld [vmem:[%s1698_s28 + $0x130] sm:$0xff] }
  0x1f   : > { %v314_v20 = vld [vmem:[%s1698_s28 + $0x140] sm:$0xff]  ;;  %311 = vst [vmem:[%s1703_s29 + $0x90] sm:$0xff] %v310_v18  ;;  %313 = vst [vmem:[%s1703_s29 + $0x98] sm:$0xff] %v312_v19  ;;  %v316_v21 = vld [vmem:[%s1698_s28 + $0x150] sm:$0xff] }
  0x20   : > { %315 = vst [vmem:[%s1703_s29 + $0xa0] sm:$0xff] %v314_v20  ;;  %v318_v22 = vld [vmem:[%s1698_s28 + $0x160] sm:$0xff]  ;;  %v320_v23 = vld [vmem:[%s1698_s28 + $0x170] sm:$0xff]  ;;  %317 = vst [vmem:[%s1703_s29 + $0xa8] sm:$0xff] %v316_v21 }
  0x21   : > { %319 = vst [vmem:[%s1703_s29 + $0xb0] sm:$0xff] %v318_v22  ;;  %321 = vst [vmem:[%s1703_s29 + $0xb8] sm:$0xff] %v320_v23  ;;  %v322_v24 = vld [vmem:[%s1698_s28 + $0x180] sm:$0xff]  ;;  %v324_v25 = vld [vmem:[%s1698_s28 + $0x190] sm:$0xff] }
  0x22   : > { %v326_v26 = vld [vmem:[%s1698_s28 + $0x1a0] sm:$0xff]  ;;  %323 = vst [vmem:[%s1703_s29 + $0xc0] sm:$0xff] %v322_v24  ;;  %325 = vst [vmem:[%s1703_s29 + $0xc8] sm:$0xff] %v324_v25  ;;  %v328_v27 = vld [vmem:[%s1698_s28 + $0x1b0] sm:$0xff] }
  0x23   : > { %327 = vst [vmem:[%s1703_s29 + $0xd0] sm:$0xff] %v326_v26  ;;  %v330_v28 = vld [vmem:[%s1698_s28 + $0x1c0] sm:$0xff]  ;;  %v332_v29 = vld [vmem:[%s1698_s28 + $0x1d0] sm:$0xff]  ;;  %329 = vst [vmem:[%s1703_s29 + $0xd8] sm:$0xff] %v328_v27 }
  0x24   : > { %331 = vst [vmem:[%s1703_s29 + $0xe0] sm:$0xff] %v330_v28  ;;  %333 = vst [vmem:[%s1703_s29 + $0xe8] sm:$0xff] %v332_v29  ;;  %v334_v30 = vld [vmem:[%s1698_s28 + $0x1e0] sm:$0xff]  ;;  %v336_v31 = vld [vmem:[%s1698_s28 + $0x1f0] sm:$0xff] }
  0x25   : > { %335 = vst [vmem:[%s1703_s29 + $0xf0] sm:$0xff] %v334_v30  ;;  %337 = vst [vmem:[%s1703_s29 + $0xf8] sm:$0xff] %v336_v31 }
  0x26 PF: > { %p1355_p8 = scmp.ge.s32.totalorder %s1628_s16, 1  ;;  %p350_p9 = scmp.lt.s32.totalorder %s1628_s16, 3 }
  0x28   : > { %p351_p10 = pnand %p1355_p8, %p350_p9 }
  0x29   : > { %s357_s30 = sand.u32 (!%p351_p10), 1, %s1612_s12   ;;  %v1568_v32 = vld [vmem:[%s1950_s0 + $0x4] ss:$8 sps:$4 sm:$0xff] (!%p351_p10)   ;;  %v1566_v2 = vld [vmem:[%s1950_s0] ss:$8 sps:$4 sm:$0xff] (!%p351_p10)   ;;  %s1358_s28 = sshll.u32 (!%p351_p10), %s1620_s14, 1  ;;  %v984_v16 = vlaneseq (!%p351_p10) }
  0x2a   : > { %354 = sbr.rel (%p351_p10) target bundleno = 362 (0x16a), region = 66  ;;  %s1356_s4 = sshll.u32 (!%p351_p10), %s357_s30, 8  ;;  %v1571_v33 = vld [vmem:[%s1950_s0 + $0x44] ss:$8 sps:$4 sm:$0xff] (!%p351_p10)   ;;  %802 = vmatprep.mubr.bf16.mxu0 (!%p351_p10), %v1568_v32  ;;  %v1569_v3 = vld [vmem:[%s1950_s0 + $0x40] ss:$8 sps:$4 sm:$0xff] (!%p351_p10)  }
  0x2b   : > { %s1777_s9 = scalar_lea.vmem (!%p351_p10), [#allocation3], %s1356_s4  ;;  %842 = vmatprep.mubr.bf16.mxu1 (!%p351_p10), %v1571_v33  ;;  %v1572_v4 = vld [vmem:[%s1950_s0 + $0x14] ss:$8 sps:$4 sm:$0xff] (!%p351_p10)   ;;  %v1576_v6 = vld [vmem:[%s1950_s0 + $0x10] ss:$8 sps:$4 sm:$0xff] (!%p351_p10)   ;;  %p408_p11 = scmp.lt.s32.totalorder (!%p351_p10), %s1358_s28, 3 }
  0x2c   : > { %v1518_v34 = vld [vmem:[%s1777_s9 + $0x4] ss:$8 sps:$4 sm:$0xff] (!%p351_p10)   ;;  %v1520_v35 = vld [vmem:[%s1777_s9] ss:$8 sps:$4 sm:$0xff] (!%p351_p10)   ;;  %v1521_v36 = vld [vmem:[%s1777_s9 + $0x14] ss:$8 sps:$4 sm:$0xff] (!%p351_p10)  }
  0x2d   : > { %770 = vmatprep.subr.bf16.mxu0 (!%p351_p10), %v1518_v34  ;;  %1446 = vmatprep.subr.bf16.mxu1 (!%p351_p10), %v1518_v34  ;;  %v1523_v37 = vld [vmem:[%s1777_s9 + $0x10] ss:$8 sps:$4 sm:$0xff] (!%p351_p10)   ;;  %v1524_v38 = vld [vmem:[%s1777_s9 + $0x24] ss:$8 sps:$4 sm:$0xff] (!%p351_p10)   ;;  %v1526_v39 = vld [vmem:[%s1777_s9 + $0x20] ss:$8 sps:$4 sm:$0xff] (!%p351_p10)  }
  0x2e   : > { %771 = vmatpush1.bf16.msra.mxu0 (!%p351_p10), %v1520_v35  ;;  %1462 = vmatpush1.bf16.msra.mxu1 (!%p351_p10), %v1520_v35  ;;  %v1527_v40 = vld [vmem:[%s1777_s9 + $0x34] ss:$8 sps:$4 sm:$0xff] (!%p351_p10)   ;;  %v1529_v41 = vld [vmem:[%s1777_s9 + $0x30] ss:$8 sps:$4 sm:$0xff] (!%p351_p10)   ;;  %v1530_v42 = vld [vmem:[%s1777_s9 + $0x44] ss:$8 sps:$4 sm:$0xff] (!%p351_p10)  }
  0x2f   : > { %772 = vmatprep.subr.bf16.mxu0 (!%p351_p10), %v1521_v36  ;;  %1447 = vmatprep.subr.bf16.mxu1 (!%p351_p10), %v1521_v36  ;;  %v1532_v43 = vld [vmem:[%s1777_s9 + $0x40] ss:$8 sps:$4 sm:$0xff] (!%p351_p10)   ;;  %v1533_v44 = vld [vmem:[%s1777_s9 + $0x54] ss:$8 sps:$4 sm:$0xff] (!%p351_p10)   ;;  %v1535_v45 = vld [vmem:[%s1777_s9 + $0x50] ss:$8 sps:$4 sm:$0xff] (!%p351_p10)  }
  0x30   : > { %v1536_v46 = vld [vmem:[%s1777_s9 + $0x64] ss:$8 sps:$4 sm:$0xff] (!%p351_p10)   ;;  %v1538_v47 = vld [vmem:[%s1777_s9 + $0x60] ss:$8 sps:$4 sm:$0xff] (!%p351_p10)   ;;  %v1539_v48 = vld [vmem:[%s1777_s9 + $0x74] ss:$8 sps:$4 sm:$0xff] (!%p351_p10)  }
  0x31   : > { %v1541_v49 = vld [vmem:[%s1777_s9 + $0x70] ss:$8 sps:$4 sm:$0xff]   ;;  %v1542_v50 = vld [vmem:[%s1777_s9 + $0x84] ss:$8 sps:$4 sm:$0xff]   ;;  %v1544_v51 = vld [vmem:[%s1777_s9 + $0x80] ss:$8 sps:$4 sm:$0xff]  }
  0x32   : > { %773 = vmatpush1.bf16.msra.mxu0 %v1523_v37  ;;  %1463 = vmatpush1.bf16.msra.mxu1 %v1523_v37  ;;  %v1545_v52 = vld [vmem:[%s1777_s9 + $0x94] ss:$8 sps:$4 sm:$0xff]   ;;  %v1547_v53 = vld [vmem:[%s1777_s9 + $0x90] ss:$8 sps:$4 sm:$0xff]   ;;  %v1548_v54 = vld [vmem:[%s1777_s9 + $0xa4] ss:$8 sps:$4 sm:$0xff]  }
  0x33   : > { %774 = vmatprep.subr.bf16.mxu0 %v1524_v38  ;;  %1448 = vmatprep.subr.bf16.mxu1 %v1524_v38  ;;  %v1550_v55 = vld [vmem:[%s1777_s9 + $0xa0] ss:$8 sps:$4 sm:$0xff]   ;;  %v1551_v56 = vld [vmem:[%s1777_s9 + $0xb4] ss:$8 sps:$4 sm:$0xff]   ;;  %v1553_v57 = vld [vmem:[%s1777_s9 + $0xb0] ss:$8 sps:$4 sm:$0xff]  }
  0x34   : > { %v1554_v58 = vld [vmem:[%s1777_s9 + $0xc4] ss:$8 sps:$4 sm:$0xff]   ;;  %v1556_v59 = vld [vmem:[%s1777_s9 + $0xc0] ss:$8 sps:$4 sm:$0xff]   ;;  %v1557_v60 = vld [vmem:[%s1777_s9 + $0xd4] ss:$8 sps:$4 sm:$0xff]  }
  0x35   : > { %v1559_v61 = vld [vmem:[%s1777_s9 + $0xd0] ss:$8 sps:$4 sm:$0xff]   ;;  %v1560_v62 = vld [vmem:[%s1777_s9 + $0xe4] ss:$8 sps:$4 sm:$0xff]   ;;  %v1562_v63 = vld [vmem:[%s1777_s9 + $0xe0] ss:$8 sps:$4 sm:$0xff]  }
  0x36   : > { %775 = vmatpush1.bf16.msra.mxu0 %v1526_v39  ;;  %1464 = vmatpush1.bf16.msra.mxu1 %v1526_v39  ;;  %v1563_v0 = vld [vmem:[%s1777_s9 + $0xf4] ss:$8 sps:$4 sm:$0xff]   ;;  %v1565_v1 = vld [vmem:[%s1777_s9 + $0xf0] ss:$8 sps:$4 sm:$0xff]   ;;  %v1578_v8 = vld [vmem:[%s1950_s0 + $0x24] ss:$8 sps:$4 sm:$0xff]  }
  0x37   : > { %776 = vmatprep.subr.bf16.mxu0 %v1527_v40  ;;  %1449 = vmatprep.subr.bf16.mxu1 %v1527_v40  ;;  %v1574_v5 = vld [vmem:[%s1950_s0 + $0x54] ss:$8 sps:$4 sm:$0xff]   ;;  %v1577_v7 = vld [vmem:[%s1950_s0 + $0x50] ss:$8 sps:$4 sm:$0xff]   ;;  %v1580_v9 = vld [vmem:[%s1950_s0 + $0x64] ss:$8 sps:$4 sm:$0xff]  }
  0x38   : > { %v1582_v10 = vld [vmem:[%s1950_s0 + $0x20] ss:$8 sps:$4 sm:$0xff]   ;;  %v1584_v12 = vld [vmem:[%s1950_s0 + $0x34] ss:$8 sps:$4 sm:$0xff]   ;;  %v1588_v14 = vld [vmem:[%s1950_s0 + $0x30] ss:$8 sps:$4 sm:$0xff]  }
  0x39   : > { %v1583_v11 = vld [vmem:[%s1950_s0 + $0x60] ss:$8 sps:$4 sm:$0xff]   ;;  %v1586_v13 = vld [vmem:[%s1950_s0 + $0x74] ss:$8 sps:$4 sm:$0xff]   ;;  %v1589_v15 = vld [vmem:[%s1950_s0 + $0x70] ss:$8 sps:$4 sm:$0xff]  }
  0x3a   : > { %777 = vmatpush1.bf16.msra.mxu0 %v1529_v41  ;;  %1465 = vmatpush1.bf16.msra.mxu1 %v1529_v41  ;;  %s1962_s28 = smov (!%p408_p11, %s1358_s28), 3  ;;  %v985_v17 = vshrl.u32 %v984_v16, 7  ;;  %s1357_s6 = sshll.u32 %s357_s30, 7 }
  0x3b   : > { %778 = vmatprep.subr.bf16.mxu0 %v1530_v42  ;;  %1450 = vmatprep.subr.bf16.mxu1 %v1530_v42  ;;  %s410_s5 = scalar_lea.vmem %s1952_s2, %s1962_s28  ;;  %s1871_s12 = scalar_lea.vmem [#allocation4], %s1357_s6 }
  0x3c   : > { %v986_v18 = vsub.s32 0, %v985_v17  ;;  %v982_v19 = vld [vmem:[%s410_s5] sm:$0x3]  ;;  %v990_v20 = vsub.s32 1, %v985_v17  ;;  %s1445_s30 = sshll.u32 (%p1685_p6), %s1620_s14, 3 }
  0x3d   : > { %s1150_s9 = scalar_lea.vmem (%p1685_p6), %s1953_s3, %s1445_s30 }
  0x3e   : > { %779 = vmatpush1.bf16.msra.mxu0 %v1532_v43  ;;  %1466 = vmatpush1.bf16.msra.mxu1 %v1532_v43  ;;  %v1857_v21 = vrot.slane %v982_v19, %v986_v18  ;;  %v1859_v22 = vrot.slane %v982_v19, %v990_v20 }
  0x3f   : > { %780 = vmatprep.subr.bf16.mxu0 %v1533_v44  ;;  %1451 = vmatprep.subr.bf16.mxu1 %v1533_v44 }
  0x42   : > { %781 = vmatpush1.bf16.msra.mxu0 %v1535_v45  ;;  %1467 = vmatpush1.bf16.msra.mxu1 %v1535_v45 }
  0x43   : > { %782 = vmatprep.subr.bf16.mxu0 %v1536_v46  ;;  %1452 = vmatprep.subr.bf16.mxu1 %v1536_v46 }
  0x46   : > { %783 = vmatpush1.bf16.msra.mxu0 %v1538_v47  ;;  %1468 = vmatpush1.bf16.msra.mxu1 %v1538_v47 }
  0x47   : > { %784 = vmatprep.subr.bf16.mxu0 %v1539_v48  ;;  %1453 = vmatprep.subr.bf16.mxu1 %v1539_v48 }
  0x4a   : > { %785 = vmatpush1.bf16.msra.mxu0 %v1541_v49  ;;  %1469 = vmatpush1.bf16.msra.mxu1 %v1541_v49 }
  0x4b   : > { %786 = vmatprep.subr.bf16.mxu0 %v1542_v50  ;;  %1454 = vmatprep.subr.bf16.mxu1 %v1542_v50 }
  0x4e   : > { %787 = vmatpush1.bf16.msra.mxu0 %v1544_v51  ;;  %1470 = vmatpush1.bf16.msra.mxu1 %v1544_v51 }
  0x4f   : > { %788 = vmatprep.subr.bf16.mxu0 %v1545_v52  ;;  %1455 = vmatprep.subr.bf16.mxu1 %v1545_v52 }
  0x52   : > { %789 = vmatpush1.bf16.msra.mxu0 %v1547_v53  ;;  %1471 = vmatpush1.bf16.msra.mxu1 %v1547_v53 }
  0x53   : > { %790 = vmatprep.subr.bf16.mxu0 %v1548_v54  ;;  %1456 = vmatprep.subr.bf16.mxu1 %v1548_v54 }
  0x56   : > { %791 = vmatpush1.bf16.msra.mxu0 %v1550_v55  ;;  %1472 = vmatpush1.bf16.msra.mxu1 %v1550_v55 }
  0x57   : > { %792 = vmatprep.subr.bf16.mxu0 %v1551_v56  ;;  %1457 = vmatprep.subr.bf16.mxu1 %v1551_v56 }
  0x5a   : > { %793 = vmatpush1.bf16.msra.mxu0 %v1553_v57  ;;  %1473 = vmatpush1.bf16.msra.mxu1 %v1553_v57 }
  0x5b   : > { %794 = vmatprep.subr.bf16.mxu0 %v1554_v58  ;;  %1458 = vmatprep.subr.bf16.mxu1 %v1554_v58 }
  0x5e   : > { %795 = vmatpush1.bf16.msra.mxu0 %v1556_v59  ;;  %1474 = vmatpush1.bf16.msra.mxu1 %v1556_v59 }
  0x5f   : > { %796 = vmatprep.subr.bf16.mxu0 %v1557_v60  ;;  %1459 = vmatprep.subr.bf16.mxu1 %v1557_v60 }
  0x62   : > { %797 = vmatpush1.bf16.msra.mxu0 %v1559_v61  ;;  %1475 = vmatpush1.bf16.msra.mxu1 %v1559_v61 }
  0x63   : > { %798 = vmatprep.subr.bf16.mxu0 %v1560_v62  ;;  %1460 = vmatprep.subr.bf16.mxu1 %v1560_v62 }
  0x66   : > { %799 = vmatpush1.bf16.msra.mxu0 %v1562_v63  ;;  %1476 = vmatpush1.bf16.msra.mxu1 %v1562_v63 }
  0x67   : > { %800 = vmatprep.subr.bf16.mxu0 %v1563_v0  ;;  %1461 = vmatprep.subr.bf16.mxu1 %v1563_v0 }
  0x6a   : > { %801 = vmatpush1.bf16.msra.mxu0 %v1565_v1  ;;  %1477 = vmatpush1.bf16.msra.mxu1 %v1565_v1 }
  0x6d   : > { %803 = vmatmul.mubr.bf16.vlgmr.msra.gmra.mrb[0].mxu0 %v1566_v2  ;;  %843 = vmatmul.mubr.bf16.vlgmr.msra.gmra.mrb[0].mxu1 %v1569_v3 }
  0x6e   : > { %812 = vmatprep.mubr.bf16.mxu0 %v1572_v4  ;;  %852 = vmatprep.mubr.bf16.mxu1 %v1574_v5 }
  0x75   : > { %813 = vmatmul.mubr.bf16.gmra.mrb[4].mxu0 %v1576_v6  ;;  %853 = vmatmul.mubr.bf16.gmra.mrb[4].mxu1 %v1577_v7 }
  0x76   : > { %822 = vmatprep.mubr.bf16.mxu0 %v1578_v8  ;;  %862 = vmatprep.mubr.bf16.mxu1 %v1580_v9 }
  0x7d   : > { %823 = vmatmul.mubr.bf16.gmra.mrb[8].mxu0 %v1582_v10  ;;  %863 = vmatmul.mubr.bf16.gmra.mrb[8].mxu1 %v1583_v11 }
  0x7e   : > { %832 = vmatprep.mubr.bf16.mxu0 %v1584_v12  ;;  %872 = vmatprep.mubr.bf16.mxu1 %v1586_v13 }
  0x85   : > { %833 = vmatmul.mubr.bf16.gmra.mrb[12].mxu0 %v1588_v14  ;;  %873 = vmatmul.mubr.bf16.gmra.mrb[12].mxu1 %v1589_v15 }
 0x140   : > { %v804_v23 = vpop.f32.mrb[0].mxu0  ;;  %v844_v24 = vpop.f32.mrb[0].mxu1 }
 0x141   : > { %v994_v25 = vadd.f32 %v1857_v21, %v804_v23  ;;  %v1010_v26 = vadd.f32 %v1857_v21, %v844_v24  ;;  %v806_v27 = vpop.f32.mrb[1].mxu0  ;;  %v846_v28 = vpop.f32.mrb[1].mxu1 }
 0x142   : > { %v995_v29 = vadd.f32 %v1859_v22, %v806_v27  ;;  %v1011_v30 = vadd.f32 %v1859_v22, %v846_v28  ;;  %v808_v31 = vpop.f32.mrb[2].mxu0  ;;  %v848_v32 = vpop.f32.mrb[2].mxu1 }
 0x143   : > { %v996_v33 = vadd.f32 %v1857_v21, %v808_v31  ;;  %v1012_v34 = vadd.f32 %v1857_v21, %v848_v32  ;;  %v810_v35 = vpop.f32.mrb[3].mxu0  ;;  %v850_v36 = vpop.f32.mrb[3].mxu1 }
 0x144   : > { %v1429_v37 = vpack.c.bf16 %v995_v29, %v994_v25  ;;  %v1437_v38 = vpack.c.bf16 %v1011_v30, %v1010_v26  ;;  %v997_v39 = vadd.f32 %v1859_v22, %v810_v35  ;;  %v1013_v40 = vadd.f32 %v1859_v22, %v850_v36 }
 0x146   : > { %1122 = vst [vmem:[%s1871_s12] sm:$0xff] %v1429_v37  ;;  %1130 = vst [vmem:[%s1871_s12 + $0x40] sm:$0xff] %v1437_v38  ;;  %v1430_v41 = vpack.c.bf16 %v997_v39, %v996_v33  ;;  %v1438_v42 = vpack.c.bf16 %v1013_v40, %v1012_v34 }
 0x148   : > { %1123 = vst [vmem:[%s1871_s12 + $0x8] sm:$0xff] %v1430_v41  ;;  %1131 = vst [vmem:[%s1871_s12 + $0x48] sm:$0xff] %v1438_v42  ;;  %v814_v43 = vpop.f32.mrb[4].mxu0  ;;  %v854_v44 = vpop.f32.mrb[4].mxu1 }
 0x149   : > { %v998_v45 = vadd.f32 %v1857_v21, %v814_v43  ;;  %v1014_v46 = vadd.f32 %v1857_v21, %v854_v44  ;;  %v816_v47 = vpop.f32.mrb[5].mxu0  ;;  %v856_v48 = vpop.f32.mrb[5].mxu1 }
 0x14a   : > { %v999_v49 = vadd.f32 %v1859_v22, %v816_v47  ;;  %v1015_v50 = vadd.f32 %v1859_v22, %v856_v48  ;;  %v818_v51 = vpop.f32.mrb[6].mxu0  ;;  %v858_v52 = vpop.f32.mrb[6].mxu1 }
 0x14b   : > { %v1000_v53 = vadd.f32 %v1857_v21, %v818_v51  ;;  %v1016_v54 = vadd.f32 %v1857_v21, %v858_v52  ;;  %v820_v55 = vpop.f32.mrb[7].mxu0  ;;  %v860_v56 = vpop.f32.mrb[7].mxu1 }
 0x14c   : > { %v1431_v57 = vpack.c.bf16 %v999_v49, %v998_v45  ;;  %v1439_v58 = vpack.c.bf16 %v1015_v50, %v1014_v46  ;;  %v1001_v59 = vadd.f32 %v1859_v22, %v820_v55  ;;  %v1017_v60 = vadd.f32 %v1859_v22, %v860_v56 }
 0x14d   : > { %v1224_v47 = vld [vmem:[%s1871_s12 + $0x40] sm:$0xff] (%p1685_p6) }
 0x14e   : > { %1124 = vst [vmem:[%s1871_s12 + $0x10] sm:$0xff] %v1431_v57  ;;  %1132 = vst [vmem:[%s1871_s12 + $0x50] sm:$0xff] %v1439_v58  ;;  %v1432_v61 = vpack.c.bf16 %v1001_v59, %v1000_v53  ;;  %v1440_v62 = vpack.c.bf16 %v1017_v60, %v1016_v54 }
 0x14f   : > { %1225 = vst [vmem:[%s1150_s9 + $0x80] sm:$0xff] (%p1685_p6), %v1224_v47  ;;  %v1226_v48 = vld [vmem:[%s1871_s12 + $0x48] sm:$0xff] (%p1685_p6) }
 0x150   : > { %1125 = vst [vmem:[%s1871_s12 + $0x18] sm:$0xff] %v1432_v61  ;;  %1133 = vst [vmem:[%s1871_s12 + $0x58] sm:$0xff] %v1440_v62  ;;  %v824_v63 = vpop.f32.mrb[8].mxu0  ;;  %v864_v0 = vpop.f32.mrb[8].mxu1 }
 0x151   : > { %v1002_v1 = vadd.f32 %v1857_v21, %v824_v63  ;;  %v1018_v2 = vadd.f32 %v1857_v21, %v864_v0  ;;  %v826_v3 = vpop.f32.mrb[9].mxu0  ;;  %v866_v4 = vpop.f32.mrb[9].mxu1  ;;  %1227 = vst [vmem:[%s1150_s9 + $0x90] sm:$0xff] (%p1685_p6), %v1226_v48 }
 0x152   : > { %v1003_v5 = vadd.f32 %v1859_v22, %v826_v3  ;;  %v1019_v6 = vadd.f32 %v1859_v22, %v866_v4  ;;  %v828_v7 = vpop.f32.mrb[10].mxu0  ;;  %v868_v8 = vpop.f32.mrb[10].mxu1 }
 0x153   : > { %v1004_v9 = vadd.f32 %v1857_v21, %v828_v7  ;;  %v1020_v10 = vadd.f32 %v1857_v21, %v868_v8  ;;  %v830_v11 = vpop.f32.mrb[11].mxu0  ;;  %v870_v12 = vpop.f32.mrb[11].mxu1 }
 0x154   : > { %v1433_v13 = vpack.c.bf16 %v1003_v5, %v1002_v1  ;;  %v1441_v14 = vpack.c.bf16 %v1019_v6, %v1018_v2  ;;  %v1005_v15 = vadd.f32 %v1859_v22, %v830_v11  ;;  %v1021_v16 = vadd.f32 %v1859_v22, %v870_v12 }
 0x155   : > { %v1212_v41 = vld [vmem:[%s1871_s12 + $0x10] sm:$0xff] (%p1685_p6) }
 0x156   : > { %1126 = vst [vmem:[%s1871_s12 + $0x20] sm:$0xff] %v1433_v13  ;;  %1134 = vst [vmem:[%s1871_s12 + $0x60] sm:$0xff] %v1441_v14  ;;  %v1434_v17 = vpack.c.bf16 %v1005_v15, %v1004_v9  ;;  %v1442_v18 = vpack.c.bf16 %v1021_v16, %v1020_v10  ;;  %v1228_v49 = vld [vmem:[%s1871_s12 + $0x50] sm:$0xff] (%p1685_p6) }
 0x157   : > { %v1214_v42 = vld [vmem:[%s1871_s12 + $0x18] sm:$0xff] (%p1685_p6)  ;;  %1213 = vst [vmem:[%s1150_s9 + $0x20] sm:$0xff] (%p1685_p6), %v1212_v41  ;;  %1229 = vst [vmem:[%s1150_s9 + $0xa0] sm:$0xff] (%p1685_p6), %v1228_v49 }
 0x158   : > { %1127 = vst [vmem:[%s1871_s12 + $0x28] sm:$0xff] %v1434_v17  ;;  %1135 = vst [vmem:[%s1871_s12 + $0x68] sm:$0xff] %v1442_v18  ;;  %v834_v19 = vpop.f32.mrb[12].mxu0  ;;  %v874_v20 = vpop.f32.mrb[12].mxu1  ;;  %v1230_v50 = vld [vmem:[%s1871_s12 + $0x58] sm:$0xff] (%p1685_p6) }
 0x159   : > { %v1006_v23 = vadd.f32 %v1857_v21, %v834_v19  ;;  %v1022_v24 = vadd.f32 %v1857_v21, %v874_v20  ;;  %v836_v25 = vpop.f32.mrb[13].mxu0  ;;  %v876_v26 = vpop.f32.mrb[13].mxu1  ;;  %1215 = vst [vmem:[%s1150_s9 + $0x30] sm:$0xff] (%p1685_p6), %v1214_v42  ;;  %1231 = vst [vmem:[%s1150_s9 + $0xb0] sm:$0xff] (%p1685_p6), %v1230_v50 }
 0x15a   : > { %v1007_v27 = vadd.f32 %v1859_v22, %v836_v25  ;;  %v1023_v28 = vadd.f32 %v1859_v22, %v876_v26  ;;  %v838_v29 = vpop.f32.mrb[14].mxu0  ;;  %v878_v30 = vpop.f32.mrb[14].mxu1  ;;  %1144 = sbr.rel (!%p1685_p6) target bundleno = 362 (0x16a), region = 82 }
 0x15b   : > { %v1008_v31 = vadd.f32 %v1857_v21, %v838_v29  ;;  %v1024_v32 = vadd.f32 %v1857_v21, %v878_v30  ;;  %v840_v33 = vpop.f32.mrb[15].mxu0  ;;  %v880_v34 = vpop.f32.mrb[15].mxu1  ;;  %v1208_v21 = vld [vmem:[%s1871_s12] sm:$0xff] (%p1685_p6) }
 0x15c   : > { %v1435_v35 = vpack.c.bf16 %v1007_v27, %v1006_v23  ;;  %v1443_v36 = vpack.c.bf16 %v1023_v28, %v1022_v24  ;;  %v1009_v37 = vadd.f32 %v1859_v22, %v840_v33  ;;  %v1025_v38 = vadd.f32 %v1859_v22, %v880_v34  ;;  %v1210_v22 = vld [vmem:[%s1871_s12 + $0x8] sm:$0xff] (%p1685_p6)  ;;  %1209 = vst [vmem:[%s1150_s9] sm:$0xff] (%p1685_p6), %v1208_v21 }
 0x15d   : > { %v1216_v43 = vld [vmem:[%s1871_s12 + $0x20] sm:$0xff] (%p1685_p6)  ;;  %1211 = vst [vmem:[%s1150_s9 + $0x10] sm:$0xff] (%p1685_p6), %v1210_v22 }
 0x15e   : > { %1128 = vst [vmem:[%s1871_s12 + $0x30] sm:$0xff] %v1435_v35  ;;  %1136 = vst [vmem:[%s1871_s12 + $0x70] sm:$0xff] %v1443_v36  ;;  %v1436_v39 = vpack.c.bf16 %v1009_v37, %v1008_v31  ;;  %v1444_v40 = vpack.c.bf16 %v1025_v38, %v1024_v32  ;;  %v1232_v51 = vld [vmem:[%s1871_s12 + $0x60] sm:$0xff] (%p1685_p6) }
 0x15f   : > { %v1218_v44 = vld [vmem:[%s1871_s12 + $0x28] sm:$0xff] (%p1685_p6)  ;;  %1217 = vst [vmem:[%s1150_s9 + $0x40] sm:$0xff] (%p1685_p6), %v1216_v43  ;;  %1233 = vst [vmem:[%s1150_s9 + $0xc0] sm:$0xff] (%p1685_p6), %v1232_v51 }
 0x160   : > { %1129 = vst [vmem:[%s1871_s12 + $0x38] sm:$0xff] %v1436_v39  ;;  %1137 = vst [vmem:[%s1871_s12 + $0x78] sm:$0xff] %v1444_v40  ;;  %v1234_v52 = vld [vmem:[%s1871_s12 + $0x68] sm:$0xff] (%p1685_p6) }
 0x161   : > { %1219 = vst [vmem:[%s1150_s9 + $0x50] sm:$0xff] %v1218_v44  ;;  %1235 = vst [vmem:[%s1150_s9 + $0xd0] sm:$0xff] %v1234_v52 }
 0x165   : > { %v1220_v45 = vld [vmem:[%s1871_s12 + $0x30] sm:$0xff] }
 0x166   : > { %1221 = vst [vmem:[%s1150_s9 + $0x60] sm:$0xff] %v1220_v45  ;;  %v1236_v53 = vld [vmem:[%s1871_s12 + $0x70] sm:$0xff] }
 0x167   : > { %v1222_v46 = vld [vmem:[%s1871_s12 + $0x38] sm:$0xff]  ;;  %1237 = vst [vmem:[%s1150_s9 + $0xe0] sm:$0xff] %v1236_v53 }
 0x168   : > { %1223 = vst [vmem:[%s1150_s9 + $0x70] sm:$0xff] %v1222_v46  ;;  %v1238_v54 = vld [vmem:[%s1871_s12 + $0x78] sm:$0xff] }
 0x169   : > { %1239 = vst [vmem:[%s1150_s9 + $0xf0] sm:$0xff] %v1238_v54 }
 0x16a PF: > { %s13_s16 = sadd.s32 1, %s1628_s16   ;;  %s1955_s12 = smov %s1616_s13 }
 0x16b   : > { %p10_p12 = scmp.ge.s32.totalorder %s13_s16, 4   ;;  %s1956_s13 = smov %s1690_s22 }
 0x16c   : > { %s1957_s14 = smov %s1624_s15  ;;  %s1958_s15 = smov %s1960_s17 }
 0x16d   :  { %12 = sbr.rel (!%p10_p12) target bundleno = 3 (0x3), region = 157 }

// kernel: _lambda_.26
= control target key start
LH: loop header
LB: loop body
LE: loop exit
PB: predicated region body
PF: predicated region fallthrough
CT: control target
= control target key end

     0   :  { %s3364_s0 = inlined_call_operand.vmem [shape: bf16[128,4608], index: 0, kind: input, shape index: {}]   ;;  %s3365_s1 = inlined_call_operand.vmem [shape: bf16[4608,512], index: 1, kind: input, shape index: {}]   ;;  %s3366_s2 = inlined_call_operand.vmem [shape: f32[1,512], index: 2, kind: input, shape index: {}]   ;;  %s3367_s3 = inlined_call_operand.vmem [shape: bf16[128,512], index: 3, kind: input, shape index: {}]   ;;  %s3368_s4 = inlined_call_operand.vmem [shape: bf16[128,512], index: 4, kind: output, shape index: {}]  }
   0x1   :  { %3371 = sst [smem:[#allocation10_spill]] %s3364_s0 }
   0x2   :  { %s2769_s15 = smov 0   ;;  %s2771_s16 = smov 0  }
   0x3   :  { %s2773_s17 = smov 0   ;;  %s2775_s18 = smov 0  }
   0x4   :  { %s2777_s19 = smov 0   ;;  %s2779_s20 = smov 0  }
   0x5   :  { %s2781_s21 = smov 0   ;;  %s2783_s22 = smov 0  }
   0x6   :  { %s2785_s23 = smov 0   ;;  %s2787_s24 = smov 0  }
   0x7   :  { %s2789_s25 = smov 0  }
   0x8 LB: > { %s2230_s26 = sadd.s32 4294967295, %s2741_s25   ;;  %s26_s27 = sadd.s32 1, %s2733_s23  ;;  %s2741_s25 = sphi %s2789_s25, %s14_s25   ;;  %s2737_s24 = sphi %s2787_s24, %s3392_s24   ;;  %s2733_s23 = sphi %s2785_s23, %s3391_s23   ;;  %s2729_s22 = sphi %s2783_s22, %s3390_s22   ;;  %s2725_s21 = sphi %s2781_s21, %s3389_s21   ;;  %s2721_s20 = sphi %s2779_s20, %s3388_s20   ;;  %s2717_s19 = sphi %s2777_s19, %s3387_s19   ;;  %s2713_s18 = sphi %s2775_s18, %s3386_s18   ;;  %s2709_s17 = sphi %s2773_s17, %s3385_s17   ;;  %s2705_s16 = sphi %s2771_s16, %s3384_s16   ;;  %s2701_s15 = sphi %s2769_s15, %s3383_s15  }
   0x9   : > { %p27_p0 = scmp.ge.s32.totalorder %s26_s27, 9  ;;  %s29_s28 = sadd.s32 1, %s2737_s24 }
   0xa   : > { %s42_s29 = sadd.s32 1, %s2721_s20  ;;  %p49_p1 = scmp.ne.s32.totalorder %s2721_s20, %s2717_s19 }
   0xb   : > { %s3394_s27 = smov (%p27_p0, %s26_s27), 0  ;;  %s3396_s28 = smov (!%p27_p0, %s29_s28), %s2737_s24 }
   0xc   : > { %3372 = sst [smem:[#allocation7_spill]] %s3394_s27  ;;  %s38_s30 = ssub.s32 %s2733_s23, %s3394_s27 }
   0xd   : > { %p50_p2 = scmp.eq.s32.totalorder %s2741_s25, 0  ;;  %p31_p3 = scmp.ge.s32.totalorder %s3396_s28, 2 }
   0xe   : > { %p40_p4 = scmp.eq.s32.totalorder %s38_s30, 0  ;;  %s70_s6 = sadd.s32 1, %s2713_s18 }
   0xf   : > { %p2838_p5 = por %p50_p2, %p49_p1  ;;  %s3398_s28 = smov (%p31_p3, %s3396_s28), 0 }
  0x10   : > { %3374 = sst [smem:[#allocation8_spill]] %s3398_s28  ;;  %s66_s8 = ssub.s32 %s2737_s24, %s3398_s28 }
  0x11   : > { %s2846_s7 = scalar_select %p40_p4, %s2721_s20, %s42_s29  }
  0x12   : > { %p77_p6 = scmp.ne.s32.totalorder %s2713_s18, %s2709_s17  ;;  %s67_s9 = sor.u32 %s66_s8, %s38_s30 }
  0x13   : > { %3375 = sst [smem:[#allocation9_spill]] %s2846_s7  ;;  %p122_p7 = scmp.eq.s32.totalorder %s66_s8, 0 }
  0x14   : > { %p68_p8 = scmp.eq.s32.totalorder %s67_s9, 0  ;;  %p2854_p9 = por %p77_p6, %p50_p2 }
  0x15   : > { %s124_s11 = sadd.s32 1, %s2705_s16  ;;  %p131_p10 = scmp.ne.s32.totalorder %s2705_s16, %s2701_s15 }
  0x16   : > { %s2862_s12 = scalar_select %p68_p8, %s2713_s18, %s70_s6  }
  0x17   : > { %s2865_s13 = scalar_select %p122_p7, %s2705_s16, %s124_s11  }
  0x18   : > { %p2869_p11 = por %p131_p10, %p50_p2  ;;  %p163_p12 = scmp.eq.s32.totalorder %s2230_s26, 17 }
  0x19   : > { %p2233_p0 = scmp.ge.s32.totalorder %s2741_s25, 18 }
  0x1a   : > { %p2873_p13 = por %p163_p12, %p131_p10 }
  0x1b   : > { %185 = sbr.rel (%p2233_p0) target bundleno = 111 (0x6f), region = 16 }
  0x22   : > { %188 = sbr.rel (!%p2838_p5) target bundleno = 60 (0x3c), region = 20  ;;  %s190_s30 = sand.u32 (%p2838_p5), 1, %s2721_s20  }
  0x23   : > { %s2370_s6 = sshll.u32 (%p2838_p5), %s2733_s23, 4  ;;  %s2234_s8 = sshll.u32 (%p2838_p5), %s190_s30, 8 }
  0x24   : > { %s3379_s0 = sld [smem:[#allocation10_spill]] (%p2838_p5)  ;;  %s2890_s26 = scalar_lea.vmem (%p2838_p5), [#allocation3], %s2234_s8 }
  0x2a   : > { %s2885_s28 = scalar_lea.vmem %s3379_s0, %s2370_s6 }
  0x2b   : > { %v211_v0 = vld [vmem:[%s2885_s28] sm:$0xff]  ;;  %v213_v1 = vld [vmem:[%s2885_s28 + $0x8] sm:$0xff]  ;;  %v215_v2 = vld [vmem:[%s2885_s28 + $0x90] sm:$0xff] }
  0x2c   : > { %212 = vst [vmem:[%s2890_s26] sm:$0xff] %v211_v0  ;;  %214 = vst [vmem:[%s2890_s26 + $0x8] sm:$0xff] %v213_v1  ;;  %v217_v3 = vld [vmem:[%s2885_s28 + $0x98] sm:$0xff]  ;;  %v219_v4 = vld [vmem:[%s2885_s28 + $0x120] sm:$0xff] }
  0x2d   : > { %216 = vst [vmem:[%s2890_s26 + $0x10] sm:$0xff] %v215_v2  ;;  %v221_v5 = vld [vmem:[%s2885_s28 + $0x128] sm:$0xff]  ;;  %218 = vst [vmem:[%s2890_s26 + $0x18] sm:$0xff] %v217_v3  ;;  %v223_v6 = vld [vmem:[%s2885_s28 + $0x1b0] sm:$0xff] }
  0x2e   : > { %220 = vst [vmem:[%s2890_s26 + $0x20] sm:$0xff] %v219_v4  ;;  %222 = vst [vmem:[%s2890_s26 + $0x28] sm:$0xff] %v221_v5  ;;  %v225_v7 = vld [vmem:[%s2885_s28 + $0x1b8] sm:$0xff]  ;;  %v227_v8 = vld [vmem:[%s2885_s28 + $0x240] sm:$0xff] }
  0x2f   : > { %224 = vst [vmem:[%s2890_s26 + $0x30] sm:$0xff] %v223_v6  ;;  %226 = vst [vmem:[%s2890_s26 + $0x38] sm:$0xff] %v225_v7  ;;  %v229_v9 = vld [vmem:[%s2885_s28 + $0x248] sm:$0xff]  ;;  %v231_v10 = vld [vmem:[%s2885_s28 + $0x2d0] sm:$0xff] }
  0x30   : > { %228 = vst [vmem:[%s2890_s26 + $0x40] sm:$0xff] %v227_v8  ;;  %v233_v11 = vld [vmem:[%s2885_s28 + $0x2d8] sm:$0xff]  ;;  %230 = vst [vmem:[%s2890_s26 + $0x48] sm:$0xff] %v229_v9  ;;  %v235_v12 = vld [vmem:[%s2885_s28 + $0x360] sm:$0xff] }
  0x31   : > { %232 = vst [vmem:[%s2890_s26 + $0x50] sm:$0xff] %v231_v10  ;;  %234 = vst [vmem:[%s2890_s26 + $0x58] sm:$0xff] %v233_v11  ;;  %v237_v13 = vld [vmem:[%s2885_s28 + $0x368] sm:$0xff]  ;;  %v239_v14 = vld [vmem:[%s2885_s28 + $0x3f0] sm:$0xff] }
  0x32   : > { %236 = vst [vmem:[%s2890_s26 + $0x60] sm:$0xff] %v235_v12  ;;  %238 = vst [vmem:[%s2890_s26 + $0x68] sm:$0xff] %v237_v13  ;;  %v241_v15 = vld [vmem:[%s2885_s28 + $0x3f8] sm:$0xff]  ;;  %v243_v16 = vld [vmem:[%s2885_s28 + $0x480] sm:$0xff] }
  0x33   : > { %240 = vst [vmem:[%s2890_s26 + $0x70] sm:$0xff] %v239_v14  ;;  %v245_v17 = vld [vmem:[%s2885_s28 + $0x488] sm:$0xff]  ;;  %242 = vst [vmem:[%s2890_s26 + $0x78] sm:$0xff] %v241_v15  ;;  %v247_v18 = vld [vmem:[%s2885_s28 + $0x510] sm:$0xff] }
  0x34   : > { %244 = vst [vmem:[%s2890_s26 + $0x80] sm:$0xff] %v243_v16  ;;  %246 = vst [vmem:[%s2890_s26 + $0x88] sm:$0xff] %v245_v17  ;;  %v249_v19 = vld [vmem:[%s2885_s28 + $0x518] sm:$0xff]  ;;  %v251_v20 = vld [vmem:[%s2885_s28 + $0x5a0] sm:$0xff] }
  0x35   : > { %248 = vst [vmem:[%s2890_s26 + $0x90] sm:$0xff] %v247_v18  ;;  %250 = vst [vmem:[%s2890_s26 + $0x98] sm:$0xff] %v249_v19  ;;  %v253_v21 = vld [vmem:[%s2885_s28 + $0x5a8] sm:$0xff]  ;;  %v255_v22 = vld [vmem:[%s2885_s28 + $0x630] sm:$0xff] }
  0x36   : > { %252 = vst [vmem:[%s2890_s26 + $0xa0] sm:$0xff] %v251_v20  ;;  %v257_v23 = vld [vmem:[%s2885_s28 + $0x638] sm:$0xff]  ;;  %254 = vst [vmem:[%s2890_s26 + $0xa8] sm:$0xff] %v253_v21  ;;  %v259_v24 = vld [vmem:[%s2885_s28 + $0x6c0] sm:$0xff] }
  0x37   : > { %256 = vst [vmem:[%s2890_s26 + $0xb0] sm:$0xff] %v255_v22  ;;  %258 = vst [vmem:[%s2890_s26 + $0xb8] sm:$0xff] %v257_v23  ;;  %v261_v25 = vld [vmem:[%s2885_s28 + $0x6c8] sm:$0xff]  ;;  %v263_v26 = vld [vmem:[%s2885_s28 + $0x750] sm:$0xff] }
  0x38   : > { %260 = vst [vmem:[%s2890_s26 + $0xc0] sm:$0xff] %v259_v24  ;;  %262 = vst [vmem:[%s2890_s26 + $0xc8] sm:$0xff] %v261_v25  ;;  %v265_v27 = vld [vmem:[%s2885_s28 + $0x758] sm:$0xff]  ;;  %v267_v28 = vld [vmem:[%s2885_s28 + $0x7e0] sm:$0xff] }
  0x39   : > { %264 = vst [vmem:[%s2890_s26 + $0xd0] sm:$0xff] %v263_v26  ;;  %v269_v29 = vld [vmem:[%s2885_s28 + $0x7e8] sm:$0xff]  ;;  %266 = vst [vmem:[%s2890_s26 + $0xd8] sm:$0xff] %v265_v27  ;;  %v271_v30 = vld [vmem:[%s2885_s28 + $0x870] sm:$0xff] }
  0x3a   : > { %268 = vst [vmem:[%s2890_s26 + $0xe0] sm:$0xff] %v267_v28  ;;  %270 = vst [vmem:[%s2890_s26 + $0xe8] sm:$0xff] %v269_v29  ;;  %v273_v31 = vld [vmem:[%s2885_s28 + $0x878] sm:$0xff] }
  0x3b   : > { %272 = vst [vmem:[%s2890_s26 + $0xf0] sm:$0xff] %v271_v30  ;;  %274 = vst [vmem:[%s2890_s26 + $0xf8] sm:$0xff] %v273_v31 }
  0x3c PF: > { %280 = sbr.rel (!%p2854_p9) target bundleno = 99 (0x63), region = 43  ;;  %s282_s5 = sand.u32 (%p2854_p9), 1, %s2713_s18  }
  0x3d   : > { %s2239_s30 = sshll.u32 (%p2854_p9), %s2737_s24, 1  ;;  %s2237_s6 = sshll.u32 (%p2854_p9), %s282_s5, 9 }
  0x3e   : > { %s2371_s8 = sshll.u32 (%p2854_p9), %s2733_s23, 8  ;;  %s2966_s28 = scalar_lea.vmem (%p2854_p9), [#allocation4], %s2237_s6 }
  0x3f   : > { %s288_s9 = sadd.s32 (%p2854_p9), %s2371_s8, %s2239_s30 }
  0x40   : > { %s2241_s11 = sshll.u32 (%p2854_p9), %s288_s9, 2 }
  0x41   : > { %s2961_s7 = scalar_lea.vmem (%p2854_p9), %s3365_s1, %s2241_s11 }
  0x42   : > { %v444_v32 = vld [vmem:[%s2961_s7] sm:$0xff] (%p2854_p9)  ;;  %v446_v33 = vld [vmem:[%s2961_s7 + $0x10] sm:$0xff] (%p2854_p9) }
  0x43   : > { %v448_v34 = vld [vmem:[%s2961_s7 + $0x20] sm:$0xff]  ;;  %445 = vst [vmem:[%s2966_s28] sm:$0xff] %v444_v32  ;;  %447 = vst [vmem:[%s2966_s28 + $0x8] sm:$0xff] %v446_v33  ;;  %v450_v35 = vld [vmem:[%s2961_s7 + $0x30] sm:$0xff] }
  0x44   : > { %449 = vst [vmem:[%s2966_s28 + $0x10] sm:$0xff] %v448_v34  ;;  %v452_v36 = vld [vmem:[%s2961_s7 + $0x40] sm:$0xff]  ;;  %v454_v37 = vld [vmem:[%s2961_s7 + $0x50] sm:$0xff]  ;;  %451 = vst [vmem:[%s2966_s28 + $0x18] sm:$0xff] %v450_v35 }
  0x45   : > { %453 = vst [vmem:[%s2966_s28 + $0x20] sm:$0xff] %v452_v36  ;;  %455 = vst [vmem:[%s2966_s28 + $0x28] sm:$0xff] %v454_v37  ;;  %v456_v38 = vld [vmem:[%s2961_s7 + $0x60] sm:$0xff]  ;;  %v458_v39 = vld [vmem:[%s2961_s7 + $0x70] sm:$0xff] }
  0x46   : > { %v460_v40 = vld [vmem:[%s2961_s7 + $0x80] sm:$0xff]  ;;  %457 = vst [vmem:[%s2966_s28 + $0x30] sm:$0xff] %v456_v38  ;;  %459 = vst [vmem:[%s2966_s28 + $0x38] sm:$0xff] %v458_v39  ;;  %v462_v41 = vld [vmem:[%s2961_s7 + $0x90] sm:$0xff] }
  0x47   : > { %461 = vst [vmem:[%s2966_s28 + $0x40] sm:$0xff] %v460_v40  ;;  %v464_v42 = vld [vmem:[%s2961_s7 + $0xa0] sm:$0xff]  ;;  %v466_v43 = vld [vmem:[%s2961_s7 + $0xb0] sm:$0xff]  ;;  %463 = vst [vmem:[%s2966_s28 + $0x48] sm:$0xff] %v462_v41 }
  0x48   : > { %465 = vst [vmem:[%s2966_s28 + $0x50] sm:$0xff] %v464_v42  ;;  %467 = vst [vmem:[%s2966_s28 + $0x58] sm:$0xff] %v466_v43  ;;  %v468_v44 = vld [vmem:[%s2961_s7 + $0xc0] sm:$0xff]  ;;  %v470_v45 = vld [vmem:[%s2961_s7 + $0xd0] sm:$0xff] }
  0x49   : > { %v472_v46 = vld [vmem:[%s2961_s7 + $0xe0] sm:$0xff]  ;;  %469 = vst [vmem:[%s2966_s28 + $0x60] sm:$0xff] %v468_v44  ;;  %471 = vst [vmem:[%s2966_s28 + $0x68] sm:$0xff] %v470_v45  ;;  %v474_v47 = vld [vmem:[%s2961_s7 + $0xf0] sm:$0xff] }
  0x4a   : > { %473 = vst [vmem:[%s2966_s28 + $0x70] sm:$0xff] %v472_v46  ;;  %v476_v48 = vld [vmem:[%s2961_s7 + $0x100] sm:$0xff]  ;;  %v478_v49 = vld [vmem:[%s2961_s7 + $0x110] sm:$0xff]  ;;  %475 = vst [vmem:[%s2966_s28 + $0x78] sm:$0xff] %v474_v47 }
  0x4b   : > { %477 = vst [vmem:[%s2966_s28 + $0x80] sm:$0xff] %v476_v48  ;;  %479 = vst [vmem:[%s2966_s28 + $0x88] sm:$0xff] %v478_v49  ;;  %v480_v50 = vld [vmem:[%s2961_s7 + $0x120] sm:$0xff]  ;;  %v482_v51 = vld [vmem:[%s2961_s7 + $0x130] sm:$0xff] }
  0x4c   : > { %v484_v52 = vld [vmem:[%s2961_s7 + $0x140] sm:$0xff]  ;;  %481 = vst [vmem:[%s2966_s28 + $0x90] sm:$0xff] %v480_v50  ;;  %483 = vst [vmem:[%s2966_s28 + $0x98] sm:$0xff] %v482_v51  ;;  %v486_v53 = vld [vmem:[%s2961_s7 + $0x150] sm:$0xff] }
  0x4d   : > { %485 = vst [vmem:[%s2966_s28 + $0xa0] sm:$0xff] %v484_v52  ;;  %v488_v54 = vld [vmem:[%s2961_s7 + $0x160] sm:$0xff]  ;;  %v490_v55 = vld [vmem:[%s2961_s7 + $0x170] sm:$0xff]  ;;  %487 = vst [vmem:[%s2966_s28 + $0xa8] sm:$0xff] %v486_v53 }
  0x4e   : > { %489 = vst [vmem:[%s2966_s28 + $0xb0] sm:$0xff] %v488_v54  ;;  %491 = vst [vmem:[%s2966_s28 + $0xb8] sm:$0xff] %v490_v55  ;;  %v492_v56 = vld [vmem:[%s2961_s7 + $0x180] sm:$0xff]  ;;  %v494_v57 = vld [vmem:[%s2961_s7 + $0x190] sm:$0xff] }
  0x4f   : > { %v496_v58 = vld [vmem:[%s2961_s7 + $0x1a0] sm:$0xff]  ;;  %493 = vst [vmem:[%s2966_s28 + $0xc0] sm:$0xff] %v492_v56  ;;  %495 = vst [vmem:[%s2966_s28 + $0xc8] sm:$0xff] %v494_v57  ;;  %v498_v59 = vld [vmem:[%s2961_s7 + $0x1b0] sm:$0xff] }
  0x50   : > { %497 = vst [vmem:[%s2966_s28 + $0xd0] sm:$0xff] %v496_v58  ;;  %v500_v60 = vld [vmem:[%s2961_s7 + $0x1c0] sm:$0xff]  ;;  %v502_v61 = vld [vmem:[%s2961_s7 + $0x1d0] sm:$0xff]  ;;  %499 = vst [vmem:[%s2966_s28 + $0xd8] sm:$0xff] %v498_v59 }
  0x51   : > { %501 = vst [vmem:[%s2966_s28 + $0xe0] sm:$0xff] %v500_v60  ;;  %503 = vst [vmem:[%s2966_s28 + $0xe8] sm:$0xff] %v502_v61  ;;  %v504_v62 = vld [vmem:[%s2961_s7 + $0x1e0] sm:$0xff]  ;;  %v506_v63 = vld [vmem:[%s2961_s7 + $0x1f0] sm:$0xff] }
  0x52   : > { %v508_v0 = vld [vmem:[%s2961_s7 + $0x200] sm:$0xff]  ;;  %505 = vst [vmem:[%s2966_s28 + $0xf0] sm:$0xff] %v504_v62  ;;  %507 = vst [vmem:[%s2966_s28 + $0xf8] sm:$0xff] %v506_v63  ;;  %v510_v1 = vld [vmem:[%s2961_s7 + $0x210] sm:$0xff] }
  0x53   : > { %509 = vst [vmem:[%s2966_s28 + $0x100] sm:$0xff] %v508_v0  ;;  %v512_v2 = vld [vmem:[%s2961_s7 + $0x220] sm:$0xff]  ;;  %v514_v3 = vld [vmem:[%s2961_s7 + $0x230] sm:$0xff]  ;;  %511 = vst [vmem:[%s2966_s28 + $0x108] sm:$0xff] %v510_v1 }
  0x54   : > { %513 = vst [vmem:[%s2966_s28 + $0x110] sm:$0xff] %v512_v2  ;;  %515 = vst [vmem:[%s2966_s28 + $0x118] sm:$0xff] %v514_v3  ;;  %v516_v4 = vld [vmem:[%s2961_s7 + $0x240] sm:$0xff]  ;;  %v518_v5 = vld [vmem:[%s2961_s7 + $0x250] sm:$0xff] }
  0x55   : > { %v520_v6 = vld [vmem:[%s2961_s7 + $0x260] sm:$0xff]  ;;  %517 = vst [vmem:[%s2966_s28 + $0x120] sm:$0xff] %v516_v4  ;;  %519 = vst [vmem:[%s2966_s28 + $0x128] sm:$0xff] %v518_v5  ;;  %v522_v7 = vld [vmem:[%s2961_s7 + $0x270] sm:$0xff] }
  0x56   : > { %521 = vst [vmem:[%s2966_s28 + $0x130] sm:$0xff] %v520_v6  ;;  %v524_v8 = vld [vmem:[%s2961_s7 + $0x280] sm:$0xff]  ;;  %v526_v9 = vld [vmem:[%s2961_s7 + $0x290] sm:$0xff]  ;;  %523 = vst [vmem:[%s2966_s28 + $0x138] sm:$0xff] %v522_v7 }
  0x57   : > { %525 = vst [vmem:[%s2966_s28 + $0x140] sm:$0xff] %v524_v8  ;;  %527 = vst [vmem:[%s2966_s28 + $0x148] sm:$0xff] %v526_v9  ;;  %v528_v10 = vld [vmem:[%s2961_s7 + $0x2a0] sm:$0xff]  ;;  %v530_v11 = vld [vmem:[%s2961_s7 + $0x2b0] sm:$0xff] }
  0x58   : > { %v532_v12 = vld [vmem:[%s2961_s7 + $0x2c0] sm:$0xff]  ;;  %529 = vst [vmem:[%s2966_s28 + $0x150] sm:$0xff] %v528_v10  ;;  %531 = vst [vmem:[%s2966_s28 + $0x158] sm:$0xff] %v530_v11  ;;  %v534_v13 = vld [vmem:[%s2961_s7 + $0x2d0] sm:$0xff] }
  0x59   : > { %533 = vst [vmem:[%s2966_s28 + $0x160] sm:$0xff] %v532_v12  ;;  %v536_v14 = vld [vmem:[%s2961_s7 + $0x2e0] sm:$0xff]  ;;  %v538_v15 = vld [vmem:[%s2961_s7 + $0x2f0] sm:$0xff]  ;;  %535 = vst [vmem:[%s2966_s28 + $0x168] sm:$0xff] %v534_v13 }
  0x5a   : > { %537 = vst [vmem:[%s2966_s28 + $0x170] sm:$0xff] %v536_v14  ;;  %539 = vst [vmem:[%s2966_s28 + $0x178] sm:$0xff] %v538_v15  ;;  %v540_v16 = vld [vmem:[%s2961_s7 + $0x300] sm:$0xff]  ;;  %v542_v17 = vld [vmem:[%s2961_s7 + $0x310] sm:$0xff] }
  0x5b   : > { %v544_v18 = vld [vmem:[%s2961_s7 + $0x320] sm:$0xff]  ;;  %541 = vst [vmem:[%s2966_s28 + $0x180] sm:$0xff] %v540_v16  ;;  %543 = vst [vmem:[%s2966_s28 + $0x188] sm:$0xff] %v542_v17  ;;  %v546_v19 = vld [vmem:[%s2961_s7 + $0x330] sm:$0xff] }
  0x5c   : > { %545 = vst [vmem:[%s2966_s28 + $0x190] sm:$0xff] %v544_v18  ;;  %v548_v20 = vld [vmem:[%s2961_s7 + $0x340] sm:$0xff]  ;;  %v550_v21 = vld [vmem:[%s2961_s7 + $0x350] sm:$0xff]  ;;  %547 = vst [vmem:[%s2966_s28 + $0x198] sm:$0xff] %v546_v19 }
  0x5d   : > { %549 = vst [vmem:[%s2966_s28 + $0x1a0] sm:$0xff] %v548_v20  ;;  %551 = vst [vmem:[%s2966_s28 + $0x1a8] sm:$0xff] %v550_v21  ;;  %v552_v22 = vld [vmem:[%s2961_s7 + $0x360] sm:$0xff]  ;;  %v554_v23 = vld [vmem:[%s2961_s7 + $0x370] sm:$0xff] }
  0x5e   : > { %v556_v24 = vld [vmem:[%s2961_s7 + $0x380] sm:$0xff]  ;;  %553 = vst [vmem:[%s2966_s28 + $0x1b0] sm:$0xff] %v552_v22  ;;  %555 = vst [vmem:[%s2966_s28 + $0x1b8] sm:$0xff] %v554_v23  ;;  %v558_v25 = vld [vmem:[%s2961_s7 + $0x390] sm:$0xff] }
  0x5f   : > { %557 = vst [vmem:[%s2966_s28 + $0x1c0] sm:$0xff] %v556_v24  ;;  %v560_v26 = vld [vmem:[%s2961_s7 + $0x3a0] sm:$0xff]  ;;  %v562_v27 = vld [vmem:[%s2961_s7 + $0x3b0] sm:$0xff]  ;;  %559 = vst [vmem:[%s2966_s28 + $0x1c8] sm:$0xff] %v558_v25 }
  0x60   : > { %561 = vst [vmem:[%s2966_s28 + $0x1d0] sm:$0xff] %v560_v26  ;;  %563 = vst [vmem:[%s2966_s28 + $0x1d8] sm:$0xff] %v562_v27  ;;  %v564_v28 = vld [vmem:[%s2961_s7 + $0x3c0] sm:$0xff]  ;;  %v566_v29 = vld [vmem:[%s2961_s7 + $0x3d0] sm:$0xff] }
  0x61   : > { %v568_v30 = vld [vmem:[%s2961_s7 + $0x3e0] sm:$0xff]  ;;  %565 = vst [vmem:[%s2966_s28 + $0x1e0] sm:$0xff] %v564_v28  ;;  %567 = vst [vmem:[%s2966_s28 + $0x1e8] sm:$0xff] %v566_v29  ;;  %v570_v31 = vld [vmem:[%s2961_s7 + $0x3f0] sm:$0xff] }
  0x62   : > { %569 = vst [vmem:[%s2966_s28 + $0x1f0] sm:$0xff] %v568_v30  ;;  %571 = vst [vmem:[%s2966_s28 + $0x1f8] sm:$0xff] %v570_v31 }
  0x63 PF: > { %585 = sbr.rel (!%p2869_p11) target bundleno = 111 (0x6f), region = 85  ;;  %s587_s0 = sand.u32 (%p2869_p11), 1, %s2705_s16  }
  0x64   : > { %s2372_s27 = sshll.u32 (%p2869_p11), %s2737_s24, 3  ;;  %s2242_s10 = sshll.u32 (%p2869_p11), %s587_s0, 7 }
  0x65   : > { %s3100_s30 = scalar_lea.vmem (%p2869_p11), %s3367_s3, %s2372_s27  ;;  %s589_s7 = scalar_lea.vmem (%p2869_p11), [#allocation5], %s2242_s10 }
  0x66   : > { %v653_v32 = vld [vmem:[%s3100_s30] sm:$0xff] (%p2869_p11)  ;;  %v655_v33 = vld [vmem:[%s3100_s30 + $0x10] sm:$0xff] (%p2869_p11) }
  0x67   : > { %v657_v34 = vld [vmem:[%s3100_s30 + $0x20] sm:$0xff] (%p2869_p11)  ;;  %654 = vst [vmem:[%s589_s7] sm:$0xff] (%p2869_p11), %v653_v32  ;;  %656 = vst [vmem:[%s589_s7 + $0x8] sm:$0xff] (%p2869_p11), %v655_v33  ;;  %v659_v35 = vld [vmem:[%s3100_s30 + $0x30] sm:$0xff] (%p2869_p11) }
  0x68   : > { %658 = vst [vmem:[%s589_s7 + $0x10] sm:$0xff] (%p2869_p11), %v657_v34  ;;  %v661_v36 = vld [vmem:[%s3100_s30 + $0x40] sm:$0xff] (%p2869_p11)  ;;  %v663_v37 = vld [vmem:[%s3100_s30 + $0x50] sm:$0xff] (%p2869_p11)  ;;  %660 = vst [vmem:[%s589_s7 + $0x18] sm:$0xff] (%p2869_p11), %v659_v35 }
  0x69   : > { %662 = vst [vmem:[%s589_s7 + $0x20] sm:$0xff] (%p2869_p11), %v661_v36  ;;  %664 = vst [vmem:[%s589_s7 + $0x28] sm:$0xff] (%p2869_p11), %v663_v37  ;;  %v665_v38 = vld [vmem:[%s3100_s30 + $0x60] sm:$0xff] (%p2869_p11)  ;;  %v667_v39 = vld [vmem:[%s3100_s30 + $0x70] sm:$0xff] (%p2869_p11) }
  0x6a   : > { %v669_v40 = vld [vmem:[%s3100_s30 + $0x80] sm:$0xff]  ;;  %666 = vst [vmem:[%s589_s7 + $0x30] sm:$0xff] %v665_v38  ;;  %668 = vst [vmem:[%s589_s7 + $0x38] sm:$0xff] %v667_v39  ;;  %v671_v41 = vld [vmem:[%s3100_s30 + $0x90] sm:$0xff] }
  0x6b   : > { %670 = vst [vmem:[%s589_s7 + $0x40] sm:$0xff] %v669_v40  ;;  %v673_v42 = vld [vmem:[%s3100_s30 + $0xa0] sm:$0xff]  ;;  %v675_v43 = vld [vmem:[%s3100_s30 + $0xb0] sm:$0xff]  ;;  %672 = vst [vmem:[%s589_s7 + $0x48] sm:$0xff] %v671_v41 }
  0x6c   : > { %674 = vst [vmem:[%s589_s7 + $0x50] sm:$0xff] %v673_v42  ;;  %676 = vst [vmem:[%s589_s7 + $0x58] sm:$0xff] %v675_v43  ;;  %v677_v44 = vld [vmem:[%s3100_s30 + $0xc0] sm:$0xff]  ;;  %v679_v45 = vld [vmem:[%s3100_s30 + $0xd0] sm:$0xff] }
  0x6d   : > { %v681_v46 = vld [vmem:[%s3100_s30 + $0xe0] sm:$0xff]  ;;  %678 = vst [vmem:[%s589_s7 + $0x60] sm:$0xff] %v677_v44  ;;  %680 = vst [vmem:[%s589_s7 + $0x68] sm:$0xff] %v679_v45  ;;  %v683_v47 = vld [vmem:[%s3100_s30 + $0xf0] sm:$0xff] }
  0x6e   : > { %682 = vst [vmem:[%s589_s7 + $0x70] sm:$0xff] %v681_v46  ;;  %684 = vst [vmem:[%s589_s7 + $0x78] sm:$0xff] %v683_v47 }
  0x6f PF: > { %p2245_p1 = scmp.ge.s32.totalorder %s2741_s25, 1  ;;  %p689_p2 = scmp.lt.s32.totalorder %s2741_s25, 19 }
  0x71   : > { %p690_p3 = pnand %p2245_p1, %p689_p2 }
  0x72   : > { %s696_s14 = sand.u32 (!%p690_p3), 1, %s2717_s19   ;;  %s703_s6 = sand.u32 (!%p690_p3), 1, %s2709_s17  }
  0x73   : > { %693 = sbr.rel (%p690_p3) target bundleno = 522 (0x20a), region = 123  ;;  %s2246_s8 = sshll.u32 (!%p690_p3), %s696_s14, 8 }
  0x74   : > { %s2247_s9 = sshll.u32 (!%p690_p3), %s703_s6, 9  ;;  %s710_s11 = sand.u32 (!%p690_p3), 1, %s2701_s15  }
  0x75   : > { %s2250_s28 = sshll.u32 (!%p690_p3), %s2729_s22, 1  ;;  %s2248_s0 = sshll.u32 (!%p690_p3), %s710_s11, 7 }
  0x76   : > { %p751_p4 = scmp.lt.s32.totalorder (!%p690_p3), %s2250_s28, 3  ;;  %s3130_s5 = scalar_lea.vmem (!%p690_p3), [#allocation3], %s2246_s8 }
  0x77   : > { %s3132_s30 = scalar_lea.vmem (!%p690_p3), [#allocation4], %s2247_s9  ;;  %s3134_s7 = scalar_lea.vmem (!%p690_p3), [#allocation5], %s2248_s0 }
  0x78   : > { %s3136_s17 = scalar_lea.vmem (!%p690_p3), [#allocation6], %s2248_s0  ;;  %p2251_p5 = scmp.ne.s32.totalorder (!%p690_p3), %s2725_s21, 0 }
  0x7a   : > { %s3400_s28 = smov (!%p751_p4, %s2250_s28), 3  ;;  %762 = sbr.rel (%p2251_p5) target bundleno = 140 (0x8c), region = 139 }
  0x7b   : > { %s753_s26 = scalar_lea.vmem %s3366_s2, %s3400_s28  ;;  %v2743_v48 = vmov (!%p2251_p5), 0.0  }
  0x7c   : > { %763 = vst [vmem:[#allocation2] sm:$0xff] (!%p2251_p5), %v2743_v48  ;;  %764 = vst [vmem:[#allocation2 + $0x8] sm:$0xff] (!%p2251_p5), %v2743_v48 }
  0x7d   : > { %765 = vst [vmem:[#allocation2 + $0x10] sm:$0xff] (!%p2251_p5), %v2743_v48  ;;  %766 = vst [vmem:[#allocation2 + $0x18] sm:$0xff] (!%p2251_p5), %v2743_v48 }
  0x7e   : > { %767 = vst [vmem:[#allocation2 + $0x20] sm:$0xff] (!%p2251_p5), %v2743_v48  ;;  %768 = vst [vmem:[#allocation2 + $0x28] sm:$0xff] (!%p2251_p5), %v2743_v48 }
  0x7f   : > { %769 = vst [vmem:[#allocation2 + $0x30] sm:$0xff] (!%p2251_p5), %v2743_v48  ;;  %770 = vst [vmem:[#allocation2 + $0x38] sm:$0xff] (!%p2251_p5), %v2743_v48 }
  0x80   : > { %771 = vst [vmem:[#allocation2 + $0x40] sm:$0xff] (!%p2251_p5), %v2743_v48  ;;  %772 = vst [vmem:[#allocation2 + $0x48] sm:$0xff] (!%p2251_p5), %v2743_v48 }
  0x81   : > { %773 = vst [vmem:[#allocation2 + $0x50] sm:$0xff] %v2743_v48  ;;  %774 = vst [vmem:[#allocation2 + $0x58] sm:$0xff] %v2743_v48 }
  0x82   : > { %775 = vst [vmem:[#allocation2 + $0x60] sm:$0xff] %v2743_v48  ;;  %776 = vst [vmem:[#allocation2 + $0x68] sm:$0xff] %v2743_v48 }
  0x83   : > { %777 = vst [vmem:[#allocation2 + $0x70] sm:$0xff] %v2743_v48  ;;  %778 = vst [vmem:[#allocation2 + $0x78] sm:$0xff] %v2743_v48 }
  0x84   : > { %779 = vst [vmem:[#allocation2 + $0x80] sm:$0xff] %v2743_v48  ;;  %780 = vst [vmem:[#allocation2 + $0x88] sm:$0xff] %v2743_v48 }
  0x85   : > { %781 = vst [vmem:[#allocation2 + $0x90] sm:$0xff] %v2743_v48  ;;  %782 = vst [vmem:[#allocation2 + $0x98] sm:$0xff] %v2743_v48 }
  0x86   : > { %783 = vst [vmem:[#allocation2 + $0xa0] sm:$0xff] %v2743_v48  ;;  %784 = vst [vmem:[#allocation2 + $0xa8] sm:$0xff] %v2743_v48 }
  0x87   : > { %785 = vst [vmem:[#allocation2 + $0xb0] sm:$0xff] %v2743_v48  ;;  %786 = vst [vmem:[#allocation2 + $0xb8] sm:$0xff] %v2743_v48 }
  0x88   : > { %787 = vst [vmem:[#allocation2 + $0xc0] sm:$0xff] %v2743_v48  ;;  %788 = vst [vmem:[#allocation2 + $0xc8] sm:$0xff] %v2743_v48 }
  0x89   : > { %789 = vst [vmem:[#allocation2 + $0xd0] sm:$0xff] %v2743_v48  ;;  %790 = vst [vmem:[#allocation2 + $0xd8] sm:$0xff] %v2743_v48 }
  0x8a   : > { %791 = vst [vmem:[#allocation2 + $0xe0] sm:$0xff] %v2743_v48  ;;  %792 = vst [vmem:[#allocation2 + $0xe8] sm:$0xff] %v2743_v48 }
  0x8b   : > { %793 = vst [vmem:[#allocation2 + $0xf0] sm:$0xff] %v2743_v48  ;;  %794 = vst [vmem:[#allocation2 + $0xf8] sm:$0xff] %v2743_v48 }
  0x8c PF: > { %v2511_v49 = vld [vmem:[%s3132_s30 + $0x4] ss:$8 sps:$4 sm:$0xff]   ;;  %v2515_v51 = vld [vmem:[%s3132_s30] ss:$8 sps:$4 sm:$0xff]   ;;  %v2517_v53 = vld [vmem:[%s3132_s30 + $0x14] ss:$8 sps:$4 sm:$0xff]  }
  0x8d   : > { %v2513_v50 = vld [vmem:[%s3132_s30 + $0x104] ss:$8 sps:$4 sm:$0xff]   ;;  %1403 = vmatprep.subr.bf16.mxu1 %v2511_v49  ;;  %v2516_v52 = vld [vmem:[%s3132_s30 + $0x100] ss:$8 sps:$4 sm:$0xff]   ;;  %v2519_v54 = vld [vmem:[%s3132_s30 + $0x114] ss:$8 sps:$4 sm:$0xff]  }
  0x8e   : > { %1516 = vmatprep.subr.bf16.mxu0 %v2513_v50  ;;  %1404 = vmatpush1.bf16.msra.mxu1 %v2515_v51  ;;  %v2521_v55 = vld [vmem:[%s3132_s30 + $0x10] ss:$8 sps:$4 sm:$0xff]   ;;  %v2523_v57 = vld [vmem:[%s3132_s30 + $0x24] ss:$8 sps:$4 sm:$0xff]   ;;  %v2527_v59 = vld [vmem:[%s3132_s30 + $0x20] ss:$8 sps:$4 sm:$0xff]  }
  0x8f   : > { %1517 = vmatpush1.bf16.msra.mxu0 %v2516_v52  ;;  %1405 = vmatprep.subr.bf16.mxu1 %v2517_v53  ;;  %v2522_v56 = vld [vmem:[%s3132_s30 + $0x110] ss:$8 sps:$4 sm:$0xff]   ;;  %v2525_v58 = vld [vmem:[%s3132_s30 + $0x124] ss:$8 sps:$4 sm:$0xff]   ;;  %v2528_v60 = vld [vmem:[%s3132_s30 + $0x120] ss:$8 sps:$4 sm:$0xff]  }
  0x90   : > { %1518 = vmatprep.subr.bf16.mxu0 %v2519_v54  ;;  %v2529_v61 = vld [vmem:[%s3132_s30 + $0x34] ss:$8 sps:$4 sm:$0xff]   ;;  %v2533_v63 = vld [vmem:[%s3132_s30 + $0x30] ss:$8 sps:$4 sm:$0xff]   ;;  %v2535_v1 = vld [vmem:[%s3132_s30 + $0x44] ss:$8 sps:$4 sm:$0xff]  }
  0x91   : > { %v2531_v62 = vld [vmem:[%s3132_s30 + $0x134] ss:$8 sps:$4 sm:$0xff]   ;;  %v2534_v0 = vld [vmem:[%s3132_s30 + $0x130] ss:$8 sps:$4 sm:$0xff]   ;;  %v2537_v2 = vld [vmem:[%s3132_s30 + $0x144] ss:$8 sps:$4 sm:$0xff]  }
  0x92   : > { %1406 = vmatpush1.bf16.msra.mxu1 %v2521_v55  ;;  %v2539_v3 = vld [vmem:[%s3132_s30 + $0x40] ss:$8 sps:$4 sm:$0xff]   ;;  %v2541_v5 = vld [vmem:[%s3132_s30 + $0x54] ss:$8 sps:$4 sm:$0xff]   ;;  %v2545_v7 = vld [vmem:[%s3132_s30 + $0x50] ss:$8 sps:$4 sm:$0xff]  }
  0x93   : > { %1519 = vmatpush1.bf16.msra.mxu0 %v2522_v56  ;;  %1407 = vmatprep.subr.bf16.mxu1 %v2523_v57  ;;  %v2540_v4 = vld [vmem:[%s3132_s30 + $0x140] ss:$8 sps:$4 sm:$0xff]   ;;  %v2543_v6 = vld [vmem:[%s3132_s30 + $0x154] ss:$8 sps:$4 sm:$0xff]   ;;  %v2546_v8 = vld [vmem:[%s3132_s30 + $0x150] ss:$8 sps:$4 sm:$0xff]  }
  0x94   : > { %1520 = vmatprep.subr.bf16.mxu0 %v2525_v58  ;;  %v2547_v9 = vld [vmem:[%s3132_s30 + $0x64] ss:$8 sps:$4 sm:$0xff]   ;;  %v2551_v11 = vld [vmem:[%s3132_s30 + $0x60] ss:$8 sps:$4 sm:$0xff]   ;;  %v2553_v13 = vld [vmem:[%s3132_s30 + $0x74] ss:$8 sps:$4 sm:$0xff]  }
  0x95   : > { %v2549_v10 = vld [vmem:[%s3132_s30 + $0x164] ss:$8 sps:$4 sm:$0xff]   ;;  %v2552_v12 = vld [vmem:[%s3132_s30 + $0x160] ss:$8 sps:$4 sm:$0xff]   ;;  %v2555_v14 = vld [vmem:[%s3132_s30 + $0x174] ss:$8 sps:$4 sm:$0xff]  }
  0x96   : > { %1408 = vmatpush1.bf16.msra.mxu1 %v2527_v59  ;;  %v2557_v15 = vld [vmem:[%s3132_s30 + $0x70] ss:$8 sps:$4 sm:$0xff]   ;;  %v2559_v17 = vld [vmem:[%s3132_s30 + $0x84] ss:$8 sps:$4 sm:$0xff]   ;;  %v2563_v19 = vld [vmem:[%s3132_s30 + $0x80] ss:$8 sps:$4 sm:$0xff]  }
  0x97   : > { %1521 = vmatpush1.bf16.msra.mxu0 %v2528_v60  ;;  %1409 = vmatprep.subr.bf16.mxu1 %v2529_v61  ;;  %v2558_v16 = vld [vmem:[%s3132_s30 + $0x170] ss:$8 sps:$4 sm:$0xff]   ;;  %v2561_v18 = vld [vmem:[%s3132_s30 + $0x184] ss:$8 sps:$4 sm:$0xff]   ;;  %v2564_v20 = vld [vmem:[%s3132_s30 + $0x180] ss:$8 sps:$4 sm:$0xff]  }
  0x98   : > { %1522 = vmatprep.subr.bf16.mxu0 %v2531_v62  ;;  %v2565_v21 = vld [vmem:[%s3132_s30 + $0x94] ss:$8 sps:$4 sm:$0xff]   ;;  %v2569_v23 = vld [vmem:[%s3132_s30 + $0x90] ss:$8 sps:$4 sm:$0xff]   ;;  %v2571_v25 = vld [vmem:[%s3132_s30 + $0xa4] ss:$8 sps:$4 sm:$0xff]  }
  0x99   : > { %v2567_v22 = vld [vmem:[%s3132_s30 + $0x194] ss:$8 sps:$4 sm:$0xff]   ;;  %v2570_v24 = vld [vmem:[%s3132_s30 + $0x190] ss:$8 sps:$4 sm:$0xff]   ;;  %v2573_v26 = vld [vmem:[%s3132_s30 + $0x1a4] ss:$8 sps:$4 sm:$0xff]  }
  0x9a   : > { %1410 = vmatpush1.bf16.msra.mxu1 %v2533_v63  ;;  %v2575_v27 = vld [vmem:[%s3132_s30 + $0xa0] ss:$8 sps:$4 sm:$0xff]   ;;  %v2577_v29 = vld [vmem:[%s3132_s30 + $0xb4] ss:$8 sps:$4 sm:$0xff]   ;;  %v2581_v31 = vld [vmem:[%s3132_s30 + $0xb0] ss:$8 sps:$4 sm:$0xff]  }
  0x9b   : > { %1523 = vmatpush1.bf16.msra.mxu0 %v2534_v0  ;;  %1411 = vmatprep.subr.bf16.mxu1 %v2535_v1  ;;  %v2576_v28 = vld [vmem:[%s3132_s30 + $0x1a0] ss:$8 sps:$4 sm:$0xff]   ;;  %v2579_v30 = vld [vmem:[%s3132_s30 + $0x1b4] ss:$8 sps:$4 sm:$0xff]   ;;  %v2582_v32 = vld [vmem:[%s3132_s30 + $0x1b0] ss:$8 sps:$4 sm:$0xff]  }
  0x9c   : > { %1524 = vmatprep.subr.bf16.mxu0 %v2537_v2  ;;  %v2583_v33 = vld [vmem:[%s3132_s30 + $0xc4] ss:$8 sps:$4 sm:$0xff]   ;;  %v2587_v37 = vld [vmem:[%s3132_s30 + $0xc0] ss:$8 sps:$4 sm:$0xff]   ;;  %v2589_v39 = vld [vmem:[%s3132_s30 + $0xd4] ss:$8 sps:$4 sm:$0xff]  }
  0x9d   : > { %v2609_v34 = vld [vmem:[%s3130_s5 + $0x4] ss:$16 sps:$4 sm:$0xff]   ;;  %v2612_v36 = vld [vmem:[%s3130_s5 + $0xc] ss:$16 sps:$4 sm:$0xff]   ;;  %v2588_v38 = vld [vmem:[%s3132_s30 + $0x1c0] ss:$8 sps:$4 sm:$0xff]  }
  0x9e   : > { %1412 = vmatpush1.bf16.msra.mxu1 %v2539_v3  ;;  %v2585_v35 = vld [vmem:[%s3132_s30 + $0x1c4] ss:$8 sps:$4 sm:$0xff]   ;;  %1435 = vmatprep.mubr.bf16.mxu1 %v2609_v34  ;;  %v2591_v40 = vld [vmem:[%s3132_s30 + $0x1d4] ss:$8 sps:$4 sm:$0xff]   ;;  %v2593_v41 = vld [vmem:[%s3132_s30 + $0xd0] ss:$8 sps:$4 sm:$0xff]  }
  0x9f   : > { %1525 = vmatpush1.bf16.msra.mxu0 %v2540_v4  ;;  %1413 = vmatprep.subr.bf16.mxu1 %v2541_v5  ;;  %v2594_v42 = vld [vmem:[%s3132_s30 + $0x1d0] ss:$8 sps:$4 sm:$0xff]   ;;  %v2595_v43 = vld [vmem:[%s3132_s30 + $0xe4] ss:$8 sps:$4 sm:$0xff]   ;;  %v2599_v45 = vld [vmem:[%s3132_s30 + $0xe0] ss:$8 sps:$4 sm:$0xff]  }
  0xa0   : > { %1526 = vmatprep.subr.bf16.mxu0 %v2543_v6  ;;  %1548 = vmatprep.mubr.bf16.mxu0 %v2612_v36  ;;  %v2597_v44 = vld [vmem:[%s3132_s30 + $0x1e4] ss:$8 sps:$4 sm:$0xff]   ;;  %v2600_v46 = vld [vmem:[%s3132_s30 + $0x1e0] ss:$8 sps:$4 sm:$0xff]   ;;  %v2601_v47 = vld [vmem:[%s3132_s30 + $0xf4] ss:$8 sps:$4 sm:$0xff]  }
  0xa1   : > { %v2603_v48 = vld [vmem:[%s3132_s30 + $0x1f4] ss:$8 sps:$4 sm:$0xff]   ;;  %v2605_v49 = vld [vmem:[%s3132_s30 + $0xf0] ss:$8 sps:$4 sm:$0xff]   ;;  %p2348_p6 = scmp.ne.s32.totalorder %s2725_s21, 8 }
  0xa2   : > { %1414 = vmatpush1.bf16.msra.mxu1 %v2545_v7  ;;  %v2606_v50 = vld [vmem:[%s3132_s30 + $0x1f0] ss:$8 sps:$4 sm:$0xff]   ;;  %v2613_v53 = vld [vmem:[%s3130_s5 + $0x24] ss:$16 sps:$4 sm:$0xff]   ;;  %v2615_v54 = vld [vmem:[%s3130_s5 + $0x2c] ss:$16 sps:$4 sm:$0xff]  }
  0xa3   : > { %1527 = vmatpush1.bf16.msra.mxu0 %v2546_v8  ;;  %1415 = vmatprep.subr.bf16.mxu1 %v2547_v9  ;;  %v2607_v51 = vld [vmem:[%s3130_s5] ss:$16 sps:$4 sm:$0xff]   ;;  %v2610_v52 = vld [vmem:[%s3130_s5 + $0x8] ss:$16 sps:$4 sm:$0xff]   ;;  %v2619_v57 = vld [vmem:[%s3130_s5 + $0x44] ss:$16 sps:$4 sm:$0xff]  }
  0xa4   : > { %1528 = vmatprep.subr.bf16.mxu0 %v2549_v10  ;;  %v2617_v55 = vld [vmem:[%s3130_s5 + $0x20] ss:$16 sps:$4 sm:$0xff]   ;;  %v2618_v56 = vld [vmem:[%s3130_s5 + $0x28] ss:$16 sps:$4 sm:$0xff]   ;;  %v2621_v58 = vld [vmem:[%s3130_s5 + $0x4c] ss:$16 sps:$4 sm:$0xff]  }
  0xa5   : > { %v2623_v59 = vld [vmem:[%s3130_s5 + $0x40] ss:$16 sps:$4 sm:$0xff]   ;;  %v2624_v60 = vld [vmem:[%s3130_s5 + $0x48] ss:$16 sps:$4 sm:$0xff]   ;;  %v2625_v61 = vld [vmem:[%s3130_s5 + $0x64] ss:$16 sps:$4 sm:$0xff]  }
  0xa6   : > { %1416 = vmatpush1.bf16.msra.mxu1 %v2551_v11  ;;  %v2627_v62 = vld [vmem:[%s3130_s5 + $0x6c] ss:$16 sps:$4 sm:$0xff]   ;;  %v2629_v63 = vld [vmem:[%s3130_s5 + $0x60] ss:$16 sps:$4 sm:$0xff]   ;;  %v2630_v0 = vld [vmem:[%s3130_s5 + $0x68] ss:$16 sps:$4 sm:$0xff]  }
  0xa7   : > { %1529 = vmatpush1.bf16.msra.mxu0 %v2552_v12  ;;  %1417 = vmatprep.subr.bf16.mxu1 %v2553_v13  ;;  %v2631_v1 = vld [vmem:[%s3130_s5 + $0x84] ss:$16 sps:$4 sm:$0xff]   ;;  %v2633_v2 = vld [vmem:[%s3130_s5 + $0x8c] ss:$16 sps:$4 sm:$0xff]   ;;  %v2635_v3 = vld [vmem:[%s3130_s5 + $0x80] ss:$16 sps:$4 sm:$0xff]  }
  0xa8   : > { %1530 = vmatprep.subr.bf16.mxu0 %v2555_v14  ;;  %v2636_v4 = vld [vmem:[%s3130_s5 + $0x88] ss:$16 sps:$4 sm:$0xff]   ;;  %v2637_v5 = vld [vmem:[%s3130_s5 + $0xa4] ss:$16 sps:$4 sm:$0xff]   ;;  %v2639_v6 = vld [vmem:[%s3130_s5 + $0xac] ss:$16 sps:$4 sm:$0xff]  }
  0xa9   : > { %v2641_v7 = vld [vmem:[%s3130_s5 + $0xa0] ss:$16 sps:$4 sm:$0xff]   ;;  %v2642_v8 = vld [vmem:[%s3130_s5 + $0xa8] ss:$16 sps:$4 sm:$0xff]   ;;  %v2643_v9 = vld [vmem:[%s3130_s5 + $0xc4] ss:$16 sps:$4 sm:$0xff]  }
  0xaa   : > { %1418 = vmatpush1.bf16.msra.mxu1 %v2557_v15  ;;  %v2645_v10 = vld [vmem:[%s3130_s5 + $0xcc] ss:$16 sps:$4 sm:$0xff]   ;;  %v2647_v11 = vld [vmem:[%s3130_s5 + $0xc0] ss:$16 sps:$4 sm:$0xff]   ;;  %v2648_v12 = vld [vmem:[%s3130_s5 + $0xc8] ss:$16 sps:$4 sm:$0xff]  }
  0xab   : > { %1531 = vmatpush1.bf16.msra.mxu0 %v2558_v16  ;;  %1419 = vmatprep.subr.bf16.mxu1 %v2559_v17  ;;  %v2649_v13 = vld [vmem:[%s3130_s5 + $0xe4] ss:$16 sps:$4 sm:$0xff]   ;;  %v2651_v14 = vld [vmem:[%s3130_s5 + $0xec] ss:$16 sps:$4 sm:$0xff]   ;;  %v2653_v15 = vld [vmem:[%s3130_s5 + $0xe0] ss:$16 sps:$4 sm:$0xff]  }
  0xac   : > { %1532 = vmatprep.subr.bf16.mxu0 %v2561_v18  ;;  %v2654_v16 = vld [vmem:[%s3130_s5 + $0xe8] ss:$16 sps:$4 sm:$0xff]   ;;  %v795_v18 = vld [vmem:[#allocation2] sm:$0xff] }
  0xae   : > { %1420 = vmatpush1.bf16.msra.mxu1 %v2563_v19 }
  0xaf   : > { %1533 = vmatpush1.bf16.msra.mxu0 %v2564_v20  ;;  %1421 = vmatprep.subr.bf16.mxu1 %v2565_v21 }
  0xb0   : > { %1534 = vmatprep.subr.bf16.mxu0 %v2567_v22  ;;  %v796_v22 = vld [vmem:[#allocation2 + $0x8] sm:$0xff] }
  0xb2   : > { %1422 = vmatpush1.bf16.msra.mxu1 %v2569_v23 }
  0xb3   : > { %1535 = vmatpush1.bf16.msra.mxu0 %v2570_v24  ;;  %1423 = vmatprep.subr.bf16.mxu1 %v2571_v25 }
  0xb4   : > { %1536 = vmatprep.subr.bf16.mxu0 %v2573_v26  ;;  %v797_v26 = vld [vmem:[#allocation2 + $0x10] sm:$0xff] }
  0xb6   : > { %1424 = vmatpush1.bf16.msra.mxu1 %v2575_v27 }
  0xb7   : > { %1537 = vmatpush1.bf16.msra.mxu0 %v2576_v28  ;;  %1425 = vmatprep.subr.bf16.mxu1 %v2577_v29 }
  0xb8   : > { %1538 = vmatprep.subr.bf16.mxu0 %v2579_v30 }
  0xba   : > { %1426 = vmatpush1.bf16.msra.mxu1 %v2581_v31  ;;  %v798_v31 = vld [vmem:[#allocation2 + $0x18] sm:$0xff] }
  0xbb   : > { %1539 = vmatpush1.bf16.msra.mxu0 %v2582_v32  ;;  %1427 = vmatprep.subr.bf16.mxu1 %v2583_v33 }
  0xbc   : > { %1540 = vmatprep.subr.bf16.mxu0 %v2585_v35 }
  0xbe   : > { %1428 = vmatpush1.bf16.msra.mxu1 %v2587_v37 }
  0xbf   : > { %1541 = vmatpush1.bf16.msra.mxu0 %v2588_v38  ;;  %1429 = vmatprep.subr.bf16.mxu1 %v2589_v39  ;;  %v799_v38 = vld [vmem:[#allocation2 + $0x20] sm:$0xff] }
  0xc0   : > { %1542 = vmatprep.subr.bf16.mxu0 %v2591_v40 }
  0xc2   : > { %1430 = vmatpush1.bf16.msra.mxu1 %v2593_v41 }
  0xc3   : > { %1543 = vmatpush1.bf16.msra.mxu0 %v2594_v42  ;;  %1431 = vmatprep.subr.bf16.mxu1 %v2595_v43  ;;  %v800_v42 = vld [vmem:[#allocation2 + $0x28] sm:$0xff] }
  0xc4   : > { %1544 = vmatprep.subr.bf16.mxu0 %v2597_v44 }
  0xc6   : > { %1432 = vmatpush1.bf16.msra.mxu1 %v2599_v45 }
  0xc7   : > { %1545 = vmatpush1.bf16.msra.mxu0 %v2600_v46  ;;  %1433 = vmatprep.subr.bf16.mxu1 %v2601_v47  ;;  %v801_v46 = vld [vmem:[#allocation2 + $0x30] sm:$0xff] }
  0xc8   : > { %1546 = vmatprep.subr.bf16.mxu0 %v2603_v48 }
  0xca   : > { %1434 = vmatpush1.bf16.msra.mxu1 %v2605_v49 }
  0xcb   : > { %1547 = vmatpush1.bf16.msra.mxu0 %v2606_v50 }
  0xcd   : > { %1436 = vmatmul.mubr.bf16.vlgmr.msra.gmra.mrb[0].mxu1 %v2607_v51  ;;  %v802_v51 = vld [vmem:[#allocation2 + $0x38] sm:$0xff] }
  0xce   : > { %1549 = vmatmul.mubr.bf16.vlgmr.msra.gmra.mrb[0].mxu0 %v2610_v52  ;;  %1445 = vmatprep.mubr.bf16.mxu1 %v2613_v53 }
  0xcf   : > { %1558 = vmatprep.mubr.bf16.mxu0 %v2615_v54 }
  0xd5   : > { %1446 = vmatmul.mubr.bf16.gmra.mrb[4].mxu1 %v2617_v55 }
  0xd6   : > { %1559 = vmatmul.mubr.bf16.gmra.mrb[4].mxu0 %v2618_v56  ;;  %1455 = vmatprep.mubr.bf16.mxu1 %v2619_v57 }
  0xd7   : > { %1568 = vmatprep.mubr.bf16.mxu0 %v2621_v58  ;;  %v803_v58 = vld [vmem:[#allocation2 + $0x40] sm:$0xff] }
  0xdd   : > { %1456 = vmatmul.mubr.bf16.gmra.mrb[8].mxu1 %v2623_v59 }
  0xde   : > { %1569 = vmatmul.mubr.bf16.gmra.mrb[8].mxu0 %v2624_v60  ;;  %1465 = vmatprep.mubr.bf16.mxu1 %v2625_v61 }
  0xdf   : > { %1578 = vmatprep.mubr.bf16.mxu0 %v2627_v62  ;;  %v804_v62 = vld [vmem:[#allocation2 + $0x48] sm:$0xff] }
  0xe5   : > { %1466 = vmatmul.mubr.bf16.gmra.mrb[12].mxu1 %v2629_v63 }
  0xe6   : > { %1579 = vmatmul.mubr.bf16.gmra.mrb[12].mxu0 %v2630_v0  ;;  %1475 = vmatprep.mubr.bf16.mxu1 %v2631_v1 }
  0xe7   : > { %1588 = vmatprep.mubr.bf16.mxu0 %v2633_v2  ;;  %v805_v2 = vld [vmem:[#allocation2 + $0x50] sm:$0xff] }
  0xed   : > { %1476 = vmatmul.mubr.bf16.gmra.mrb[16].mxu1 %v2635_v3 }
  0xee   : > { %1589 = vmatmul.mubr.bf16.gmra.mrb[16].mxu0 %v2636_v4  ;;  %1485 = vmatprep.mubr.bf16.mxu1 %v2637_v5 }
  0xef   : > { %1598 = vmatprep.mubr.bf16.mxu0 %v2639_v6 }
  0xf5   : > { %1486 = vmatmul.mubr.bf16.gmra.mrb[20].mxu1 %v2641_v7  ;;  %v806_v7 = vld [vmem:[#allocation2 + $0x58] sm:$0xff] }
  0xf6   : > { %1599 = vmatmul.mubr.bf16.gmra.mrb[20].mxu0 %v2642_v8  ;;  %1495 = vmatprep.mubr.bf16.mxu1 %v2643_v9 }
  0xf7   : > { %1608 = vmatprep.mubr.bf16.mxu0 %v2645_v10 }
  0xfd   : > { %1496 = vmatmul.mubr.bf16.gmra.mrb[24].mxu1 %v2647_v11 }
  0xfe   : > { %1609 = vmatmul.mubr.bf16.gmra.mrb[24].mxu0 %v2648_v12  ;;  %1505 = vmatprep.mubr.bf16.mxu1 %v2649_v13 }
  0xff   : > { %1618 = vmatprep.mubr.bf16.mxu0 %v2651_v14  ;;  %v807_v14 = vld [vmem:[#allocation2 + $0x60] sm:$0xff] }
 0x105   : > { %1506 = vmatmul.mubr.bf16.gmra.mrb[28].mxu1 %v2653_v15 }
 0x106   : > { %1619 = vmatmul.mubr.bf16.gmra.mrb[28].mxu0 %v2654_v16 }
 0x1a0   : > { %v1437_v17 = vpop.f32.mrb[0].mxu1 }
 0x1a1   : > { %v1550_v19 = vpop.f32.mrb[0].mxu0  ;;  %v1439_v21 = vpop.f32.mrb[1].mxu1 }
 0x1a2   : > { %v1551_v20 = vadd.f32 %v1550_v19, %v1437_v17  ;;  %v1552_v23 = vpop.f32.mrb[1].mxu0  ;;  %v1441_v25 = vpop.f32.mrb[2].mxu1 }
 0x1a3   : > { %v1553_v24 = vadd.f32 %v1552_v23, %v1439_v21  ;;  %v1554_v27 = vpop.f32.mrb[2].mxu0  ;;  %v1443_v30 = vpop.f32.mrb[3].mxu1 }
 0x1a4   : > { %v1629_v28 = vadd.f32 %v1551_v20, %v795_v18  ;;  %v1555_v29 = vadd.f32 %v1554_v27, %v1441_v25  ;;  %v1556_v32 = vpop.f32.mrb[3].mxu0  ;;  %v808_v18 = vld [vmem:[#allocation2 + $0x68] sm:$0xff]  ;;  %v810_v27 = vld [vmem:[#allocation2 + $0x78] sm:$0xff] }
 0x1a5   : > { %v1630_v33 = vadd.f32 %v1553_v24, %v796_v22  ;;  %v1557_v34 = vadd.f32 %v1556_v32, %v1443_v30  ;;  %v809_v22 = vld [vmem:[#allocation2 + $0x70] sm:$0xff] }
 0x1a6   : > { %1661 = vst [vmem:[#allocation2] sm:$0xff] %v1629_v28  ;;  %v1631_v35 = vadd.f32 %v1555_v29, %v797_v26 }
 0x1a7   : > { %1662 = vst [vmem:[#allocation2 + $0x8] sm:$0xff] %v1630_v33  ;;  %v1632_v36 = vadd.f32 %v1557_v34, %v798_v31  ;;  %v811_v34 = vld [vmem:[#allocation2 + $0x80] sm:$0xff] }
 0x1a8   : > { %1663 = vst [vmem:[#allocation2 + $0x10] sm:$0xff] %v1631_v35  ;;  %v1447_v37 = vpop.f32.mrb[4].mxu1 }
 0x1a9   : > { %1664 = vst [vmem:[#allocation2 + $0x18] sm:$0xff] %v1632_v36  ;;  %v1560_v39 = vpop.f32.mrb[4].mxu0  ;;  %v1449_v41 = vpop.f32.mrb[5].mxu1 }
 0x1aa   : > { %v1561_v40 = vadd.f32 %v1560_v39, %v1447_v37  ;;  %v1562_v43 = vpop.f32.mrb[5].mxu0  ;;  %v1451_v45 = vpop.f32.mrb[6].mxu1 }
 0x1ab   : > { %v1563_v44 = vadd.f32 %v1562_v43, %v1449_v41  ;;  %v1564_v47 = vpop.f32.mrb[6].mxu0  ;;  %v1453_v50 = vpop.f32.mrb[7].mxu1 }
 0x1ac   : > { %v1633_v48 = vadd.f32 %v1561_v40, %v799_v38  ;;  %v1565_v49 = vadd.f32 %v1564_v47, %v1451_v45  ;;  %v1566_v52 = vpop.f32.mrb[7].mxu0  ;;  %v812_v38 = vld [vmem:[#allocation2 + $0x88] sm:$0xff]  ;;  %v814_v47 = vld [vmem:[#allocation2 + $0x98] sm:$0xff] }
 0x1ad   : > { %v1634_v53 = vadd.f32 %v1563_v44, %v800_v42  ;;  %v1567_v54 = vadd.f32 %v1566_v52, %v1453_v50  ;;  %v813_v42 = vld [vmem:[#allocation2 + $0x90] sm:$0xff] }
 0x1ae   : > { %1665 = vst [vmem:[#allocation2 + $0x20] sm:$0xff] %v1633_v48  ;;  %v1635_v55 = vadd.f32 %v1565_v49, %v801_v46 }
 0x1af   : > { %1666 = vst [vmem:[#allocation2 + $0x28] sm:$0xff] %v1634_v53  ;;  %v1636_v56 = vadd.f32 %v1567_v54, %v802_v51  ;;  %v815_v54 = vld [vmem:[#allocation2 + $0xa0] sm:$0xff] }
 0x1b0   : > { %1667 = vst [vmem:[#allocation2 + $0x30] sm:$0xff] %v1635_v55  ;;  %v1457_v57 = vpop.f32.mrb[8].mxu1 }
 0x1b1   : > { %1668 = vst [vmem:[#allocation2 + $0x38] sm:$0xff] %v1636_v56  ;;  %v1570_v59 = vpop.f32.mrb[8].mxu0  ;;  %v1459_v61 = vpop.f32.mrb[9].mxu1 }
 0x1b2   : > { %v1571_v60 = vadd.f32 %v1570_v59, %v1457_v57  ;;  %v1572_v63 = vpop.f32.mrb[9].mxu0  ;;  %v1461_v1 = vpop.f32.mrb[10].mxu1 }
 0x1b3   : > { %v1573_v0 = vadd.f32 %v1572_v63, %v1459_v61  ;;  %v1574_v3 = vpop.f32.mrb[10].mxu0  ;;  %v1463_v6 = vpop.f32.mrb[11].mxu1 }
 0x1b4   : > { %v1637_v4 = vadd.f32 %v1571_v60, %v803_v58  ;;  %v1575_v5 = vadd.f32 %v1574_v3, %v1461_v1  ;;  %v1576_v8 = vpop.f32.mrb[11].mxu0  ;;  %v816_v58 = vld [vmem:[#allocation2 + $0xa8] sm:$0xff]  ;;  %v818_v3 = vld [vmem:[#allocation2 + $0xb8] sm:$0xff] }
 0x1b5   : > { %v1638_v9 = vadd.f32 %v1573_v0, %v804_v62  ;;  %v1577_v10 = vadd.f32 %v1576_v8, %v1463_v6  ;;  %v817_v62 = vld [vmem:[#allocation2 + $0xb0] sm:$0xff] }
 0x1b6   : > { %1669 = vst [vmem:[#allocation2 + $0x40] sm:$0xff] %v1637_v4  ;;  %v1639_v11 = vadd.f32 %v1575_v5, %v805_v2 }
 0x1b7   : > { %1670 = vst [vmem:[#allocation2 + $0x48] sm:$0xff] %v1638_v9  ;;  %v1640_v12 = vadd.f32 %v1577_v10, %v806_v7  ;;  %v819_v10 = vld [vmem:[#allocation2 + $0xc0] sm:$0xff] }
 0x1b8   : > { %1671 = vst [vmem:[#allocation2 + $0x50] sm:$0xff] %v1639_v11  ;;  %v1467_v13 = vpop.f32.mrb[12].mxu1 }
 0x1b9   : > { %1672 = vst [vmem:[#allocation2 + $0x58] sm:$0xff] %v1640_v12  ;;  %v1580_v15 = vpop.f32.mrb[12].mxu0  ;;  %v1469_v17 = vpop.f32.mrb[13].mxu1 }
 0x1ba   : > { %v1581_v16 = vadd.f32 %v1580_v15, %v1467_v13  ;;  %v1582_v19 = vpop.f32.mrb[13].mxu0  ;;  %v1471_v21 = vpop.f32.mrb[14].mxu1 }
 0x1bb   : > { %v1583_v20 = vadd.f32 %v1582_v19, %v1469_v17  ;;  %v1584_v23 = vpop.f32.mrb[14].mxu0  ;;  %v1473_v26 = vpop.f32.mrb[15].mxu1 }
 0x1bc   : > { %v1641_v24 = vadd.f32 %v1581_v16, %v807_v14  ;;  %v1585_v25 = vadd.f32 %v1584_v23, %v1471_v21  ;;  %v1586_v28 = vpop.f32.mrb[15].mxu0  ;;  %v820_v14 = vld [vmem:[#allocation2 + $0xc8] sm:$0xff]  ;;  %v822_v23 = vld [vmem:[#allocation2 + $0xd8] sm:$0xff] }
 0x1bd   : > { %v1642_v29 = vadd.f32 %v1583_v20, %v808_v18  ;;  %v1587_v30 = vadd.f32 %v1586_v28, %v1473_v26  ;;  %v821_v18 = vld [vmem:[#allocation2 + $0xd0] sm:$0xff] }
 0x1be   : > { %1673 = vst [vmem:[#allocation2 + $0x60] sm:$0xff] %v1641_v24  ;;  %v1643_v31 = vadd.f32 %v1585_v25, %v809_v22 }
 0x1bf   : > { %1674 = vst [vmem:[#allocation2 + $0x68] sm:$0xff] %v1642_v29  ;;  %v1644_v32 = vadd.f32 %v1587_v30, %v810_v27  ;;  %v823_v30 = vld [vmem:[#allocation2 + $0xe0] sm:$0xff] }
 0x1c0   : > { %1675 = vst [vmem:[#allocation2 + $0x70] sm:$0xff] %v1643_v31  ;;  %v1477_v33 = vpop.f32.mrb[16].mxu1 }
 0x1c1   : > { %1676 = vst [vmem:[#allocation2 + $0x78] sm:$0xff] %v1644_v32  ;;  %v1590_v35 = vpop.f32.mrb[16].mxu0  ;;  %v1479_v37 = vpop.f32.mrb[17].mxu1 }
 0x1c2   : > { %v1591_v36 = vadd.f32 %v1590_v35, %v1477_v33  ;;  %v1592_v39 = vpop.f32.mrb[17].mxu0  ;;  %v1481_v41 = vpop.f32.mrb[18].mxu1 }
 0x1c3   : > { %v1593_v40 = vadd.f32 %v1592_v39, %v1479_v37  ;;  %v1594_v43 = vpop.f32.mrb[18].mxu0  ;;  %v1483_v46 = vpop.f32.mrb[19].mxu1 }
 0x1c4   : > { %v1645_v44 = vadd.f32 %v1591_v36, %v811_v34  ;;  %v1595_v45 = vadd.f32 %v1594_v43, %v1481_v41  ;;  %v1596_v48 = vpop.f32.mrb[19].mxu0  ;;  %v824_v34 = vld [vmem:[#allocation2 + $0xe8] sm:$0xff]  ;;  %v826_v43 = vld [vmem:[#allocation2 + $0xf8] sm:$0xff] }
 0x1c5   : > { %v1646_v49 = vadd.f32 %v1593_v40, %v812_v38  ;;  %v1597_v50 = vadd.f32 %v1596_v48, %v1483_v46  ;;  %v825_v38 = vld [vmem:[#allocation2 + $0xf0] sm:$0xff] }
 0x1c6   : > { %1677 = vst [vmem:[#allocation2 + $0x80] sm:$0xff] %v1645_v44  ;;  %v1647_v51 = vadd.f32 %v1595_v45, %v813_v42 }
 0x1c7   : > { %1678 = vst [vmem:[#allocation2 + $0x88] sm:$0xff] %v1646_v49  ;;  %v1648_v52 = vadd.f32 %v1597_v50, %v814_v47  ;;  %v1731_v49 = vlaneseq (!%p2348_p6)  ;;  %v1773_v50 = vld [vmem:[%s3134_s7] sm:$0xff] (!%p2348_p6) }
 0x1c8   : > { %1679 = vst [vmem:[#allocation2 + $0x90] sm:$0xff] %v1647_v51  ;;  %v1487_v53 = vpop.f32.mrb[20].mxu1 }
 0x1c9   : > { %1680 = vst [vmem:[#allocation2 + $0x98] sm:$0xff] %v1648_v52  ;;  %v1600_v55 = vpop.f32.mrb[20].mxu0  ;;  %v1489_v57 = vpop.f32.mrb[21].mxu1  ;;  %v1732_v51 = vshrl.u32 (!%p2348_p6), %v1731_v49, 7  ;;  %v1774_v52 = vld [vmem:[%s3134_s7 + $0x8] sm:$0xff] (!%p2348_p6) }
 0x1ca   : > { %v1601_v56 = vadd.f32 %v1600_v55, %v1487_v53  ;;  %v1602_v59 = vpop.f32.mrb[21].mxu0  ;;  %v1491_v61 = vpop.f32.mrb[22].mxu1  ;;  %v1697_v53 = vld [vmem:[#allocation2] sm:$0xff] (!%p2348_p6) }
 0x1cb   : > { %v1603_v60 = vadd.f32 %v1602_v59, %v1489_v57  ;;  %v1604_v63 = vpop.f32.mrb[22].mxu0  ;;  %v1493_v2 = vpop.f32.mrb[23].mxu1  ;;  %v1729_v55 = vld [vmem:[%s753_s26] sm:$0x3] (!%p2348_p6)  ;;  %v1733_v57 = vsub.s32 (!%p2348_p6), 0, %v1732_v51  ;;  %v1789_v59 = vunpack.c.l.bf16 (!%p2348_p6), %v1773_v50 }
 0x1cc   : > { %v1649_v0 = vadd.f32 %v1601_v56, %v815_v54  ;;  %v1605_v1 = vadd.f32 %v1604_v63, %v1491_v61  ;;  %v1606_v4 = vpop.f32.mrb[23].mxu0  ;;  %v1698_v54 = vld [vmem:[#allocation2 + $0x8] sm:$0xff] (!%p2348_p6)  ;;  %v1775_v56 = vld [vmem:[%s3134_s7 + $0x10] sm:$0xff] (!%p2348_p6)  ;;  %v1776_v63 = vld [vmem:[%s3134_s7 + $0x18] sm:$0xff] (!%p2348_p6) }
 0x1cd   : > { %v1650_v5 = vadd.f32 %v1603_v60, %v816_v58  ;;  %v1607_v6 = vadd.f32 %v1606_v4, %v1493_v2  ;;  %v1737_v58 = vsub.s32 (!%p2348_p6), 1, %v1732_v51  ;;  %v1790_v60 = vunpack.c.h.bf16 (!%p2348_p6), %v1773_v50  ;;  %v1699_v61 = vld [vmem:[#allocation2 + $0x10] sm:$0xff] (!%p2348_p6)  ;;  %v1701_v2 = vld [vmem:[#allocation2 + $0x20] sm:$0xff] (!%p2348_p6) }
 0x1ce   : > { %1681 = vst [vmem:[#allocation2 + $0xa0] sm:$0xff] %v1649_v0  ;;  %v1651_v7 = vadd.f32 %v1605_v1, %v817_v62  ;;  %v1700_v62 = vld [vmem:[#allocation2 + $0x18] sm:$0xff] (!%p2348_p6)  ;;  %v1791_v0 = vunpack.c.l.bf16 (!%p2348_p6), %v1774_v52  ;;  %v1792_v1 = vunpack.c.h.bf16 (!%p2348_p6), %v1774_v52  ;;  %v1793_v4 = vunpack.c.l.bf16 (!%p2348_p6), %v1775_v56  ;;  %v1779_v52 = vld [vmem:[%s3134_s7 + $0x30] sm:$0xff] (!%p2348_p6) }
 0x1cf   : > { %1682 = vst [vmem:[#allocation2 + $0xa8] sm:$0xff] %v1650_v5  ;;  %v1652_v8 = vadd.f32 %v1607_v6, %v818_v3  ;;  %v1702_v3 = vld [vmem:[#allocation2 + $0x28] sm:$0xff] (!%p2348_p6)  ;;  %v1794_v5 = vunpack.c.h.bf16 (!%p2348_p6), %v1775_v56  ;;  %v1777_v6 = vld [vmem:[%s3134_s7 + $0x20] sm:$0xff] (!%p2348_p6) }
 0x1d0   : > { %1683 = vst [vmem:[#allocation2 + $0xb0] sm:$0xff] %v1651_v7  ;;  %v1497_v9 = vpop.f32.mrb[24].mxu1  ;;  %v3246_v7 = vrot.slane (!%p2348_p6), %v1729_v55, %v1733_v57  ;;  %v1711_v57 = vld [vmem:[#allocation2 + $0x70] sm:$0xff] (!%p2348_p6) }
 0x1d1   : > { %1684 = vst [vmem:[#allocation2 + $0xb8] sm:$0xff] %v1652_v8  ;;  %v1610_v11 = vpop.f32.mrb[24].mxu0  ;;  %v1499_v13 = vpop.f32.mrb[25].mxu1  ;;  %v3248_v8 = vrot.slane (!%p2348_p6), %v1729_v55, %v1737_v58  ;;  %v1712_v58 = vld [vmem:[#allocation2 + $0x78] sm:$0xff] (!%p2348_p6) }
 0x1d2   : > { %v1611_v12 = vadd.f32 %v1610_v11, %v1497_v9  ;;  %v1612_v15 = vpop.f32.mrb[25].mxu0  ;;  %v1501_v17 = vpop.f32.mrb[26].mxu1  ;;  %v1703_v9 = vld [vmem:[#allocation2 + $0x30] sm:$0xff] (!%p2348_p6)  ;;  %v1795_v11 = vunpack.c.l.bf16 (!%p2348_p6), %v1776_v63 }
 0x1d3   : > { %v1613_v16 = vadd.f32 %v1612_v15, %v1499_v13  ;;  %v1614_v19 = vpop.f32.mrb[26].mxu0  ;;  %v1503_v22 = vpop.f32.mrb[27].mxu1  ;;  %v1778_v13 = vld [vmem:[%s3134_s7 + $0x28] sm:$0xff] (!%p2348_p6)  ;;  %v1798_v15 = vunpack.c.h.bf16 (!%p2348_p6), %v1777_v6 }
 0x1d4   : > { %v1653_v20 = vadd.f32 %v1611_v12, %v819_v10  ;;  %v1615_v21 = vadd.f32 %v1614_v19, %v1501_v17  ;;  %v1616_v24 = vpop.f32.mrb[27].mxu0  ;;  %v1704_v10 = vld [vmem:[#allocation2 + $0x38] sm:$0xff] (!%p2348_p6)  ;;  %v1796_v12 = vunpack.c.h.bf16 (!%p2348_p6), %v1776_v63  ;;  %v1800_v17 = vunpack.c.h.bf16 (!%p2348_p6), %v1778_v13 }
 0x1d5   : > { %v1654_v25 = vadd.f32 %v1613_v16, %v820_v14  ;;  %v1617_v26 = vadd.f32 %v1616_v24, %v1503_v22  ;;  %v1797_v14 = vunpack.c.l.bf16 (!%p2348_p6), %v1777_v6  ;;  %v1799_v16 = vunpack.c.l.bf16 (!%p2348_p6), %v1778_v13 }
 0x1d6   : > { %1685 = vst [vmem:[#allocation2 + $0xc0] sm:$0xff] %v1653_v20  ;;  %v1655_v27 = vadd.f32 %v1615_v21, %v821_v18  ;;  %v1741_v18 = vadd.f32 (!%p2348_p6), %v3246_v7, %v1697_v53  ;;  %v1742_v19 = vadd.f32 (!%p2348_p6), %v3248_v8, %v1698_v54  ;;  %v1743_v20 = vadd.f32 (!%p2348_p6), %v3246_v7, %v1699_v61 }
 0x1d7   : > { %1686 = vst [vmem:[#allocation2 + $0xc8] sm:$0xff] %v1654_v25  ;;  %v1656_v28 = vadd.f32 %v1617_v26, %v822_v23  ;;  %v1744_v21 = vadd.f32 (!%p2348_p6), %v3248_v8, %v1700_v62  ;;  %v1745_v22 = vadd.f32 (!%p2348_p6), %v3246_v7, %v1701_v2  ;;  %v1746_v23 = vadd.f32 (!%p2348_p6), %v3248_v8, %v1702_v3  ;;  %v1780_v3 = vld [vmem:[%s3134_s7 + $0x38] sm:$0xff] (!%p2348_p6) }
 0x1d8   : > { %1687 = vst [vmem:[#allocation2 + $0xd0] sm:$0xff] %v1655_v27  ;;  %v1507_v29 = vpop.f32.mrb[28].mxu1  ;;  %v1747_v24 = vadd.f32 (!%p2348_p6), %v3246_v7, %v1703_v9  ;;  %v1748_v25 = vadd.f32 (!%p2348_p6), %v3248_v8, %v1704_v10  ;;  %v1821_v26 = vadd.f32 (!%p2348_p6), %v1789_v59, %v1741_v18  ;;  %v1822_v27 = vadd.f32 (!%p2348_p6), %v1790_v60, %v1742_v19  ;;  %v1781_v18 = vld [vmem:[%s3134_s7 + $0x40] sm:$0xff] (!%p2348_p6) }
 0x1d9   : > { %1688 = vst [vmem:[#allocation2 + $0xd8] sm:$0xff] %v1656_v28  ;;  %v1620_v31 = vpop.f32.mrb[28].mxu0  ;;  %v1509_v33 = vpop.f32.mrb[29].mxu1  ;;  %v1823_v28 = vadd.f32 (!%p2348_p6), %v1791_v0, %v1743_v20  ;;  %v1802_v2 = vunpack.c.h.bf16 (!%p2348_p6), %v1779_v52  ;;  %v1755_v9 = vadd.f32 (!%p2348_p6), %v3246_v7, %v1711_v57  ;;  %v1756_v10 = vadd.f32 (!%p2348_p6), %v3248_v8, %v1712_v58 }
 0x1da   : > { %v1621_v32 = vadd.f32 %v1620_v31, %v1507_v29  ;;  %v1622_v35 = vpop.f32.mrb[29].mxu0  ;;  %v1511_v37 = vpop.f32.mrb[30].mxu1  ;;  %v1824_v29 = vadd.f32 (!%p2348_p6), %v1792_v1, %v1744_v21  ;;  %v1826_v31 = vadd.f32 (!%p2348_p6), %v1794_v5, %v1746_v23  ;;  %v1801_v1 = vunpack.c.l.bf16 (!%p2348_p6), %v1779_v52  ;;  %v1715_v21 = vld [vmem:[#allocation2 + $0x90] sm:$0xff] (!%p2348_p6)  ;;  %v1782_v23 = vld [vmem:[%s3134_s7 + $0x48] sm:$0xff] (!%p2348_p6) }
 0x1db   : > { %v1623_v36 = vadd.f32 %v1622_v35, %v1509_v33  ;;  %v1624_v39 = vpop.f32.mrb[30].mxu0  ;;  %v1513_v42 = vpop.f32.mrb[31].mxu1  ;;  %1696 = sbr.rel (%p2348_p6) target bundleno = 512 (0x200), region = 143  ;;  %v1828_v33 = vadd.f32 (!%p2348_p6), %v1796_v12, %v1748_v25  ;;  %v1706_v35 = vld [vmem:[#allocation2 + $0x48] sm:$0xff] (!%p2348_p6)  ;;  %v1804_v19 = vunpack.c.h.bf16 (!%p2348_p6), %v1780_v3 }
 0x1dc   : > { %v1657_v40 = vadd.f32 %v1621_v32, %v823_v30  ;;  %v1625_v41 = vadd.f32 %v1624_v39, %v1511_v37  ;;  %v1626_v44 = vpop.f32.mrb[31].mxu0  ;;  %v1825_v30 = vadd.f32 (!%p2348_p6), %v1793_v4, %v1745_v22  ;;  %v1827_v32 = vadd.f32 (!%p2348_p6), %v1795_v11, %v1747_v24  ;;  %v1713_v4 = vld [vmem:[#allocation2 + $0x80] sm:$0xff] (!%p2348_p6)  ;;  %v1714_v11 = vld [vmem:[#allocation2 + $0x88] sm:$0xff] (!%p2348_p6)  ;;  %v1716_v22 = vld [vmem:[#allocation2 + $0x98] sm:$0xff] (!%p2348_p6) }
 0x1dd   : > { %v1658_v45 = vadd.f32 %v1623_v36, %v824_v34  ;;  %v1627_v46 = vadd.f32 %v1626_v44, %v1513_v42  ;;  %v1705_v34 = vld [vmem:[#allocation2 + $0x40] sm:$0xff] (!%p2348_p6)  ;;  %v1853_v36 = vmax.f32 (!%p2348_p6), %v1821_v26, 0.0  ;;  %v1854_v37 = vmax.f32 (!%p2348_p6), %v1822_v27, 0.0 }
 0x1de   : > { %1689 = vst [vmem:[#allocation2 + $0xe0] sm:$0xff] %v1657_v40  ;;  %v1659_v47 = vadd.f32 %v1625_v41, %v825_v38  ;;  %v1855_v38 = vmax.f32 (!%p2348_p6), %v1823_v28, 0.0  ;;  %v1856_v39 = vmax.f32 (!%p2348_p6), %v1824_v29, 0.0  ;;  %v1707_v40 = vld [vmem:[#allocation2 + $0x50] sm:$0xff] (!%p2348_p6)  ;;  %v1708_v41 = vld [vmem:[#allocation2 + $0x58] sm:$0xff] (!%p2348_p6)  ;;  %v1857_v42 = vmax.f32 (!%p2348_p6), %v1825_v30, 0.0 }
 0x1df   : > { %1690 = vst [vmem:[#allocation2 + $0xe8] sm:$0xff] %v1658_v45  ;;  %v1660_v48 = vadd.f32 %v1627_v46, %v826_v43  ;;  %v1858_v43 = vmax.f32 (!%p2348_p6), %v1826_v31, 0.0  ;;  %v1859_v44 = vmax.f32 (!%p2348_p6), %v1827_v32, 0.0  ;;  %v1860_v45 = vmax.f32 (!%p2348_p6), %v1828_v33, 0.0  ;;  %v1709_v46 = vld [vmem:[#allocation2 + $0x60] sm:$0xff] (!%p2348_p6)  ;;  %v1718_v33 = vld [vmem:[#allocation2 + $0xa8] sm:$0xff] (!%p2348_p6) }
 0x1e0   : > { %1691 = vst [vmem:[#allocation2 + $0xf0] sm:$0xff] %v1659_v47  ;;  %v1710_v47 = vld [vmem:[#allocation2 + $0x68] sm:$0xff] (!%p2348_p6)  ;;  %v2374_v49 = vpack.c.bf16 (!%p2348_p6), %v1856_v39, %v1855_v38  ;;  %v1749_v50 = vadd.f32 (!%p2348_p6), %v3246_v7, %v1705_v34  ;;  %v1750_v51 = vadd.f32 (!%p2348_p6), %v3248_v8, %v1706_v35  ;;  %v1751_v55 = vadd.f32 (!%p2348_p6), %v3246_v7, %v1707_v40  ;;  %v1717_v32 = vld [vmem:[#allocation2 + $0xa0] sm:$0xff] (!%p2348_p6)  ;;  %v1783_v38 = vld [vmem:[%s3134_s7 + $0x50] sm:$0xff] (!%p2348_p6) }
 0x1e1   : > { %1692 = vst [vmem:[#allocation2 + $0xf8] sm:$0xff] %v1660_v48  ;;  %v2373_v48 = vpack.c.bf16 (!%p2348_p6), %v1854_v37, %v1853_v36  ;;  %v2375_v53 = vpack.c.bf16 (!%p2348_p6), %v1858_v43, %v1857_v42  ;;  %v2376_v54 = vpack.c.bf16 (!%p2348_p6), %v1860_v45, %v1859_v44  ;;  %v1752_v56 = vadd.f32 (!%p2348_p6), %v3248_v8, %v1708_v41  ;;  %v1719_v43 = vld [vmem:[#allocation2 + $0xb0] sm:$0xff] (!%p2348_p6) }
 0x1e2   : > { %1982 = vst [vmem:[%s3136_s17 + $0x8] sm:$0xff] %v2374_v49  ;;  %v1829_v59 = vadd.f32 %v1797_v14, %v1749_v50  ;;  %v1830_v60 = vadd.f32 %v1798_v15, %v1750_v51  ;;  %v1753_v61 = vadd.f32 %v3246_v7, %v1709_v46  ;;  %v1754_v62 = vadd.f32 %v3248_v8, %v1710_v47  ;;  %v1784_v49 = vld [vmem:[%s3134_s7 + $0x58] sm:$0xff] }
 0x1e3   : > { %1981 = vst [vmem:[%s3136_s17] sm:$0xff] %v2373_v48  ;;  %1983 = vst [vmem:[%s3136_s17 + $0x10] sm:$0xff] %v2375_v53  ;;  %v1831_v63 = vadd.f32 %v1799_v16, %v1751_v55  ;;  %v1832_v0 = vadd.f32 %v1800_v17, %v1752_v56  ;;  %v1803_v17 = vunpack.c.l.bf16 %v1780_v3  ;;  %v1757_v20 = vadd.f32 %v3246_v7, %v1713_v4  ;;  %v1720_v48 = vld [vmem:[#allocation2 + $0xb8] sm:$0xff] }
 0x1e4   : > { %1984 = vst [vmem:[%s3136_s17 + $0x18] sm:$0xff] %v2376_v54  ;;  %v1861_v5 = vmax.f32 %v1829_v59, 0.0  ;;  %v1862_v6 = vmax.f32 %v1830_v60, 0.0  ;;  %v1833_v14 = vadd.f32 %v1801_v1, %v1753_v61  ;;  %v1834_v15 = vadd.f32 %v1802_v2, %v1754_v62  ;;  %v1721_v54 = vld [vmem:[#allocation2 + $0xc0] sm:$0xff]  ;;  %v1722_v59 = vld [vmem:[#allocation2 + $0xc8] sm:$0xff] }
 0x1e5   : > { %v1863_v12 = vmax.f32 %v1831_v63, 0.0  ;;  %v1864_v13 = vmax.f32 %v1832_v0, 0.0  ;;  %v1758_v27 = vadd.f32 %v3248_v8, %v1714_v11  ;;  %v1835_v28 = vadd.f32 %v1803_v17, %v1755_v9  ;;  %v1785_v60 = vld [vmem:[%s3134_s7 + $0x60] sm:$0xff] }
 0x1e6   : > { %v2377_v16 = vpack.c.bf16 %v1862_v6, %v1861_v5  ;;  %v1865_v25 = vmax.f32 %v1833_v14, 0.0  ;;  %v1866_v26 = vmax.f32 %v1834_v15, 0.0  ;;  %v1836_v29 = vadd.f32 %v1804_v19, %v1756_v10  ;;  %v1723_v5 = vld [vmem:[#allocation2 + $0xd0] sm:$0xff]  ;;  %v1724_v6 = vld [vmem:[#allocation2 + $0xd8] sm:$0xff]  ;;  %v1725_v17 = vld [vmem:[#allocation2 + $0xe0] sm:$0xff] }
 0x1e7   : > { %v2378_v24 = vpack.c.bf16 %v1864_v13, %v1863_v12  ;;  %v1805_v30 = vunpack.c.l.bf16 %v1781_v18  ;;  %v1806_v31 = vunpack.c.h.bf16 %v1781_v18  ;;  %v1759_v35 = vadd.f32 %v3246_v7, %v1715_v21  ;;  %v1786_v13 = vld [vmem:[%s3134_s7 + $0x68] sm:$0xff] }
 0x1e8   : > { %1985 = vst [vmem:[%s3136_s17 + $0x20] sm:$0xff] %v2377_v16  ;;  %v2379_v34 = vpack.c.bf16 %v1866_v26, %v1865_v25  ;;  %v1760_v36 = vadd.f32 %v3248_v8, %v1716_v22  ;;  %v1807_v37 = vunpack.c.l.bf16 %v1782_v23  ;;  %v1867_v39 = vmax.f32 %v1835_v28, 0.0  ;;  %v1726_v19 = vld [vmem:[#allocation2 + $0xe8] sm:$0xff] }
 0x1e9   : > { %1986 = vst [vmem:[%s3136_s17 + $0x28] sm:$0xff] %v2378_v24  ;;  %v1868_v40 = vmax.f32 %v1836_v29, 0.0  ;;  %v1837_v41 = vadd.f32 %v1805_v30, %v1757_v20  ;;  %v1838_v42 = vadd.f32 %v1806_v31, %v1758_v27  ;;  %v1808_v44 = vunpack.c.h.bf16 %v1782_v23  ;;  %v1787_v24 = vld [vmem:[%s3134_s7 + $0x70] sm:$0xff]  ;;  %v1728_v30 = vld [vmem:[#allocation2 + $0xf8] sm:$0xff] }
 0x1ea   : > { %1987 = vst [vmem:[%s3136_s17 + $0x30] sm:$0xff] %v2379_v34  ;;  %v1839_v45 = vadd.f32 %v1807_v37, %v1759_v35  ;;  %v1761_v46 = vadd.f32 %v3246_v7, %v1717_v32  ;;  %v1762_v47 = vadd.f32 %v3248_v8, %v1718_v33  ;;  %v1809_v53 = vunpack.c.l.bf16 %v1783_v38  ;;  %v1727_v29 = vld [vmem:[#allocation2 + $0xf0] sm:$0xff]  ;;  %v1788_v35 = vld [vmem:[%s3134_s7 + $0x78] sm:$0xff] }
 0x1eb   : > { %v2380_v50 = vpack.c.bf16 %v1868_v40, %v1867_v39  ;;  %v1869_v51 = vmax.f32 %v1837_v41, 0.0  ;;  %v1870_v52 = vmax.f32 %v1838_v42, 0.0  ;;  %v1840_v55 = vadd.f32 %v1808_v44, %v1760_v36 }
 0x1ec   : > { %v1871_v56 = vmax.f32 %v1839_v45, 0.0  ;;  %v1810_v57 = vunpack.c.h.bf16 %v1783_v38  ;;  %v1763_v58 = vadd.f32 %v3246_v7, %v1719_v43  ;;  %v1841_v62 = vadd.f32 %v1809_v53, %v1761_v46 }
 0x1ed   : > { %1988 = vst [vmem:[%s3136_s17 + $0x38] sm:$0xff] %v2380_v50  ;;  %v2381_v61 = vpack.c.bf16 %v1870_v52, %v1869_v51  ;;  %v1764_v63 = vadd.f32 %v3248_v8, %v1720_v48  ;;  %v1811_v0 = vunpack.c.l.bf16 %v1784_v49  ;;  %v1872_v1 = vmax.f32 %v1840_v55, 0.0 }
 0x1ee   : > { %v1842_v2 = vadd.f32 %v1810_v57, %v1762_v47  ;;  %v1812_v3 = vunpack.c.h.bf16 %v1784_v49  ;;  %v1765_v4 = vadd.f32 %v3246_v7, %v1721_v54  ;;  %v1873_v9 = vmax.f32 %v1841_v62, 0.0 }
 0x1ef   : > { %1989 = vst [vmem:[%s3136_s17 + $0x40] sm:$0xff] %v2381_v61  ;;  %v1843_v10 = vadd.f32 %v1811_v0, %v1763_v58  ;;  %v1766_v11 = vadd.f32 %v3248_v8, %v1722_v59  ;;  %v1813_v12 = vunpack.c.l.bf16 %v1785_v60  ;;  %v2382_v14 = vpack.c.bf16 %v1872_v1, %v1871_v56 }
 0x1f0   : > { %v1874_v15 = vmax.f32 %v1842_v2, 0.0  ;;  %v1844_v18 = vadd.f32 %v1812_v3, %v1764_v63  ;;  %v1814_v16 = vunpack.c.h.bf16 %v1785_v60  ;;  %v1767_v22 = vadd.f32 %v3246_v7, %v1723_v5 }
 0x1f1   : > { %v1875_v20 = vmax.f32 %v1843_v10, 0.0  ;;  %v1845_v21 = vadd.f32 %v1813_v12, %v1765_v4  ;;  %v1768_v23 = vadd.f32 %v3248_v8, %v1724_v6  ;;  %1990 = vst [vmem:[%s3136_s17 + $0x48] sm:$0xff] %v2382_v14  ;;  %v1815_v28 = vunpack.c.l.bf16 %v1786_v13 }
 0x1f2   : > { %v2383_v25 = vpack.c.bf16 %v1874_v15, %v1873_v9  ;;  %v1876_v26 = vmax.f32 %v1844_v18, 0.0  ;;  %v1846_v27 = vadd.f32 %v1814_v16, %v1766_v11  ;;  %v1816_v32 = vunpack.c.h.bf16 %v1786_v13 }
 0x1f3   : > { %v1877_v31 = vmax.f32 %v1845_v21, 0.0  ;;  %v1769_v33 = vadd.f32 %v3246_v7, %v1725_v17  ;;  %v1770_v34 = vadd.f32 %v3248_v8, %v1726_v19  ;;  %v1847_v38 = vadd.f32 %v1815_v28, %v1767_v22 }
 0x1f4   : > { %1991 = vst [vmem:[%s3136_s17 + $0x50] sm:$0xff] %v2383_v25  ;;  %v2384_v36 = vpack.c.bf16 %v1876_v26, %v1875_v20  ;;  %v1878_v37 = vmax.f32 %v1846_v27, 0.0  ;;  %v1817_v39 = vunpack.c.l.bf16 %v1787_v24  ;;  %v1848_v40 = vadd.f32 %v1816_v32, %v1768_v23 }
 0x1f5   : > { %v1818_v41 = vunpack.c.h.bf16 %v1787_v24  ;;  %v1771_v42 = vadd.f32 %v3246_v7, %v1727_v29  ;;  %v1772_v43 = vadd.f32 %v3248_v8, %v1728_v30  ;;  %v1879_v45 = vmax.f32 %v1847_v38, 0.0 }
 0x1f6   : > { %1992 = vst [vmem:[%s3136_s17 + $0x58] sm:$0xff] %v2384_v36  ;;  %v2385_v44 = vpack.c.bf16 %v1878_v37, %v1877_v31  ;;  %v1849_v46 = vadd.f32 %v1817_v39, %v1769_v33  ;;  %v1819_v47 = vunpack.c.l.bf16 %v1788_v35  ;;  %v1880_v48 = vmax.f32 %v1848_v40, 0.0 }
 0x1f7   : > { %v1850_v49 = vadd.f32 %v1818_v41, %v1770_v34  ;;  %v1820_v50 = vunpack.c.h.bf16 %v1788_v35 }
 0x1f8   : > { %1993 = vst [vmem:[%s3136_s17 + $0x60] sm:$0xff] %v2385_v44  ;;  %v1881_v51 = vmax.f32 %v1849_v46, 0.0  ;;  %v1851_v52 = vadd.f32 %v1819_v47, %v1771_v42  ;;  %v2386_v53 = vpack.c.bf16 %v1880_v48, %v1879_v45 }
 0x1f9   : > { %v1882_v54 = vmax.f32 %v1850_v49, 0.0  ;;  %v1852_v55 = vadd.f32 %v1820_v50, %v1772_v43 }
 0x1fa   : > { %v1883_v7 = vmax.f32 %v1851_v52, 0.0  ;;  %1994 = vst [vmem:[%s3136_s17 + $0x68] sm:$0xff] %v2386_v53 }
 0x1fb   : > { %v2387_v8 = vpack.c.bf16 %v1882_v54, %v1881_v51  ;;  %v1884_v56 = vmax.f32 %v1852_v55, 0.0 }
 0x1fd   : > { %1995 = vst [vmem:[%s3136_s17 + $0x70] sm:$0xff] %v2387_v8  ;;  %v2388_v57 = vpack.c.bf16 %v1884_v56, %v1883_v7 }
 0x1ff   : > { %1996 = vst [vmem:[%s3136_s17 + $0x78] sm:$0xff] %v2388_v57 }
 0x200 PF: > { %2003 = sbr.rel (!%p2873_p13) target bundleno = 522 (0x20a), region = 147  ;;  %s2389_s21 = sshll.u32 (%p2873_p13), %s2729_s22, 3  ;;  %v2067_v58 = vld [vmem:[%s3136_s17] sm:$0xff] (%p2873_p13)  ;;  %v2071_v60 = vld [vmem:[%s3136_s17 + $0x10] sm:$0xff] (%p2873_p13)  ;;  %v2073_v61 = vld [vmem:[%s3136_s17 + $0x18] sm:$0xff] (%p2873_p13) }
 0x201   : > { %s2009_s8 = scalar_lea.vmem (%p2873_p13), %s3368_s4, %s2389_s21  ;;  %v2075_v62 = vld [vmem:[%s3136_s17 + $0x20] sm:$0xff] (%p2873_p13)  ;;  %v2077_v63 = vld [vmem:[%s3136_s17 + $0x28] sm:$0xff] (%p2873_p13)  ;;  %v2079_v0 = vld [vmem:[%s3136_s17 + $0x30] sm:$0xff] (%p2873_p13) }
 0x202   : > { %2068 = vst [vmem:[%s2009_s8] sm:$0xff] (%p2873_p13), %v2067_v58  ;;  %2072 = vst [vmem:[%s2009_s8 + $0x20] sm:$0xff] (%p2873_p13), %v2071_v60  ;;  %v2081_v1 = vld [vmem:[%s3136_s17 + $0x38] sm:$0xff] (%p2873_p13)  ;;  %v2083_v2 = vld [vmem:[%s3136_s17 + $0x40] sm:$0xff] (%p2873_p13) }
 0x203   : > { %2074 = vst [vmem:[%s2009_s8 + $0x30] sm:$0xff] (%p2873_p13), %v2073_v61  ;;  %2076 = vst [vmem:[%s2009_s8 + $0x40] sm:$0xff] (%p2873_p13), %v2075_v62  ;;  %v2085_v3 = vld [vmem:[%s3136_s17 + $0x48] sm:$0xff] (%p2873_p13)  ;;  %v2087_v4 = vld [vmem:[%s3136_s17 + $0x50] sm:$0xff] (%p2873_p13) }
 0x204   : > { %2078 = vst [vmem:[%s2009_s8 + $0x50] sm:$0xff] (%p2873_p13), %v2077_v63  ;;  %2080 = vst [vmem:[%s2009_s8 + $0x60] sm:$0xff] (%p2873_p13), %v2079_v0  ;;  %v2089_v5 = vld [vmem:[%s3136_s17 + $0x58] sm:$0xff] (%p2873_p13)  ;;  %v2091_v6 = vld [vmem:[%s3136_s17 + $0x60] sm:$0xff] (%p2873_p13) }
 0x205   : > { %2082 = vst [vmem:[%s2009_s8 + $0x70] sm:$0xff] (%p2873_p13), %v2081_v1  ;;  %2084 = vst [vmem:[%s2009_s8 + $0x80] sm:$0xff] (%p2873_p13), %v2083_v2  ;;  %v2093_v9 = vld [vmem:[%s3136_s17 + $0x68] sm:$0xff] (%p2873_p13)  ;;  %v2095_v10 = vld [vmem:[%s3136_s17 + $0x70] sm:$0xff] (%p2873_p13) }
 0x206   : > { %2086 = vst [vmem:[%s2009_s8 + $0x90] sm:$0xff] (%p2873_p13), %v2085_v3  ;;  %2088 = vst [vmem:[%s2009_s8 + $0xa0] sm:$0xff] (%p2873_p13), %v2087_v4  ;;  %v2097_v11 = vld [vmem:[%s3136_s17 + $0x78] sm:$0xff] (%p2873_p13) }
 0x207   : > { %v2069_v59 = vld [vmem:[%s3136_s17 + $0x8] sm:$0xff]  ;;  %2090 = vst [vmem:[%s2009_s8 + $0xb0] sm:$0xff] %v2089_v5  ;;  %2092 = vst [vmem:[%s2009_s8 + $0xc0] sm:$0xff] %v2091_v6 }
 0x208   : > { %2070 = vst [vmem:[%s2009_s8 + $0x10] sm:$0xff] %v2069_v59  ;;  %2094 = vst [vmem:[%s2009_s8 + $0xd0] sm:$0xff] %v2093_v9 }
 0x209   : > { %2096 = vst [vmem:[%s2009_s8 + $0xe0] sm:$0xff] %v2095_v10  ;;  %2098 = vst [vmem:[%s2009_s8 + $0xf0] sm:$0xff] %v2097_v11 }
 0x20a PF: > { %s14_s25 = sadd.s32 1, %s2741_s25   ;;  %s3380_s22 = sld [smem:[#allocation9_spill]] }
 0x20b   : > { %p11_p7 = scmp.ge.s32.totalorder %s14_s25, 20   ;;  %s3381_s29 = sld [smem:[#allocation7_spill]] }
 0x20c   : > { %s3382_s9 = sld [smem:[#allocation8_spill]]  ;;  %s3383_s15 = smov %s2705_s16 }
 0x20d   : > { %s3384_s16 = smov %s2865_s13  ;;  %s3385_s17 = smov %s2713_s18 }
 0x20e   : > { %s3386_s18 = smov %s2862_s12  ;;  %s3387_s19 = smov %s2721_s20 }
 0x20f   : > { %s3389_s21 = smov %s2733_s23  ;;  %13 = sbr.rel (!%p11_p7) target bundleno = 8 (0x8), region = 235 }
 0x210   : > { %s3388_s20 = smov %s3380_s22  ;;  %s3390_s22 = smov %s2737_s24 }
 0x211   : > { %s3391_s23 = smov %s3381_s29 }
 0x212   : > { %s3392_s24 = smov %s3382_s9 }

</bundles_post_ra>
